<compile_context>
chip_gen: v7x
topology: tpu7x:2x2x1
jax: 0.10.0
libtpu: 0.0.40
codegen_flags: <defaults>
</compile_context>

<pallas_src>
import functools

import jax
import jax.numpy as jnp
from jax.experimental import pallas as pl
from jax.experimental.pallas import tpu as pltpu


def _spatial_attention_kernel(x_ref, w_ref, o_ref, sum_ref, max_ref, pad_ref,
                              *, ksize, c_total, c_tile):
    """Grid = (batch blocks, channel chunks); channel chunk is the inner axis.

    x_ref  : (Bt, Ct, H, W) VMEM             input chunk for this step (NCHW kept)
    w_ref  : (2*k*k,) SMEM f32               flattened conv weight [ic, kh, kw];
                                             avg-channel taps pre-scaled by 1/C
    o_ref  : (Bt, 1, H*W) VMEM               lane-dense sigmoid(conv) output
    sum_ref: (Bt, H, W) VMEM f32             running channel sum (scratch)
    max_ref: (Bt, H, W) VMEM f32             running channel max (scratch)
    pad_ref: (2, Bt, H+k-1, W+k-1) VMEM f32  zero-halo padded pooled maps
    """
    Bt, Ct, H, W = x_ref.shape
    pad = ksize // 2
    c_idx = pl.program_id(1)
    n_c = pl.num_programs(1)

    # ---- streamed channel reduction: only 2 x (Bt,H,W) f32 ever live --------
    @pl.when(c_idx == 0)
    def _init():
        sum_ref[...] = jnp.zeros_like(sum_ref)
        max_ref[...] = jnp.full_like(max_ref, -jnp.inf)

    c_base = c_idx * c_tile
    full_chunks = (c_total % c_tile) == 0  # static: skip masking when exact

    def chan_body(c, carry):
        s, m = carry
        plane = x_ref[:, c, :, :].astype(jnp.float32)        # (Bt, H, W)
        if full_chunks:
            return s + plane, jnp.maximum(m, plane)
        valid = (c_base + c) < c_total                       # ragged last chunk
        return (s + jnp.where(valid, plane, 0.0),
                jnp.maximum(m, jnp.where(valid, plane, -jnp.inf)))

    s, m = jax.lax.fori_loop(0, Ct, chan_body,
                             (sum_ref[...], max_ref[...]), unroll=True)
    sum_ref[...] = s
    max_ref[...] = m

    # ---- finalize on the last channel chunk ---------------------------------
    @pl.when(c_idx == n_c - 1)
    def _finalize():
        Hp = H + ksize - 1
        Wp = W + ksize - 1

        # Zero only the thin halo strips (not the whole scratch). Re-done every
        # image (never gated on program_id) so per-core scratch under v7x
        # megacore stays correct.
        pad_ref[:, :, :pad, :] = jnp.zeros((2, Bt, pad, Wp), jnp.float32)
        pad_ref[:, :, pad + H:, :] = jnp.zeros((2, Bt, pad, Wp), jnp.float32)
        pad_ref[:, :, :, :pad] = jnp.zeros((2, Bt, Hp, pad), jnp.float32)
        pad_ref[:, :, :, pad + W:] = jnp.zeros((2, Bt, Hp, pad), jnp.float32)

        # Interior <- pooled maps (1/C already folded into the avg-channel taps,
        # so the raw channel sum is the avg-channel conv input).
        pad_ref[0, :, pl.ds(pad, H), pl.ds(pad, W)] = sum_ref[...]
        pad_ref[1, :, pl.ds(pad, H), pl.ds(pad, W)] = max_ref[...]

        # 2 -> 1 channel k x k conv, fully unrolled scalar(SMEM) x tile FMAs on
        # the VPU.  Loop order (ic, kw, kh): each lane (kw) shift is loaded once
        # and reused across all k sublane (kh) offsets; 4 independent partial
        # accumulators restore ILP in the unrolled add chain.
        n_acc = 4
        accs = [jnp.zeros((Bt, H, W), jnp.float32) for _ in range(n_acc)]
        tap_i = 0
        for ic in range(2):
            for kw in range(ksize):
                col = pad_ref[ic, :, :, pl.ds(kw, W)]          # (Bt, Hp, W)
                for kh in range(ksize):
                    wgt = w_ref[(ic * ksize + kh) * ksize + kw]  # scalar, SMEM
                    tap = jax.lax.slice_in_dim(col, kh, kh + H, axis=1)
                    accs[tap_i % n_acc] = accs[tap_i % n_acc] + wgt * tap
                    tap_i += 1
        acc = (accs[0] + accs[1]) + (accs[2] + accs[3])

        # Sigmoid's exp lands on the EUP slot; only this final (Bt,H,W) tile is
        # relaid out to the lane-dense (Bt, 1, H*W) output block.
        y = jax.nn.sigmoid(acc).astype(o_ref.dtype)
        o_ref[...] = y.reshape(Bt, 1, H * W)


def _pick_tiles(B, C, H, W, itemsize, *, c_tile_max=16, target_block_bytes=1 << 20):
    """Choose (Bt, Ct): bound per-step VMEM while keeping DMA blocks big enough."""
    Ct = min(C, c_tile_max)
    per_image = Ct * H * W * itemsize
    Bt = 1
    if per_image < target_block_bytes and B > 1:
        Bt = max(1, min(B, target_block_bytes // per_image))
        while B % Bt:              # keep the batch grid exact (no ragged blocks)
            Bt -= 1
    return int(Bt), int(Ct)


def spatial_attention(x, weight, *, kernel_size=7):
    """Pallas TPU SpatialAttention forward.

    x      : (B, C, H, W)
    weight : (1, 2, k, k)  OIHW weight of Conv2d(2, 1, k, padding=k//2, bias=False)
    returns: (B, 1, H, W)
    """
    assert kernel_size in (3, 7), "kernel size must be 3 or 7"
    B, C, H, W = x.shape
    assert weight.shape == (1, 2, kernel_size, kernel_size)

    itemsize = jnp.dtype(x.dtype).itemsize
    Bt, Ct = _pick_tiles(B, C, H, W, itemsize)
    n_b = B // Bt
    n_c = pl.cdiv(C, Ct)
    Hp = H + kernel_size - 1
    Wp = W + kernel_size - 1

    # Fold the 1/C of the channel mean into the avg-channel conv taps (exact:
    # the conv is linear), so the kernel accumulates a plain channel sum.
    w = weight.astype(jnp.float32)
    w = w.at[:, 0, :, :].multiply(1.0 / C)
    w_flat = w.reshape(-1)                                     # (2*k*k,) -> SMEM

    # Explicit VMEM budget with headroom (v7x: 64 MiB total, 32 MiB scoped default;
    # v5e scoped default is 16 MiB).
    in_block = Bt * Ct * H * W * itemsize
    out_block = Bt * H * W * itemsize
    scratch = 2 * Bt * H * W * 4 + 2 * Bt * Hp * Wp * 4
    vmem_limit = int(min(64 << 20,
                         max(8 << 20, 4 * (2 * in_block + 2 * out_block + scratch))))

    out = pl.pallas_call(
        functools.partial(_spatial_attention_kernel, ksize=kernel_size,
                          c_total=C, c_tile=Ct),
        out_shape=jax.ShapeDtypeStruct((B, 1, H * W), x.dtype),
        grid_spec=pltpu.PrefetchScalarGridSpec(
            num_scalar_prefetch=0,
            grid=(n_b, n_c),
            in_specs=[
                # NCHW kept natively (no wrapper transposes); W stays the lane axis.
                pl.BlockSpec((Bt, Ct, H, W), lambda b, c: (b, c, 0, 0)),
                # Tiny conv weight lives in SMEM; read as scalars in the kernel.
                pl.BlockSpec(memory_space=pltpu.MemorySpace.SMEM),
            ],
            # Lane-dense output block (H*W on the lane axis) instead of W/128
            # lane utilization with masked stores.
            out_specs=pl.BlockSpec((Bt, 1, H * W), lambda b, c: (b, 0, 0)),
            scratch_shapes=[
                pltpu.VMEM((Bt, H, W), jnp.float32),           # channel-sum acc
                pltpu.VMEM((Bt, H, W), jnp.float32),           # channel-max acc
                pltpu.VMEM((2, Bt, Hp, Wp), jnp.float32),      # zero-halo padded maps
            ],
        ),
        compiler_params=pltpu.CompilerParams(
            # Batch blocks shard across TensorCores on v7x; the channel-chunk
            # axis carries the accumulators, so it must stay "arbitrary".
            dimension_semantics=("parallel", "arbitrary"),
            vmem_limit_bytes=vmem_limit,
        ),
    )(x, w_flat)
    return out.reshape(B, 1, H, W)


def reference_spatial_attention(x, weight):
    """Pure-JAX reference matching the PyTorch module."""
    avg = jnp.mean(x, axis=1, keepdims=True)
    mx = jnp.max(x, axis=1, keepdims=True)
    s = jnp.concatenate([avg, mx], axis=1)                     # (B, 2, H, W)
    k = weight.shape[-1]
    p = k // 2
    y = jax.lax.conv_general_dilated(
        s, weight, window_strides=(1, 1), padding=((p, p), (p, p)),
        dimension_numbers=("NCHW", "OIHW", "NCHW"))
    return jax.nn.sigmoid(y)


def _run_case(key, B, C, H, W, ksize):
    kx, kw = jax.random.split(key)
    x = jax.random.normal(kx, (B, C, H, W), dtype=jnp.float32)
    fan_in = 2 * ksize * ksize
    weight = jax.random.normal(kw, (1, 2, ksize, ksize), dtype=jnp.float32) / jnp.sqrt(
        jnp.float32(fan_in))

    out = spatial_attention(x, weight, kernel_size=ksize)
    out = jax.block_until_ready(out)

    ref = reference_spatial_attention(x, weight)
    assert out.shape == (B, 1, H, W)
    assert jnp.allclose(out, ref, atol=1e-5, rtol=1e-5), (
        f"mismatch vs reference (B={B}, C={C}, H={H}, W={W}, k={ksize})")


if __name__ == "__main__":
    key = jax.random.PRNGKey(0)
    k1, k2 = jax.random.split(key)

    # Main case from the module spec: batch=2, channels=4, spatial=16, k=7.
    _run_case(k1, B=2, C=4, H=16, W=16, ksize=7)
    # Exercise the channel-chunked accumulator path (C > chunk, ragged tail) and k=3.
    _run_case(k2, B=2, C=20, H=16, W=16, ksize=3)

    print("KERNEL_OK")
</pallas_src>

<mosaic_0001>
module attributes {stable_mosaic.version = 11 : i64} {
  func.func @_spatial_attention_kernel(%arg0: i32, %arg1: i32, %arg2: memref<2x4x16x16xf32, #tpu.memory_space<vmem>>, %arg3: memref<98xf32, #tpu.memory_space<smem>>, %arg4: memref<2x1x256xf32, #tpu.memory_space<vmem>>, %arg5: memref<2x16x16xf32, #tpu.memory_space<vmem>>, %arg6: memref<2x16x16xf32, #tpu.memory_space<vmem>>, %arg7: memref<2x2x22x22xf32, #tpu.memory_space<vmem>>) attributes {dimension_semantics = [#tpu.dimension_semantics<parallel>, #tpu.dimension_semantics<arbitrary>], iteration_bounds = array<i64: 1, 1>, scalar_prefetch = 0 : i64, scratch_operands = 3 : i64, tpu.core_type = #tpu.core_type<tc>, window_params = [{transform_indices = @transform_0, window_bounds = array<i64: 2, 4, 16, 16>}, {transform_indices = @transform_1, window_bounds = array<i64: 98>}, {transform_indices = @transform_2, window_bounds = array<i64: 2, 1, 256>}]} {
    %c0_i32 = arith.constant 0 : i32
    %0 = arith.cmpi eq, %arg1, %c0_i32 : i32
    %1 = arith.extui %0 : i1 to i32
    %c0_i32_0 = arith.constant 0 : i32
    %2 = arith.cmpi ne, %1, %c0_i32_0 : i32
    scf.if %2 {
      %cst = arith.constant 0.000000e+00 : f32
      %30 = vector.broadcast %cst : f32 to vector<2x16x16xf32>
      %c0_27 = arith.constant 0 : index
      %c0_28 = arith.constant 0 : index
      %c0_29 = arith.constant 0 : index
      %31 = vector.load %arg5[%c0_27, %c0_28, %c0_29] : memref<2x16x16xf32, #tpu.memory_space<vmem>>, vector<2x16x16xf32>
      tpu.vector_store %arg5[%c0_27, %c0_28, %c0_29], %30 {strides = array<i32>} : memref<2x16x16xf32, #tpu.memory_space<vmem>>, vector<2x16x16xf32>,
      %cst_30 = arith.constant 0xFF800000 : f32
      %32 = vector.broadcast %cst_30 : f32 to vector<2x16x16xf32>
      %c0_31 = arith.constant 0 : index
      %c0_32 = arith.constant 0 : index
      %c0_33 = arith.constant 0 : index
      %33 = vector.load %arg6[%c0_31, %c0_32, %c0_33] : memref<2x16x16xf32, #tpu.memory_space<vmem>>, vector<2x16x16xf32>
      tpu.vector_store %arg6[%c0_31, %c0_32, %c0_33], %32 {strides = array<i32>} : memref<2x16x16xf32, #tpu.memory_space<vmem>>, vector<2x16x16xf32>,
    } else {
    }
    %c0 = arith.constant 0 : index
    %c0_1 = arith.constant 0 : index
    %c0_2 = arith.constant 0 : index
    %3 = vector.load %arg5[%c0, %c0_1, %c0_2] : memref<2x16x16xf32, #tpu.memory_space<vmem>>, vector<2x16x16xf32>
    %c0_3 = arith.constant 0 : index
    %c0_4 = arith.constant 0 : index
    %c0_5 = arith.constant 0 : index
    %4 = vector.load %arg6[%c0_3, %c0_4, %c0_5] : memref<2x16x16xf32, #tpu.memory_space<vmem>>, vector<2x16x16xf32>
    %c0_i32_6 = arith.constant 0 : i32
    %c0_7 = arith.constant 0 : index
    %5 = arith.index_cast %c0_i32_6 : i32 to index
    %c0_8 = arith.constant 0 : index
    %c0_9 = arith.constant 0 : index
    %6 = vector.load %arg2[%c0_7, %5, %c0_8, %c0_9] : memref<2x4x16x16xf32, #tpu.memory_space<vmem>>, vector<2x1x16x16xf32>
    %7 = vector.shape_cast %6 : vector<2x1x16x16xf32> to vector<2x16x16xf32>
    %8 = arith.addf %3, %7 : vector<2x16x16xf32>
    %9 = arith.maximumf %4, %7 : vector<2x16x16xf32>
    %c1_i32 = arith.constant 1 : i32
    %c0_10 = arith.constant 0 : index
    %10 = arith.index_cast %c1_i32 : i32 to index
    %c0_11 = arith.constant 0 : index
    %c0_12 = arith.constant 0 : index
    %11 = vector.load %arg2[%c0_10, %10, %c0_11, %c0_12] : memref<2x4x16x16xf32, #tpu.memory_space<vmem>>, vector<2x1x16x16xf32>
    %12 = vector.shape_cast %11 : vector<2x1x16x16xf32> to vector<2x16x16xf32>
    %13 = arith.addf %8, %12 : vector<2x16x16xf32>
    %14 = arith.maximumf %9, %12 : vector<2x16x16xf32>
    %c2_i32 = arith.constant 2 : i32
    %c0_13 = arith.constant 0 : index
    %15 = arith.index_cast %c2_i32 : i32 to index
    %c0_14 = arith.constant 0 : index
    %c0_15 = arith.constant 0 : index
    %16 = vector.load %arg2[%c0_13, %15, %c0_14, %c0_15] : memref<2x4x16x16xf32, #tpu.memory_space<vmem>>, vector<2x1x16x16xf32>
    %17 = vector.shape_cast %16 : vector<2x1x16x16xf32> to vector<2x16x16xf32>
    %18 = arith.addf %13, %17 : vector<2x16x16xf32>
    %19 = arith.maximumf %14, %17 : vector<2x16x16xf32>
    %c3_i32 = arith.constant 3 : i32
    %c0_16 = arith.constant 0 : index
    %20 = arith.index_cast %c3_i32 : i32 to index
    %c0_17 = arith.constant 0 : index
    %c0_18 = arith.constant 0 : index
    %21 = vector.load %arg2[%c0_16, %20, %c0_17, %c0_18] : memref<2x4x16x16xf32, #tpu.memory_space<vmem>>, vector<2x1x16x16xf32>
    %22 = vector.shape_cast %21 : vector<2x1x16x16xf32> to vector<2x16x16xf32>
    %23 = arith.addf %18, %22 : vector<2x16x16xf32>
    %24 = arith.maximumf %19, %22 : vector<2x16x16xf32>
    %c4_i32 = arith.constant 4 : i32
    %c0_19 = arith.constant 0 : index
    %c0_20 = arith.constant 0 : index
    %c0_21 = arith.constant 0 : index
    %25 = vector.load %arg5[%c0_19, %c0_20, %c0_21] : memref<2x16x16xf32, #tpu.memory_space<vmem>>, vector<2x16x16xf32>
    tpu.vector_store %arg5[%c0_19, %c0_20, %c0_21], %23 {strides = array<i32>} : memref<2x16x16xf32, #tpu.memory_space<vmem>>, vector<2x16x16xf32>,
    %c0_22 = arith.constant 0 : index
    %c0_23 = arith.constant 0 : index
    %c0_24 = arith.constant 0 : index
    %26 = vector.load %arg6[%c0_22, %c0_23, %c0_24] : memref<2x16x16xf32, #tpu.memory_space<vmem>>, vector<2x16x16xf32>
    tpu.vector_store %arg6[%c0_22, %c0_23, %c0_24], %24 {strides = array<i32>} : memref<2x16x16xf32, #tpu.memory_space<vmem>>, vector<2x16x16xf32>,
    %c0_i32_25 = arith.constant 0 : i32
    %27 = arith.cmpi eq, %arg1, %c0_i32_25 : i32
    %28 = arith.extui %27 : i1 to i32
    %c0_i32_26 = arith.constant 0 : i32
    %29 = arith.cmpi ne, %28, %c0_i32_26 : i32
    scf.if %29 {
      %cst = arith.constant 0.000000e+00 : f32
      %30 = vector.broadcast %cst : f32 to vector<2x2x3x22xf32>
      %c0_27 = arith.constant 0 : index
      %c0_28 = arith.constant 0 : index
      %c0_29 = arith.constant 0 : index
      %c0_30 = arith.constant 0 : index
      %31 = vector.load %arg7[%c0_27, %c0_28, %c0_29, %c0_30] : memref<2x2x22x22xf32, #tpu.memory_space<vmem>>, vector<2x2x3x22xf32>
      tpu.vector_store %arg7[%c0_27, %c0_28, %c0_29, %c0_30], %30 {strides = array<i32>} : memref<2x2x22x22xf32, #tpu.memory_space<vmem>>, vector<2x2x3x22xf32>,
      %cst_31 = arith.constant 0.000000e+00 : f32
      %32 = vector.broadcast %cst_31 : f32 to vector<2x2x3x22xf32>
      %c0_32 = arith.constant 0 : index
      %c0_33 = arith.constant 0 : index
      %c19 = arith.constant 19 : index
      %c0_34 = arith.constant 0 : index
      %33 = vector.load %arg7[%c0_32, %c0_33, %c19, %c0_34] : memref<2x2x22x22xf32, #tpu.memory_space<vmem>>, vector<2x2x3x22xf32>
      tpu.vector_store %arg7[%c0_32, %c0_33, %c19, %c0_34], %32 {strides = array<i32>} : memref<2x2x22x22xf32, #tpu.memory_space<vmem>>, vector<2x2x3x22xf32>,
      %cst_35 = arith.constant 0.000000e+00 : f32
      %34 = vector.broadcast %cst_35 : f32 to vector<2x2x22x3xf32>
      %c0_36 = arith.constant 0 : index
      %c0_37 = arith.constant 0 : index
      %c0_38 = arith.constant 0 : index
      %c0_39 = arith.constant 0 : index
      %35 = vector.load %arg7[%c0_36, %c0_37, %c0_38, %c0_39] : memref<2x2x22x22xf32, #tpu.memory_space<vmem>>, vector<2x2x22x3xf32>
      tpu.vector_store %arg7[%c0_36, %c0_37, %c0_38, %c0_39], %34 {strides = array<i32>} : memref<2x2x22x22xf32, #tpu.memory_space<vmem>>, vector<2x2x22x3xf32>,
      %cst_40 = arith.constant 0.000000e+00 : f32
      %36 = vector.broadcast %cst_40 : f32 to vector<2x2x22x3xf32>
      %c0_41 = arith.constant 0 : index
      %c0_42 = arith.constant 0 : index
      %c0_43 = arith.constant 0 : index
      %c19_44 = arith.constant 19 : index
      %37 = vector.load %arg7[%c0_41, %c0_42, %c0_43, %c19_44] : memref<2x2x22x22xf32, #tpu.memory_space<vmem>>, vector<2x2x22x3xf32>
      tpu.vector_store %arg7[%c0_41, %c0_42, %c0_43, %c19_44], %36 {strides = array<i32>} : memref<2x2x22x22xf32, #tpu.memory_space<vmem>>, vector<2x2x22x3xf32>,
      %c0_45 = arith.constant 0 : index
      %c0_46 = arith.constant 0 : index
      %c0_47 = arith.constant 0 : index
      %38 = vector.load %arg5[%c0_45, %c0_46, %c0_47] : memref<2x16x16xf32, #tpu.memory_space<vmem>>, vector<2x16x16xf32>
      %c0_48 = arith.constant 0 : index
      %c0_49 = arith.constant 0 : index
      %c3 = arith.constant 3 : index
      %c3_50 = arith.constant 3 : index
      %39 = vector.load %arg7[%c0_48, %c0_49, %c3, %c3_50] : memref<2x2x22x22xf32, #tpu.memory_space<vmem>>, vector<1x2x16x16xf32>
      %40 = vector.shape_cast %39 : vector<1x2x16x16xf32> to vector<2x16x16xf32>
      %41 = vector.shape_cast %38 : vector<2x16x16xf32> to vector<1x2x16x16xf32>
      tpu.vector_store %arg7[%c0_48, %c0_49, %c3, %c3_50], %41 {strides = array<i32>} : memref<2x2x22x22xf32, #tpu.memory_space<vmem>>, vector<1x2x16x16xf32>,
      %c0_51 = arith.constant 0 : index
      %c0_52 = arith.constant 0 : index
      %c0_53 = arith.constant 0 : index
      %42 = vector.load %arg6[%c0_51, %c0_52, %c0_53] : memref<2x16x16xf32, #tpu.memory_space<vmem>>, vector<2x16x16xf32>
      %c1 = arith.constant 1 : index
      %c0_54 = arith.constant 0 : index
      %c3_55 = arith.constant 3 : index
      %c3_56 = arith.constant 3 : index
      %43 = vector.load %arg7[%c1, %c0_54, %c3_55, %c3_56] : memref<2x2x22x22xf32, #tpu.memory_space<vmem>>, vector<1x2x16x16xf32>
      %44 = vector.shape_cast %43 : vector<1x2x16x16xf32> to vector<2x16x16xf32>
      %45 = vector.shape_cast %42 : vector<2x16x16xf32> to vector<1x2x16x16xf32>
      tpu.vector_store %arg7[%c1, %c0_54, %c3_55, %c3_56], %45 {strides = array<i32>} : memref<2x2x22x22xf32, #tpu.memory_space<vmem>>, vector<1x2x16x16xf32>,
      %cst_57 = arith.constant 0.000000e+00 : f32
      %46 = vector.broadcast %cst_57 : f32 to vector<2x16x16xf32>
      %cst_58 = arith.constant 0.000000e+00 : f32
      %47 = vector.broadcast %cst_58 : f32 to vector<2x16x16xf32>
      %cst_59 = arith.constant 0.000000e+00 : f32
      %48 = vector.broadcast %cst_59 : f32 to vector<2x16x16xf32>
      %cst_60 = arith.constant 0.000000e+00 : f32
      %49 = vector.broadcast %cst_60 : f32 to vector<2x16x16xf32>
      %c0_61 = arith.constant 0 : index
      %c0_62 = arith.constant 0 : index
      %c0_63 = arith.constant 0 : index
      %c0_64 = arith.constant 0 : index
      %50 = vector.load %arg7[%c0_61, %c0_62, %c0_63, %c0_64] : memref<2x2x22x22xf32, #tpu.memory_space<vmem>>, vector<1x2x22x16xf32>
      %51 = vector.shape_cast %50 : vector<1x2x22x16xf32> to vector<2x22x16xf32>
      %c0_65 = arith.constant 0 : index
      %52 = memref.load %arg3[%c0_65] : memref<98xf32, #tpu.memory_space<smem>>
      %53 = vector.extract_strided_slice %51 {offsets = [0, 0, 0], sizes = [2, 16, 16], strides = [1, 1, 1]} : vector<2x22x16xf32> to vector<2x16x16xf32>
      %54 = vector.broadcast %52 : f32 to vector<2x16x16xf32>
      %55 = arith.mulf %54, %53 : vector<2x16x16xf32>
      %56 = arith.addf %46, %55 : vector<2x16x16xf32>
      %c7 = arith.constant 7 : index
      %57 = memref.load %arg3[%c7] : memref<98xf32, #tpu.memory_space<smem>>
      %58 = vector.extract_strided_slice %51 {offsets = [0, 1, 0], sizes = [2, 16, 16], strides = [1, 1, 1]} : vector<2x22x16xf32> to vector<2x16x16xf32>
      %59 = vector.broadcast %57 : f32 to vector<2x16x16xf32>
      %60 = arith.mulf %59, %58 : vector<2x16x16xf32>
      %61 = arith.addf %47, %60 : vector<2x16x16xf32>
      %c14 = arith.constant 14 : index
      %62 = memref.load %arg3[%c14] : memref<98xf32, #tpu.memory_space<smem>>
      %63 = vector.extract_strided_slice %51 {offsets = [0, 2, 0], sizes = [2, 16, 16], strides = [1, 1, 1]} : vector<2x22x16xf32> to vector<2x16x16xf32>
      %64 = vector.broadcast %62 : f32 to vector<2x16x16xf32>
      %65 = arith.mulf %64, %63 : vector<2x16x16xf32>
      %66 = arith.addf %48, %65 : vector<2x16x16xf32>
      %c21 = arith.constant 21 : index
      %67 = memref.load %arg3[%c21] : memref<98xf32, #tpu.memory_space<smem>>
      %68 = vector.extract_strided_slice %51 {offsets = [0, 3, 0], sizes = [2, 16, 16], strides = [1, 1, 1]} : vector<2x22x16xf32> to vector<2x16x16xf32>
      %69 = vector.broadcast %67 : f32 to vector<2x16x16xf32>
      %70 = arith.mulf %69, %68 : vector<2x16x16xf32>
      %71 = arith.addf %49, %70 : vector<2x16x16xf32>
      %c28 = arith.constant 28 : index
      %72 = memref.load %arg3[%c28] : memref<98xf32, #tpu.memory_space<smem>>
      %73 = vector.extract_strided_slice %51 {offsets = [0, 4, 0], sizes = [2, 16, 16], strides = [1, 1, 1]} : vector<2x22x16xf32> to vector<2x16x16xf32>
      %74 = vector.broadcast %72 : f32 to vector<2x16x16xf32>
      %75 = arith.mulf %74, %73 : vector<2x16x16xf32>
      %76 = arith.addf %56, %75 : vector<2x16x16xf32>
      %c35 = arith.constant 35 : index
      %77 = memref.load %arg3[%c35] : memref<98xf32, #tpu.memory_space<smem>>
      %78 = vector.extract_strided_slice %51 {offsets = [0, 5, 0], sizes = [2, 16, 16], strides = [1, 1, 1]} : vector<2x22x16xf32> to vector<2x16x16xf32>
      %79 = vector.broadcast %77 : f32 to vector<2x16x16xf32>
      %80 = arith.mulf %79, %78 : vector<2x16x16xf32>
      %81 = arith.addf %61, %80 : vector<2x16x16xf32>
      %c42 = arith.constant 42 : index
      %82 = memref.load %arg3[%c42] : memref<98xf32, #tpu.memory_space<smem>>
      %83 = vector.extract_strided_slice %51 {offsets = [0, 6, 0], sizes = [2, 16, 16], strides = [1, 1, 1]} : vector<2x22x16xf32> to vector<2x16x16xf32>
      %84 = vector.broadcast %82 : f32 to vector<2x16x16xf32>
      %85 = arith.mulf %84, %83 : vector<2x16x16xf32>
      %86 = arith.addf %66, %85 : vector<2x16x16xf32>
      %c0_66 = arith.constant 0 : index
      %c0_67 = arith.constant 0 : index
      %c0_68 = arith.constant 0 : index
      %c1_69 = arith.constant 1 : index
      %87 = vector.load %arg7[%c0_66, %c0_67, %c0_68, %c1_69] : memref<2x2x22x22xf32, #tpu.memory_space<vmem>>, vector<1x2x22x16xf32>
      %88 = vector.shape_cast %87 : vector<1x2x22x16xf32> to vector<2x22x16xf32>
      %c1_70 = arith.constant 1 : index
      %89 = memref.load %arg3[%c1_70] : memref<98xf32, #tpu.memory_space<smem>>
      %90 = vector.extract_strided_slice %88 {offsets = [0, 0, 0], sizes = [2, 16, 16], strides = [1, 1, 1]} : vector<2x22x16xf32> to vector<2x16x16xf32>
      %91 = vector.broadcast %89 : f32 to vector<2x16x16xf32>
      %92 = arith.mulf %91, %90 : vector<2x16x16xf32>
      %93 = arith.addf %71, %92 : vector<2x16x16xf32>
      %c8 = arith.constant 8 : index
      %94 = memref.load %arg3[%c8] : memref<98xf32, #tpu.memory_space<smem>>
      %95 = vector.extract_strided_slice %88 {offsets = [0, 1, 0], sizes = [2, 16, 16], strides = [1, 1, 1]} : vector<2x22x16xf32> to vector<2x16x16xf32>
      %96 = vector.broadcast %94 : f32 to vector<2x16x16xf32>
      %97 = arith.mulf %96, %95 : vector<2x16x16xf32>
      %98 = arith.addf %76, %97 : vector<2x16x16xf32>
      %c15 = arith.constant 15 : index
      %99 = memref.load %arg3[%c15] : memref<98xf32, #tpu.memory_space<smem>>
      %100 = vector.extract_strided_slice %88 {offsets = [0, 2, 0], sizes = [2, 16, 16], strides = [1, 1, 1]} : vector<2x22x16xf32> to vector<2x16x16xf32>
      %101 = vector.broadcast %99 : f32 to vector<2x16x16xf32>
      %102 = arith.mulf %101, %100 : vector<2x16x16xf32>
      %103 = arith.addf %81, %102 : vector<2x16x16xf32>
      %c22 = arith.constant 22 : index
      %104 = memref.load %arg3[%c22] : memref<98xf32, #tpu.memory_space<smem>>
      %105 = vector.extract_strided_slice %88 {offsets = [0, 3, 0], sizes = [2, 16, 16], strides = [1, 1, 1]} : vector<2x22x16xf32> to vector<2x16x16xf32>
      %106 = vector.broadcast %104 : f32 to vector<2x16x16xf32>
      %107 = arith.mulf %106, %105 : vector<2x16x16xf32>
      %108 = arith.addf %86, %107 : vector<2x16x16xf32>
      %c29 = arith.constant 29 : index
      %109 = memref.load %arg3[%c29] : memref<98xf32, #tpu.memory_space<smem>>
      %110 = vector.extract_strided_slice %88 {offsets = [0, 4, 0], sizes = [2, 16, 16], strides = [1, 1, 1]} : vector<2x22x16xf32> to vector<2x16x16xf32>
      %111 = vector.broadcast %109 : f32 to vector<2x16x16xf32>
      %112 = arith.mulf %111, %110 : vector<2x16x16xf32>
      %113 = arith.addf %93, %112 : vector<2x16x16xf32>
      %c36 = arith.constant 36 : index
      %114 = memref.load %arg3[%c36] : memref<98xf32, #tpu.memory_space<smem>>
      %115 = vector.extract_strided_slice %88 {offsets = [0, 5, 0], sizes = [2, 16, 16], strides = [1, 1, 1]} : vector<2x22x16xf32> to vector<2x16x16xf32>
      %116 = vector.broadcast %114 : f32 to vector<2x16x16xf32>
      %117 = arith.mulf %116, %115 : vector<2x16x16xf32>
      %118 = arith.addf %98, %117 : vector<2x16x16xf32>
      %c43 = arith.constant 43 : index
      %119 = memref.load %arg3[%c43] : memref<98xf32, #tpu.memory_space<smem>>
      %120 = vector.extract_strided_slice %88 {offsets = [0, 6, 0], sizes = [2, 16, 16], strides = [1, 1, 1]} : vector<2x22x16xf32> to vector<2x16x16xf32>
      %121 = vector.broadcast %119 : f32 to vector<2x16x16xf32>
      %122 = arith.mulf %121, %120 : vector<2x16x16xf32>
      %123 = arith.addf %103, %122 : vector<2x16x16xf32>
      %c0_71 = arith.constant 0 : index
      %c0_72 = arith.constant 0 : index
      %c0_73 = arith.constant 0 : index
      %c2 = arith.constant 2 : index
      %124 = vector.load %arg7[%c0_71, %c0_72, %c0_73, %c2] : memref<2x2x22x22xf32, #tpu.memory_space<vmem>>, vector<1x2x22x16xf32>
      %125 = vector.shape_cast %124 : vector<1x2x22x16xf32> to vector<2x22x16xf32>
      %c2_74 = arith.constant 2 : index
      %126 = memref.load %arg3[%c2_74] : memref<98xf32, #tpu.memory_space<smem>>
      %127 = vector.extract_strided_slice %125 {offsets = [0, 0, 0], sizes = [2, 16, 16], strides = [1, 1, 1]} : vector<2x22x16xf32> to vector<2x16x16xf32>
      %128 = vector.broadcast %126 : f32 to vector<2x16x16xf32>
      %129 = arith.mulf %128, %127 : vector<2x16x16xf32>
      %130 = arith.addf %108, %129 : vector<2x16x16xf32>
      %c9 = arith.constant 9 : index
      %131 = memref.load %arg3[%c9] : memref<98xf32, #tpu.memory_space<smem>>
      %132 = vector.extract_strided_slice %125 {offsets = [0, 1, 0], sizes = [2, 16, 16], strides = [1, 1, 1]} : vector<2x22x16xf32> to vector<2x16x16xf32>
      %133 = vector.broadcast %131 : f32 to vector<2x16x16xf32>
      %134 = arith.mulf %133, %132 : vector<2x16x16xf32>
      %135 = arith.addf %113, %134 : vector<2x16x16xf32>
      %c16 = arith.constant 16 : index
      %136 = memref.load %arg3[%c16] : memref<98xf32, #tpu.memory_space<smem>>
      %137 = vector.extract_strided_slice %125 {offsets = [0, 2, 0], sizes = [2, 16, 16], strides = [1, 1, 1]} : vector<2x22x16xf32> to vector<2x16x16xf32>
      %138 = vector.broadcast %136 : f32 to vector<2x16x16xf32>
      %139 = arith.mulf %138, %137 : vector<2x16x16xf32>
      %140 = arith.addf %118, %139 : vector<2x16x16xf32>
      %c23 = arith.constant 23 : index
      %141 = memref.load %arg3[%c23] : memref<98xf32, #tpu.memory_space<smem>>
      %142 = vector.extract_strided_slice %125 {offsets = [0, 3, 0], sizes = [2, 16, 16], strides = [1, 1, 1]} : vector<2x22x16xf32> to vector<2x16x16xf32>
      %143 = vector.broadcast %141 : f32 to vector<2x16x16xf32>
      %144 = arith.mulf %143, %142 : vector<2x16x16xf32>
      %145 = arith.addf %123, %144 : vector<2x16x16xf32>
      %c30 = arith.constant 30 : index
      %146 = memref.load %arg3[%c30] : memref<98xf32, #tpu.memory_space<smem>>
      %147 = vector.extract_strided_slice %125 {offsets = [0, 4, 0], sizes = [2, 16, 16], strides = [1, 1, 1]} : vector<2x22x16xf32> to vector<2x16x16xf32>
      %148 = vector.broadcast %146 : f32 to vector<2x16x16xf32>
      %149 = arith.mulf %148, %147 : vector<2x16x16xf32>
      %150 = arith.addf %130, %149 : vector<2x16x16xf32>
      %c37 = arith.constant 37 : index
      %151 = memref.load %arg3[%c37] : memref<98xf32, #tpu.memory_space<smem>>
      %152 = vector.extract_strided_slice %125 {offsets = [0, 5, 0], sizes = [2, 16, 16], strides = [1, 1, 1]} : vector<2x22x16xf32> to vector<2x16x16xf32>
      %153 = vector.broadcast %151 : f32 to vector<2x16x16xf32>
      %154 = arith.mulf %153, %152 : vector<2x16x16xf32>
      %155 = arith.addf %135, %154 : vector<2x16x16xf32>
      %c44 = arith.constant 44 : index
      %156 = memref.load %arg3[%c44] : memref<98xf32, #tpu.memory_space<smem>>
      %157 = vector.extract_strided_slice %125 {offsets = [0, 6, 0], sizes = [2, 16, 16], strides = [1, 1, 1]} : vector<2x22x16xf32> to vector<2x16x16xf32>
      %158 = vector.broadcast %156 : f32 to vector<2x16x16xf32>
      %159 = arith.mulf %158, %157 : vector<2x16x16xf32>
      %160 = arith.addf %140, %159 : vector<2x16x16xf32>
      %c0_75 = arith.constant 0 : index
      %c0_76 = arith.constant 0 : index
      %c0_77 = arith.constant 0 : index
      %c3_78 = arith.constant 3 : index
      %161 = vector.load %arg7[%c0_75, %c0_76, %c0_77, %c3_78] : memref<2x2x22x22xf32, #tpu.memory_space<vmem>>, vector<1x2x22x16xf32>
      %162 = vector.shape_cast %161 : vector<1x2x22x16xf32> to vector<2x22x16xf32>
      %c3_79 = arith.constant 3 : index
      %163 = memref.load %arg3[%c3_79] : memref<98xf32, #tpu.memory_space<smem>>
      %164 = vector.extract_strided_slice %162 {offsets = [0, 0, 0], sizes = [2, 16, 16], strides = [1, 1, 1]} : vector<2x22x16xf32> to vector<2x16x16xf32>
      %165 = vector.broadcast %163 : f32 to vector<2x16x16xf32>
      %166 = arith.mulf %165, %164 : vector<2x16x16xf32>
      %167 = arith.addf %145, %166 : vector<2x16x16xf32>
      %c10 = arith.constant 10 : index
      %168 = memref.load %arg3[%c10] : memref<98xf32, #tpu.memory_space<smem>>
      %169 = vector.extract_strided_slice %162 {offsets = [0, 1, 0], sizes = [2, 16, 16], strides = [1, 1, 1]} : vector<2x22x16xf32> to vector<2x16x16xf32>
      %170 = vector.broadcast %168 : f32 to vector<2x16x16xf32>
      %171 = arith.mulf %170, %169 : vector<2x16x16xf32>
      %172 = arith.addf %150, %171 : vector<2x16x16xf32>
      %c17 = arith.constant 17 : index
      %173 = memref.load %arg3[%c17] : memref<98xf32, #tpu.memory_space<smem>>
      %174 = vector.extract_strided_slice %162 {offsets = [0, 2, 0], sizes = [2, 16, 16], strides = [1, 1, 1]} : vector<2x22x16xf32> to vector<2x16x16xf32>
      %175 = vector.broadcast %173 : f32 to vector<2x16x16xf32>
      %176 = arith.mulf %175, %174 : vector<2x16x16xf32>
      %177 = arith.addf %155, %176 : vector<2x16x16xf32>
      %c24 = arith.constant 24 : index
      %178 = memref.load %arg3[%c24] : memref<98xf32, #tpu.memory_space<smem>>
      %179 = vector.extract_strided_slice %162 {offsets = [0, 3, 0], sizes = [2, 16, 16], strides = [1, 1, 1]} : vector<2x22x16xf32> to vector<2x16x16xf32>
      %180 = vector.broadcast %178 : f32 to vector<2x16x16xf32>
      %181 = arith.mulf %180, %179 : vector<2x16x16xf32>
      %182 = arith.addf %160, %181 : vector<2x16x16xf32>
      %c31 = arith.constant 31 : index
      %183 = memref.load %arg3[%c31] : memref<98xf32, #tpu.memory_space<smem>>
      %184 = vector.extract_strided_slice %162 {offsets = [0, 4, 0], sizes = [2, 16, 16], strides = [1, 1, 1]} : vector<2x22x16xf32> to vector<2x16x16xf32>
      %185 = vector.broadcast %183 : f32 to vector<2x16x16xf32>
      %186 = arith.mulf %185, %184 : vector<2x16x16xf32>
      %187 = arith.addf %167, %186 : vector<2x16x16xf32>
      %c38 = arith.constant 38 : index
      %188 = memref.load %arg3[%c38] : memref<98xf32, #tpu.memory_space<smem>>
      %189 = vector.extract_strided_slice %162 {offsets = [0, 5, 0], sizes = [2, 16, 16], strides = [1, 1, 1]} : vector<2x22x16xf32> to vector<2x16x16xf32>
      %190 = vector.broadcast %188 : f32 to vector<2x16x16xf32>
      %191 = arith.mulf %190, %189 : vector<2x16x16xf32>
      %192 = arith.addf %172, %191 : vector<2x16x16xf32>
      %c45 = arith.constant 45 : index
      %193 = memref.load %arg3[%c45] : memref<98xf32, #tpu.memory_space<smem>>
      %194 = vector.extract_strided_slice %162 {offsets = [0, 6, 0], sizes = [2, 16, 16], strides = [1, 1, 1]} : vector<2x22x16xf32> to vector<2x16x16xf32>
      %195 = vector.broadcast %193 : f32 to vector<2x16x16xf32>
      %196 = arith.mulf %195, %194 : vector<2x16x16xf32>
      %197 = arith.addf %177, %196 : vector<2x16x16xf32>
      %c0_80 = arith.constant 0 : index
      %c0_81 = arith.constant 0 : index
      %c0_82 = arith.constant 0 : index
      %c4 = arith.constant 4 : index
      %198 = vector.load %arg7[%c0_80, %c0_81, %c0_82, %c4] : memref<2x2x22x22xf32, #tpu.memory_space<vmem>>, vector<1x2x22x16xf32>
      %199 = vector.shape_cast %198 : vector<1x2x22x16xf32> to vector<2x22x16xf32>
      %c4_83 = arith.constant 4 : index
      %200 = memref.load %arg3[%c4_83] : memref<98xf32, #tpu.memory_space<smem>>
      %201 = vector.extract_strided_slice %199 {offsets = [0, 0, 0], sizes = [2, 16, 16], strides = [1, 1, 1]} : vector<2x22x16xf32> to vector<2x16x16xf32>
      %202 = vector.broadcast %200 : f32 to vector<2x16x16xf32>
      %203 = arith.mulf %202, %201 : vector<2x16x16xf32>
      %204 = arith.addf %182, %203 : vector<2x16x16xf32>
      %c11 = arith.constant 11 : index
      %205 = memref.load %arg3[%c11] : memref<98xf32, #tpu.memory_space<smem>>
      %206 = vector.extract_strided_slice %199 {offsets = [0, 1, 0], sizes = [2, 16, 16], strides = [1, 1, 1]} : vector<2x22x16xf32> to vector<2x16x16xf32>
      %207 = vector.broadcast %205 : f32 to vector<2x16x16xf32>
      %208 = arith.mulf %207, %206 : vector<2x16x16xf32>
      %209 = arith.addf %187, %208 : vector<2x16x16xf32>
      %c18 = arith.constant 18 : index
      %210 = memref.load %arg3[%c18] : memref<98xf32, #tpu.memory_space<smem>>
      %211 = vector.extract_strided_slice %199 {offsets = [0, 2, 0], sizes = [2, 16, 16], strides = [1, 1, 1]} : vector<2x22x16xf32> to vector<2x16x16xf32>
      %212 = vector.broadcast %210 : f32 to vector<2x16x16xf32>
      %213 = arith.mulf %212, %211 : vector<2x16x16xf32>
      %214 = arith.addf %192, %213 : vector<2x16x16xf32>
      %c25 = arith.constant 25 : index
      %215 = memref.load %arg3[%c25] : memref<98xf32, #tpu.memory_space<smem>>
      %216 = vector.extract_strided_slice %199 {offsets = [0, 3, 0], sizes = [2, 16, 16], strides = [1, 1, 1]} : vector<2x22x16xf32> to vector<2x16x16xf32>
      %217 = vector.broadcast %215 : f32 to vector<2x16x16xf32>
      %218 = arith.mulf %217, %216 : vector<2x16x16xf32>
      %219 = arith.addf %197, %218 : vector<2x16x16xf32>
      %c32 = arith.constant 32 : index
      %220 = memref.load %arg3[%c32] : memref<98xf32, #tpu.memory_space<smem>>
      %221 = vector.extract_strided_slice %199 {offsets = [0, 4, 0], sizes = [2, 16, 16], strides = [1, 1, 1]} : vector<2x22x16xf32> to vector<2x16x16xf32>
      %222 = vector.broadcast %220 : f32 to vector<2x16x16xf32>
      %223 = arith.mulf %222, %221 : vector<2x16x16xf32>
      %224 = arith.addf %204, %223 : vector<2x16x16xf32>
      %c39 = arith.constant 39 : index
      %225 = memref.load %arg3[%c39] : memref<98xf32, #tpu.memory_space<smem>>
      %226 = vector.extract_strided_slice %199 {offsets = [0, 5, 0], sizes = [2, 16, 16], strides = [1, 1, 1]} : vector<2x22x16xf32> to vector<2x16x16xf32>
      %227 = vector.broadcast %225 : f32 to vector<2x16x16xf32>
      %228 = arith.mulf %227, %226 : vector<2x16x16xf32>
      %229 = arith.addf %209, %228 : vector<2x16x16xf32>
      %c46 = arith.constant 46 : index
      %230 = memref.load %arg3[%c46] : memref<98xf32, #tpu.memory_space<smem>>
      %231 = vector.extract_strided_slice %199 {offsets = [0, 6, 0], sizes = [2, 16, 16], strides = [1, 1, 1]} : vector<2x22x16xf32> to vector<2x16x16xf32>
      %232 = vector.broadcast %230 : f32 to vector<2x16x16xf32>
      %233 = arith.mulf %232, %231 : vector<2x16x16xf32>
      %234 = arith.addf %214, %233 : vector<2x16x16xf32>
      %c0_84 = arith.constant 0 : index
      %c0_85 = arith.constant 0 : index
      %c0_86 = arith.constant 0 : index
      %c5 = arith.constant 5 : index
      %235 = vector.load %arg7[%c0_84, %c0_85, %c0_86, %c5] : memref<2x2x22x22xf32, #tpu.memory_space<vmem>>, vector<1x2x22x16xf32>
      %236 = vector.shape_cast %235 : vector<1x2x22x16xf32> to vector<2x22x16xf32>
      %c5_87 = arith.constant 5 : index
      %237 = memref.load %arg3[%c5_87] : memref<98xf32, #tpu.memory_space<smem>>
      %238 = vector.extract_strided_slice %236 {offsets = [0, 0, 0], sizes = [2, 16, 16], strides = [1, 1, 1]} : vector<2x22x16xf32> to vector<2x16x16xf32>
      %239 = vector.broadcast %237 : f32 to vector<2x16x16xf32>
      %240 = arith.mulf %239, %238 : vector<2x16x16xf32>
      %241 = arith.addf %219, %240 : vector<2x16x16xf32>
      %c12 = arith.constant 12 : index
      %242 = memref.load %arg3[%c12] : memref<98xf32, #tpu.memory_space<smem>>
      %243 = vector.extract_strided_slice %236 {offsets = [0, 1, 0], sizes = [2, 16, 16], strides = [1, 1, 1]} : vector<2x22x16xf32> to vector<2x16x16xf32>
      %244 = vector.broadcast %242 : f32 to vector<2x16x16xf32>
      %245 = arith.mulf %244, %243 : vector<2x16x16xf32>
      %246 = arith.addf %224, %245 : vector<2x16x16xf32>
      %c19_88 = arith.constant 19 : index
      %247 = memref.load %arg3[%c19_88] : memref<98xf32, #tpu.memory_space<smem>>
      %248 = vector.extract_strided_slice %236 {offsets = [0, 2, 0], sizes = [2, 16, 16], strides = [1, 1, 1]} : vector<2x22x16xf32> to vector<2x16x16xf32>
      %249 = vector.broadcast %247 : f32 to vector<2x16x16xf32>
      %250 = arith.mulf %249, %248 : vector<2x16x16xf32>
      %251 = arith.addf %229, %250 : vector<2x16x16xf32>
      %c26 = arith.constant 26 : index
      %252 = memref.load %arg3[%c26] : memref<98xf32, #tpu.memory_space<smem>>
      %253 = vector.extract_strided_slice %236 {offsets = [0, 3, 0], sizes = [2, 16, 16], strides = [1, 1, 1]} : vector<2x22x16xf32> to vector<2x16x16xf32>
      %254 = vector.broadcast %252 : f32 to vector<2x16x16xf32>
      %255 = arith.mulf %254, %253 : vector<2x16x16xf32>
      %256 = arith.addf %234, %255 : vector<2x16x16xf32>
      %c33 = arith.constant 33 : index
      %257 = memref.load %arg3[%c33] : memref<98xf32, #tpu.memory_space<smem>>
      %258 = vector.extract_strided_slice %236 {offsets = [0, 4, 0], sizes = [2, 16, 16], strides = [1, 1, 1]} : vector<2x22x16xf32> to vector<2x16x16xf32>
      %259 = vector.broadcast %257 : f32 to vector<2x16x16xf32>
      %260 = arith.mulf %259, %258 : vector<2x16x16xf32>
      %261 = arith.addf %241, %260 : vector<2x16x16xf32>
      %c40 = arith.constant 40 : index
      %262 = memref.load %arg3[%c40] : memref<98xf32, #tpu.memory_space<smem>>
      %263 = vector.extract_strided_slice %236 {offsets = [0, 5, 0], sizes = [2, 16, 16], strides = [1, 1, 1]} : vector<2x22x16xf32> to vector<2x16x16xf32>
      %264 = vector.broadcast %262 : f32 to vector<2x16x16xf32>
      %265 = arith.mulf %264, %263 : vector<2x16x16xf32>
      %266 = arith.addf %246, %265 : vector<2x16x16xf32>
      %c47 = arith.constant 47 : index
      %267 = memref.load %arg3[%c47] : memref<98xf32, #tpu.memory_space<smem>>
      %268 = vector.extract_strided_slice %236 {offsets = [0, 6, 0], sizes = [2, 16, 16], strides = [1, 1, 1]} : vector<2x22x16xf32> to vector<2x16x16xf32>
      %269 = vector.broadcast %267 : f32 to vector<2x16x16xf32>
      %270 = arith.mulf %269, %268 : vector<2x16x16xf32>
      %271 = arith.addf %251, %270 : vector<2x16x16xf32>
      %c0_89 = arith.constant 0 : index
      %c0_90 = arith.constant 0 : index
      %c0_91 = arith.constant 0 : index
      %c6 = arith.constant 6 : index
      %272 = vector.load %arg7[%c0_89, %c0_90, %c0_91, %c6] : memref<2x2x22x22xf32, #tpu.memory_space<vmem>>, vector<1x2x22x16xf32>
      %273 = vector.shape_cast %272 : vector<1x2x22x16xf32> to vector<2x22x16xf32>
      %c6_92 = arith.constant 6 : index
      %274 = memref.load %arg3[%c6_92] : memref<98xf32, #tpu.memory_space<smem>>
      %275 = vector.extract_strided_slice %273 {offsets = [0, 0, 0], sizes = [2, 16, 16], strides = [1, 1, 1]} : vector<2x22x16xf32> to vector<2x16x16xf32>
      %276 = vector.broadcast %274 : f32 to vector<2x16x16xf32>
      %277 = arith.mulf %276, %275 : vector<2x16x16xf32>
      %278 = arith.addf %256, %277 : vector<2x16x16xf32>
      %c13 = arith.constant 13 : index
      %279 = memref.load %arg3[%c13] : memref<98xf32, #tpu.memory_space<smem>>
      %280 = vector.extract_strided_slice %273 {offsets = [0, 1, 0], sizes = [2, 16, 16], strides = [1, 1, 1]} : vector<2x22x16xf32> to vector<2x16x16xf32>
      %281 = vector.broadcast %279 : f32 to vector<2x16x16xf32>
      %282 = arith.mulf %281, %280 : vector<2x16x16xf32>
      %283 = arith.addf %261, %282 : vector<2x16x16xf32>
      %c20 = arith.constant 20 : index
      %284 = memref.load %arg3[%c20] : memref<98xf32, #tpu.memory_space<smem>>
      %285 = vector.extract_strided_slice %273 {offsets = [0, 2, 0], sizes = [2, 16, 16], strides = [1, 1, 1]} : vector<2x22x16xf32> to vector<2x16x16xf32>
      %286 = vector.broadcast %284 : f32 to vector<2x16x16xf32>
      %287 = arith.mulf %286, %285 : vector<2x16x16xf32>
      %288 = arith.addf %266, %287 : vector<2x16x16xf32>
      %c27 = arith.constant 27 : index
      %289 = memref.load %arg3[%c27] : memref<98xf32, #tpu.memory_space<smem>>
      %290 = vector.extract_strided_slice %273 {offsets = [0, 3, 0], sizes = [2, 16, 16], strides = [1, 1, 1]} : vector<2x22x16xf32> to vector<2x16x16xf32>
      %291 = vector.broadcast %289 : f32 to vector<2x16x16xf32>
      %292 = arith.mulf %291, %290 : vector<2x16x16xf32>
      %293 = arith.addf %271, %292 : vector<2x16x16xf32>
      %c34 = arith.constant 34 : index
      %294 = memref.load %arg3[%c34] : memref<98xf32, #tpu.memory_space<smem>>
      %295 = vector.extract_strided_slice %273 {offsets = [0, 4, 0], sizes = [2, 16, 16], strides = [1, 1, 1]} : vector<2x22x16xf32> to vector<2x16x16xf32>
      %296 = vector.broadcast %294 : f32 to vector<2x16x16xf32>
      %297 = arith.mulf %296, %295 : vector<2x16x16xf32>
      %298 = arith.addf %278, %297 : vector<2x16x16xf32>
      %c41 = arith.constant 41 : index
      %299 = memref.load %arg3[%c41] : memref<98xf32, #tpu.memory_space<smem>>
      %300 = vector.extract_strided_slice %273 {offsets = [0, 5, 0], sizes = [2, 16, 16], strides = [1, 1, 1]} : vector<2x22x16xf32> to vector<2x16x16xf32>
      %301 = vector.broadcast %299 : f32 to vector<2x16x16xf32>
      %302 = arith.mulf %301, %300 : vector<2x16x16xf32>
      %303 = arith.addf %283, %302 : vector<2x16x16xf32>
      %c48 = arith.constant 48 : index
      %304 = memref.load %arg3[%c48] : memref<98xf32, #tpu.memory_space<smem>>
      %305 = vector.extract_strided_slice %273 {offsets = [0, 6, 0], sizes = [2, 16, 16], strides = [1, 1, 1]} : vector<2x22x16xf32> to vector<2x16x16xf32>
      %306 = vector.broadcast %304 : f32 to vector<2x16x16xf32>
      %307 = arith.mulf %306, %305 : vector<2x16x16xf32>
      %308 = arith.addf %288, %307 : vector<2x16x16xf32>
      %c1_93 = arith.constant 1 : index
      %c0_94 = arith.constant 0 : index
      %c0_95 = arith.constant 0 : index
      %c0_96 = arith.constant 0 : index
      %309 = vector.load %arg7[%c1_93, %c0_94, %c0_95, %c0_96] : memref<2x2x22x22xf32, #tpu.memory_space<vmem>>, vector<1x2x22x16xf32>
      %310 = vector.shape_cast %309 : vector<1x2x22x16xf32> to vector<2x22x16xf32>
      %c49 = arith.constant 49 : index
      %311 = memref.load %arg3[%c49] : memref<98xf32, #tpu.memory_space<smem>>
      %312 = vector.extract_strided_slice %310 {offsets = [0, 0, 0], sizes = [2, 16, 16], strides = [1, 1, 1]} : vector<2x22x16xf32> to vector<2x16x16xf32>
      %313 = vector.broadcast %311 : f32 to vector<2x16x16xf32>
      %314 = arith.mulf %313, %312 : vector<2x16x16xf32>
      %315 = arith.addf %293, %314 : vector<2x16x16xf32>
      %c56 = arith.constant 56 : index
      %316 = memref.load %arg3[%c56] : memref<98xf32, #tpu.memory_space<smem>>
      %317 = vector.extract_strided_slice %310 {offsets = [0, 1, 0], sizes = [2, 16, 16], strides = [1, 1, 1]} : vector<2x22x16xf32> to vector<2x16x16xf32>
      %318 = vector.broadcast %316 : f32 to vector<2x16x16xf32>
      %319 = arith.mulf %318, %317 : vector<2x16x16xf32>
      %320 = arith.addf %298, %319 : vector<2x16x16xf32>
      %c63 = arith.constant 63 : index
      %321 = memref.load %arg3[%c63] : memref<98xf32, #tpu.memory_space<smem>>
      %322 = vector.extract_strided_slice %310 {offsets = [0, 2, 0], sizes = [2, 16, 16], strides = [1, 1, 1]} : vector<2x22x16xf32> to vector<2x16x16xf32>
      %323 = vector.broadcast %321 : f32 to vector<2x16x16xf32>
      %324 = arith.mulf %323, %322 : vector<2x16x16xf32>
      %325 = arith.addf %303, %324 : vector<2x16x16xf32>
      %c70 = arith.constant 70 : index
      %326 = memref.load %arg3[%c70] : memref<98xf32, #tpu.memory_space<smem>>
      %327 = vector.extract_strided_slice %310 {offsets = [0, 3, 0], sizes = [2, 16, 16], strides = [1, 1, 1]} : vector<2x22x16xf32> to vector<2x16x16xf32>
      %328 = vector.broadcast %326 : f32 to vector<2x16x16xf32>
      %329 = arith.mulf %328, %327 : vector<2x16x16xf32>
      %330 = arith.addf %308, %329 : vector<2x16x16xf32>
      %c77 = arith.constant 77 : index
      %331 = memref.load %arg3[%c77] : memref<98xf32, #tpu.memory_space<smem>>
      %332 = vector.extract_strided_slice %310 {offsets = [0, 4, 0], sizes = [2, 16, 16], strides = [1, 1, 1]} : vector<2x22x16xf32> to vector<2x16x16xf32>
      %333 = vector.broadcast %331 : f32 to vector<2x16x16xf32>
      %334 = arith.mulf %333, %332 : vector<2x16x16xf32>
      %335 = arith.addf %315, %334 : vector<2x16x16xf32>
      %c84 = arith.constant 84 : index
      %336 = memref.load %arg3[%c84] : memref<98xf32, #tpu.memory_space<smem>>
      %337 = vector.extract_strided_slice %310 {offsets = [0, 5, 0], sizes = [2, 16, 16], strides = [1, 1, 1]} : vector<2x22x16xf32> to vector<2x16x16xf32>
      %338 = vector.broadcast %336 : f32 to vector<2x16x16xf32>
      %339 = arith.mulf %338, %337 : vector<2x16x16xf32>
      %340 = arith.addf %320, %339 : vector<2x16x16xf32>
      %c91 = arith.constant 91 : index
      %341 = memref.load %arg3[%c91] : memref<98xf32, #tpu.memory_space<smem>>
      %342 = vector.extract_strided_slice %310 {offsets = [0, 6, 0], sizes = [2, 16, 16], strides = [1, 1, 1]} : vector<2x22x16xf32> to vector<2x16x16xf32>
      %343 = vector.broadcast %341 : f32 to vector<2x16x16xf32>
      %344 = arith.mulf %343, %342 : vector<2x16x16xf32>
      %345 = arith.addf %325, %344 : vector<2x16x16xf32>
      %c1_97 = arith.constant 1 : index
      %c0_98 = arith.constant 0 : index
      %c0_99 = arith.constant 0 : index
      %c1_100 = arith.constant 1 : index
      %346 = vector.load %arg7[%c1_97, %c0_98, %c0_99, %c1_100] : memref<2x2x22x22xf32, #tpu.memory_space<vmem>>, vector<1x2x22x16xf32>
      %347 = vector.shape_cast %346 : vector<1x2x22x16xf32> to vector<2x22x16xf32>
      %c50 = arith.constant 50 : index
      %348 = memref.load %arg3[%c50] : memref<98xf32, #tpu.memory_space<smem>>
      %349 = vector.extract_strided_slice %347 {offsets = [0, 0, 0], sizes = [2, 16, 16], strides = [1, 1, 1]} : vector<2x22x16xf32> to vector<2x16x16xf32>
      %350 = vector.broadcast %348 : f32 to vector<2x16x16xf32>
      %351 = arith.mulf %350, %349 : vector<2x16x16xf32>
      %352 = arith.addf %330, %351 : vector<2x16x16xf32>
      %c57 = arith.constant 57 : index
      %353 = memref.load %arg3[%c57] : memref<98xf32, #tpu.memory_space<smem>>
      %354 = vector.extract_strided_slice %347 {offsets = [0, 1, 0], sizes = [2, 16, 16], strides = [1, 1, 1]} : vector<2x22x16xf32> to vector<2x16x16xf32>
      %355 = vector.broadcast %353 : f32 to vector<2x16x16xf32>
      %356 = arith.mulf %355, %354 : vector<2x16x16xf32>
      %357 = arith.addf %335, %356 : vector<2x16x16xf32>
      %c64 = arith.constant 64 : index
      %358 = memref.load %arg3[%c64] : memref<98xf32, #tpu.memory_space<smem>>
      %359 = vector.extract_strided_slice %347 {offsets = [0, 2, 0], sizes = [2, 16, 16], strides = [1, 1, 1]} : vector<2x22x16xf32> to vector<2x16x16xf32>
      %360 = vector.broadcast %358 : f32 to vector<2x16x16xf32>
      %361 = arith.mulf %360, %359 : vector<2x16x16xf32>
      %362 = arith.addf %340, %361 : vector<2x16x16xf32>
      %c71 = arith.constant 71 : index
      %363 = memref.load %arg3[%c71] : memref<98xf32, #tpu.memory_space<smem>>
      %364 = vector.extract_strided_slice %347 {offsets = [0, 3, 0], sizes = [2, 16, 16], strides = [1, 1, 1]} : vector<2x22x16xf32> to vector<2x16x16xf32>
      %365 = vector.broadcast %363 : f32 to vector<2x16x16xf32>
      %366 = arith.mulf %365, %364 : vector<2x16x16xf32>
      %367 = arith.addf %345, %366 : vector<2x16x16xf32>
      %c78 = arith.constant 78 : index
      %368 = memref.load %arg3[%c78] : memref<98xf32, #tpu.memory_space<smem>>
      %369 = vector.extract_strided_slice %347 {offsets = [0, 4, 0], sizes = [2, 16, 16], strides = [1, 1, 1]} : vector<2x22x16xf32> to vector<2x16x16xf32>
      %370 = vector.broadcast %368 : f32 to vector<2x16x16xf32>
      %371 = arith.mulf %370, %369 : vector<2x16x16xf32>
      %372 = arith.addf %352, %371 : vector<2x16x16xf32>
      %c85 = arith.constant 85 : index
      %373 = memref.load %arg3[%c85] : memref<98xf32, #tpu.memory_space<smem>>
      %374 = vector.extract_strided_slice %347 {offsets = [0, 5, 0], sizes = [2, 16, 16], strides = [1, 1, 1]} : vector<2x22x16xf32> to vector<2x16x16xf32>
      %375 = vector.broadcast %373 : f32 to vector<2x16x16xf32>
      %376 = arith.mulf %375, %374 : vector<2x16x16xf32>
      %377 = arith.addf %357, %376 : vector<2x16x16xf32>
      %c92 = arith.constant 92 : index
      %378 = memref.load %arg3[%c92] : memref<98xf32, #tpu.memory_space<smem>>
      %379 = vector.extract_strided_slice %347 {offsets = [0, 6, 0], sizes = [2, 16, 16], strides = [1, 1, 1]} : vector<2x22x16xf32> to vector<2x16x16xf32>
      %380 = vector.broadcast %378 : f32 to vector<2x16x16xf32>
      %381 = arith.mulf %380, %379 : vector<2x16x16xf32>
      %382 = arith.addf %362, %381 : vector<2x16x16xf32>
      %c1_101 = arith.constant 1 : index
      %c0_102 = arith.constant 0 : index
      %c0_103 = arith.constant 0 : index
      %c2_104 = arith.constant 2 : index
      %383 = vector.load %arg7[%c1_101, %c0_102, %c0_103, %c2_104] : memref<2x2x22x22xf32, #tpu.memory_space<vmem>>, vector<1x2x22x16xf32>
      %384 = vector.shape_cast %383 : vector<1x2x22x16xf32> to vector<2x22x16xf32>
      %c51 = arith.constant 51 : index
      %385 = memref.load %arg3[%c51] : memref<98xf32, #tpu.memory_space<smem>>
      %386 = vector.extract_strided_slice %384 {offsets = [0, 0, 0], sizes = [2, 16, 16], strides = [1, 1, 1]} : vector<2x22x16xf32> to vector<2x16x16xf32>
      %387 = vector.broadcast %385 : f32 to vector<2x16x16xf32>
      %388 = arith.mulf %387, %386 : vector<2x16x16xf32>
      %389 = arith.addf %367, %388 : vector<2x16x16xf32>
      %c58 = arith.constant 58 : index
      %390 = memref.load %arg3[%c58] : memref<98xf32, #tpu.memory_space<smem>>
      %391 = vector.extract_strided_slice %384 {offsets = [0, 1, 0], sizes = [2, 16, 16], strides = [1, 1, 1]} : vector<2x22x16xf32> to vector<2x16x16xf32>
      %392 = vector.broadcast %390 : f32 to vector<2x16x16xf32>
      %393 = arith.mulf %392, %391 : vector<2x16x16xf32>
      %394 = arith.addf %372, %393 : vector<2x16x16xf32>
      %c65 = arith.constant 65 : index
      %395 = memref.load %arg3[%c65] : memref<98xf32, #tpu.memory_space<smem>>
      %396 = vector.extract_strided_slice %384 {offsets = [0, 2, 0], sizes = [2, 16, 16], strides = [1, 1, 1]} : vector<2x22x16xf32> to vector<2x16x16xf32>
      %397 = vector.broadcast %395 : f32 to vector<2x16x16xf32>
      %398 = arith.mulf %397, %396 : vector<2x16x16xf32>
      %399 = arith.addf %377, %398 : vector<2x16x16xf32>
      %c72 = arith.constant 72 : index
      %400 = memref.load %arg3[%c72] : memref<98xf32, #tpu.memory_space<smem>>
      %401 = vector.extract_strided_slice %384 {offsets = [0, 3, 0], sizes = [2, 16, 16], strides = [1, 1, 1]} : vector<2x22x16xf32> to vector<2x16x16xf32>
      %402 = vector.broadcast %400 : f32 to vector<2x16x16xf32>
      %403 = arith.mulf %402, %401 : vector<2x16x16xf32>
      %404 = arith.addf %382, %403 : vector<2x16x16xf32>
      %c79 = arith.constant 79 : index
      %405 = memref.load %arg3[%c79] : memref<98xf32, #tpu.memory_space<smem>>
      %406 = vector.extract_strided_slice %384 {offsets = [0, 4, 0], sizes = [2, 16, 16], strides = [1, 1, 1]} : vector<2x22x16xf32> to vector<2x16x16xf32>
      %407 = vector.broadcast %405 : f32 to vector<2x16x16xf32>
      %408 = arith.mulf %407, %406 : vector<2x16x16xf32>
      %409 = arith.addf %389, %408 : vector<2x16x16xf32>
      %c86 = arith.constant 86 : index
      %410 = memref.load %arg3[%c86] : memref<98xf32, #tpu.memory_space<smem>>
      %411 = vector.extract_strided_slice %384 {offsets = [0, 5, 0], sizes = [2, 16, 16], strides = [1, 1, 1]} : vector<2x22x16xf32> to vector<2x16x16xf32>
      %412 = vector.broadcast %410 : f32 to vector<2x16x16xf32>
      %413 = arith.mulf %412, %411 : vector<2x16x16xf32>
      %414 = arith.addf %394, %413 : vector<2x16x16xf32>
      %c93 = arith.constant 93 : index
      %415 = memref.load %arg3[%c93] : memref<98xf32, #tpu.memory_space<smem>>
      %416 = vector.extract_strided_slice %384 {offsets = [0, 6, 0], sizes = [2, 16, 16], strides = [1, 1, 1]} : vector<2x22x16xf32> to vector<2x16x16xf32>
      %417 = vector.broadcast %415 : f32 to vector<2x16x16xf32>
      %418 = arith.mulf %417, %416 : vector<2x16x16xf32>
      %419 = arith.addf %399, %418 : vector<2x16x16xf32>
      %c1_105 = arith.constant 1 : index
      %c0_106 = arith.constant 0 : index
      %c0_107 = arith.constant 0 : index
      %c3_108 = arith.constant 3 : index
      %420 = vector.load %arg7[%c1_105, %c0_106, %c0_107, %c3_108] : memref<2x2x22x22xf32, #tpu.memory_space<vmem>>, vector<1x2x22x16xf32>
      %421 = vector.shape_cast %420 : vector<1x2x22x16xf32> to vector<2x22x16xf32>
      %c52 = arith.constant 52 : index
      %422 = memref.load %arg3[%c52] : memref<98xf32, #tpu.memory_space<smem>>
      %423 = vector.extract_strided_slice %421 {offsets = [0, 0, 0], sizes = [2, 16, 16], strides = [1, 1, 1]} : vector<2x22x16xf32> to vector<2x16x16xf32>
      %424 = vector.broadcast %422 : f32 to vector<2x16x16xf32>
      %425 = arith.mulf %424, %423 : vector<2x16x16xf32>
      %426 = arith.addf %404, %425 : vector<2x16x16xf32>
      %c59 = arith.constant 59 : index
      %427 = memref.load %arg3[%c59] : memref<98xf32, #tpu.memory_space<smem>>
      %428 = vector.extract_strided_slice %421 {offsets = [0, 1, 0], sizes = [2, 16, 16], strides = [1, 1, 1]} : vector<2x22x16xf32> to vector<2x16x16xf32>
      %429 = vector.broadcast %427 : f32 to vector<2x16x16xf32>
      %430 = arith.mulf %429, %428 : vector<2x16x16xf32>
      %431 = arith.addf %409, %430 : vector<2x16x16xf32>
      %c66 = arith.constant 66 : index
      %432 = memref.load %arg3[%c66] : memref<98xf32, #tpu.memory_space<smem>>
      %433 = vector.extract_strided_slice %421 {offsets = [0, 2, 0], sizes = [2, 16, 16], strides = [1, 1, 1]} : vector<2x22x16xf32> to vector<2x16x16xf32>
      %434 = vector.broadcast %432 : f32 to vector<2x16x16xf32>
      %435 = arith.mulf %434, %433 : vector<2x16x16xf32>
      %436 = arith.addf %414, %435 : vector<2x16x16xf32>
      %c73 = arith.constant 73 : index
      %437 = memref.load %arg3[%c73] : memref<98xf32, #tpu.memory_space<smem>>
      %438 = vector.extract_strided_slice %421 {offsets = [0, 3, 0], sizes = [2, 16, 16], strides = [1, 1, 1]} : vector<2x22x16xf32> to vector<2x16x16xf32>
      %439 = vector.broadcast %437 : f32 to vector<2x16x16xf32>
      %440 = arith.mulf %439, %438 : vector<2x16x16xf32>
      %441 = arith.addf %419, %440 : vector<2x16x16xf32>
      %c80 = arith.constant 80 : index
      %442 = memref.load %arg3[%c80] : memref<98xf32, #tpu.memory_space<smem>>
      %443 = vector.extract_strided_slice %421 {offsets = [0, 4, 0], sizes = [2, 16, 16], strides = [1, 1, 1]} : vector<2x22x16xf32> to vector<2x16x16xf32>
      %444 = vector.broadcast %442 : f32 to vector<2x16x16xf32>
      %445 = arith.mulf %444, %443 : vector<2x16x16xf32>
      %446 = arith.addf %426, %445 : vector<2x16x16xf32>
      %c87 = arith.constant 87 : index
      %447 = memref.load %arg3[%c87] : memref<98xf32, #tpu.memory_space<smem>>
      %448 = vector.extract_strided_slice %421 {offsets = [0, 5, 0], sizes = [2, 16, 16], strides = [1, 1, 1]} : vector<2x22x16xf32> to vector<2x16x16xf32>
      %449 = vector.broadcast %447 : f32 to vector<2x16x16xf32>
      %450 = arith.mulf %449, %448 : vector<2x16x16xf32>
      %451 = arith.addf %431, %450 : vector<2x16x16xf32>
      %c94 = arith.constant 94 : index
      %452 = memref.load %arg3[%c94] : memref<98xf32, #tpu.memory_space<smem>>
      %453 = vector.extract_strided_slice %421 {offsets = [0, 6, 0], sizes = [2, 16, 16], strides = [1, 1, 1]} : vector<2x22x16xf32> to vector<2x16x16xf32>
      %454 = vector.broadcast %452 : f32 to vector<2x16x16xf32>
      %455 = arith.mulf %454, %453 : vector<2x16x16xf32>
      %456 = arith.addf %436, %455 : vector<2x16x16xf32>
      %c1_109 = arith.constant 1 : index
      %c0_110 = arith.constant 0 : index
      %c0_111 = arith.constant 0 : index
      %c4_112 = arith.constant 4 : index
      %457 = vector.load %arg7[%c1_109, %c0_110, %c0_111, %c4_112] : memref<2x2x22x22xf32, #tpu.memory_space<vmem>>, vector<1x2x22x16xf32>
      %458 = vector.shape_cast %457 : vector<1x2x22x16xf32> to vector<2x22x16xf32>
      %c53 = arith.constant 53 : index
      %459 = memref.load %arg3[%c53] : memref<98xf32, #tpu.memory_space<smem>>
      %460 = vector.extract_strided_slice %458 {offsets = [0, 0, 0], sizes = [2, 16, 16], strides = [1, 1, 1]} : vector<2x22x16xf32> to vector<2x16x16xf32>
      %461 = vector.broadcast %459 : f32 to vector<2x16x16xf32>
      %462 = arith.mulf %461, %460 : vector<2x16x16xf32>
      %463 = arith.addf %441, %462 : vector<2x16x16xf32>
      %c60 = arith.constant 60 : index
      %464 = memref.load %arg3[%c60] : memref<98xf32, #tpu.memory_space<smem>>
      %465 = vector.extract_strided_slice %458 {offsets = [0, 1, 0], sizes = [2, 16, 16], strides = [1, 1, 1]} : vector<2x22x16xf32> to vector<2x16x16xf32>
      %466 = vector.broadcast %464 : f32 to vector<2x16x16xf32>
      %467 = arith.mulf %466, %465 : vector<2x16x16xf32>
      %468 = arith.addf %446, %467 : vector<2x16x16xf32>
      %c67 = arith.constant 67 : index
      %469 = memref.load %arg3[%c67] : memref<98xf32, #tpu.memory_space<smem>>
      %470 = vector.extract_strided_slice %458 {offsets = [0, 2, 0], sizes = [2, 16, 16], strides = [1, 1, 1]} : vector<2x22x16xf32> to vector<2x16x16xf32>
      %471 = vector.broadcast %469 : f32 to vector<2x16x16xf32>
      %472 = arith.mulf %471, %470 : vector<2x16x16xf32>
      %473 = arith.addf %451, %472 : vector<2x16x16xf32>
      %c74 = arith.constant 74 : index
      %474 = memref.load %arg3[%c74] : memref<98xf32, #tpu.memory_space<smem>>
      %475 = vector.extract_strided_slice %458 {offsets = [0, 3, 0], sizes = [2, 16, 16], strides = [1, 1, 1]} : vector<2x22x16xf32> to vector<2x16x16xf32>
      %476 = vector.broadcast %474 : f32 to vector<2x16x16xf32>
      %477 = arith.mulf %476, %475 : vector<2x16x16xf32>
      %478 = arith.addf %456, %477 : vector<2x16x16xf32>
      %c81 = arith.constant 81 : index
      %479 = memref.load %arg3[%c81] : memref<98xf32, #tpu.memory_space<smem>>
      %480 = vector.extract_strided_slice %458 {offsets = [0, 4, 0], sizes = [2, 16, 16], strides = [1, 1, 1]} : vector<2x22x16xf32> to vector<2x16x16xf32>
      %481 = vector.broadcast %479 : f32 to vector<2x16x16xf32>
      %482 = arith.mulf %481, %480 : vector<2x16x16xf32>
      %483 = arith.addf %463, %482 : vector<2x16x16xf32>
      %c88 = arith.constant 88 : index
      %484 = memref.load %arg3[%c88] : memref<98xf32, #tpu.memory_space<smem>>
      %485 = vector.extract_strided_slice %458 {offsets = [0, 5, 0], sizes = [2, 16, 16], strides = [1, 1, 1]} : vector<2x22x16xf32> to vector<2x16x16xf32>
      %486 = vector.broadcast %484 : f32 to vector<2x16x16xf32>
      %487 = arith.mulf %486, %485 : vector<2x16x16xf32>
      %488 = arith.addf %468, %487 : vector<2x16x16xf32>
      %c95 = arith.constant 95 : index
      %489 = memref.load %arg3[%c95] : memref<98xf32, #tpu.memory_space<smem>>
      %490 = vector.extract_strided_slice %458 {offsets = [0, 6, 0], sizes = [2, 16, 16], strides = [1, 1, 1]} : vector<2x22x16xf32> to vector<2x16x16xf32>
      %491 = vector.broadcast %489 : f32 to vector<2x16x16xf32>
      %492 = arith.mulf %491, %490 : vector<2x16x16xf32>
      %493 = arith.addf %473, %492 : vector<2x16x16xf32>
      %c1_113 = arith.constant 1 : index
      %c0_114 = arith.constant 0 : index
      %c0_115 = arith.constant 0 : index
      %c5_116 = arith.constant 5 : index
      %494 = vector.load %arg7[%c1_113, %c0_114, %c0_115, %c5_116] : memref<2x2x22x22xf32, #tpu.memory_space<vmem>>, vector<1x2x22x16xf32>
      %495 = vector.shape_cast %494 : vector<1x2x22x16xf32> to vector<2x22x16xf32>
      %c54 = arith.constant 54 : index
      %496 = memref.load %arg3[%c54] : memref<98xf32, #tpu.memory_space<smem>>
      %497 = vector.extract_strided_slice %495 {offsets = [0, 0, 0], sizes = [2, 16, 16], strides = [1, 1, 1]} : vector<2x22x16xf32> to vector<2x16x16xf32>
      %498 = vector.broadcast %496 : f32 to vector<2x16x16xf32>
      %499 = arith.mulf %498, %497 : vector<2x16x16xf32>
      %500 = arith.addf %478, %499 : vector<2x16x16xf32>
      %c61 = arith.constant 61 : index
      %501 = memref.load %arg3[%c61] : memref<98xf32, #tpu.memory_space<smem>>
      %502 = vector.extract_strided_slice %495 {offsets = [0, 1, 0], sizes = [2, 16, 16], strides = [1, 1, 1]} : vector<2x22x16xf32> to vector<2x16x16xf32>
      %503 = vector.broadcast %501 : f32 to vector<2x16x16xf32>
      %504 = arith.mulf %503, %502 : vector<2x16x16xf32>
      %505 = arith.addf %483, %504 : vector<2x16x16xf32>
      %c68 = arith.constant 68 : index
      %506 = memref.load %arg3[%c68] : memref<98xf32, #tpu.memory_space<smem>>
      %507 = vector.extract_strided_slice %495 {offsets = [0, 2, 0], sizes = [2, 16, 16], strides = [1, 1, 1]} : vector<2x22x16xf32> to vector<2x16x16xf32>
      %508 = vector.broadcast %506 : f32 to vector<2x16x16xf32>
      %509 = arith.mulf %508, %507 : vector<2x16x16xf32>
      %510 = arith.addf %488, %509 : vector<2x16x16xf32>
      %c75 = arith.constant 75 : index
      %511 = memref.load %arg3[%c75] : memref<98xf32, #tpu.memory_space<smem>>
      %512 = vector.extract_strided_slice %495 {offsets = [0, 3, 0], sizes = [2, 16, 16], strides = [1, 1, 1]} : vector<2x22x16xf32> to vector<2x16x16xf32>
      %513 = vector.broadcast %511 : f32 to vector<2x16x16xf32>
      %514 = arith.mulf %513, %512 : vector<2x16x16xf32>
      %515 = arith.addf %493, %514 : vector<2x16x16xf32>
      %c82 = arith.constant 82 : index
      %516 = memref.load %arg3[%c82] : memref<98xf32, #tpu.memory_space<smem>>
      %517 = vector.extract_strided_slice %495 {offsets = [0, 4, 0], sizes = [2, 16, 16], strides = [1, 1, 1]} : vector<2x22x16xf32> to vector<2x16x16xf32>
      %518 = vector.broadcast %516 : f32 to vector<2x16x16xf32>
      %519 = arith.mulf %518, %517 : vector<2x16x16xf32>
      %520 = arith.addf %500, %519 : vector<2x16x16xf32>
      %c89 = arith.constant 89 : index
      %521 = memref.load %arg3[%c89] : memref<98xf32, #tpu.memory_space<smem>>
      %522 = vector.extract_strided_slice %495 {offsets = [0, 5, 0], sizes = [2, 16, 16], strides = [1, 1, 1]} : vector<2x22x16xf32> to vector<2x16x16xf32>
      %523 = vector.broadcast %521 : f32 to vector<2x16x16xf32>
      %524 = arith.mulf %523, %522 : vector<2x16x16xf32>
      %525 = arith.addf %505, %524 : vector<2x16x16xf32>
      %c96 = arith.constant 96 : index
      %526 = memref.load %arg3[%c96] : memref<98xf32, #tpu.memory_space<smem>>
      %527 = vector.extract_strided_slice %495 {offsets = [0, 6, 0], sizes = [2, 16, 16], strides = [1, 1, 1]} : vector<2x22x16xf32> to vector<2x16x16xf32>
      %528 = vector.broadcast %526 : f32 to vector<2x16x16xf32>
      %529 = arith.mulf %528, %527 : vector<2x16x16xf32>
      %530 = arith.addf %510, %529 : vector<2x16x16xf32>
      %c1_117 = arith.constant 1 : index
      %c0_118 = arith.constant 0 : index
      %c0_119 = arith.constant 0 : index
      %c6_120 = arith.constant 6 : index
      %531 = vector.load %arg7[%c1_117, %c0_118, %c0_119, %c6_120] : memref<2x2x22x22xf32, #tpu.memory_space<vmem>>, vector<1x2x22x16xf32>
      %532 = vector.shape_cast %531 : vector<1x2x22x16xf32> to vector<2x22x16xf32>
      %c55 = arith.constant 55 : index
      %533 = memref.load %arg3[%c55] : memref<98xf32, #tpu.memory_space<smem>>
      %534 = vector.extract_strided_slice %532 {offsets = [0, 0, 0], sizes = [2, 16, 16], strides = [1, 1, 1]} : vector<2x22x16xf32> to vector<2x16x16xf32>
      %535 = vector.broadcast %533 : f32 to vector<2x16x16xf32>
      %536 = arith.mulf %535, %534 : vector<2x16x16xf32>
      %537 = arith.addf %515, %536 : vector<2x16x16xf32>
      %c62 = arith.constant 62 : index
      %538 = memref.load %arg3[%c62] : memref<98xf32, #tpu.memory_space<smem>>
      %539 = vector.extract_strided_slice %532 {offsets = [0, 1, 0], sizes = [2, 16, 16], strides = [1, 1, 1]} : vector<2x22x16xf32> to vector<2x16x16xf32>
      %540 = vector.broadcast %538 : f32 to vector<2x16x16xf32>
      %541 = arith.mulf %540, %539 : vector<2x16x16xf32>
      %542 = arith.addf %520, %541 : vector<2x16x16xf32>
      %c69 = arith.constant 69 : index
      %543 = memref.load %arg3[%c69] : memref<98xf32, #tpu.memory_space<smem>>
      %544 = vector.extract_strided_slice %532 {offsets = [0, 2, 0], sizes = [2, 16, 16], strides = [1, 1, 1]} : vector<2x22x16xf32> to vector<2x16x16xf32>
      %545 = vector.broadcast %543 : f32 to vector<2x16x16xf32>
      %546 = arith.mulf %545, %544 : vector<2x16x16xf32>
      %547 = arith.addf %525, %546 : vector<2x16x16xf32>
      %c76 = arith.constant 76 : index
      %548 = memref.load %arg3[%c76] : memref<98xf32, #tpu.memory_space<smem>>
      %549 = vector.extract_strided_slice %532 {offsets = [0, 3, 0], sizes = [2, 16, 16], strides = [1, 1, 1]} : vector<2x22x16xf32> to vector<2x16x16xf32>
      %550 = vector.broadcast %548 : f32 to vector<2x16x16xf32>
      %551 = arith.mulf %550, %549 : vector<2x16x16xf32>
      %552 = arith.addf %530, %551 : vector<2x16x16xf32>
      %c83 = arith.constant 83 : index
      %553 = memref.load %arg3[%c83] : memref<98xf32, #tpu.memory_space<smem>>
      %554 = vector.extract_strided_slice %532 {offsets = [0, 4, 0], sizes = [2, 16, 16], strides = [1, 1, 1]} : vector<2x22x16xf32> to vector<2x16x16xf32>
      %555 = vector.broadcast %553 : f32 to vector<2x16x16xf32>
      %556 = arith.mulf %555, %554 : vector<2x16x16xf32>
      %557 = arith.addf %537, %556 : vector<2x16x16xf32>
      %c90 = arith.constant 90 : index
      %558 = memref.load %arg3[%c90] : memref<98xf32, #tpu.memory_space<smem>>
      %559 = vector.extract_strided_slice %532 {offsets = [0, 5, 0], sizes = [2, 16, 16], strides = [1, 1, 1]} : vector<2x22x16xf32> to vector<2x16x16xf32>
      %560 = vector.broadcast %558 : f32 to vector<2x16x16xf32>
      %561 = arith.mulf %560, %559 : vector<2x16x16xf32>
      %562 = arith.addf %542, %561 : vector<2x16x16xf32>
      %c97 = arith.constant 97 : index
      %563 = memref.load %arg3[%c97] : memref<98xf32, #tpu.memory_space<smem>>
      %564 = vector.extract_strided_slice %532 {offsets = [0, 6, 0], sizes = [2, 16, 16], strides = [1, 1, 1]} : vector<2x22x16xf32> to vector<2x16x16xf32>
      %565 = vector.broadcast %563 : f32 to vector<2x16x16xf32>
      %566 = arith.mulf %565, %564 : vector<2x16x16xf32>
      %567 = arith.addf %547, %566 : vector<2x16x16xf32>
      %568 = arith.addf %562, %567 : vector<2x16x16xf32>
      %569 = arith.addf %552, %557 : vector<2x16x16xf32>
      %570 = arith.addf %568, %569 : vector<2x16x16xf32>
      %571 = arith.negf %570 : vector<2x16x16xf32>
      %572 = math.exp %571 : vector<2x16x16xf32>
      %cst_121 = arith.constant 1.000000e+00 : f32
      %573 = vector.broadcast %cst_121 : f32 to vector<2x16x16xf32>
      %574 = arith.addf %573, %572 : vector<2x16x16xf32>
      %575 = arith.divf %573, %574 : vector<2x16x16xf32>
      %576 = vector.shape_cast %575 : vector<2x16x16xf32> to vector<2x1x256xf32>
      %c0_122 = arith.constant 0 : index
      %c0_123 = arith.constant 0 : index
      %c0_124 = arith.constant 0 : index
      %577 = vector.load %arg4[%c0_122, %c0_123, %c0_124] : memref<2x1x256xf32, #tpu.memory_space<vmem>>, vector<2x1x256xf32>
      tpu.vector_store %arg4[%c0_122, %c0_123, %c0_124], %576 {strides = array<i32>} : memref<2x1x256xf32, #tpu.memory_space<vmem>>, vector<2x1x256xf32>,
    } else {
    }
    return
  }
  func.func @transform_0(%arg0: i32, %arg1: i32) -> (i32, i32, i32, i32) {
    %c0_i32 = arith.constant 0 : i32
    %c0_i32_0 = arith.constant 0 : i32
    %c0_i32_1 = arith.constant 0 : i32
    return %arg0, %arg1, %c0_i32, %c0_i32_0 : i32, i32, i32, i32
  }
  func.func @transform_1(%arg0: i32, %arg1: i32) -> i32 {
    %c0_i32 = arith.constant 0 : i32
    %c0_i32_0 = arith.constant 0 : i32
    return %c0_i32 : i32
  }
  func.func @transform_2(%arg0: i32, %arg1: i32) -> (i32, i32, i32) {
    %c0_i32 = arith.constant 0 : i32
    %c0_i32_0 = arith.constant 0 : i32
    %c0_i32_1 = arith.constant 0 : i32
    return %arg0, %c0_i32, %c0_i32_0 : i32, i32, i32
  }
}

</mosaic_0001>

<bundles_post_ra>
// kernel: tpu_custom_call.1
= control target key start
LH: loop header
LB: loop body
LE: loop exit
PB: predicated region body
PF: predicated region fallthrough
CT: control target
= control target key end

     0   :  { %7 = vsyncpa [#allocation6], 0  ;;  %s8829_s0 = inlined_call_operand.hbm [shape: f32[2,4,16,16], index: 0, kind: input, shape index: {}]   ;;  %s8830_s1 = inlined_call_operand.vmem [shape: f32[98], index: 1, kind: input, shape index: {}]   ;;  %s8831_s2 = inlined_call_operand.hbm [shape: f32[2,1,256], index: 2, kind: output, shape index: {}]  }
   0x1   :  { %8 = vsyncpa [#allocation8], 0 }
   0x2   :  { %9 = vsyncpa [#allocation7], 0  ;;  %s5013_s9 = smov [#allocation5]   ;;  %s28_s13 = sshll.u32 %s8830_s1, 4  ;;  %s29_s13 = int_to_ptr.vmem [resolvable:$true] %s28_s13 }
   0x3   :  { %s15_s10 = sshll.u32 %s5013_s9, 4  ;;  %s4951_s16 = scalar_lea.hbm %s8829_s0, 2048  ;;  %s16_s10 = int_to_ptr.vmem [resolvable:$true] %s15_s10 }
   0x4   :  { %p4952_p0 = scmp.ne.s32.totalorder %s8829_s0, %s4951_s16  ;;  %p4955_p1 = scmp.lt.u32.totalorder %s4951_s16, %s8829_s0 }
   0x6   :  { %p4957_p2 = pnand %p4955_p1, %p4952_p0 }
   0x8   :  { %4960 = shalt.err (!%p4957_p2)
}
   0x9   :  { %s4961_s21 = scalar_lea.vmem %s16_s10, 2048  ;;  %p4966_p4 = scmp.lt.s32.totalorder %s16_s10, %s16_s10 }
   0xa   :  { %p4962_p3 = scmp.ne.s32.totalorder %s16_s10, %s4961_s21  ;;  %p4967_p5 = scmp.lt.s32.totalorder %s4961_s21, %s4961_s21 }
   0xc   :  { %p4968_p6 = por %p4967_p5, %p4966_p4 }
   0xe   :  { %p4969_p7 = pnand %p4968_p6, %p4962_p3 }
  0x10   :  { %4972 = shalt.err (!%p4969_p7)
}
  0x11   :  { %s5014_s1 = smov 128   ;;  %s5015_s22 = smov 8  }
  0x12   :  { %21 = dma.hbm_to_vmem [thread:$0]  %s8829_s0, 2048, %s16_s10, [#allocation6], %s5014_s1, %s5014_s1, %s5015_s22  }
  0x13   :  { %s4973_s25 = scalar_lea.vmem %s29_s13, 16  ;;  %p4978_p9 = scmp.lt.s32.totalorder %s29_s13, %s29_s13 }
  0x14   :  { %p4974_p8 = scmp.ne.s32.totalorder %s29_s13, %s4973_s25  ;;  %p4979_p10 = scmp.lt.s32.totalorder %s4973_s25, %s4973_s25 }
  0x16   :  { %p4980_p11 = por %p4979_p10, %p4978_p9 }
  0x18   :  { %p4981_p12 = pnand %p4980_p11, %p4974_p8 }
  0x1a   :  { %4984 = shalt.err (!%p4981_p12)
}
  0x1b   :  { %s5016_s26 = smov [#allocation9]  }
  0x1c   :  { %31 = dma.vmem_to_smem %s29_s13, 16, %s5016_s26, [#allocation8]  }
  0x1d   :  { %5007 = dma.done.wait [#allocation6], 2048  }
  0x1e   :  { %5008 = vsyncadd [#allocation6], 4294965248 }
  0x1f   :  { %5009 = dma.done.wait [#allocation8], 16  }
  0x20   :  { %5010 = vsyncadd [#allocation8], 4294967280 }
  0x21   :  { %38 = sfence }
  0x22   :  { %vm43_vm0 = vcmask 130048   ;;  %v8832_v0 = vmov 0.0   ;;  %vm123_vm1 = vcmask 174080   ;;  %vm132_vm2 = vcmask 23552   ;;  %v62_v2 = vld [vmem:[#allocation5 + $0x40] sm:$0xff]  ;;  %v75_v3 = vld [vmem:[#allocation5 + $0x50] sm:$0xff] }
  0x23   :  { %46 = vst.msk [vmem:[#allocation2 + $0x10] sm:$0xff] %vm43_vm0, %v8832_v0  ;;  %44 = vst.msk [vmem:[#allocation2] sm:$0xff] %vm43_vm0, %v8832_v0  ;;  %vm146_vm3 = vcmask 179352   ;;  %v5018_v1 = vmov -inf   ;;  %v60_v4 = vld [vmem:[#allocation5] sm:$0xff]  ;;  %v63_v5 = vld [vmem:[#allocation5 + $0x48] sm:$0xff] }
  0x24   :  { %45 = vst.msk [vmem:[#allocation2 + $0x8] sm:$0xff] %vm43_vm0, %v8832_v0  ;;  %47 = vst.msk [vmem:[#allocation2 + $0x18] sm:$0xff] %vm43_vm0, %v8832_v0  ;;  %v73_v6 = vld [vmem:[#allocation5 + $0x10] sm:$0xff]  ;;  %v76_v7 = vld [vmem:[#allocation5 + $0x58] sm:$0xff]  ;;  %vm135_vm4 = vcmask 21504   ;;  %vm149_vm5 = vcmask 177304  }
  0x25   :  { %125 = vst.msk [vmem:[#allocation4 + $0x18] sm:$0x7] %vm123_vm1, %v8832_v0  ;;  %124 = vst.msk [vmem:[#allocation4] sm:$0x7] %vm123_vm1, %v8832_v0  ;;  %v61_v8 = vld [vmem:[#allocation5 + $0x8] sm:$0xff]  ;;  %v5120_v10 = vld [vmem:[#allocation5 + $0x60] sm:$0xff] }
  0x26   :  { %138 = vst.msk [vmem:[#allocation4 + $0x20] sm:$0xff] %vm132_vm2, %v8832_v0  ;;  %134 = vst.msk [vmem:[#allocation4 + $0x8] sm:$0xff] %vm132_vm2, %v8832_v0  ;;  %v86_v12 = vld [vmem:[#allocation5 + $0x20] sm:$0xff]  ;;  %v89_v17 = vld [vmem:[#allocation5 + $0x68] sm:$0xff]  ;;  %s5019_s0 = smov 3   ;;  %vm180_vm6 = vcmask 154648  }
  0x27   :  { %126 = vst.msk [vmem:[#allocation4 + $0x30] sm:$0x7] %vm123_vm1, %v8832_v0  ;;  %127 = vst.msk [vmem:[#allocation4 + $0x48] sm:$0x7] %vm123_vm1, %v8832_v0  ;;  %v74_v19 = vld [vmem:[#allocation5 + $0x18] sm:$0xff]  ;;  %v87_v27 = vld [vmem:[#allocation5 + $0x28] sm:$0xff] }
  0x28   :  { %128 = vst.msk [vmem:[#allocation4 + $0x13] sm:$0x7] %vm123_vm1, %v8832_v0  ;;  %129 = vst.msk [vmem:[#allocation4 + $0x2b] sm:$0x7] %vm123_vm1, %v8832_v0  ;;  %v101_v30 = vld [vmem:[#allocation5 + $0x70] sm:$0xff]  ;;  %v102_v32 = vld [vmem:[#allocation5 + $0x78] sm:$0xff] }
  0x29   :  { %130 = vst.msk [vmem:[#allocation4 + $0x43] sm:$0x7] %vm123_vm1, %v8832_v0  ;;  %131 = vst.msk [vmem:[#allocation4 + $0x5b] sm:$0x7] %vm123_vm1, %v8832_v0  ;;  %v99_v31 = vld [vmem:[#allocation5 + $0x30] sm:$0xff]  ;;  %v100_v40 = vld [vmem:[#allocation5 + $0x38] sm:$0xff] }
  0x2a   :  { %141 = vst.msk [vmem:[#allocation4 + $0x38] sm:$0xff] %vm132_vm2, %v8832_v0  ;;  %144 = vst.msk [vmem:[#allocation4 + $0x50] sm:$0xff] %vm132_vm2, %v8832_v0  ;;  %v54_v9 = vld [vmem:[#allocation2 + $0x10] sm:$0xff]  ;;  %v52_v11 = vld [vmem:[#allocation2] sm:$0xff]  ;;  %s4785_s27 = sld [smem:[#allocation9 + $0x1]]  ;;  %s4787_s28 = sld [smem:[#allocation9 + $0xf]] }
  0x2b   :  { %137 = vst.msk [vmem:[#allocation4 + $0x18] sm:$0xff] %vm132_vm2, %v8832_v0  ;;  %133 = vst.msk [vmem:[#allocation4] sm:$0xff] %vm132_vm2, %v8832_v0  ;;  %v55_v13 = vld [vmem:[#allocation2 + $0x18] sm:$0xff]  ;;  %v66_v14 = vadd.f32 %v62_v2, %v54_v9  ;;  %v64_v15 = vadd.f32 %v60_v4, %v52_v11  ;;  %v53_v18 = vld [vmem:[#allocation2 + $0x8] sm:$0xff]  ;;  %s4788_s29 = sld [smem:[#allocation9 + $0x16]]  ;;  %s5020_s30 = smov 127  }
  0x2c   :  { %152 = vst.msk [vmem:[#allocation4 + $0x20] sm:$0xff] %vm146_vm3, %v8832_v0  ;;  %148 = vst.msk [vmem:[#allocation4 + $0x8] sm:$0xff] %vm146_vm3, %v8832_v0  ;;  %v67_v16 = vadd.f32 %v63_v5, %v55_v13  ;;  %v65_v20 = vadd.f32 %v61_v8, %v53_v18  ;;  %s4789_s3 = sld [smem:[#allocation9 + $0x1d]]  ;;  %s4791_s4 = sld [smem:[#allocation9 + $0x2b]]  ;;  %vm697_vm7 = vcmask 1041408   ;;  %vm383_vm8 = vcmask 1042432  }
  0x2d   :  { %140 = vst.msk [vmem:[#allocation4 + $0x30] sm:$0xff] %vm132_vm2, %v8832_v0  ;;  %143 = vst.msk [vmem:[#allocation4 + $0x48] sm:$0xff] %vm132_vm2, %v8832_v0  ;;  %v79_v24 = vadd.f32 %v75_v3, %v66_v14  ;;  %v77_v25 = vadd.f32 %v73_v6, %v64_v15  ;;  %s4792_s5 = sld [smem:[#allocation9 + $0x2]]  ;;  %s4793_s6 = sld [smem:[#allocation9 + $0x9]]  ;;  %vm790_vm9 = vcmask 1045504   ;;  %vm428_vm10 = vcmask 1046528  }
  0x2e   :  { %155 = vst.msk [vmem:[#allocation4 + $0x38] sm:$0xff] %vm146_vm3, %v8832_v0  ;;  %158 = vst.msk [vmem:[#allocation4 + $0x50] sm:$0xff] %vm146_vm3, %v8832_v0  ;;  %v80_v26 = vadd.f32 %v76_v7, %v67_v16  ;;  %v78_v33 = vadd.f32 %v74_v19, %v65_v20  ;;  %s4795_s7 = sld [smem:[#allocation9 + $0x17]]  ;;  %s5021_s8 = smov 126   ;;  %vm1011_vm11 = vcmask 1040384   ;;  %vm1152_vm12 = vcmask 1044480  }
  0x2f   :  { %49 = vst.msk [vmem:[#allocation3 + $0x8] sm:$0xff] %vm43_vm0, %v5018_v1  ;;  %48 = vst.msk [vmem:[#allocation3] sm:$0xff] %vm43_vm0, %v5018_v1  ;;  %v92_v37 = vadd.f32 %v5120_v10, %v79_v24  ;;  %v90_v38 = vadd.f32 %v86_v12, %v77_v25  ;;  %s4796_s9 = sld [smem:[#allocation9 + $0x1e]]  ;;  %s4797_s10 = sld [smem:[#allocation9 + $0x25]]  ;;  %vm282_vm13 = vcmask 1043456   ;;  %vm4687_vm14 = vcmask 261120  }
  0x30   :  { %50 = vst.msk [vmem:[#allocation3 + $0x10] sm:$0xff] %vm43_vm0, %v5018_v1  ;;  %51 = vst.msk [vmem:[#allocation3 + $0x18] sm:$0xff] %vm43_vm0, %v5018_v1  ;;  %v93_v39 = vadd.f32 %v89_v17, %v80_v26  ;;  %v91_v41 = vadd.f32 %v87_v27, %v78_v33  ;;  %v5180_v24 = vstv %s4787_s28  ;;  %s4786_s11 = sld [smem:[#allocation9 + $0x8]]  ;;  %s4790_s12 = sld [smem:[#allocation9 + $0x24]]  ;;  %vm4690_vm15 = vcmask 392192  }
  0x31   :  { %151 = vst.msk [vmem:[#allocation4 + $0x18] sm:$0xff] %vm146_vm3, %v8832_v0  ;;  %147 = vst.msk [vmem:[#allocation4] sm:$0xff] %vm146_vm3, %v8832_v0  ;;  %v105_v44 = vadd.f32 %v101_v30, %v92_v37  ;;  %v103_v45 = vadd.f32 %v99_v31, %v90_v38  ;;  %s4794_s13 = sld [smem:[#allocation9 + $0x10]]  ;;  %s4798_s14 = sld [smem:[#allocation9 + $0x2c]]  ;;  %vm4693_vm1 = vcmask 523264   ;;  %vm4696_vm2 = vcmask 654336  }
  0x32   :  { %154 = vst.msk [vmem:[#allocation4 + $0x30] sm:$0xff] %vm146_vm3, %v8832_v0  ;;  %157 = vst.msk [vmem:[#allocation4 + $0x48] sm:$0xff] %vm146_vm3, %v8832_v0  ;;  %v106_v46 = vadd.f32 %v102_v32, %v93_v39  ;;  %v104_v48 = vadd.f32 %v100_v40, %v91_v41  ;;  %v5234_v39 = vstv %s4791_s4  ;;  %s4799_s15 = sld [smem:[#allocation9 + $0x3]]  ;;  %s4800_s16 = sld [smem:[#allocation9 + $0xa]]  ;;  %vm4699_vm3 = vcmask 785408  }
  0x33   :  { %139 = vst.msk [vmem:[#allocation4 + $0x28] sm:$0x3f] %vm135_vm4, %v8832_v0  ;;  %136 = vst.msk [vmem:[#allocation4 + $0x10] sm:$0x3f] %vm135_vm4, %v8832_v0  ;;  %s5022_s17 = smov 125   ;;  %s4801_s18 = sld [smem:[#allocation9 + $0x11]] }
  0x34   :  { %142 = vst.msk [vmem:[#allocation4 + $0x40] sm:$0x3f] %vm135_vm4, %v8832_v0  ;;  %145 = vst.msk [vmem:[#allocation4 + $0x58] sm:$0x3f] %vm135_vm4, %v8832_v0  ;;  %s4802_s19 = sld [smem:[#allocation9 + $0x18]]  ;;  %s4803_s20 = sld [smem:[#allocation9 + $0x1f]] }
  0x35   :  { %153 = vst.msk [vmem:[#allocation4 + $0x28] sm:$0x3f] %vm149_vm5, %v8832_v0  ;;  %150 = vst.msk [vmem:[#allocation4 + $0x10] sm:$0x3f] %vm149_vm5, %v8832_v0  ;;  %s4804_s21 = sld [smem:[#allocation9 + $0x26]]  ;;  %s4805_s1 = sld [smem:[#allocation9 + $0x2d]] }
  0x36   :  { %v57_v21 = vld [vmem:[#allocation3 + $0x8] sm:$0xff]  ;;  %v56_v22 = vld [vmem:[#allocation3] sm:$0xff]  ;;  %156 = vst.msk [vmem:[#allocation4 + $0x40] sm:$0x3f] %vm149_vm5, %v8832_v0  ;;  %159 = vst.msk [vmem:[#allocation4 + $0x58] sm:$0x3f] %vm149_vm5, %v8832_v0 }
  0x37   :  { %v59_v23 = vld [vmem:[#allocation3 + $0x18] sm:$0xff]  ;;  %v69_v28 = vmax.f32 %v57_v21, %v61_v8  ;;  %v58_v29 = vld [vmem:[#allocation3 + $0x10] sm:$0xff]  ;;  %v68_v34 = vmax.f32 %v56_v22, %v60_v4  ;;  %114 = vst.msk [vmem:[#allocation2 + $0x10] sm:$0xff] %vm43_vm0, %v105_v44  ;;  %112 = vst.msk [vmem:[#allocation2] sm:$0xff] %vm43_vm0, %v103_v45  ;;  %v688_v44 = vstv %s4792_s5  ;;  %s4806_s22 = sld [smem:[#allocation9 + $0x4]]  ;;  %s4807_s23 = sld [smem:[#allocation9 + $0xb]] }
  0x38   :  { %v71_v35 = vmax.f32 %v59_v23, %v63_v5  ;;  %v70_v36 = vmax.f32 %v58_v29, %v62_v2  ;;  %115 = vst.msk [vmem:[#allocation2 + $0x18] sm:$0xff] %vm43_vm0, %v106_v46  ;;  %113 = vst.msk [vmem:[#allocation2 + $0x8] sm:$0xff] %vm43_vm0, %v104_v48  ;;  %v5198_v29 = vstv %s4788_s29  ;;  %s5023_s24 = smov 124   ;;  %s4808_s25 = sld [smem:[#allocation9 + $0x12]]  ;;  %vm4702_vm4 = vcmask 916480  }
  0x39   :  { %v82_v42 = vmax.f32 %v69_v28, %v74_v19  ;;  %v81_v43 = vmax.f32 %v68_v34, %v73_v6  ;;  %v5216_v34 = vstv %s4789_s3  ;;  %s4809_s26 = sld [smem:[#allocation9 + $0x19]]  ;;  %s4812_s28 = sld [smem:[#allocation9 + $0x2e]] }
  0x3a   :  { %v84_v47 = vmax.f32 %v71_v35, %v76_v7  ;;  %v83_v51 = vmax.f32 %v70_v36, %v75_v3  ;;  %v374_v7 = vstv %s4785_s27  ;;  %s4811_s27 = sld [smem:[#allocation9 + $0x27]]  ;;  %s4813_s29 = sld [smem:[#allocation9 + $0x5]] }
  0x3b   :  { %v95_v49 = vmax.f32 %v82_v42, %v87_v27  ;;  %v94_v50 = vmax.f32 %v81_v43, %v86_v12  ;;  %s4814_s3 = sld [smem:[#allocation9 + $0xc]]  ;;  %s5024_s4 = smov 123  }
  0x3c   :  { %v97_v52 = vmax.f32 %v84_v47, %v89_v17  ;;  %v96_v55 = vmax.f32 %v83_v51, %v5120_v10  ;;  %s4815_s5 = sld [smem:[#allocation9 + $0x13]] }
  0x3d   :  { %v108_v53 = vmax.f32 %v95_v49, %v100_v40  ;;  %v107_v54 = vmax.f32 %v94_v50, %v99_v31 }
  0x3e   :  { %v110_v56 = vmax.f32 %v97_v52, %v102_v32  ;;  %v109_v57 = vmax.f32 %v96_v55, %v101_v30  ;;  %v162_v58 = vld [vmem:[#allocation2 + $0x10] sm:$0xff]  ;;  %v160_v59 = vld [vmem:[#allocation2] sm:$0xff] }
  0x3f   :  { %117 = vst.msk [vmem:[#allocation3 + $0x8] sm:$0xff] %vm43_vm0, %v108_v53  ;;  %116 = vst.msk [vmem:[#allocation3] sm:$0xff] %vm43_vm0, %v107_v54  ;;  %172 = vrot.lane.b32.xlu1 %v162_v58, %s5019_s0  ;;  %168 = vrot.lane.b32.xlu0 %v160_v59, %s5019_s0  ;;  %v163_v60 = vld [vmem:[#allocation2 + $0x18] sm:$0xff]  ;;  %v161_v61 = vld [vmem:[#allocation2 + $0x8] sm:$0xff]  ;;  %v5254_v54 = vstv %s4793_s6  ;;  %s4816_s6 = sld [smem:[#allocation9 + $0x1a]] }
  0x40   :  { %119 = vst.msk [vmem:[#allocation3 + $0x18] sm:$0xff] %vm43_vm0, %v110_v56  ;;  %118 = vst.msk [vmem:[#allocation3 + $0x10] sm:$0xff] %vm43_vm0, %v109_v57 }
  0x43   :  { %174 = vrot.lane.b32.xlu1 %v163_v60, %s5019_s0  ;;  %170 = vrot.lane.b32.xlu0 %v161_v61, %s5019_s0 }
  0x46   :  { %v186_v62 = vld [vmem:[#allocation3 + $0x8] sm:$0xff]  ;;  %v185_v63 = vld [vmem:[#allocation3] sm:$0xff] }
  0x47   :  { %195 = vrot.lane.b32.xlu1 %v186_v62, %s5019_s0  ;;  %193 = vrot.lane.b32.xlu0 %v185_v63, %s5019_s0  ;;  %v188_v1 = vld [vmem:[#allocation3 + $0x18] sm:$0xff]  ;;  %v187_v2 = vld [vmem:[#allocation3 + $0x10] sm:$0xff] }
  0x4b   :  { %199 = vrot.lane.b32.xlu1 %v188_v1, %s5019_s0  ;;  %197 = vrot.lane.b32.xlu0 %v187_v2, %s5019_s0  ;;  %v5283_v1 = vstv %s4795_s7  ;;  %s4810_s0 = sld [smem:[#allocation9 + $0x20]]  ;;  %s4817_s7 = sld [smem:[#allocation9 + $0x21]] }
  0xb1   :  { %v173_v3 = vpop.permute.xlu1 %172  ;;  %v169_v4 = vpop.permute.xlu0 %168 }
  0xb2   :  { %183 = vst.msk [vmem:[#allocation4 + $0x1b] sm:$0xff] %vm180_vm6, %v173_v3  ;;  %181 = vst.msk [vmem:[#allocation4 + $0x3] sm:$0xff] %vm180_vm6, %v169_v4 }
  0xb5   :  { %v175_v5 = vpop.permute.xlu1 %174  ;;  %v171_v6 = vpop.permute.xlu0 %170 }
  0xb6   :  { %184 = vst.msk [vmem:[#allocation4 + $0x23] sm:$0xff] %vm180_vm6, %v175_v5  ;;  %182 = vst.msk [vmem:[#allocation4 + $0xb] sm:$0xff] %vm180_vm6, %v171_v6 }
  0xb9   :  { %v5144_v8 = vld [vmem:[#allocation4 + $0x18] sm:$0xff]  ;;  %v5146_v9 = vld [vmem:[#allocation4] sm:$0xff]  ;;  %v196_v10 = vpop.permute.xlu1 %195  ;;  %v194_v11 = vpop.permute.xlu0 %193 }
  0xba   :  { %v5149_v12 = vmul.f32 %v374_v7, %v5144_v8  ;;  %v5152_v13 = vmul.f32 %v374_v7, %v5146_v9  ;;  %207 = vst.msk [vmem:[#allocation4 + $0x3b] sm:$0xff] %vm180_vm6, %v196_v10  ;;  %206 = vst.msk [vmem:[#allocation4 + $0x33] sm:$0xff] %vm180_vm6, %v194_v11  ;;  %v691_v45 = vmul.f32 %v688_v44, %v5144_v8 }
  0xbb   :  { %v689_v48 = vmul.f32 %v688_v44, %v5146_v9  ;;  %v733_v57 = vmul.f32 %v5254_v54, %v5144_v8  ;;  %v730_v58 = vmul.f32 %v5254_v54, %v5146_v9 }
  0xbc   :  { %v387_v14 = vrot.slane %v5149_v12, 5  ;;  %v384_v15 = vrot.slane %v5152_v13, 5  ;;  %v701_v51 = vrot.slane %v691_v45, 6 }
  0xbd   :  { %v5158_v16 = vld [vmem:[#allocation4 + $0x20] sm:$0xff]  ;;  %v5160_v17 = vld [vmem:[#allocation4 + $0x28] sm:$0x3f]  ;;  %v200_v19 = vpop.permute.xlu1 %199  ;;  %v198_v20 = vpop.permute.xlu0 %197  ;;  %v5164_v21 = vld [vmem:[#allocation4 + $0x10] sm:$0x3f]  ;;  %v698_v52 = vrot.slane %v689_v48, 6 }
  0xbe   :  { %v5162_v18 = vld [vmem:[#allocation4 + $0x8] sm:$0xff]  ;;  %396 = vrot.lane.b32.xlu1 %v387_v14, %s5020_s30  ;;  %390 = vrot.lane.b32.xlu0 %v384_v15, %s5020_s30  ;;  %v5173_v22 = vmul.f32 %v374_v7, %v5158_v16  ;;  %209 = vst.msk [vmem:[#allocation4 + $0x53] sm:$0xff] %vm180_vm6, %v200_v19  ;;  %208 = vst.msk [vmem:[#allocation4 + $0x4b] sm:$0xff] %vm180_vm6, %v198_v20  ;;  %v5186_v27 = vmul.f32 %v5180_v24, %v5160_v17  ;;  %v747_v4 = vrot.slane %v733_v57, 6 }
  0xbf   :  { %v5176_v23 = vmul.f32 %v374_v7, %v5162_v18  ;;  %v5190_v28 = vmul.f32 %v5180_v24, %v5164_v21  ;;  %v5204_v32 = vmul.f32 %v5198_v29, %v5160_v17  ;;  %v5208_v33 = vmul.f32 %v5198_v29, %v5164_v21 }
  0xc0   :  { %v388_v25 = vrot.slane %v5173_v22, 5  ;;  %v477_v30 = vrot.slane %v5186_v27, 1  ;;  %v5222_v37 = vmul.f32 %v5216_v34, %v5160_v17  ;;  %v5226_v38 = vmul.f32 %v5216_v34, %v5164_v21 }
  0xc1   :  { %v385_v26 = vrot.slane %v5176_v23, 5  ;;  %v472_v31 = vrot.slane %v5190_v28, 1  ;;  %v525_v35 = vrot.slane %v5204_v32, 1  ;;  %v520_v36 = vrot.slane %v5208_v33, 1 }
  0xc2   :  { %400 = vrot.lane.b32.xlu1 %v388_v25, %s5020_s30  ;;  %v573_v40 = vrot.slane %v5222_v37, 1  ;;  %v568_v41 = vrot.slane %v5226_v38, 1  ;;  %v646_v42 = vmul.f32 %v5234_v39, %v5160_v17  ;;  %v643_v43 = vmul.f32 %v5234_v39, %v5164_v21 }
  0xc3   :  { %394 = vrot.lane.b32.xlu0 %v385_v26, %s5020_s30  ;;  %v690_v49 = vmul.f32 %v688_v44, %v5162_v18  ;;  %v692_v50 = vmul.f32 %v688_v44, %v5158_v16  ;;  %v5260_v56 = vmul.f32 %v5234_v39, %v5162_v18  ;;  %v5269_v60 = vmul.f32 %v5234_v39, %v5158_v16 }
  0xc4   :  { %v661_v46 = vrot.slane %v646_v42, 5  ;;  %v656_v47 = vrot.slane %v643_v43, 5  ;;  %v5279_v63 = vmul.f32 %v5254_v54, %v5162_v18  ;;  %v742_v5 = vrot.slane %v730_v58, 6 }
  0xc5   :  { %v699_v53 = vrot.slane %v690_v49, 6  ;;  %v702_v55 = vrot.slane %v692_v50, 6  ;;  %v8838_v59 = vrot.slane %v5260_v56, 5  ;;  %v8837_v3 = vrot.slane %v5269_v60, 5 }
  0xc6   :  { %489 = vrot.lane.b32.xlu1 %v477_v30, %s5020_s30  ;;  %v8836_v6 = vrot.slane %v5279_v63, 6  ;;  %v5294_v7 = vmul.f32 %v5254_v54, %v5158_v16  ;;  %v824_v10 = vmul.f32 %v5283_v1, %v5160_v17  ;;  %v821_v11 = vmul.f32 %v5283_v1, %v5164_v21 }
  0xc7   :  { %483 = vrot.lane.b32.xlu0 %v472_v31, %s5020_s30  ;;  %v5272_v61 = vsel %vm697_vm7, %v698_v52, %v699_v53  ;;  %v5275_v62 = vsel %vm697_vm7, %v701_v51, %v702_v55  ;;  %v5288_v2 = vsel %vm383_vm8, %v8838_v59, %v656_v47  ;;  %v5303_v19 = vsel %vm383_vm8, %v8837_v3, %v661_v46 }
  0xc8   :  { %v5308_v20 = vsel %vm697_vm7, %v742_v5, %v8836_v6  ;;  %v8835_v42 = vrot.slane %v5294_v7, 6  ;;  %v5313_v43 = vstv %s4796_s9  ;;  %v839_v45 = vrot.slane %v824_v10, 2  ;;  %s4818_s9 = sld [smem:[#allocation9 + $0x28]] }
  0xc9   :  { %v869_v48 = vmul.f32 %v5313_v43, %v5164_v21  ;;  %v5326_v49 = vmul.f32 %v5283_v1, %v5162_v18  ;;  %v5330_v50 = vstv %s4797_s10  ;;  %v5337_v58 = vmul.f32 %v5283_v1, %v5158_v16  ;;  %s4819_s10 = sld [smem:[#allocation9 + $0x2f]] }
  0xca   :  { %537 = vrot.lane.b32.xlu1 %v525_v35, %s5020_s30  ;;  %v5318_v44 = vsel %vm697_vm7, %v747_v4, %v8835_v42  ;;  %v917_v57 = vmul.f32 %v5330_v50, %v5164_v21  ;;  %v386_v0 = vsel %vm383_vm8, %v384_v15, %v385_v26  ;;  %v5370_v13 = vmul.f32 %v5313_v43, %v5158_v16 }
  0xcb   :  { %531 = vrot.lane.b32.xlu0 %v520_v36, %s5020_s30  ;;  %v389_v26 = vsel %vm383_vm8, %v387_v14, %v388_v25  ;;  %v509_v28 = vmul.f32 %v5198_v29, %v5158_v16  ;;  %v556_v27 = vmul.f32 %v5216_v34, %v5144_v8  ;;  %v553_v33 = vmul.f32 %v5216_v34, %v5146_v9 }
  0xcc   :  { %v644_v37 = vmul.f32 %v5234_v39, %v5144_v8 }
  0xce   :  { %585 = vrot.lane.b32.xlu1 %v573_v40, %s5020_s30 }
  0xcf   :  { %579 = vrot.lane.b32.xlu0 %v568_v41, %s5020_s30 }
  0xd2   :  { %673 = vrot.lane.b32.xlu1 %v661_v46, %s5020_s30  ;;  %v834_v46 = vrot.slane %v821_v11, 2  ;;  %v8839_v11 = vrot.slane %v5337_v58, 2 }
  0xd3   :  { %667 = vrot.lane.b32.xlu0 %v656_v47, %s5020_s30  ;;  %v872_v47 = vmul.f32 %v5313_v43, %v5160_v17 }
  0xd6   :  { %710 = vrot.lane.b32.xlu1 %v701_v51, %s5021_s8  ;;  %v415_v51 = vstv %s4786_s11  ;;  %s4820_s11 = sld [smem:[#allocation9 + $0x6]] }
  0xd7   :  { %704 = vrot.lane.b32.xlu0 %v698_v52, %s5021_s8  ;;  %v8834_v52 = vrot.slane %v5326_v49, 2  ;;  %v421_v3 = vmul.f32 %v415_v51, %v5160_v17  ;;  %v416_v15 = vmul.f32 %v415_v51, %v5146_v9 }
  0xd9   :  { %v5344_v10 = vsel %vm790_vm9, %v8834_v52, %v834_v46  ;;  %v5362_v52 = vsel %vm790_vm9, %v8839_v11, %v839_v45  ;;  %v437_v11 = vrot.slane %v421_v3, 1  ;;  %v429_v22 = vrot.slane %v416_v15, 1 }
  0xda   :  { %714 = vrot.lane.b32.xlu1 %v702_v55, %s5021_s8  ;;  %v882_v55 = vrot.slane %v869_v48, 2  ;;  %v930_v48 = vrot.slane %v917_v57, 2  ;;  %v5387_v57 = vmul.f32 %v5330_v50, %v5162_v18  ;;  %v457_v15 = vmul.f32 %v5180_v24, %v5146_v9 }
  0xdb   :  { %708 = vrot.lane.b32.xlu0 %v699_v53, %s5021_s8  ;;  %v887_v53 = vrot.slane %v872_v47, 2  ;;  %v5351_v47 = vmul.f32 %v5313_v43, %v5162_v18 }
  0xdc   :  { %v928_v14 = vrot.slane %v5387_v57, 2 }
  0xdd   :  { %v880_v59 = vrot.slane %v5351_v47, 2 }
  0xde   :  { %758 = vrot.lane.b32.xlu1 %v747_v4, %s5021_s8  ;;  %v417_v4 = vmul.f32 %v415_v51, %v5162_v18  ;;  %v5405_v3 = vsel %vm790_vm9, %v928_v14, %v930_v48 }
  0xdf   :  { %752 = vrot.lane.b32.xlu0 %v742_v5, %s5021_s8  ;;  %v418_v5 = vmul.f32 %v415_v51, %v5164_v21  ;;  %v5376_v23 = vsel %vm790_vm9, %v880_v59, %v882_v55 }
  0xe0   :  { %v430_v42 = vrot.slane %v417_v4, 1 }
  0xe1   :  { %v432_v6 = vrot.slane %v418_v5, 1 }
  0xe2   :  { %851 = vrot.lane.b32.xlu1 %v839_v45, %s5021_s8  ;;  %v885_v45 = vrot.slane %v5370_v13, 2 }
  0xe3   :  { %845 = vrot.lane.b32.xlu0 %v834_v46, %s5021_s8  ;;  %v420_v46 = vmul.f32 %v415_v51, %v5158_v16  ;;  %v433_v4 = vsel %vm428_vm10, %v430_v42, %v432_v6  ;;  %v460_v6 = vmul.f32 %v5180_v24, %v5144_v8 }
  0xe4   :  { %v5397_v12 = vsel %vm790_vm9, %v885_v45, %v887_v53 }
  0xe5   :  { %v435_v5 = vrot.slane %v420_v46, 1 }
  0xe6   :  { %899 = vrot.lane.b32.xlu1 %v887_v53, %s5021_s8  ;;  %v461_v53 = vmul.f32 %v5180_v24, %v5158_v16 }
  0xe7   :  { %893 = vrot.lane.b32.xlu0 %v882_v55, %s5021_s8  ;;  %v458_v55 = vmul.f32 %v5180_v24, %v5162_v18  ;;  %v438_v46 = vsel %vm428_vm10, %v435_v5, %v437_v11  ;;  %v506_v11 = vmul.f32 %v5198_v29, %v5162_v18 }
  0xea   :  { %392 = vrot.lane.b32.xlu1 %v386_v0, %s5020_s30  ;;  %v419_v0 = vmul.f32 %v415_v51, %v5144_v8  ;;  %v431_v51 = vsel %vm428_vm10, %v429_v22, %v430_v42 }
  0xeb   :  { %941 = vrot.lane.b32.xlu0 %v930_v48, %s5021_s8  ;;  %v475_v48 = vrot.slane %v461_v53, 1  ;;  %v523_v53 = vrot.slane %v509_v28, 1 }
  0xec   :  { %v434_v25 = vrot.slane %v419_v0, 1  ;;  %v474_v0 = vrot.slane %v460_v6, 1  ;;  %v518_v6 = vrot.slane %v506_v11, 1 }
  0xee   :  { %441 = vrot.lane.b32.xlu1 %v433_v4, %s5020_s30  ;;  %v436_v4 = vsel %vm428_vm10, %v434_v25, %v435_v5  ;;  %v476_v24 = vsel %vm428_vm10, %v474_v0, %v475_v48  ;;  %v508_v5 = vmul.f32 %v5198_v29, %v5144_v8  ;;  %v554_v25 = vmul.f32 %v5216_v34, %v5162_v18 }
  0xef   :  { %398 = vrot.lane.b32.xlu0 %v389_v26, %s5020_s30  ;;  %v470_v26 = vrot.slane %v458_v55, 1  ;;  %v469_v55 = vrot.slane %v457_v15, 1 }
  0xf1   :  { %v473_v42 = vsel %vm428_vm10, %v470_v26, %v472_v31  ;;  %v471_v22 = vsel %vm428_vm10, %v469_v55, %v470_v26  ;;  %v505_v31 = vmul.f32 %v5198_v29, %v5146_v9  ;;  %v522_v26 = vrot.slane %v508_v5, 1 }
  0xf2   :  { %445 = vrot.lane.b32.xlu1 %v438_v46, %s5020_s30  ;;  %v521_v46 = vsel %vm428_vm10, %v518_v6, %v520_v36  ;;  %v566_v29 = vrot.slane %v554_v25, 1  ;;  %v600_v36 = vstv %s4790_s12  ;;  %v570_v55 = vrot.slane %v556_v27, 1  ;;  %s4821_s12 = sld [smem:[#allocation9 + $0xd]] }
  0xf3   :  { %439 = vrot.lane.b32.xlu0 %v431_v51, %s5020_s30  ;;  %v478_v51 = vsel %vm428_vm10, %v475_v48, %v477_v30  ;;  %v517_v15 = vrot.slane %v505_v31, 1  ;;  %v557_v30 = vmul.f32 %v5216_v34, %v5158_v16  ;;  %v602_v48 = vmul.f32 %v600_v36, %v5162_v18 }
  0xf4   :  { %v569_v11 = vsel %vm428_vm10, %v566_v29, %v568_v41  ;;  %v565_v34 = vrot.slane %v553_v33, 1  ;;  %v605_v32 = vmul.f32 %v600_v36, %v5158_v16  ;;  %v606_v38 = vmul.f32 %v600_v36, %v5160_v17 }
  0xf5   :  { %v519_v0 = vsel %vm428_vm10, %v517_v15, %v518_v6  ;;  %v614_v6 = vrot.slane %v602_v48, 5  ;;  %v601_v41 = vmul.f32 %v600_v36, %v5146_v9  ;;  %v658_v27 = vrot.slane %v644_v37, 5 }
  0xf6   :  { %481 = vrot.lane.b32.xlu1 %v473_v42, %s5020_s30  ;;  %v526_v42 = vsel %vm428_vm10, %v523_v53, %v525_v35  ;;  %v567_v35 = vsel %vm428_vm10, %v565_v34, %v566_v29  ;;  %v8862_v33 = vrot.slane %v5260_v56, 5  ;;  %v777_v56 = vstv %s4794_s13  ;;  %s5025_s13 = smov 122  }
  0xf7   :  { %443 = vrot.lane.b32.xlu0 %v436_v4, %s5020_s30  ;;  %v524_v4 = vsel %vm428_vm10, %v522_v26, %v523_v53  ;;  %v604_v26 = vmul.f32 %v600_v36, %v5144_v8  ;;  %v613_v53 = vrot.slane %v601_v41, 5  ;;  %v8866_v37 = vrot.slane %v5326_v49, 2 }
  0xf9   :  { %v615_v15 = vsel %vm383_vm8, %v613_v53, %v614_v6 }
  0xfa   :  { %485 = vrot.lane.b32.xlu1 %v476_v24, %s5020_s30  ;;  %v603_v24 = vmul.f32 %v600_v36, %v5164_v21 }
  0xfb   :  { %479 = vrot.lane.b32.xlu0 %v471_v22, %s5020_s30  ;;  %v571_v22 = vrot.slane %v557_v30, 1 }
  0xfc   :  { %v616_v28 = vrot.slane %v603_v24, 5 }
  0xfd   :  { %v572_v5 = vsel %vm428_vm10, %v570_v55, %v571_v22  ;;  %v574_v31 = vsel %vm428_vm10, %v571_v22, %v573_v40  ;;  %v641_v40 = vmul.f32 %v5234_v39, %v5146_v9  ;;  %v732_v39 = vmul.f32 %v5254_v54, %v5164_v21 }
  0xfe   :  { %529 = vrot.lane.b32.xlu1 %v521_v46, %s5020_s30  ;;  %v617_v25 = vsel %vm383_vm8, %v614_v6, %v616_v28  ;;  %v621_v46 = vrot.slane %v606_v38, 5  ;;  %v780_v22 = vmul.f32 %v777_v56, %v5164_v21  ;;  %v781_v28 = vmul.f32 %v777_v56, %v5144_v8 }
  0xff   :  { %487 = vrot.lane.b32.xlu0 %v478_v51, %s5020_s30  ;;  %v619_v51 = vrot.slane %v605_v32, 5  ;;  %v653_v30 = vrot.slane %v641_v40, 5  ;;  %v782_v32 = vmul.f32 %v777_v56, %v5158_v16  ;;  %v8867_v40 = vrot.slane %v5337_v58, 2 }
 0x100   :  { %v794_v6 = vrot.slane %v780_v22, 2 }
 0x101   :  { %v622_v29 = vsel %vm383_vm8, %v619_v51, %v621_v46  ;;  %v655_v36 = vsel %vm383_vm8, %v653_v30, %v8862_v33 }
 0x102   :  { %533 = vrot.lane.b32.xlu1 %v524_v4, %s5020_s30 }
 0x103   :  { %527 = vrot.lane.b32.xlu0 %v519_v0, %s5020_s30  ;;  %v618_v0 = vrot.slane %v604_v26, 5 }
 0x105   :  { %v620_v4 = vsel %vm383_vm8, %v618_v0, %v619_v51  ;;  %v819_v51 = vmul.f32 %v5283_v1, %v5146_v9 }
 0x106   :  { %577 = vrot.lane.b32.xlu1 %v569_v11, %s5020_s30  ;;  %v779_v11 = vmul.f32 %v777_v56, %v5162_v18 }
 0x107   :  { %535 = vrot.lane.b32.xlu0 %v526_v42, %s5020_s30  ;;  %v8863_v42 = vrot.slane %v5269_v60, 5  ;;  %v745_v60 = vrot.slane %v732_v39, 6  ;;  %v915_v39 = vmul.f32 %v5330_v50, %v5146_v9 }
 0x108   :  { %v792_v24 = vrot.slane %v779_v11, 2 }
 0x109   :  { %v660_v48 = vsel %vm383_vm8, %v658_v27, %v8863_v42  ;;  %v870_v27 = vmul.f32 %v5313_v43, %v5144_v8 }
 0x10a   :  { %581 = vrot.lane.b32.xlu1 %v572_v5, %s5020_s30 }
 0x10b   :  { %575 = vrot.lane.b32.xlu0 %v567_v35, %s5020_s30  ;;  %v783_v35 = vmul.f32 %v777_v56, %v5160_v17  ;;  %v884_v49 = vrot.slane %v870_v27, 2 }
 0x10d   :  { %v799_v5 = vrot.slane %v783_v35, 2 }
 0x10e   :  { %625 = vrot.lane.b32.xlu1 %v617_v25, %s5020_s30  ;;  %v822_v25 = vmul.f32 %v5283_v1, %v5144_v8 }
 0x10f   :  { %583 = vrot.lane.b32.xlu0 %v574_v31, %s5020_s30  ;;  %v796_v31 = vrot.slane %v781_v28, 2 }
 0x110   :  { %v836_v53 = vrot.slane %v822_v25, 2 }
 0x112   :  { %629 = vrot.lane.b32.xlu1 %v622_v29, %s5020_s30 }
 0x113   :  { %623 = vrot.lane.b32.xlu0 %v615_v15, %s5020_s30  ;;  %v831_v15 = vrot.slane %v819_v51, 2 }
 0x115   :  { %v833_v1 = vsel %vm790_vm9, %v831_v15, %v8866_v37 }
 0x116   :  { %665 = vrot.lane.b32.xlu1 %v5288_v2, %s5020_s30  ;;  %v735_v2 = vmul.f32 %v5254_v54, %v5160_v17  ;;  %v8864_v54 = vrot.slane %v5279_v63, 6  ;;  %v795_v63 = vsel %vm790_vm9, %v792_v24, %v794_v6 }
 0x117   :  { %627 = vrot.lane.b32.xlu0 %v620_v4, %s5020_s30  ;;  %v838_v4 = vsel %vm790_vm9, %v836_v53, %v8867_v40 }
 0x118   :  { %v750_v55 = vrot.slane %v735_v2, 6 }
 0x11a   :  { %669 = vrot.lane.b32.xlu1 %v660_v48, %s5020_s30  ;;  %v886_v48 = vsel %vm790_vm9, %v884_v49, %v885_v45  ;;  %v920_v45 = vmul.f32 %v5330_v50, %v5160_v17 }
 0x11b   :  { %663 = vrot.lane.b32.xlu0 %v655_v36, %s5020_s30 }
 0x11e   :  { %706 = vrot.lane.b32.xlu1 %v5272_v61, %s5021_s8  ;;  %v8865_v61 = vrot.slane %v5294_v7, 6 }
 0x11f   :  { %671 = vrot.lane.b32.xlu0 %v5303_v19, %s5020_s30  ;;  %v746_v19 = vsel %vm697_vm7, %v8864_v54, %v745_v60  ;;  %v962_v60 = vstv %s4798_s14  ;;  %s4822_s14 = sld [smem:[#allocation9 + $0x14]] }
 0x120   :  { %v751_v34 = vsel %vm697_vm7, %v8865_v61, %v750_v55  ;;  %v964_v22 = vmul.f32 %v962_v60, %v5162_v18  ;;  %v966_v57 = vmul.f32 %v962_v60, %v5144_v8  ;;  %v968_v35 = vmul.f32 %v962_v60, %v5160_v17 }
 0x122   :  { %754 = vrot.lane.b32.xlu1 %v5308_v20, %s5021_s8  ;;  %v797_v20 = vrot.slane %v782_v32, 2  ;;  %v967_v32 = vmul.f32 %v962_v60, %v5158_v16  ;;  %v980_v28 = vrot.slane %v966_v57, 6  ;;  %v983_v25 = vrot.slane %v968_v35, 6 }
 0x123   :  { %712 = vrot.lane.b32.xlu0 %v5275_v62, %s5021_s8  ;;  %v778_v62 = vmul.f32 %v777_v56, %v5146_v9  ;;  %v927_v56 = vrot.slane %v915_v39, 2 }
 0x124   :  { %v800_v41 = vsel %vm790_vm9, %v797_v20, %v799_v5  ;;  %v798_v26 = vsel %vm790_vm9, %v796_v31, %v797_v20  ;;  %v981_v31 = vrot.slane %v967_v32, 6 }
 0x125   :  { %v791_v7 = vrot.slane %v778_v62, 2  ;;  %v929_v54 = vsel %vm790_vm9, %v927_v56, %v928_v14 }
 0x126   :  { %762 = vrot.lane.b32.xlu1 %v751_v34, %s5021_s8  ;;  %v976_v34 = vrot.slane %v964_v22, 6  ;;  %v982_v15 = vsel %vm697_vm7, %v980_v28, %v981_v31  ;;  %v984_v37 = vsel %vm697_vm7, %v981_v31, %v983_v25 }
 0x127   :  { %756 = vrot.lane.b32.xlu0 %v746_v19, %s5021_s8  ;;  %v793_v38 = vsel %vm790_vm9, %v791_v7, %v792_v24  ;;  %v935_v19 = vrot.slane %v920_v45, 2 }
 0x12a   :  { %803 = vrot.lane.b32.xlu1 %v795_v63, %s5021_s8  ;;  %v1002_v63 = vstv %s4799_s15  ;;  %s4823_s15 = sld [smem:[#allocation9 + $0x1b]] }
 0x12b   :  { %760 = vrot.lane.b32.xlu0 %v5318_v44, %s5021_s8  ;;  %v1004_v7 = vmul.f32 %v1002_v63, %v5162_v18  ;;  %v1003_v51 = vmul.f32 %v1002_v63, %v5146_v9 }
 0x12d   :  { %v1012_v40 = vrot.slane %v1003_v51, 7 }
 0x12e   :  { %807 = vrot.lane.b32.xlu1 %v800_v41, %s5021_s8 }
 0x12f   :  { %801 = vrot.lane.b32.xlu0 %v793_v38, %s5021_s8 }
 0x130   :  { %v5535_v46 = vpop.permute.xlu1 %396  ;;  %v5537_v44 = vpop.permute.xlu0 %390 }
 0x132   :  { %843 = vrot.lane.b32.xlu1 %v5344_v10, %s5021_s8  ;;  %v867_v10 = vmul.f32 %v5313_v43, %v5146_v9 }
 0x133   :  { %805 = vrot.lane.b32.xlu0 %v798_v26, %s5021_s8 }
 0x134   :  { %v5543_v29 = vpop.permute.xlu1 %400  ;;  %v879_v58 = vrot.slane %v867_v10, 2  ;;  %v1005_v10 = vmul.f32 %v1002_v63, %v5144_v8 }
 0x135   :  { %v5545_v0 = vpop.permute.xlu0 %394 }
 0x136   :  { %847 = vrot.lane.b32.xlu1 %v838_v4, %s5021_s8  ;;  %v881_v43 = vsel %vm790_vm9, %v879_v58, %v880_v59  ;;  %v1006_v58 = vmul.f32 %v1002_v63, %v5158_v16  ;;  %v1091_v63 = vstv %s4801_s18  ;;  %s4825_s18 = sld [smem:[#allocation9 + $0x29]] }
 0x137   :  { %841 = vrot.lane.b32.xlu0 %v833_v1, %s5021_s8  ;;  %v1013_v1 = vrot.slane %v1004_v7, 7  ;;  %v1092_v31 = vmul.f32 %v1091_v63, %v5146_v9 }
 0x138   :  { %v5559_v30 = vpop.permute.xlu1 %489  ;;  %v1016_v39 = vrot.slane %v1006_v58, 7 }
 0x139   :  { %v5561_v33 = vpop.permute.xlu0 %483  ;;  %v1014_v49 = vsel %vm1011_vm11, %v1012_v40, %v1013_v1 }
 0x13a   :  { %891 = vrot.lane.b32.xlu1 %v5376_v23, %s5021_s8  ;;  %v919_v23 = vmul.f32 %v5330_v50, %v5158_v16 }
 0x13b   :  { %849 = vrot.lane.b32.xlu0 %v5362_v52, %s5021_s8  ;;  %v918_v52 = vmul.f32 %v5330_v50, %v5144_v8 }
 0x13c   :  { %v5567_v36 = vpop.permute.xlu1 %537  ;;  %v933_v2 = vrot.slane %v919_v23, 2  ;;  %v1043_v23 = vstv %s4800_s16  ;;  %s4824_s16 = sld [smem:[#allocation9 + $0x22]] }
 0x13d   :  { %v5569_v42 = vpop.permute.xlu0 %531  ;;  %v932_v13 = vrot.slane %v918_v52, 2  ;;  %v1015_v52 = vrot.slane %v1005_v10, 7  ;;  %v1104_v10 = vrot.slane %v1092_v31, 7 }
 0x13e   :  { %895 = vrot.lane.b32.xlu1 %v886_v48, %s5021_s8  ;;  %v936_v14 = vsel %vm790_vm9, %v933_v2, %v935_v19 }
 0x13f   :  { %889 = vrot.lane.b32.xlu0 %v881_v43, %s5021_s8  ;;  %v934_v50 = vsel %vm790_vm9, %v932_v13, %v933_v2  ;;  %v1045_v13 = vmul.f32 %v1043_v23, %v5162_v18  ;;  %v1044_v2 = vmul.f32 %v1043_v23, %v5146_v9 }
 0x140   :  { %v5585_v47 = vpop.permute.xlu1 %585 }
 0x141   :  { %v5587_v59 = vpop.permute.xlu0 %579  ;;  %v1057_v22 = vrot.slane %v1045_v13, 7  ;;  %v1096_v13 = vmul.f32 %v1091_v63, %v5158_v16 }
 0x142   :  { %8868 = vst [vmem:[#allocation14_spill] sm:$0xff] %v5587_v59  ;;  %939 = vrot.lane.b32.xlu1 %v5405_v3, %s5021_s8  ;;  %v963_v3 = vmul.f32 %v962_v60, %v5146_v9 }
 0x143   :  { %897 = vrot.lane.b32.xlu0 %v5397_v12, %s5021_s8  ;;  %v965_v12 = vmul.f32 %v962_v60, %v5164_v21  ;;  %v1017_v60 = vsel %vm1011_vm11, %v1015_v52, %v1016_v39 }
 0x144   :  { %v5595_v11 = vpop.permute.xlu1 %673  ;;  %v975_v62 = vrot.slane %v963_v3, 6  ;;  %v1047_v3 = vmul.f32 %v1043_v23, %v5144_v8 }
 0x145   :  { %v5597_v55 = vpop.permute.xlu0 %667  ;;  %v978_v6 = vrot.slane %v965_v12, 6 }
 0x146   :  { %943 = vrot.lane.b32.xlu1 %v934_v50, %s5021_s8  ;;  %v977_v38 = vsel %vm697_vm7, %v975_v62, %v976_v34  ;;  %v1056_v50 = vrot.slane %v1044_v2, 7  ;;  %v1061_v62 = vrot.slane %v1047_v3, 7  ;;  %v1097_v2 = vmul.f32 %v1091_v63, %v5160_v17 }
 0x147   :  { %937 = vrot.lane.b32.xlu0 %v929_v54, %s5021_s8  ;;  %v979_v41 = vsel %vm697_vm7, %v976_v34, %v978_v6  ;;  %v1046_v54 = vmul.f32 %v1043_v23, %v5164_v21  ;;  %v1049_v6 = vmul.f32 %v1043_v23, %v5160_v17 }
 0x148   :  { %v5608_v24 = vpop.permute.xlu1 %710  ;;  %v1058_v34 = vsel %vm1011_vm11, %v1056_v50, %v1057_v22 }
 0x149   :  { %8869 = vst [vmem:[#allocation15_spill] sm:$0xff] %v5608_v24  ;;  %v5610_v61 = vpop.permute.xlu0 %704  ;;  %v1059_v57 = vrot.slane %v1046_v54, 7  ;;  %v7194_v24 = vld [vmem:[#allocation4] sm:$0xff] }
 0x14a   :  { %8870 = vst [vmem:[#allocation16_spill] sm:$0xff] %v5610_v61  ;;  %947 = vrot.lane.b32.xlu1 %v935_v19, %s5021_s8 }
 0x14b   :  { %945 = vrot.lane.b32.xlu0 %v936_v14, %s5021_s8  ;;  %v1048_v14 = vmul.f32 %v1043_v23, %v5158_v16  ;;  %v1060_v28 = vsel %vm1011_vm11, %v1057_v22, %v1059_v57 }
 0x14c   :  { %v5618_v20 = vpop.permute.xlu1 %714 }
 0x14d   :  { %v5620_v5 = vpop.permute.xlu0 %708  ;;  %v1062_v7 = vrot.slane %v1048_v14, 7  ;;  %v1110_v14 = vrot.slane %v1096_v13, 7 }
 0x14e   :  { %8871 = vst [vmem:[#allocation17_spill] sm:$0xff] %v5620_v5  ;;  %987 = vrot.lane.b32.xlu1 %v979_v41, %s5021_s8  ;;  %v1093_v41 = vmul.f32 %v1091_v63, %v5162_v18 }
 0x14f   :  { %985 = vrot.lane.b32.xlu0 %v977_v38, %s5021_s8  ;;  %v1064_v38 = vrot.slane %v1049_v6, 7  ;;  %v1112_v6 = vrot.slane %v1097_v2, 7 }
 0x150   :  { %v5628_v26 = vpop.permute.xlu1 %758 }
 0x151   :  { %8872 = vst [vmem:[#allocation18_spill] sm:$0xff] %v5628_v26  ;;  %v5630_v53 = vpop.permute.xlu0 %752 }
 0x152   :  { %8873 = vst [vmem:[#allocation19_spill] sm:$0xff] %v5630_v53  ;;  %991 = vrot.lane.b32.xlu1 %v984_v37, %s5021_s8  ;;  %v1065_v37 = vsel %vm1011_vm11, %v1062_v7, %v1064_v38 }
 0x153   :  { %989 = vrot.lane.b32.xlu0 %v982_v15, %s5021_s8  ;;  %v1063_v15 = vsel %vm1011_vm11, %v1061_v62, %v1062_v7 }
 0x154   :  { %v5636_v4 = vpop.permute.xlu1 %851 }
 0x155   :  { %8874 = vst [vmem:[#allocation20_spill] sm:$0xff] %v5636_v4  ;;  %v5638_v27 = vpop.permute.xlu0 %845 }
 0x156   :  { %8875 = vst [vmem:[#allocation21_spill] sm:$0xff] %v5638_v27  ;;  %1020 = vrot.lane.b32.xlu1 %v1014_v49, %s5022_s17 }
 0x157   :  { %1018 = vrot.lane.b32.xlu0 %v1012_v40, %s5022_s17  ;;  %v1094_v40 = vmul.f32 %v1091_v63, %v5164_v21 }
 0x158   :  { %v5645_v43 = vpop.permute.xlu1 %899 }
 0x159   :  { %8876 = vst [vmem:[#allocation22_spill] sm:$0xff] %v5645_v43  ;;  %v5647_v48 = vpop.permute.xlu0 %893 }
 0x15a   :  { %8877 = vst [vmem:[#allocation23_spill] sm:$0xff] %v5647_v48  ;;  %1024 = vrot.lane.b32.xlu1 %v1015_v52, %s5022_s17  ;;  %v1095_v52 = vmul.f32 %v1091_v63, %v5144_v8 }
 0x15b   :  { %1022 = vrot.lane.b32.xlu0 %v1013_v1, %s5022_s17  ;;  %v1105_v1 = vrot.slane %v1093_v41, 7 }
 0x15c   :  { %v5653_v45 = vpop.permute.xlu1 %392 }
 0x15d   :  { %8878 = vst [vmem:[#allocation24_spill] sm:$0xff] %v5653_v45  ;;  %v5655_v56 = vpop.permute.xlu0 %941  ;;  %v1106_v23 = vsel %vm1011_vm11, %v1104_v10, %v1105_v1 }
 0x15e   :  { %8879 = vst [vmem:[#allocation25_spill] sm:$0xff] %v5655_v56  ;;  %1028 = vrot.lane.b32.xlu1 %v1016_v39, %s5022_s17  ;;  %v1107_v39 = vrot.slane %v1094_v40, 7 }
 0x15f   :  { %1026 = vrot.lane.b32.xlu0 %v1017_v60, %s5022_s17  ;;  %v1139_v60 = vstv %s4802_s19  ;;  %s4826_s19 = sld [smem:[#allocation9 + $0x30]] }
 0x160   :  { %v5661_v19 = vpop.permute.xlu1 %441  ;;  %v1141_v3 = vmul.f32 %v1139_v60, %v5162_v18  ;;  %v1108_v57 = vsel %vm1011_vm11, %v1105_v1, %v1107_v39  ;;  %v1144_v41 = vmul.f32 %v1139_v60, %v5158_v16  ;;  %v1143_v1 = vmul.f32 %v1139_v60, %v5144_v8 }
 0x161   :  { %8880 = vst [vmem:[#allocation26_spill] sm:$0xff] %v5661_v19  ;;  %v5663_v12 = vpop.permute.xlu0 %398 }
 0x162   :  { %8881 = vst [vmem:[#allocation27_spill] sm:$0xff] %v5663_v12  ;;  %1068 = vrot.lane.b32.xlu1 %v1058_v34, %s5022_s17  ;;  %v1142_v34 = vmul.f32 %v1139_v60, %v5164_v21  ;;  %v1154_v7 = vrot.slane %v1141_v3, 3  ;;  %v1159_v13 = vrot.slane %v1144_v41, 3 }
 0x163   :  { %1066 = vrot.lane.b32.xlu0 %v1056_v50, %s5022_s17  ;;  %v1109_v50 = vrot.slane %v1095_v52, 7 }
 0x164   :  { %v5671_v32 = vpop.permute.xlu1 %445  ;;  %v1156_v38 = vrot.slane %v1142_v34, 3  ;;  %v1158_v34 = vrot.slane %v1143_v1, 3 }
 0x165   :  { %8882 = vst [vmem:[#allocation28_spill] sm:$0xff] %v5671_v32  ;;  %v5673_v35 = vpop.permute.xlu0 %439  ;;  %v1111_v31 = vsel %vm1011_vm11, %v1109_v50, %v1110_v14 }
 0x166   :  { %8883 = vst [vmem:[#allocation29_spill] sm:$0xff] %v5673_v35  ;;  %1072 = vrot.lane.b32.xlu1 %v1061_v62, %s5022_s17  ;;  %v1140_v62 = vmul.f32 %v1139_v60, %v5146_v9  ;;  %v1157_v39 = vsel %vm1152_vm12, %v1154_v7, %v1156_v38  ;;  %v1160_v41 = vsel %vm1152_vm12, %v1158_v34, %v1159_v13 }
 0x167   :  { %1070 = vrot.lane.b32.xlu0 %v1060_v28, %s5022_s17 }
 0x168   :  { %v5680_v25 = vpop.permute.xlu1 %481  ;;  %v1153_v40 = vrot.slane %v1140_v62, 3 }
 0x169   :  { %8884 = vst [vmem:[#allocation30_spill] sm:$0xff] %v5680_v25  ;;  %v5682_v51 = vpop.permute.xlu0 %443 }
 0x16a   :  { %8885 = vst [vmem:[#allocation31_spill] sm:$0xff] %v5682_v51  ;;  %1076 = vrot.lane.b32.xlu1 %v1065_v37, %s5022_s17  ;;  %v1145_v37 = vmul.f32 %v1139_v60, %v5160_v17 }
 0x16b   :  { %1074 = vrot.lane.b32.xlu0 %v1063_v15, %s5022_s17  ;;  %v1113_v15 = vsel %vm1011_vm11, %v1110_v14, %v1112_v6 }
 0x16c   :  { %v5689_v49 = vpop.permute.xlu1 %485  ;;  %v1161_v3 = vrot.slane %v1145_v37, 3 }
 0x16d   :  { %8886 = vst [vmem:[#allocation32_spill] sm:$0xff] %v5689_v49  ;;  %v5691_v58 = vpop.permute.xlu0 %479 }
 0x16e   :  { %8887 = vst [vmem:[#allocation33_spill] sm:$0xff] %v5691_v58  ;;  %1116 = vrot.lane.b32.xlu1 %v1106_v23, %s5022_s17 }
 0x16f   :  { %1114 = vrot.lane.b32.xlu0 %v1104_v10, %s5022_s17  ;;  %v1180_v10 = vstv %s4803_s20  ;;  %s4834_s20 = sld [smem:[#allocation9 + $0x32]] }
 0x170   :  { %v5699_v22 = vpop.permute.xlu1 %529  ;;  %v1182_v2 = vmul.f32 %v1180_v10, %v5162_v18  ;;  %v1183_v60 = vmul.f32 %v1180_v10, %v5164_v21  ;;  %v1184_v38 = vmul.f32 %v1180_v10, %v5144_v8 }
 0x171   :  { %8888 = vst [vmem:[#allocation34_spill] sm:$0xff] %v5699_v22  ;;  %v5701_v54 = vpop.permute.xlu0 %487 }
 0x172   :  { %8889 = vst [vmem:[#allocation35_spill] sm:$0xff] %v5701_v54  ;;  %1120 = vrot.lane.b32.xlu1 %v1109_v50, %s5022_s17  ;;  %v1155_v50 = vsel %vm1152_vm12, %v1153_v40, %v1154_v7  ;;  %v1194_v62 = vrot.slane %v1182_v2, 3  ;;  %v1162_v7 = vsel %vm1152_vm12, %v1159_v13, %v1161_v3  ;;  %v1186_v13 = vmul.f32 %v1180_v10, %v5160_v17 }
 0x173   :  { %1118 = vrot.lane.b32.xlu0 %v1108_v57, %s5022_s17  ;;  %v1181_v57 = vmul.f32 %v1180_v10, %v5146_v9 }
 0x174   :  { %v5709_v63 = vpop.permute.xlu1 %533 }
 0x175   :  { %8890 = vst [vmem:[#allocation36_spill] sm:$0xff] %v5709_v63  ;;  %v5711_v28 = vpop.permute.xlu0 %527  ;;  %v1193_v37 = vrot.slane %v1181_v57, 3  ;;  %v1228_v57 = vstv %s4804_s21  ;;  %s4835_s21 = sld [smem:[#allocation9 + $0x39]] }
 0x176   :  { %8891 = vst [vmem:[#allocation37_spill] sm:$0xff] %v5711_v28  ;;  %1124 = vrot.lane.b32.xlu1 %v1113_v15, %s5022_s17  ;;  %v1185_v15 = vmul.f32 %v1180_v10, %v5158_v16  ;;  %v1231_v56 = vmul.f32 %v1228_v57, %v5164_v21  ;;  %v1229_v10 = vmul.f32 %v1228_v57, %v5146_v9  ;;  %v7208_v28 = vld [vmem:[#allocation4 + $0x20] sm:$0xff] }
 0x177   :  { %1122 = vrot.lane.b32.xlu0 %v1111_v31, %s5022_s17  ;;  %v1196_v31 = vrot.slane %v1183_v60, 3 }
 0x178   :  { %v5720_v52 = vpop.permute.xlu1 %577  ;;  %v1199_v3 = vrot.slane %v1185_v15, 3 }
 0x179   :  { %8892 = vst [vmem:[#allocation38_spill] sm:$0xff] %v5720_v52  ;;  %v5722_v23 = vpop.permute.xlu0 %535  ;;  %v1197_v2 = vsel %vm1152_vm12, %v1194_v62, %v1196_v31 }
 0x17a   :  { %8893 = vst [vmem:[#allocation39_spill] sm:$0xff] %v5722_v23  ;;  %1165 = vrot.lane.b32.xlu1 %v1157_v39, %s5022_s17  ;;  %v1198_v39 = vrot.slane %v1184_v38, 3  ;;  %v1230_v38 = vmul.f32 %v1228_v57, %v5162_v18 }
 0x17b   :  { %1163 = vrot.lane.b32.xlu0 %v1155_v50, %s5022_s17  ;;  %v1195_v50 = vsel %vm1152_vm12, %v1193_v37, %v1194_v62  ;;  %v1232_v37 = vmul.f32 %v1228_v57, %v5144_v8 }
 0x17c   :  { %v5731_v14 = vpop.permute.xlu1 %581 }
 0x17d   :  { %8894 = vst [vmem:[#allocation40_spill] sm:$0xff] %v5731_v14  ;;  %v5733_v6 = vpop.permute.xlu0 %575 }
 0x17e   :  { %8895 = vst [vmem:[#allocation41_spill] sm:$0xff] %v5733_v6  ;;  %1169 = vrot.lane.b32.xlu1 %v1162_v7, %s5022_s17  ;;  %v1200_v7 = vsel %vm1152_vm12, %v1198_v39, %v1199_v3 }
 0x17f   :  { %1167 = vrot.lane.b32.xlu0 %v1160_v41, %s5022_s17  ;;  %v1201_v41 = vrot.slane %v1186_v13, 3  ;;  %v1233_v13 = vmul.f32 %v1228_v57, %v5158_v16 }
 0x180   :  { %v5741_v1 = vpop.permute.xlu1 %625 }
 0x181   :  { %8896 = vst [vmem:[#allocation42_spill] sm:$0xff] %v5741_v1  ;;  %v5743_v40 = vpop.permute.xlu0 %583  ;;  %v1202_v39 = vsel %vm1152_vm12, %v1199_v3, %v1201_v41  ;;  %v1234_v3 = vmul.f32 %v1228_v57, %v5160_v17  ;;  %v5787_v17 = vld [vmem:[#allocation4] sm:$0xff] }
 0x182   :  { %8897 = vst [vmem:[#allocation43_spill] sm:$0xff] %v5743_v40  ;;  %1205 = vrot.lane.b32.xlu1 %v1197_v2, %s5022_s17  ;;  %v1242_v2 = vrot.slane %v1230_v38, 3 }
 0x183   :  { %1203 = vrot.lane.b32.xlu0 %v1195_v50, %s5022_s17  ;;  %v1244_v50 = vrot.slane %v1231_v56, 3 }
 0x184   :  { %v5750_v34 = vpop.permute.xlu1 %629 }
 0x185   :  { %8898 = vst [vmem:[#allocation44_spill] sm:$0xff] %v5750_v34  ;;  %v5752_v60 = vpop.permute.xlu0 %623 }
 0x186   :  { %8899 = vst [vmem:[#allocation45_spill] sm:$0xff] %v5752_v60  ;;  %1209 = vrot.lane.b32.xlu1 %v1200_v7, %s5022_s17  ;;  %v1247_v60 = vrot.slane %v1233_v13, 3  ;;  %v5794_v13 = vld [vmem:[#allocation4 + $0x18] sm:$0xff] }
 0x187   :  { %1207 = vrot.lane.b32.xlu0 %v1196_v31, %s5022_s17  ;;  %v1241_v31 = vrot.slane %v1229_v10, 3  ;;  %v1249_v10 = vrot.slane %v1234_v3, 3 }
 0x188   :  { %v5760_v62 = vpop.permute.xlu1 %665 }
 0x189   :  { %8900 = vst [vmem:[#allocation46_spill] sm:$0xff] %v5760_v62  ;;  %v5762_v15 = vpop.permute.xlu0 %627  ;;  %v1246_v62 = vrot.slane %v1232_v37, 3  ;;  %v1243_v8 = vsel %vm1152_vm12, %v1241_v31, %v1242_v2 }
 0x18a   :  { %8901 = vst [vmem:[#allocation47_spill] sm:$0xff] %v5762_v15  ;;  %1213 = vrot.lane.b32.xlu1 %v1201_v41, %s5022_s17  ;;  %v1245_v15 = vsel %vm1152_vm12, %v1242_v2, %v1244_v50  ;;  %v1276_v41 = vstv %s4805_s1  ;;  %s4836_s1 = sld [smem:[#allocation9 + $0x40]] }
 0x18b   :  { %1211 = vrot.lane.b32.xlu0 %v1202_v39, %s5022_s17  ;;  %v1248_v38 = vsel %vm1152_vm12, %v1246_v62, %v1247_v60  ;;  %v1278_v37 = vmul.f32 %v1276_v41, %v5162_v18  ;;  %v1279_v39 = vmul.f32 %v1276_v41, %v5164_v21  ;;  %v1277_v57 = vmul.f32 %v5787_v17, %v1276_v41 }
 0x18c   :  { %v5769_v7 = vpop.permute.xlu1 %669  ;;  %v1280_v62 = vmul.f32 %v5794_v13, %v1276_v41  ;;  %v1250_v18 = vsel %vm1152_vm12, %v1247_v60, %v1249_v10 }
 0x18d   :  { %8902 = vst [vmem:[#allocation48_spill] sm:$0xff] %v5769_v7  ;;  %v5771_v9 = vpop.permute.xlu0 %663  ;;  %v1290_v31 = vrot.slane %v1278_v37, 3  ;;  %v1292_v21 = vrot.slane %v1279_v39, 3  ;;  %v1289_v3 = vrot.slane %v1277_v57, 3  ;;  %v5809_v39 = vld [vmem:[#allocation4 + $0x28] sm:$0x3f] }
 0x18e   :  { %8903 = vst [vmem:[#allocation49_spill] sm:$0xff] %v5771_v9  ;;  %1253 = vrot.lane.b32.xlu1 %v1245_v15, %s5022_s17 }
 0x18f   :  { %1251 = vrot.lane.b32.xlu0 %v1243_v8, %s5022_s17  ;;  %v5798_v8 = vld [vmem:[#allocation4 + $0x20] sm:$0xff]  ;;  %v1291_v60 = vsel %vm1152_vm12, %v1289_v3, %v1290_v31 }
 0x190   :  { %v5778_v16 = vpop.permute.xlu1 %706 }
 0x191   :  { %8904 = vst [vmem:[#allocation50_spill] sm:$0xff] %v5778_v16  ;;  %v5780_v56 = vpop.permute.xlu0 %671  ;;  %v1294_v16 = vrot.slane %v1280_v62, 3 }
 0x192   :  { %8905 = vst [vmem:[#allocation51_spill] sm:$0xff] %v5780_v56  ;;  %1257 = vrot.lane.b32.xlu1 %v1248_v38, %s5022_s17  ;;  %v1282_v56 = vmul.f32 %v5809_v39, %v1276_v41 }
 0x193   :  { %1255 = vrot.lane.b32.xlu0 %v1244_v50, %s5022_s17  ;;  %v1281_v50 = vmul.f32 %v5798_v8, %v1276_v41 }
 0x194   :  { %v5790_v15 = vpop.permute.xlu1 %754 }
 0x195   :  { %8906 = vst [vmem:[#allocation52_spill] sm:$0xff] %v5790_v15  ;;  %v5792_v2 = vpop.permute.xlu0 %712  ;;  %v1293_v15 = vsel %vm1152_vm12, %v1290_v31, %v1292_v21  ;;  %v1295_v37 = vrot.slane %v1281_v50, 3 }
 0x196   :  { %8907 = vst [vmem:[#allocation53_spill] sm:$0xff] %v5792_v2  ;;  %1261 = vrot.lane.b32.xlu1 %v1249_v10, %s5022_s17 }
 0x197   :  { %1259 = vrot.lane.b32.xlu0 %v1250_v18, %s5022_s17  ;;  %v1296_v62 = vsel %vm1152_vm12, %v1294_v16, %v1295_v37  ;;  %v1297_v18 = vrot.slane %v1282_v56, 3  ;;  %v5832_v56 = vld [vmem:[#allocation4 + $0x8] sm:$0xff] }
 0x198   :  { %v5803_v38 = vpop.permute.xlu1 %762 }
 0x199   :  { %8908 = vst [vmem:[#allocation54_spill] sm:$0xff] %v5803_v38  ;;  %v5805_v2 = vpop.permute.xlu0 %756  ;;  %v1298_v41 = vsel %vm1152_vm12, %v1295_v37, %v1297_v18 }
 0x19a   :  { %8909 = vst [vmem:[#allocation55_spill] sm:$0xff] %v5805_v2  ;;  %1301 = vrot.lane.b32.xlu1 %v1293_v15, %s5022_s17  ;;  %v1324_v15 = vstv %s4806_s22  ;;  %s4837_s22 = sld [smem:[#allocation9 + $0x47]] }
 0x19b   :  { %1299 = vrot.lane.b32.xlu0 %v1291_v60, %s5022_s17  ;;  %v1325_v60 = vmul.f32 %v5787_v17, %v1324_v15 }
 0x19c   :  { %v5814_v10 = vpop.permute.xlu1 %803 }
 0x19d   :  { %8910 = vst [vmem:[#allocation56_spill] sm:$0xff] %v5814_v10  ;;  %v5816_v57 = vpop.permute.xlu0 %760 }
 0x19e   :  { %8911 = vst [vmem:[#allocation57_spill] sm:$0xff] %v5816_v57  ;;  %1305 = vrot.lane.b32.xlu1 %v1296_v62, %s5022_s17 }
 0x19f   :  { %1303 = vrot.lane.b32.xlu0 %v1292_v21, %s5022_s17  ;;  %v1326_v21 = vmul.f32 %v5832_v56, %v1324_v15 }
 0x1a0   :  { %v5821_v31 = vpop.permute.xlu1 %807 }
 0x1a1   :  { %8912 = vst [vmem:[#allocation58_spill] sm:$0xff] %v5821_v31  ;;  %v5823_v50 = vpop.permute.xlu0 %801 }
 0x1a2   :  { %8913 = vst [vmem:[#allocation59_spill] sm:$0xff] %v5823_v50  ;;  %1309 = vrot.lane.b32.xlu1 %v1297_v18, %s5022_s17  ;;  %v1328_v18 = vmul.f32 %v5798_v8, %v1324_v15 }
 0x1a3   :  { %1307 = vrot.lane.b32.xlu0 %v1298_v41, %s5022_s17  ;;  %v1327_v41 = vmul.f32 %v5794_v13, %v1324_v15 }
 0x1a4   :  { %v5828_v3 = vpop.permute.xlu1 %843 }
 0x1a5   :  { %8914 = vst [vmem:[#allocation60_spill] sm:$0xff] %v5828_v3  ;;  %v5830_v16 = vpop.permute.xlu0 %805 }
 0x1a6   :  { %8915 = vst [vmem:[#allocation61_spill] sm:$0xff] %v5830_v16  ;;  %1335 = vrot.lane.b32.xlu1 %v1326_v21, %s5023_s24  ;;  %v1350_v16 = vstv %s4807_s23  ;;  %s4838_s23 = sld [smem:[#allocation9 + $0x4e]] }
 0x1a7   :  { %1333 = vrot.lane.b32.xlu0 %v1325_v60, %s5023_s24  ;;  %v1352_v21 = vmul.f32 %v5832_v56, %v1350_v16  ;;  %v1351_v60 = vmul.f32 %v5787_v17, %v1350_v16 }
 0x1a8   :  { %v5838_v37 = vpop.permute.xlu1 %847 }
 0x1a9   :  { %8916 = vst [vmem:[#allocation62_spill] sm:$0xff] %v5838_v37  ;;  %v5840_v62 = vpop.permute.xlu0 %841 }
 0x1aa   :  { %8917 = vst [vmem:[#allocation63_spill] sm:$0xff] %v5840_v62  ;;  %1339 = vrot.lane.b32.xlu1 %v1328_v18, %s5023_s24  ;;  %v1354_v18 = vmul.f32 %v5794_v13, %v1350_v16 }
 0x1ab   :  { %1337 = vrot.lane.b32.xlu0 %v1327_v41, %s5023_s24  ;;  %v5859_v41 = vld [vmem:[#allocation4 + $0x10] sm:$0x3f] }
 0x1ac   :  { %v5846_v3 = vpop.permute.xlu1 %891 }
 0x1ad   :  { %8918 = vst [vmem:[#allocation64_spill] sm:$0xff] %v5846_v3  ;;  %v5848_v50 = vpop.permute.xlu0 %849  ;;  %v1353_v3 = vmul.f32 %v5859_v41, %v1350_v16 }
 0x1ae   :  { %8919 = vst [vmem:[#allocation65_spill] sm:$0xff] %v5848_v50  ;;  %1365 = vrot.lane.b32.xlu1 %v1352_v21, %s5023_s24  ;;  %v1356_v21 = vmul.f32 %v5809_v39, %v1350_v16 }
 0x1af   :  { %1363 = vrot.lane.b32.xlu0 %v1351_v60, %s5023_s24  ;;  %v1355_v60 = vmul.f32 %v5798_v8, %v1350_v16 }
 0x1b0   :  { %v5854_v62 = vpop.permute.xlu1 %895 }
 0x1b1   :  { %8920 = vst [vmem:[#allocation66_spill] sm:$0xff] %v5854_v62  ;;  %v5856_v15 = vpop.permute.xlu0 %889  ;;  %v1388_v62 = vstv %s4808_s25  ;;  %s4839_s25 = sld [smem:[#allocation9 + $0x55]] }
 0x1b2   :  { %8921 = vst [vmem:[#allocation67_spill] sm:$0xff] %v5856_v15  ;;  %1369 = vrot.lane.b32.xlu1 %v1354_v18, %s5023_s24  ;;  %v1390_v18 = vmul.f32 %v5832_v56, %v1388_v62 }
 0x1b3   :  { %1367 = vrot.lane.b32.xlu0 %v1353_v3, %s5023_s24  ;;  %v1389_v3 = vmul.f32 %v5787_v17, %v1388_v62 }
 0x1b4   :  { %v5864_v31 = vpop.permute.xlu1 %939 }
 0x1b5   :  { %8922 = vst [vmem:[#allocation68_spill] sm:$0xff] %v5864_v31  ;;  %v5866_v10 = vpop.permute.xlu0 %897 }
 0x1b6   :  { %8923 = vst [vmem:[#allocation69_spill] sm:$0xff] %v5866_v10  ;;  %1373 = vrot.lane.b32.xlu1 %v1356_v21, %s5023_s24  ;;  %v1392_v21 = vmul.f32 %v5794_v13, %v1388_v62 }
 0x1b7   :  { %1371 = vrot.lane.b32.xlu0 %v1355_v60, %s5023_s24  ;;  %v1391_v60 = vmul.f32 %v5859_v41, %v1388_v62 }
 0x1b8   :  { %v5872_v15 = vpop.permute.xlu1 %943 }
 0x1b9   :  { %8924 = vst [vmem:[#allocation70_spill] sm:$0xff] %v5872_v15  ;;  %v5874_v50 = vpop.permute.xlu0 %937 }
 0x1ba   :  { %8925 = vst [vmem:[#allocation71_spill] sm:$0xff] %v5874_v50  ;;  %1403 = vrot.lane.b32.xlu1 %v1390_v18, %s5023_s24  ;;  %v1394_v18 = vmul.f32 %v5809_v39, %v1388_v62 }
 0x1bb   :  { %1401 = vrot.lane.b32.xlu0 %v1389_v3, %s5023_s24  ;;  %v1393_v3 = vmul.f32 %v5798_v8, %v1388_v62 }
 0x1bc   :  { %v5880_v10 = vpop.permute.xlu1 %947 }
 0x1bd   :  { %8926 = vst [vmem:[#allocation72_spill] sm:$0xff] %v5880_v10  ;;  %v5882_v16 = vpop.permute.xlu0 %945  ;;  %v1426_v10 = vstv %s4809_s26  ;;  %s4840_s26 = sld [smem:[#allocation9 + $0x5c]] }
 0x1be   :  { %8927 = vst [vmem:[#allocation73_spill] sm:$0xff] %v5882_v16  ;;  %1407 = vrot.lane.b32.xlu1 %v1392_v21, %s5023_s24  ;;  %v1428_v21 = vmul.f32 %v5832_v56, %v1426_v10  ;;  %v1431_v37 = vmul.f32 %v5798_v8, %v1426_v10 }
 0x1bf   :  { %1405 = vrot.lane.b32.xlu0 %v1391_v60, %s5023_s24  ;;  %v1427_v60 = vmul.f32 %v5787_v17, %v1426_v10 }
 0x1c0   :  { %v5888_v50 = vpop.permute.xlu1 %987 }
 0x1c1   :  { %8928 = vst [vmem:[#allocation74_spill] sm:$0xff] %v5888_v50  ;;  %v5890_v15 = vpop.permute.xlu0 %985 }
 0x1c2   :  { %8929 = vst [vmem:[#allocation75_spill] sm:$0xff] %v5890_v15  ;;  %1411 = vrot.lane.b32.xlu1 %v1394_v18, %s5023_s24  ;;  %v1430_v18 = vmul.f32 %v5794_v13, %v1426_v10 }
 0x1c3   :  { %1409 = vrot.lane.b32.xlu0 %v1393_v3, %s5023_s24  ;;  %v1429_v3 = vmul.f32 %v5859_v41, %v1426_v10 }
 0x1c4   :  { %v5896_v16 = vpop.permute.xlu1 %991 }
 0x1c5   :  { %8930 = vst [vmem:[#allocation76_spill] sm:$0xff] %v5896_v16  ;;  %v5898_v31 = vpop.permute.xlu0 %989  ;;  %v1464_v16 = vstv %s4810_s0  ;;  %s4841_s0 = sld [smem:[#allocation9 + $0x33]] }
 0x1c6   :  { %8931 = vst [vmem:[#allocation77_spill] sm:$0xff] %v5898_v31  ;;  %1441 = vrot.lane.b32.xlu1 %v1428_v21, %s5023_s24  ;;  %v1466_v31 = vmul.f32 %v5832_v56, %v1464_v16  ;;  %v1467_v50 = vmul.f32 %v5859_v41, %v1464_v16  ;;  %v1465_v21 = vmul.f32 %v5787_v17, %v1464_v16 }
 0x1c7   :  { %1439 = vrot.lane.b32.xlu0 %v1427_v60, %s5023_s24  ;;  %v1469_v57 = vmul.f32 %v5798_v8, %v1464_v16  ;;  %v1470_v9 = vmul.f32 %v5809_v39, %v1464_v16 }
 0x1c8   :  { %v5904_v62 = vpop.permute.xlu1 %1020  ;;  %v1478_v38 = vrot.slane %v1466_v31, 4  ;;  %v1480_v2 = vrot.slane %v1467_v50, 4 }
 0x1c9   :  { %8932 = vst [vmem:[#allocation78_spill] sm:$0xff] %v5904_v62  ;;  %v5906_v15 = vpop.permute.xlu0 %1018  ;;  %v1485_v40 = vrot.slane %v1470_v9, 4 }
 0x1ca   :  { %8933 = vst [vmem:[#allocation79_spill] sm:$0xff] %v5906_v15  ;;  %1445 = vrot.lane.b32.xlu1 %v1430_v18, %s5023_s24  ;;  %v1432_v15 = vmul.f32 %v5809_v39, %v1426_v10  ;;  %v1468_v18 = vmul.f32 %v5794_v13, %v1464_v16  ;;  %v1483_v10 = vrot.slane %v1469_v57, 4  ;;  %v1481_v50 = vsel %vm282_vm13, %v1478_v38, %v1480_v2 }
 0x1cb   :  { %1443 = vrot.lane.b32.xlu0 %v1429_v3, %s5023_s24  ;;  %v1477_v3 = vrot.slane %v1465_v21, 4 }
 0x1cc   :  { %v5915_v60 = vpop.permute.xlu1 %1024  ;;  %v1482_v1 = vrot.slane %v1468_v18, 4 }
 0x1cd   :  { %8934 = vst [vmem:[#allocation80_spill] sm:$0xff] %v5915_v60  ;;  %v5917_v62 = vpop.permute.xlu0 %1022  ;;  %v1504_v60 = vstv %s4811_s27  ;;  %v1479_v16 = vsel %vm282_vm13, %v1477_v3, %v1478_v38  ;;  %s4842_s27 = sld [smem:[#allocation9 + $0x3a]] }
 0x1ce   :  { %8935 = vst [vmem:[#allocation81_spill] sm:$0xff] %v5917_v62  ;;  %1449 = vrot.lane.b32.xlu1 %v1432_v15, %s5023_s24  ;;  %v1506_v34 = vmul.f32 %v5832_v56, %v1504_v60  ;;  %v1507_v31 = vmul.f32 %v5859_v41, %v1504_v60  ;;  %v1484_v2 = vsel %vm282_vm13, %v1482_v1, %v1483_v10 }
 0x1cf   :  { %1447 = vrot.lane.b32.xlu0 %v1431_v37, %s5023_s24  ;;  %v1505_v37 = vmul.f32 %v5787_v17, %v1504_v60  ;;  %v1508_v9 = vmul.f32 %v5794_v13, %v1504_v60  ;;  %v1509_v38 = vmul.f32 %v5798_v8, %v1504_v60  ;;  %v1510_v1 = vmul.f32 %v5809_v39, %v1504_v60 }
 0x1d0   :  { %v5926_v62 = vpop.permute.xlu1 %1028  ;;  %v1518_v57 = vrot.slane %v1506_v34, 4 }
 0x1d1   :  { %8936 = vst [vmem:[#allocation82_spill] sm:$0xff] %v5926_v62  ;;  %v5928_v7 = vpop.permute.xlu0 %1026  ;;  %v1486_v62 = vsel %vm282_vm13, %v1483_v10, %v1485_v40  ;;  %v1517_v18 = vrot.slane %v1505_v37, 4  ;;  %v1522_v40 = vrot.slane %v1508_v9, 4  ;;  %v1552_v37 = vstv %s4812_s28  ;;  %s4843_s28 = sld [smem:[#allocation9 + $0x41]] }
 0x1d2   :  { %8937 = vst [vmem:[#allocation83_spill] sm:$0xff] %v5928_v7  ;;  %1489 = vrot.lane.b32.xlu1 %v1481_v50, %s5023_s24  ;;  %v1520_v7 = vrot.slane %v1507_v31, 4  ;;  %v1553_v60 = vmul.f32 %v5787_v17, %v1552_v37 }
 0x1d3   :  { %1487 = vrot.lane.b32.xlu0 %v1479_v16, %s5023_s24  ;;  %v1519_v31 = vsel %vm282_vm13, %v1517_v18, %v1518_v57  ;;  %v1523_v16 = vrot.slane %v1509_v38, 4  ;;  %v1556_v18 = vmul.f32 %v5794_v13, %v1552_v37 }
 0x1d4   :  { %v5937_v15 = vpop.permute.xlu1 %1068  ;;  %v1521_v34 = vsel %vm282_vm13, %v1518_v57, %v1520_v7  ;;  %v1555_v57 = vmul.f32 %v5859_v41, %v1552_v37 }
 0x1d5   :  { %8938 = vst [vmem:[#allocation84_spill] sm:$0xff] %v5937_v15  ;;  %v5939_v21 = vpop.permute.xlu0 %1066 }
 0x1d6   :  { %8939 = vst [vmem:[#allocation85_spill] sm:$0xff] %v5939_v21  ;;  %1493 = vrot.lane.b32.xlu1 %v1486_v62, %s5023_s24 }
 0x1d7   :  { %1491 = vrot.lane.b32.xlu0 %v1484_v2, %s5023_s24  ;;  %v1524_v2 = vsel %vm282_vm13, %v1522_v40, %v1523_v16  ;;  %v1568_v40 = vrot.slane %v1555_v57, 4  ;;  %v1600_v57 = vstv %s4813_s29  ;;  %s4845_s29 = sld [smem:[#allocation9 + $0x4f]] }
 0x1d8   :  { %v5947_v3 = vpop.permute.xlu1 %1072 }
 0x1d9   :  { %8940 = vst [vmem:[#allocation86_spill] sm:$0xff] %v5947_v3  ;;  %v5949_v50 = vpop.permute.xlu0 %1070  ;;  %v1554_v3 = vmul.f32 %v5832_v56, %v1552_v37 }
 0x1da   :  { %8941 = vst [vmem:[#allocation87_spill] sm:$0xff] %v5949_v50  ;;  %1529 = vrot.lane.b32.xlu1 %v1521_v34, %s5023_s24  ;;  %v1525_v50 = vrot.slane %v1510_v1, 4  ;;  %v1557_v1 = vmul.f32 %v5798_v8, %v1552_v37 }
 0x1db   :  { %1527 = vrot.lane.b32.xlu0 %v1519_v31, %s5023_s24  ;;  %v1566_v31 = vrot.slane %v1554_v3, 4  ;;  %v1558_v3 = vmul.f32 %v5809_v39, %v1552_v37  ;;  %v1601_v37 = vmul.f32 %v5787_v17, %v1600_v57 }
 0x1dc   :  { %v5956_v62 = vpop.permute.xlu1 %1076  ;;  %v1526_v34 = vsel %vm282_vm13, %v1523_v16, %v1525_v50 }
 0x1dd   :  { %8942 = vst [vmem:[#allocation88_spill] sm:$0xff] %v5956_v62  ;;  %v5958_v10 = vpop.permute.xlu0 %1074  ;;  %v1570_v62 = vrot.slane %v1556_v18, 4  ;;  %v1569_v21 = vsel %vm282_vm13, %v1566_v31, %v1568_v40  ;;  %v1602_v18 = vmul.f32 %v5832_v56, %v1600_v57 }
 0x1de   :  { %8943 = vst [vmem:[#allocation89_spill] sm:$0xff] %v5958_v10  ;;  %1533 = vrot.lane.b32.xlu1 %v1524_v2, %s5023_s24 }
 0x1df   :  { %1531 = vrot.lane.b32.xlu0 %v1520_v7, %s5023_s24  ;;  %v1565_v7 = vrot.slane %v1553_v60, 4 }
 0x1e0   :  { %v5966_v9 = vpop.permute.xlu1 %1116 }
 0x1e1   :  { %8944 = vst [vmem:[#allocation90_spill] sm:$0xff] %v5966_v9  ;;  %v5968_v38 = vpop.permute.xlu0 %1114  ;;  %v1567_v15 = vsel %vm282_vm13, %v1565_v7, %v1566_v31 }
 0x1e2   :  { %8945 = vst [vmem:[#allocation91_spill] sm:$0xff] %v5968_v38  ;;  %1537 = vrot.lane.b32.xlu1 %v1525_v50, %s5023_s24  ;;  %v1571_v38 = vrot.slane %v1557_v1, 4  ;;  %v1610_v1 = vrot.slane %v1602_v18, 5 }
 0x1e3   :  { %1535 = vrot.lane.b32.xlu0 %v1526_v34, %s5023_s24  ;;  %v1573_v34 = vrot.slane %v1558_v3, 4 }
 0x1e4   :  { %v5975_v2 = vpop.permute.xlu1 %1120  ;;  %v1572_v60 = vsel %vm282_vm13, %v1570_v62, %v1571_v38  ;;  %v1609_v62 = vrot.slane %v1601_v37, 5 }
 0x1e5   :  { %8946 = vst [vmem:[#allocation92_spill] sm:$0xff] %v5975_v2  ;;  %v5977_v10 = vpop.permute.xlu0 %1118  ;;  %v1574_v31 = vsel %vm282_vm13, %v1571_v38, %v1573_v34  ;;  %v1640_v38 = vstv %s4814_s3  ;;  %s4846_s3 = sld [smem:[#allocation9 + $0x56]] }
 0x1e6   :  { %8947 = vst [vmem:[#allocation93_spill] sm:$0xff] %v5977_v10  ;;  %1577 = vrot.lane.b32.xlu1 %v1569_v21, %s5023_s24 }
 0x1e7   :  { %1575 = vrot.lane.b32.xlu0 %v1567_v15, %s5023_s24 }
 0x1e8   :  { %v5984_v50 = vpop.permute.xlu1 %1124 }
 0x1e9   :  { %8948 = vst [vmem:[#allocation94_spill] sm:$0xff] %v5984_v50  ;;  %v5986_v16 = vpop.permute.xlu0 %1122  ;;  %v1680_v50 = vstv %s4815_s5  ;;  %s4847_s5 = sld [smem:[#allocation9 + $0x5d]] }
 0x1ea   :  { %8949 = vst [vmem:[#allocation95_spill] sm:$0xff] %v5986_v16  ;;  %1581 = vrot.lane.b32.xlu1 %v1572_v60, %s5023_s24  ;;  %v1611_v60 = vsel %vm383_vm8, %v1609_v62, %v1610_v1  ;;  %v1646_v16 = vmul.f32 %v5809_v39, %v1640_v38 }
 0x1eb   :  { %1579 = vrot.lane.b32.xlu0 %v1568_v40, %s5023_s24  ;;  %v1603_v40 = vmul.f32 %v5794_v13, %v1600_v57 }
 0x1ec   :  { %v5993_v21 = vpop.permute.xlu1 %1165 }
 0x1ed   :  { %8950 = vst [vmem:[#allocation96_spill] sm:$0xff] %v5993_v21  ;;  %v5995_v15 = vpop.permute.xlu0 %1163  ;;  %v1604_v21 = vmul.f32 %v5798_v8, %v1600_v57  ;;  %v1612_v37 = vrot.slane %v1603_v40, 5  ;;  %v1641_v57 = vmul.f32 %v5787_v17, %v1640_v38  ;;  %v1645_v40 = vmul.f32 %v5798_v8, %v1640_v38 }
 0x1ee   :  { %8951 = vst [vmem:[#allocation97_spill] sm:$0xff] %v5995_v15  ;;  %1585 = vrot.lane.b32.xlu1 %v1573_v34, %s5023_s24 }
 0x1ef   :  { %1583 = vrot.lane.b32.xlu0 %v1574_v31, %s5023_s24  ;;  %v1642_v31 = vmul.f32 %v5832_v56, %v1640_v38  ;;  %v1659_v2 = vrot.slane %v1645_v40, 1  ;;  %v1685_v40 = vmul.f32 %v5798_v8, %v1680_v50 }
 0x1f0   :  { %v6000_v7 = vpop.permute.xlu1 %1169 }
 0x1f1   :  { %8952 = vst [vmem:[#allocation98_spill] sm:$0xff] %v6000_v7  ;;  %v6002_v3 = vpop.permute.xlu0 %1167  ;;  %v1613_v7 = vrot.slane %v1604_v21, 5  ;;  %v1654_v15 = vrot.slane %v1642_v31, 1  ;;  %v1644_v21 = vmul.f32 %v5794_v13, %v1640_v38  ;;  %v1683_v31 = vmul.f32 %v5859_v41, %v1680_v50 }
 0x1f2   :  { %8953 = vst [vmem:[#allocation99_spill] sm:$0xff] %v6002_v3  ;;  %1617 = vrot.lane.b32.xlu1 %v1611_v60, %s5024_s4  ;;  %v1643_v3 = vmul.f32 %v5859_v41, %v1640_v38  ;;  %v1661_v38 = vrot.slane %v1646_v16, 1  ;;  %v1684_v16 = vmul.f32 %v5794_v13, %v1680_v50 }
 0x1f3   :  { %1615 = vrot.lane.b32.xlu0 %v1609_v62, %s5024_s4  ;;  %v1658_v9 = vrot.slane %v1644_v21, 1 }
 0x1f4   :  { %v6009_v34 = vpop.permute.xlu1 %1205 }
 0x1f5   :  { %8954 = vst [vmem:[#allocation100_spill] sm:$0xff] %v6009_v34  ;;  %v6011_v18 = vpop.permute.xlu0 %1203  ;;  %v1656_v34 = vrot.slane %v1643_v3, 1 }
 0x1f6   :  { %8955 = vst [vmem:[#allocation101_spill] sm:$0xff] %v6011_v18  ;;  %1621 = vrot.lane.b32.xlu1 %v1612_v37, %s5024_s4  ;;  %v1614_v18 = vsel %vm383_vm8, %v1612_v37, %v1613_v7  ;;  %v1682_v37 = vmul.f32 %v5832_v56, %v1680_v50 }
 0x1f7   :  { %1619 = vrot.lane.b32.xlu0 %v1610_v1, %s5024_s4  ;;  %v1653_v1 = vrot.slane %v1641_v57, 1  ;;  %v1657_v3 = vsel %vm428_vm10, %v1654_v15, %v1656_v34 }
 0x1f8   :  { %v6018_v60 = vpop.permute.xlu1 %1209  ;;  %v1694_v34 = vrot.slane %v1682_v37, 1 }
 0x1f9   :  { %8956 = vst [vmem:[#allocation102_spill] sm:$0xff] %v6018_v60  ;;  %v6020_v62 = vpop.permute.xlu0 %1207 }
 0x1fa   :  { %8957 = vst [vmem:[#allocation103_spill] sm:$0xff] %v6020_v62  ;;  %1625 = vrot.lane.b32.xlu1 %v1613_v7, %s5024_s4  ;;  %v1655_v62 = vsel %vm428_vm10, %v1653_v1, %v1654_v15  ;;  %v1681_v7 = vmul.f32 %v5787_v17, %v1680_v50  ;;  %v1660_v15 = vsel %vm428_vm10, %v1658_v9, %v1659_v2 }
 0x1fb   :  { %1623 = vrot.lane.b32.xlu0 %v1614_v18, %s5024_s4  ;;  %v1686_v9 = vmul.f32 %v5809_v39, %v1680_v50 }
 0x1fc   :  { %v6028_v10 = vpop.permute.xlu1 %1213 }
 0x1fd   :  { %8958 = vst [vmem:[#allocation104_spill] sm:$0xff] %v6028_v10  ;;  %v6030_v60 = vpop.permute.xlu0 %1211  ;;  %v1662_v10 = vsel %vm428_vm10, %v1659_v2, %v1661_v38  ;;  %v1699_v38 = vrot.slane %v1685_v40, 1 }
 0x1fe   :  { %8959 = vst [vmem:[#allocation105_spill] sm:$0xff] %v6030_v60  ;;  %1665 = vrot.lane.b32.xlu1 %v1657_v3, %s5024_s4  ;;  %v1696_v60 = vrot.slane %v1683_v31, 1  ;;  %v1698_v31 = vrot.slane %v1684_v16, 1 }
 0x1ff   :  { %1663 = vrot.lane.b32.xlu0 %v1655_v62, %s5024_s4  ;;  %v1693_v62 = vrot.slane %v1681_v7, 1 }
 0x200   :  { %v6039_v18 = vpop.permute.xlu1 %1253  ;;  %v1697_v3 = vsel %vm428_vm10, %v1694_v34, %v1696_v60 }
 0x201   :  { %8960 = vst [vmem:[#allocation106_spill] sm:$0xff] %v6039_v18  ;;  %v6041_v57 = vpop.permute.xlu0 %1251  ;;  %v1695_v37 = vsel %vm428_vm10, %v1693_v62, %v1694_v34 }
 0x202   :  { %8961 = vst [vmem:[#allocation107_spill] sm:$0xff] %v6041_v57  ;;  %1669 = vrot.lane.b32.xlu1 %v1662_v10, %s5024_s4  ;;  %v1728_v10 = vstv %s4816_s6  ;;  %s4848_s6 = sld [smem:[#allocation9 + $0x34]] }
 0x203   :  { %1667 = vrot.lane.b32.xlu0 %v1660_v15, %s5024_s4  ;;  %v1730_v15 = vmul.f32 %v5832_v56, %v1728_v10  ;;  %v1731_v34 = vmul.f32 %v5859_v41, %v1728_v10  ;;  %v1729_v50 = vmul.f32 %v5787_v17, %v1728_v10 }
 0x204   :  { %v6049_v21 = vpop.permute.xlu1 %1257 }
 0x205   :  { %8962 = vst [vmem:[#allocation108_spill] sm:$0xff] %v6049_v21  ;;  %v6051_v1 = vpop.permute.xlu0 %1255  ;;  %v1701_v21 = vrot.slane %v1686_v9, 1  ;;  %v1742_v62 = vrot.slane %v1730_v15, 1  ;;  %v1733_v9 = vmul.f32 %v5798_v8, %v1728_v10 }
 0x206   :  { %8963 = vst [vmem:[#allocation109_spill] sm:$0xff] %v6051_v1  ;;  %1705 = vrot.lane.b32.xlu1 %v1697_v3, %s5024_s4  ;;  %v1700_v1 = vsel %vm428_vm10, %v1698_v31, %v1699_v38  ;;  %v1732_v31 = vmul.f32 %v5794_v13, %v1728_v10 }
 0x207   :  { %1703 = vrot.lane.b32.xlu0 %v1695_v37, %s5024_s4  ;;  %v1702_v3 = vsel %vm428_vm10, %v1699_v38, %v1701_v21  ;;  %v1744_v37 = vrot.slane %v1731_v34, 1  ;;  %v1747_v57 = vrot.slane %v1733_v9, 1 }
 0x208   :  { %v6058_v2 = vpop.permute.xlu1 %1261  ;;  %v1746_v34 = vrot.slane %v1732_v31, 1 }
 0x209   :  { %8964 = vst [vmem:[#allocation110_spill] sm:$0xff] %v6058_v2  ;;  %v6060_v7 = vpop.permute.xlu0 %1259  ;;  %v1734_v2 = vmul.f32 %v5809_v39, %v1728_v10  ;;  %v1745_v15 = vsel %vm428_vm10, %v1742_v62, %v1744_v37 }
 0x20a   :  { %8965 = vst [vmem:[#allocation111_spill] sm:$0xff] %v6060_v7  ;;  %1709 = vrot.lane.b32.xlu1 %v1700_v1, %s5024_s4  ;;  %v1748_v18 = vsel %vm428_vm10, %v1746_v34, %v1747_v57 }
 0x20b   :  { %1707 = vrot.lane.b32.xlu0 %v1696_v60, %s5024_s4  ;;  %v1741_v60 = vrot.slane %v1729_v50, 1  ;;  %v1776_v50 = vstv %s4817_s7  ;;  %s4849_s7 = sld [smem:[#allocation9 + $0x3b]] }
 0x20c   :  { %v6068_v16 = vpop.permute.xlu1 %1301  ;;  %v1778_v10 = vmul.f32 %v5832_v56, %v1776_v50  ;;  %v1781_v34 = vmul.f32 %v5798_v8, %v1776_v50 }
 0x20d   :  { %8966 = vst [vmem:[#allocation112_spill] sm:$0xff] %v6068_v16  ;;  %v6070_v40 = vpop.permute.xlu0 %1299  ;;  %v1743_v38 = vsel %vm428_vm10, %v1741_v60, %v1742_v62  ;;  %v1777_v62 = vmul.f32 %v5787_v17, %v1776_v50  ;;  %v1780_v60 = vmul.f32 %v5794_v13, %v1776_v50 }
 0x20e   :  { %8967 = vst [vmem:[#allocation113_spill] sm:$0xff] %v6070_v40  ;;  %1713 = vrot.lane.b32.xlu1 %v1701_v21, %s5024_s4  ;;  %v1795_v40 = vrot.slane %v1781_v34, 1 }
 0x20f   :  { %1711 = vrot.lane.b32.xlu0 %v1702_v3, %s5024_s4 }
 0x210   :  { %v6077_v1 = vpop.permute.xlu1 %1305 }
 0x211   :  { %8968 = vst [vmem:[#allocation114_spill] sm:$0xff] %v6077_v1  ;;  %v6079_v7 = vpop.permute.xlu0 %1303  ;;  %v1779_v1 = vmul.f32 %v5859_v41, %v1776_v50 }
 0x212   :  { %8969 = vst [vmem:[#allocation115_spill] sm:$0xff] %v6079_v7  ;;  %1753 = vrot.lane.b32.xlu1 %v1745_v15, %s5024_s4  ;;  %v1749_v7 = vrot.slane %v1734_v2, 1  ;;  %v1790_v2 = vrot.slane %v1778_v10, 1 }
 0x213   :  { %1751 = vrot.lane.b32.xlu0 %v1743_v38, %s5024_s4  ;;  %v1792_v38 = vrot.slane %v1779_v1, 1 }
 0x214   :  { %v6086_v21 = vpop.permute.xlu1 %1309  ;;  %v1750_v15 = vsel %vm428_vm10, %v1747_v57, %v1749_v7  ;;  %v1782_v57 = vmul.f32 %v5809_v39, %v1776_v50 }
 0x215   :  { %8970 = vst [vmem:[#allocation116_spill] sm:$0xff] %v6086_v21  ;;  %v6088_v3 = vpop.permute.xlu0 %1307 }
 0x216   :  { %8971 = vst [vmem:[#allocation117_spill] sm:$0xff] %v6088_v3  ;;  %1757 = vrot.lane.b32.xlu1 %v1748_v18, %s5024_s4  ;;  %v1789_v18 = vrot.slane %v1777_v62, 1 }
 0x217   :  { %1755 = vrot.lane.b32.xlu0 %v1744_v37, %s5024_s4 }
 0x218   :  { %v6096_v31 = vpop.permute.xlu1 %1335  ;;  %v1791_v21 = vsel %vm428_vm10, %v1789_v18, %v1790_v2 }
 0x219   :  { %8972 = vst [vmem:[#allocation118_spill] sm:$0xff] %v6096_v31  ;;  %v6098_v9 = vpop.permute.xlu0 %1333  ;;  %v1794_v31 = vrot.slane %v1780_v60, 1 }
 0x21a   :  { %8973 = vst [vmem:[#allocation119_spill] sm:$0xff] %v6098_v9  ;;  %1761 = vrot.lane.b32.xlu1 %v1749_v7, %s5024_s4  ;;  %v1793_v9 = vsel %vm428_vm10, %v1790_v2, %v1792_v38  ;;  %v1824_v7 = vstv %s4818_s9  ;;  %s4851_s9 = sld [smem:[#allocation9 + $0x49]] }
 0x21b   :  { %1759 = vrot.lane.b32.xlu0 %v1750_v15, %s5024_s4  ;;  %v1826_v62 = vmul.f32 %v5832_v56, %v1824_v7  ;;  %v1796_v60 = vsel %vm428_vm10, %v1794_v31, %v1795_v40  ;;  %v1797_v15 = vrot.slane %v1782_v57, 1  ;;  %v1827_v2 = vmul.f32 %v5859_v41, %v1824_v7 }
 0x21c   :  { %v6105_v37 = vpop.permute.xlu1 %1339  ;;  %v1825_v50 = vmul.f32 %v5787_v17, %v1824_v7  ;;  %v1829_v18 = vmul.f32 %v5798_v8, %v1824_v7  ;;  %v1830_v31 = vmul.f32 %v5809_v39, %v1824_v7  ;;  %v1828_v57 = vmul.f32 %v5794_v13, %v1824_v7 }
 0x21d   :  { %8974 = vst [vmem:[#allocation120_spill] sm:$0xff] %v6105_v37  ;;  %v6107_v3 = vpop.permute.xlu0 %1337  ;;  %v1838_v34 = vrot.slane %v1826_v62, 5 }
 0x21e   :  { %8975 = vst [vmem:[#allocation121_spill] sm:$0xff] %v6107_v3  ;;  %1801 = vrot.lane.b32.xlu1 %v1793_v9, %s5024_s4  ;;  %v1843_v62 = vrot.slane %v1829_v18, 5  ;;  %v1845_v7 = vrot.slane %v1830_v31, 5  ;;  %v1842_v16 = vrot.slane %v1828_v57, 5 }
 0x21f   :  { %1799 = vrot.lane.b32.xlu0 %v1791_v21, %s5024_s4 }
 0x220   :  { %v6114_v1 = vpop.permute.xlu1 %1365 }
 0x221   :  { %8976 = vst [vmem:[#allocation122_spill] sm:$0xff] %v6114_v1  ;;  %v6116_v10 = vpop.permute.xlu0 %1363  ;;  %v1840_v1 = vrot.slane %v1827_v2, 5 }
 0x222   :  { %8977 = vst [vmem:[#allocation123_spill] sm:$0xff] %v6116_v10  ;;  %1805 = vrot.lane.b32.xlu1 %v1796_v60, %s5024_s4  ;;  %v1798_v10 = vsel %vm428_vm10, %v1795_v40, %v1797_v15  ;;  %v1864_v60 = vstv %s4819_s10  ;;  %s4852_s10 = sld [smem:[#allocation9 + $0x50]] }
 0x223   :  { %1803 = vrot.lane.b32.xlu0 %v1792_v38, %s5024_s4  ;;  %v1837_v38 = vrot.slane %v1825_v50, 5  ;;  %v1867_v40 = vmul.f32 %v5859_v41, %v1864_v60  ;;  %v1841_v2 = vsel %vm383_vm8, %v1838_v34, %v1840_v1  ;;  %v1844_v1 = vsel %vm383_vm8, %v1842_v16, %v1843_v62 }
 0x224   :  { %v6124_v21 = vpop.permute.xlu1 %1369  ;;  %v1869_v31 = vmul.f32 %v5798_v8, %v1864_v60  ;;  %v1870_v16 = vmul.f32 %v5809_v39, %v1864_v60 }
 0x225   :  { %8978 = vst [vmem:[#allocation124_spill] sm:$0xff] %v6124_v21  ;;  %v6126_v9 = vpop.permute.xlu0 %1367  ;;  %v1839_v21 = vsel %vm383_vm8, %v1837_v38, %v1838_v34  ;;  %v1868_v34 = vmul.f32 %v5794_v13, %v1864_v60 }
 0x226   :  { %8979 = vst [vmem:[#allocation125_spill] sm:$0xff] %v6126_v9  ;;  %1809 = vrot.lane.b32.xlu1 %v1797_v15, %s5024_s4  ;;  %v1866_v9 = vmul.f32 %v5832_v56, %v1864_v60 }
 0x227   :  { %1807 = vrot.lane.b32.xlu0 %v1798_v10, %s5024_s4  ;;  %v1865_v10 = vmul.f32 %v5787_v17, %v1864_v60 }
 0x228   :  { %v6134_v3 = vpop.permute.xlu1 %1373  ;;  %v1878_v18 = vrot.slane %v1866_v9, 5 }
 0x229   :  { %8980 = vst [vmem:[#allocation126_spill] sm:$0xff] %v6134_v3  ;;  %v6136_v37 = vpop.permute.xlu0 %1371  ;;  %v1846_v3 = vsel %vm383_vm8, %v1843_v62, %v1845_v7  ;;  %v1883_v7 = vrot.slane %v1869_v31, 5 }
 0x22a   :  { %8981 = vst [vmem:[#allocation127_spill] sm:$0xff] %v6136_v37  ;;  %1849 = vrot.lane.b32.xlu1 %v1841_v2, %s5024_s4  ;;  %v1880_v37 = vrot.slane %v1867_v40, 5  ;;  %v1882_v2 = vrot.slane %v1868_v34, 5 }
 0x22b   :  { %1847 = vrot.lane.b32.xlu0 %v1839_v21, %s5024_s4  ;;  %v1877_v21 = vrot.slane %v1865_v10, 5  ;;  %v1912_v10 = vstv %s4820_s11  ;;  %s4853_s11 = sld [smem:[#allocation9 + $0x57]] }
 0x22c   :  { %v6145_v15 = vpop.permute.xlu1 %1403  ;;  %v1881_v9 = vsel %vm383_vm8, %v1878_v18, %v1880_v37  ;;  %v1913_v60 = vmul.f32 %v5787_v17, %v1912_v10 }
 0x22d   :  { %8982 = vst [vmem:[#allocation128_spill] sm:$0xff] %v6145_v15  ;;  %v6147_v50 = vpop.permute.xlu0 %1401  ;;  %v1879_v40 = vsel %vm383_vm8, %v1877_v21, %v1878_v18 }
 0x22e   :  { %8983 = vst [vmem:[#allocation129_spill] sm:$0xff] %v6147_v50  ;;  %1853 = vrot.lane.b32.xlu1 %v1846_v3, %s5024_s4 }
 0x22f   :  { %1851 = vrot.lane.b32.xlu0 %v1844_v1, %s5024_s4  ;;  %v1884_v1 = vsel %vm383_vm8, %v1882_v2, %v1883_v7 }
 0x230   :  { %v6155_v57 = vpop.permute.xlu1 %1407 }
 0x231   :  { %8984 = vst [vmem:[#allocation130_spill] sm:$0xff] %v6155_v57  ;;  %v6157_v38 = vpop.permute.xlu0 %1405  ;;  %v1914_v57 = vmul.f32 %v5832_v56, %v1912_v10 }
 0x232   :  { %8985 = vst [vmem:[#allocation131_spill] sm:$0xff] %v6157_v38  ;;  %1889 = vrot.lane.b32.xlu1 %v1881_v9, %s5024_s4  ;;  %v1885_v38 = vrot.slane %v1870_v16, 5  ;;  %v1921_v9 = vrot.slane %v1913_v60, 6  ;;  %v1952_v60 = vstv %s4821_s12  ;;  %s4854_s12 = sld [smem:[#allocation9 + $0x5e]] }
 0x233   :  { %1887 = vrot.lane.b32.xlu0 %v1879_v40, %s5024_s4  ;;  %v1922_v21 = vrot.slane %v1914_v57, 6 }
 0x234   :  { %v6164_v3 = vpop.permute.xlu1 %1411  ;;  %v1886_v31 = vsel %vm383_vm8, %v1883_v7, %v1885_v38 }
 0x235   :  { %8986 = vst [vmem:[#allocation132_spill] sm:$0xff] %v6164_v3  ;;  %v6166_v62 = vpop.permute.xlu0 %1409  ;;  %v1923_v16 = vsel %vm697_vm7, %v1921_v9, %v1922_v21 }
 0x236   :  { %8987 = vst [vmem:[#allocation133_spill] sm:$0xff] %v6166_v62  ;;  %1893 = vrot.lane.b32.xlu1 %v1884_v1, %s5024_s4  ;;  %v1916_v1 = vmul.f32 %v5798_v8, %v1912_v10  ;;  %v1954_v62 = vmul.f32 %v5832_v56, %v1952_v60 }
 0x237   :  { %1891 = vrot.lane.b32.xlu0 %v1880_v37, %s5024_s4  ;;  %v1915_v37 = vmul.f32 %v5794_v13, %v1912_v10  ;;  %v1953_v10 = vmul.f32 %v5787_v17, %v1952_v60 }
 0x238   :  { %v6173_v18 = vpop.permute.xlu1 %1441  ;;  %v1966_v50 = vrot.slane %v1954_v62, 6 }
 0x239   :  { %8988 = vst [vmem:[#allocation134_spill] sm:$0xff] %v6173_v18  ;;  %v6175_v34 = vpop.permute.xlu0 %1439  ;;  %v1924_v7 = vrot.slane %v1915_v37, 6  ;;  %v1955_v37 = vmul.f32 %v5859_v41, %v1952_v60 }
 0x23a   :  { %8989 = vst [vmem:[#allocation135_spill] sm:$0xff] %v6175_v34  ;;  %1897 = vrot.lane.b32.xlu1 %v1885_v38, %s5024_s4 }
 0x23b   :  { %1895 = vrot.lane.b32.xlu0 %v1886_v31, %s5024_s4  ;;  %v1925_v31 = vrot.slane %v1916_v1, 6  ;;  %v1965_v1 = vrot.slane %v1953_v10, 6  ;;  %v1968_v62 = vrot.slane %v1955_v37, 6 }
 0x23c   :  { %v6180_v40 = vpop.permute.xlu1 %1445 }
 0x23d   :  { %8990 = vst [vmem:[#allocation136_spill] sm:$0xff] %v6180_v40  ;;  %v6182_v2 = vpop.permute.xlu0 %1443  ;;  %v1969_v40 = vsel %vm697_vm7, %v1966_v50, %v1968_v62 }
 0x23e   :  { %8991 = vst [vmem:[#allocation137_spill] sm:$0xff] %v6182_v2  ;;  %1929 = vrot.lane.b32.xlu1 %v1923_v16, %s5025_s13 }
 0x23f   :  { %1927 = vrot.lane.b32.xlu0 %v1921_v9, %s5025_s13  ;;  %v1926_v9 = vsel %vm697_vm7, %v1924_v7, %v1925_v31 }
 0x240   :  { %v6189_v57 = vpop.permute.xlu1 %1449 }
 0x241   :  { %8992 = vst [vmem:[#allocation138_spill] sm:$0xff] %v6189_v57  ;;  %v6191_v38 = vpop.permute.xlu0 %1447  ;;  %v1956_v57 = vmul.f32 %v5794_v13, %v1952_v60 }
 0x242   :  { %8993 = vst [vmem:[#allocation139_spill] sm:$0xff] %v6191_v38  ;;  %1933 = vrot.lane.b32.xlu1 %v1924_v7, %s5025_s13  ;;  %v1967_v7 = vsel %vm697_vm7, %v1965_v1, %v1966_v50  ;;  %v2000_v38 = vstv %s4822_s14  ;;  %s4855_s14 = sld [smem:[#allocation9 + $0x35]] }
 0x243   :  { %1931 = vrot.lane.b32.xlu0 %v1922_v21, %s5025_s13  ;;  %v2003_v2 = vmul.f32 %v5859_v41, %v2000_v38  ;;  %v2001_v37 = vmul.f32 %v5787_v17, %v2000_v38  ;;  %v2006_v50 = vmul.f32 %v5809_v39, %v2000_v38 }
 0x244   :  { %v6197_v3 = vpop.permute.xlu1 %1489 }
 0x245   :  { %8994 = vst [vmem:[#allocation140_spill] sm:$0xff] %v6197_v3  ;;  %v6199_v16 = vpop.permute.xlu0 %1487  ;;  %v1957_v3 = vmul.f32 %v5798_v8, %v1952_v60  ;;  %v2021_v34 = vrot.slane %v2006_v50, 2 }
 0x246   :  { %8995 = vst [vmem:[#allocation141_spill] sm:$0xff] %v6199_v16  ;;  %1937 = vrot.lane.b32.xlu1 %v1925_v31, %s5025_s13  ;;  %v1958_v16 = vmul.f32 %v5809_v39, %v1952_v60  ;;  %v2002_v60 = vmul.f32 %v5832_v56, %v2000_v38 }
 0x247   :  { %1935 = vrot.lane.b32.xlu0 %v1926_v9, %s5025_s13  ;;  %v1970_v9 = vrot.slane %v1956_v57, 6  ;;  %v2005_v57 = vmul.f32 %v5798_v8, %v2000_v38 }
 0x248   :  { %v6205_v15 = vpop.permute.xlu1 %1493  ;;  %v2014_v62 = vrot.slane %v2002_v60, 2 }
 0x249   :  { %8996 = vst [vmem:[#allocation142_spill] sm:$0xff] %v6205_v15  ;;  %v6207_v21 = vpop.permute.xlu0 %1491  ;;  %v1973_v15 = vrot.slane %v1958_v16, 6 }
 0x24a   :  { %8997 = vst [vmem:[#allocation143_spill] sm:$0xff] %v6207_v21  ;;  %1977 = vrot.lane.b32.xlu1 %v1967_v7, %s5025_s13  ;;  %v1971_v21 = vrot.slane %v1957_v3, 6 }
 0x24b   :  { %1975 = vrot.lane.b32.xlu0 %v1965_v1, %s5025_s13 }
 0x24c   :  { %v6215_v31 = vpop.permute.xlu1 %1529  ;;  %v1974_v3 = vsel %vm697_vm7, %v1971_v21, %v1973_v15  ;;  %v1972_v16 = vsel %vm697_vm7, %v1970_v9, %v1971_v21  ;;  %v2019_v15 = vrot.slane %v2005_v57, 2 }
 0x24d   :  { %8998 = vst [vmem:[#allocation144_spill] sm:$0xff] %v6215_v31  ;;  %v6217_v10 = vpop.permute.xlu0 %1527  ;;  %v2004_v31 = vmul.f32 %v5794_v13, %v2000_v38 }
 0x24e   :  { %8999 = vst [vmem:[#allocation145_spill] sm:$0xff] %v6217_v10  ;;  %1981 = vrot.lane.b32.xlu1 %v1970_v9, %s5025_s13  ;;  %v2016_v10 = vrot.slane %v2003_v2, 2  ;;  %v2022_v57 = vsel %vm790_vm9, %v2019_v15, %v2021_v34 }
 0x24f   :  { %1979 = vrot.lane.b32.xlu0 %v1969_v40, %s5025_s13  ;;  %v2013_v40 = vrot.slane %v2001_v37, 2  ;;  %v2018_v9 = vrot.slane %v2004_v31, 2 }
 0x250   :  { %v6225_v1 = vpop.permute.xlu1 %1533  ;;  %v2017_v21 = vsel %vm790_vm9, %v2014_v62, %v2016_v10 }
 0x251   :  { %9000 = vst [vmem:[#allocation146_spill] sm:$0xff] %v6225_v1  ;;  %v6227_v7 = vpop.permute.xlu0 %1531  ;;  %v2040_v1 = vstv %s4823_s15  ;;  %v2015_v2 = vsel %vm790_vm9, %v2013_v40, %v2014_v62  ;;  %v2020_v10 = vsel %vm790_vm9, %v2018_v9, %v2019_v15  ;;  %s4856_s15 = sld [smem:[#allocation9 + $0x3c]] }
 0x252   :  { %9001 = vst [vmem:[#allocation147_spill] sm:$0xff] %v6227_v7  ;;  %1985 = vrot.lane.b32.xlu1 %v1974_v3, %s5025_s13  ;;  %v2042_v53 = vmul.f32 %v5832_v56, %v2040_v1  ;;  %v2043_v38 = vmul.f32 %v5859_v41, %v2040_v1  ;;  %v2041_v60 = vmul.f32 %v5787_v17, %v2040_v1 }
 0x253   :  { %1983 = vrot.lane.b32.xlu0 %v1972_v16, %s5025_s13  ;;  %v2044_v50 = vmul.f32 %v5794_v13, %v2040_v1  ;;  %v2045_v62 = vmul.f32 %v5798_v8, %v2040_v1 }
 0x254   :  { %v6236_v18 = vpop.permute.xlu1 %1537  ;;  %v2054_v31 = vrot.slane %v2042_v53, 2  ;;  %v2056_v16 = vrot.slane %v2043_v38, 2  ;;  %v2053_v40 = vrot.slane %v2041_v60, 2  ;;  %v2046_v53 = vmul.f32 %v5809_v39, %v2040_v1 }
 0x255   :  { %9002 = vst [vmem:[#allocation148_spill] sm:$0xff] %v6236_v18  ;;  %v6238_v7 = vpop.permute.xlu0 %1535  ;;  %v2088_v38 = vstv %s4824_s16  ;;  %s4858_s16 = sld [smem:[#allocation9 + $0x4a]] }
 0x256   :  { %9003 = vst [vmem:[#allocation149_spill] sm:$0xff] %v6238_v7  ;;  %2025 = vrot.lane.b32.xlu1 %v2017_v21, %s5025_s13  ;;  %v2057_v34 = vsel %vm790_vm9, %v2054_v31, %v2056_v16  ;;  %v2059_v7 = vrot.slane %v2045_v62, 2  ;;  %v2089_v1 = vmul.f32 %v5787_v17, %v2088_v38  ;;  %v2092_v62 = vmul.f32 %v5794_v13, %v2088_v38 }
 0x257   :  { %2023 = vrot.lane.b32.xlu0 %v2015_v2, %s5025_s13 }
 0x258   :  { %v6247_v37 = vpop.permute.xlu1 %1577 }
 0x259   :  { %9004 = vst [vmem:[#allocation150_spill] sm:$0xff] %v6247_v37  ;;  %v6249_v3 = vpop.permute.xlu0 %1575  ;;  %v2055_v37 = vsel %vm790_vm9, %v2053_v40, %v2054_v31 }
 0x25a   :  { %9005 = vst [vmem:[#allocation151_spill] sm:$0xff] %v6249_v3  ;;  %2029 = vrot.lane.b32.xlu1 %v2022_v57, %s5025_s13  ;;  %v2058_v3 = vrot.slane %v2044_v50, 2  ;;  %v2061_v57 = vrot.slane %v2046_v53, 2  ;;  %v2090_v50 = vmul.f32 %v5832_v56, %v2088_v38  ;;  %v2093_v53 = vmul.f32 %v5798_v8, %v2088_v38 }
 0x25b   :  { %2027 = vrot.lane.b32.xlu0 %v2020_v10, %s5025_s13  ;;  %v2091_v10 = vmul.f32 %v5859_v41, %v2088_v38  ;;  %v2136_v8 = vstv %s4825_s18  ;;  %s4859_s18 = sld [smem:[#allocation9 + $0x51]] }
 0x25c   :  { %v6257_v21 = vpop.permute.xlu1 %1581  ;;  %v2060_v60 = vsel %vm790_vm9, %v2058_v3, %v2059_v7  ;;  %v2062_v3 = vsel %vm790_vm9, %v2059_v7, %v2061_v57  ;;  %v2102_v40 = vrot.slane %v2090_v50, 2  ;;  %v2094_v7 = vmul.f32 %v5809_v39, %v2088_v38  ;;  %v4927_v39 = vld [vmem:[#allocation4] sm:$0xff] }
 0x25d   :  { %9006 = vst [vmem:[#allocation152_spill] sm:$0xff] %v6257_v21  ;;  %v6259_v2 = vpop.permute.xlu0 %1579 }
 0x25e   :  { %9007 = vst [vmem:[#allocation153_spill] sm:$0xff] %v6259_v2  ;;  %2065 = vrot.lane.b32.xlu1 %v2057_v34, %s5025_s13  ;;  %v2104_v34 = vrot.slane %v2091_v10, 2  ;;  %v2107_v2 = vrot.slane %v2093_v53, 2  ;;  %v2138_v10 = vmul.f32 %v5832_v56, %v2136_v8 }
 0x25f   :  { %2063 = vrot.lane.b32.xlu0 %v2055_v37, %s5025_s13 }
 0x260   :  { %v6266_v15 = vpop.permute.xlu1 %1585  ;;  %v2150_v53 = vrot.slane %v2138_v10, 2 }
 0x261   :  { %9008 = vst [vmem:[#allocation154_spill] sm:$0xff] %v6266_v15  ;;  %v6268_v9 = vpop.permute.xlu0 %1583  ;;  %v2105_v15 = vsel %vm790_vm9, %v2102_v40, %v2104_v34 }
 0x262   :  { %9009 = vst [vmem:[#allocation155_spill] sm:$0xff] %v6268_v9  ;;  %2069 = vrot.lane.b32.xlu1 %v2060_v60, %s5025_s13  ;;  %v2106_v9 = vrot.slane %v2092_v62, 2  ;;  %v2109_v62 = vrot.slane %v2094_v7, 2  ;;  %v4929_v7 = vld [vmem:[#allocation4 + $0x20] sm:$0xff] }
 0x263   :  { %2067 = vrot.lane.b32.xlu0 %v2056_v16, %s5025_s13  ;;  %v2101_v16 = vrot.slane %v2089_v1, 2  ;;  %v2141_v21 = vmul.f32 %v4929_v7, %v2136_v8 }
 0x264   :  { %v6276_v37 = vpop.permute.xlu1 %1617  ;;  %v2108_v1 = vsel %vm790_vm9, %v2106_v9, %v2107_v2 }
 0x265   :  { %9010 = vst [vmem:[#allocation156_spill] sm:$0xff] %v6276_v37  ;;  %v6278_v31 = vpop.permute.xlu0 %1615  ;;  %v2103_v13 = vsel %vm790_vm9, %v2101_v16, %v2102_v40  ;;  %v2110_v16 = vsel %vm790_vm9, %v2107_v2, %v2109_v62 }
 0x266   :  { %9011 = vst [vmem:[#allocation157_spill] sm:$0xff] %v6278_v31  ;;  %2073 = vrot.lane.b32.xlu1 %v2061_v57, %s5025_s13 }
 0x267   :  { %2071 = vrot.lane.b32.xlu0 %v2062_v3, %s5025_s13  ;;  %v2139_v3 = vmul.f32 %v5859_v41, %v2136_v8 }
 0x268   :  { %v6285_v60 = vpop.permute.xlu1 %1621 }
 0x269   :  { %9012 = vst [vmem:[#allocation158_spill] sm:$0xff] %v6285_v60  ;;  %v6287_v17 = vpop.permute.xlu0 %1619  ;;  %v2152_v56 = vrot.slane %v2139_v3, 2 }
 0x26a   :  { %9013 = vst [vmem:[#allocation159_spill] sm:$0xff] %v6287_v17  ;;  %2113 = vrot.lane.b32.xlu1 %v2105_v15, %s5025_s13  ;;  %v2137_v15 = vmul.f32 %v4927_v39, %v2136_v8 }
 0x26b   :  { %2111 = vrot.lane.b32.xlu0 %v2103_v13, %s5025_s13  ;;  %v4928_v13 = vld [vmem:[#allocation4 + $0x18] sm:$0xff]  ;;  %v2153_v10 = vsel %vm790_vm9, %v2150_v53, %v2152_v56 }
 0x26c   :  { %v6294_v57 = vpop.permute.xlu1 %1625  ;;  %v2140_v9 = vmul.f32 %v4928_v13, %v2136_v8 }
 0x26d   :  { %9014 = vst [vmem:[#allocation160_spill] sm:$0xff] %v6294_v57  ;;  %v6296_v50 = vpop.permute.xlu0 %1623 }
 0x26e   :  { %9015 = vst [vmem:[#allocation161_spill] sm:$0xff] %v6296_v50  ;;  %2117 = vrot.lane.b32.xlu1 %v2108_v1, %s5025_s13  ;;  %v2154_v3 = vrot.slane %v2140_v9, 2 }
 0x26f   :  { %2115 = vrot.lane.b32.xlu0 %v2104_v34, %s5025_s13  ;;  %v2149_v34 = vrot.slane %v2137_v15, 2 }
 0x270   :  { %v6303_v38 = vpop.permute.xlu1 %1665 }
 0x271   :  { %9016 = vst [vmem:[#allocation162_spill] sm:$0xff] %v6303_v38  ;;  %v6305_v40 = vpop.permute.xlu0 %1663  ;;  %v4930_v38 = vld [vmem:[#allocation4 + $0x28] sm:$0x3f]  ;;  %v2151_v2 = vsel %vm790_vm9, %v2149_v34, %v2150_v53 }
 0x272   :  { %9017 = vst [vmem:[#allocation163_spill] sm:$0xff] %v6305_v40  ;;  %2121 = vrot.lane.b32.xlu1 %v2109_v62, %s5025_s13  ;;  %v2142_v57 = vmul.f32 %v4930_v38, %v2136_v8  ;;  %v2155_v40 = vrot.slane %v2141_v21, 2  ;;  %v2184_v62 = vstv %s4826_s19  ;;  %s4860_s19 = sld [smem:[#allocation9 + $0x58]] }
 0x273   :  { %2119 = vrot.lane.b32.xlu0 %v2110_v16, %s5025_s13  ;;  %v4931_v16 = vld [vmem:[#allocation4 + $0x8] sm:$0xff]  ;;  %v2185_v21 = vmul.f32 %v4927_v39, %v2184_v62 }
 0x274   :  { %v6310_v1 = vpop.permute.xlu1 %1669  ;;  %v2156_v8 = vsel %vm790_vm9, %v2154_v3, %v2155_v40  ;;  %v2157_v60 = vrot.slane %v2142_v57, 2 }
 0x275   :  { %9018 = vst [vmem:[#allocation164_spill] sm:$0xff] %v6310_v1  ;;  %v6312_v18 = vpop.permute.xlu0 %1667  ;;  %v2186_v1 = vmul.f32 %v4931_v16, %v2184_v62  ;;  %v2190_v16 = vmul.f32 %v4930_v38, %v2184_v62 }
 0x276   :  { %9019 = vst [vmem:[#allocation165_spill] sm:$0xff] %v6312_v18  ;;  %2161 = vrot.lane.b32.xlu1 %v2153_v10, %s5025_s13  ;;  %v2187_v18 = vmul.f32 %v5859_v41, %v2184_v62  ;;  %v2197_v41 = vrot.slane %v2185_v21, 6  ;;  %v2470_v21 = vstv %s4834_s20  ;;  %s4861_s20 = sld [smem:[#allocation9 + $0x5f]] }
 0x277   :  { %2159 = vrot.lane.b32.xlu0 %v2151_v2, %s5025_s13  ;;  %v2198_v34 = vrot.slane %v2186_v1, 6  ;;  %v2158_v2 = vsel %vm790_vm9, %v2155_v40, %v2157_v60  ;;  %v2205_v3 = vrot.slane %v2190_v16, 6  ;;  %v6361_v16 = vld [vmem:[#allocation4 + $0x50] sm:$0xff] }
 0x278   :  { %v6318_v50 = vpop.permute.xlu1 %1705  ;;  %v2200_v10 = vrot.slane %v2187_v18, 6 }
 0x279   :  { %9020 = vst [vmem:[#allocation166_spill] sm:$0xff] %v6318_v50  ;;  %v6320_v15 = vpop.permute.xlu0 %1703  ;;  %v2188_v50 = vmul.f32 %v4928_v13, %v2184_v62  ;;  %v2199_v1 = vsel %vm697_vm7, %v2197_v41, %v2198_v34  ;;  %v6345_v13 = vld [vmem:[#allocation4 + $0x30] sm:$0xff] }
 0x27a   :  { %9021 = vst [vmem:[#allocation167_spill] sm:$0xff] %v6320_v15  ;;  %2165 = vrot.lane.b32.xlu1 %v2156_v8, %s5025_s13  ;;  %v2189_v15 = vmul.f32 %v4929_v7, %v2184_v62  ;;  %v6347_v7 = vld [vmem:[#allocation4 + $0x38] sm:$0xff] }
 0x27b   :  { %2163 = vrot.lane.b32.xlu0 %v2152_v56, %s5025_s13  ;;  %v2201_v56 = vsel %vm697_vm7, %v2198_v34, %v2200_v10  ;;  %v2202_v40 = vrot.slane %v2188_v50, 6  ;;  %v2472_v34 = vmul.f32 %v2470_v21, %v6347_v7  ;;  %v2471_v10 = vmul.f32 %v2470_v21, %v6345_v13 }
 0x27c   :  { %v6326_v53 = vpop.permute.xlu1 %1709  ;;  %v2203_v18 = vrot.slane %v2189_v15, 6 }
 0x27d   :  { %9022 = vst [vmem:[#allocation168_spill] sm:$0xff] %v6326_v53  ;;  %v6328_v9 = vpop.permute.xlu0 %1707 }
 0x27e   :  { %9023 = vst [vmem:[#allocation169_spill] sm:$0xff] %v6328_v9  ;;  %2169 = vrot.lane.b32.xlu1 %v2157_v60, %s5025_s13  ;;  %v2206_v62 = vsel %vm697_vm7, %v2203_v18, %v2205_v3  ;;  %v2204_v8 = vsel %vm697_vm7, %v2202_v40, %v2203_v18  ;;  %v2496_v3 = vstv %s4835_s21  ;;  %s4862_s21 = sld [smem:[#allocation9 + $0x36]] }
 0x27f   :  { %2167 = vrot.lane.b32.xlu0 %v2158_v2, %s5025_s13  ;;  %v6359_v2 = vld [vmem:[#allocation4 + $0x48] sm:$0xff] }
 0x280   :  { %v6333_v57 = vpop.permute.xlu1 %1713  ;;  %v2473_v18 = vmul.f32 %v2470_v21, %v6359_v2 }
 0x281   :  { %9024 = vst [vmem:[#allocation170_spill] sm:$0xff] %v6333_v57  ;;  %v6335_v39 = vpop.permute.xlu0 %1711 }
 0x282   :  { %9025 = vst [vmem:[#allocation171_spill] sm:$0xff] %v6335_v39  ;;  %2209 = vrot.lane.b32.xlu1 %v2201_v56, %s5025_s13 }
 0x283   :  { %2207 = vrot.lane.b32.xlu0 %v2199_v1, %s5025_s13  ;;  %v2474_v1 = vmul.f32 %v2470_v21, %v6361_v16 }
 0x284   :  { %v6341_v38 = vpop.permute.xlu1 %1753 }
 0x285   :  { %9026 = vst [vmem:[#allocation172_spill] sm:$0xff] %v6341_v38  ;;  %v6343_v60 = vpop.permute.xlu0 %1751 }
 0x286   :  { %9027 = vst [vmem:[#allocation173_spill] sm:$0xff] %v6343_v60  ;;  %2213 = vrot.lane.b32.xlu1 %v2206_v62, %s5025_s13  ;;  %v2534_v60 = vstv %s4836_s1  ;;  %s4863_s1 = sld [smem:[#allocation9 + $0x3d]] }
 0x287   :  { %2211 = vrot.lane.b32.xlu0 %v2204_v8, %s5025_s13  ;;  %v2498_v8 = vmul.f32 %v2496_v3, %v6347_v7  ;;  %v2535_v39 = vmul.f32 %v2534_v60, %v6345_v13 }
 0x288   :  { %v6353_v50 = vpop.permute.xlu1 %1757 }
 0x289   :  { %9028 = vst [vmem:[#allocation174_spill] sm:$0xff] %v6353_v50  ;;  %v6355_v15 = vpop.permute.xlu0 %1755  ;;  %v2501_v50 = vmul.f32 %v2496_v3, %v6361_v16 }
 0x28a   :  { %9029 = vst [vmem:[#allocation175_spill] sm:$0xff] %v6355_v15  ;;  %2481 = vrot.lane.b32.xlu1 %v2472_v34, %s5020_s30  ;;  %v2497_v34 = vmul.f32 %v2496_v3, %v6345_v13 }
 0x28b   :  { %2479 = vrot.lane.b32.xlu0 %v2471_v10, %s5020_s30  ;;  %v6381_v10 = vld [vmem:[#allocation4 + $0x40] sm:$0x3f] }
 0x28c   :  { %v6365_v41 = vpop.permute.xlu1 %1761 }
 0x28d   :  { %9030 = vst [vmem:[#allocation176_spill] sm:$0xff] %v6365_v41  ;;  %v6367_v56 = vpop.permute.xlu0 %1759  ;;  %v6391_v41 = vld [vmem:[#allocation4 + $0x58] sm:$0x3f] }
 0x28e   :  { %9031 = vst [vmem:[#allocation177_spill] sm:$0xff] %v6367_v56  ;;  %2485 = vrot.lane.b32.xlu1 %v2474_v1, %s5020_s30  ;;  %v2499_v56 = vmul.f32 %v2496_v3, %v6381_v10 }
 0x28f   :  { %2483 = vrot.lane.b32.xlu0 %v2473_v18, %s5020_s30  ;;  %v2500_v18 = vmul.f32 %v2496_v3, %v6359_v2 }
 0x290   :  { %v6373_v40 = vpop.permute.xlu1 %1801 }
 0x291   :  { %9032 = vst [vmem:[#allocation178_spill] sm:$0xff] %v6373_v40  ;;  %v6375_v62 = vpop.permute.xlu0 %1799 }
 0x292   :  { %9033 = vst [vmem:[#allocation179_spill] sm:$0xff] %v6375_v62  ;;  %2511 = vrot.lane.b32.xlu1 %v2498_v8, %s5020_s30 }
 0x293   :  { %2509 = vrot.lane.b32.xlu0 %v2497_v34, %s5020_s30  ;;  %v2502_v34 = vmul.f32 %v2496_v3, %v6391_v41 }
 0x294   :  { %v6383_v21 = vpop.permute.xlu1 %1805 }
 0x295   :  { %9034 = vst [vmem:[#allocation180_spill] sm:$0xff] %v6383_v21  ;;  %v6385_v1 = vpop.permute.xlu0 %1803 }
 0x296   :  { %9035 = vst [vmem:[#allocation181_spill] sm:$0xff] %v6385_v1  ;;  %2515 = vrot.lane.b32.xlu1 %v2500_v18, %s5020_s30 }
 0x297   :  { %2513 = vrot.lane.b32.xlu0 %v2499_v56, %s5020_s30  ;;  %v2536_v56 = vmul.f32 %v2534_v60, %v6347_v7 }
 0x298   :  { %v6393_v15 = vpop.permute.xlu1 %1809 }
 0x299   :  { %9036 = vst [vmem:[#allocation182_spill] sm:$0xff] %v6393_v15  ;;  %v6395_v8 = vpop.permute.xlu0 %1807 }
 0x29a   :  { %9037 = vst [vmem:[#allocation183_spill] sm:$0xff] %v6395_v8  ;;  %2519 = vrot.lane.b32.xlu1 %v2502_v34, %s5020_s30  ;;  %v2538_v34 = vmul.f32 %v2534_v60, %v6359_v2 }
 0x29b   :  { %2517 = vrot.lane.b32.xlu0 %v2501_v50, %s5020_s30  ;;  %v2537_v50 = vmul.f32 %v2534_v60, %v6381_v10 }
 0x29c   :  { %v6401_v38 = vpop.permute.xlu1 %1849 }
 0x29d   :  { %9038 = vst [vmem:[#allocation184_spill] sm:$0xff] %v6401_v38  ;;  %v6403_v18 = vpop.permute.xlu0 %1847 }
 0x29e   :  { %9039 = vst [vmem:[#allocation185_spill] sm:$0xff] %v6403_v18  ;;  %2549 = vrot.lane.b32.xlu1 %v2536_v56, %s5020_s30  ;;  %v2540_v56 = vmul.f32 %v2534_v60, %v6391_v41 }
 0x29f   :  { %2547 = vrot.lane.b32.xlu0 %v2535_v39, %s5020_s30  ;;  %v2539_v39 = vmul.f32 %v2534_v60, %v6361_v16 }
 0x2a0   :  { %v6409_v57 = vpop.permute.xlu1 %1853 }
 0x2a1   :  { %9040 = vst [vmem:[#allocation186_spill] sm:$0xff] %v6409_v57  ;;  %v6411_v3 = vpop.permute.xlu0 %1851  ;;  %v2572_v57 = vstv %s4837_s22  ;;  %s4781_s22 = sld [smem:[#allocation9 + $0x15]] }
 0x2a2   :  { %9041 = vst [vmem:[#allocation187_spill] sm:$0xff] %v6411_v3  ;;  %2553 = vrot.lane.b32.xlu1 %v2538_v34, %s5020_s30  ;;  %v2574_v34 = vmul.f32 %v2572_v57, %v6347_v7 }
 0x2a3   :  { %2551 = vrot.lane.b32.xlu0 %v2537_v50, %s5020_s30  ;;  %v2573_v50 = vmul.f32 %v2572_v57, %v6345_v13 }
 0x2a4   :  { %v6417_v18 = vpop.permute.xlu1 %1889 }
 0x2a5   :  { %9042 = vst [vmem:[#allocation188_spill] sm:$0xff] %v6417_v18  ;;  %v6419_v38 = vpop.permute.xlu0 %1887  ;;  %v2610_v18 = vstv %s4838_s23  ;;  %s4779_s23 = sld [smem:[#allocation9 + $0x7]] }
 0x2a6   :  { %9043 = vst [vmem:[#allocation189_spill] sm:$0xff] %v6419_v38  ;;  %2557 = vrot.lane.b32.xlu1 %v2540_v56, %s5020_s30  ;;  %v2576_v56 = vmul.f32 %v2572_v57, %v6359_v2  ;;  %v2611_v53 = vmul.f32 %v2610_v18, %v6345_v13  ;;  %v2616_v1 = vmul.f32 %v2610_v18, %v6391_v41 }
 0x2a7   :  { %2555 = vrot.lane.b32.xlu0 %v2539_v39, %s5020_s30  ;;  %v2575_v39 = vmul.f32 %v2572_v57, %v6381_v10  ;;  %v2614_v40 = vmul.f32 %v2610_v18, %v6359_v2 }
 0x2a8   :  { %v6425_v3 = vpop.permute.xlu1 %1893  ;;  %v2623_v17 = vrot.slane %v2611_v53, 4 }
 0x2a9   :  { %9044 = vst [vmem:[#allocation190_spill] sm:$0xff] %v6425_v3  ;;  %v6427_v9 = vpop.permute.xlu0 %1891  ;;  %v2613_v3 = vmul.f32 %v2610_v18, %v6381_v10 }
 0x2aa   :  { %9045 = vst [vmem:[#allocation191_spill] sm:$0xff] %v6427_v9  ;;  %2587 = vrot.lane.b32.xlu1 %v2574_v34, %s5020_s30  ;;  %v2612_v9 = vmul.f32 %v2610_v18, %v6347_v7  ;;  %v2578_v34 = vmul.f32 %v2572_v57, %v6391_v41 }
 0x2ab   :  { %2585 = vrot.lane.b32.xlu0 %v2573_v50, %s5020_s30  ;;  %v2577_v50 = vmul.f32 %v2572_v57, %v6361_v16  ;;  %v2626_v21 = vrot.slane %v2613_v3, 4 }
 0x2ac   :  { %v6433_v60 = vpop.permute.xlu1 %1897  ;;  %v2624_v8 = vrot.slane %v2612_v9, 4  ;;  %v2628_v9 = vrot.slane %v2614_v40, 4 }
 0x2ad   :  { %9046 = vst [vmem:[#allocation192_spill] sm:$0xff] %v6433_v60  ;;  %v6435_v38 = vpop.permute.xlu0 %1895 }
 0x2ae   :  { %9047 = vst [vmem:[#allocation193_spill] sm:$0xff] %v6435_v38  ;;  %2591 = vrot.lane.b32.xlu1 %v2576_v56, %s5020_s30  ;;  %v2615_v38 = vmul.f32 %v2610_v18, %v6361_v16  ;;  %v2650_v56 = vstv %s4839_s25  ;;  %v2625_v3 = vsel %vm282_vm13, %v2623_v17, %v2624_v8  ;;  %s4783_s25 = sld [smem:[#allocation9 + $0x23]] }
 0x2af   :  { %2589 = vrot.lane.b32.xlu0 %v2575_v39, %s5020_s30  ;;  %v2652_v62 = vmul.f32 %v2650_v56, %v6347_v7  ;;  %v2653_v53 = vmul.f32 %v2650_v56, %v6381_v10  ;;  %v2651_v18 = vmul.f32 %v2650_v56, %v6345_v13  ;;  %v2654_v17 = vmul.f32 %v2650_v56, %v6359_v2 }
 0x2b0   :  { %v6447_v60 = vpop.permute.xlu1 %1929  ;;  %v2629_v37 = vrot.slane %v2615_v38, 4 }
 0x2b1   :  { %9048 = vst [vmem:[#allocation194_spill] sm:$0xff] %v6447_v60  ;;  %v6449_v15 = vpop.permute.xlu0 %1927  ;;  %v2627_v60 = vsel %vm282_vm13, %v2624_v8, %v2626_v21  ;;  %v2664_v21 = vrot.slane %v2652_v62, 4  ;;  %v2663_v8 = vrot.slane %v2651_v18, 4 }
 0x2b2   :  { %9049 = vst [vmem:[#allocation195_spill] sm:$0xff] %v6449_v15  ;;  %2595 = vrot.lane.b32.xlu1 %v2578_v34, %s5020_s30  ;;  %v2631_v15 = vrot.slane %v2616_v1, 4  ;;  %v2630_v40 = vsel %vm282_vm13, %v2628_v9, %v2629_v37  ;;  %v2666_v1 = vrot.slane %v2653_v53, 4  ;;  %v2668_v9 = vrot.slane %v2654_v17, 4 }
 0x2b3   :  { %2593 = vrot.lane.b32.xlu0 %v2577_v50, %s5020_s30  ;;  %v2698_v53 = vstv %s4840_s26  ;;  %s4784_s26 = sld [smem:[#allocation9 + $0x2a]] }
 0x2b4   :  { %v6455_v39 = vpop.permute.xlu1 %1933  ;;  %v2632_v38 = vsel %vm282_vm13, %v2629_v37, %v2631_v15  ;;  %v2667_v15 = vsel %vm282_vm13, %v2664_v21, %v2666_v1  ;;  %v2665_v37 = vsel %vm282_vm13, %v2663_v8, %v2664_v21  ;;  %v2699_v21 = vmul.f32 %v2698_v53, %v6345_v13 }
 0x2b5   :  { %9050 = vst [vmem:[#allocation196_spill] sm:$0xff] %v6455_v39  ;;  %v6457_v57 = vpop.permute.xlu0 %1931  ;;  %v2701_v39 = vmul.f32 %v2698_v53, %v6381_v10 }
 0x2b6   :  { %9051 = vst [vmem:[#allocation197_spill] sm:$0xff] %v6457_v57  ;;  %2635 = vrot.lane.b32.xlu1 %v2627_v60, %s5020_s30  ;;  %v2655_v57 = vmul.f32 %v2650_v56, %v6361_v16 }
 0x2b7   :  { %2633 = vrot.lane.b32.xlu0 %v2625_v3, %s5020_s30 }
 0x2b8   :  { %v6466_v34 = vpop.permute.xlu1 %1937  ;;  %v2669_v62 = vrot.slane %v2655_v57, 4 }
 0x2b9   :  { %9052 = vst [vmem:[#allocation198_spill] sm:$0xff] %v6466_v34  ;;  %v6468_v50 = vpop.permute.xlu0 %1935 }
 0x2ba   :  { %9053 = vst [vmem:[#allocation199_spill] sm:$0xff] %v6468_v50  ;;  %2639 = vrot.lane.b32.xlu1 %v2632_v38, %s5020_s30  ;;  %v2656_v50 = vmul.f32 %v2650_v56, %v6391_v41  ;;  %v2670_v34 = vsel %vm282_vm13, %v2668_v9, %v2669_v62  ;;  %v2700_v56 = vmul.f32 %v2698_v53, %v6347_v7  ;;  %v2711_v9 = vrot.slane %v2699_v21, 4 }
 0x2bb   :  { %2637 = vrot.lane.b32.xlu0 %v2630_v40, %s5020_s30 }
 0x2bc   :  { %v6476_v60 = vpop.permute.xlu1 %1977  ;;  %v2671_v40 = vrot.slane %v2656_v50, 4  ;;  %v2702_v50 = vmul.f32 %v2698_v53, %v6359_v2 }
 0x2bd   :  { %9054 = vst [vmem:[#allocation200_spill] sm:$0xff] %v6476_v60  ;;  %v6478_v3 = vpop.permute.xlu0 %1975 }
 0x2be   :  { %9055 = vst [vmem:[#allocation201_spill] sm:$0xff] %v6478_v3  ;;  %2675 = vrot.lane.b32.xlu1 %v2667_v15, %s5020_s30  ;;  %v2672_v8 = vsel %vm282_vm13, %v2669_v62, %v2671_v40  ;;  %v2712_v15 = vrot.slane %v2700_v56, 4  ;;  %v2704_v56 = vmul.f32 %v2698_v53, %v6391_v41 }
 0x2bf   :  { %2673 = vrot.lane.b32.xlu0 %v2665_v37, %s5020_s30  ;;  %v2714_v37 = vrot.slane %v2701_v39, 4  ;;  %v2746_v39 = vstv %s4841_s0  ;;  %s4865_s0 = sld [smem:[#allocation9 + $0x4b]] }
 0x2c0   :  { %v6485_v18 = vpop.permute.xlu1 %1981  ;;  %v2713_v62 = vsel %vm282_vm13, %v2711_v9, %v2712_v15 }
 0x2c1   :  { %9056 = vst [vmem:[#allocation202_spill] sm:$0xff] %v6485_v18  ;;  %v6487_v38 = vpop.permute.xlu0 %1979  ;;  %v2703_v18 = vmul.f32 %v2698_v53, %v6361_v16 }
 0x2c2   :  { %9057 = vst [vmem:[#allocation203_spill] sm:$0xff] %v6487_v38  ;;  %2679 = vrot.lane.b32.xlu1 %v2670_v34, %s5020_s30 }
 0x2c3   :  { %2677 = vrot.lane.b32.xlu0 %v2666_v1, %s5020_s30  ;;  %v2717_v38 = vrot.slane %v2703_v18, 4 }
 0x2c4   :  { %v6495_v57 = vpop.permute.xlu1 %1985 }
 0x2c5   :  { %9058 = vst [vmem:[#allocation204_spill] sm:$0xff] %v6495_v57  ;;  %v6497_v17 = vpop.permute.xlu0 %1983  ;;  %v2716_v57 = vrot.slane %v2702_v50, 4  ;;  %v2747_v50 = vmul.f32 %v2746_v39, %v6345_v13 }
 0x2c6   :  { %9059 = vst [vmem:[#allocation205_spill] sm:$0xff] %v6497_v17  ;;  %2683 = vrot.lane.b32.xlu1 %v2671_v40, %s5020_s30  ;;  %v2715_v17 = vsel %vm282_vm13, %v2712_v15, %v2714_v37 }
 0x2c7   :  { %2681 = vrot.lane.b32.xlu0 %v2672_v8, %s5020_s30  ;;  %v2718_v8 = vsel %vm282_vm13, %v2716_v57, %v2717_v38  ;;  %v2755_v15 = vrot.slane %v2747_v50, 5  ;;  %v2749_v57 = vmul.f32 %v2746_v39, %v6359_v2 }
 0x2c8   :  { %v6504_v34 = vpop.permute.xlu1 %2025 }
 0x2c9   :  { %9060 = vst [vmem:[#allocation206_spill] sm:$0xff] %v6504_v34  ;;  %v6506_v1 = vpop.permute.xlu0 %2023  ;;  %v2748_v34 = vmul.f32 %v2746_v39, %v6347_v7 }
 0x2ca   :  { %9061 = vst [vmem:[#allocation207_spill] sm:$0xff] %v6506_v1  ;;  %2723 = vrot.lane.b32.xlu1 %v2715_v17, %s5020_s30  ;;  %v2719_v1 = vrot.slane %v2704_v56, 4 }
 0x2cb   :  { %2721 = vrot.lane.b32.xlu0 %v2713_v62, %s5020_s30  ;;  %v2756_v9 = vrot.slane %v2748_v34, 5 }
 0x2cc   :  { %v6513_v40 = vpop.permute.xlu1 %2029  ;;  %v2720_v17 = vsel %vm282_vm13, %v2717_v38, %v2719_v1  ;;  %v2758_v38 = vrot.slane %v2749_v57, 5 }
 0x2cd   :  { %9062 = vst [vmem:[#allocation208_spill] sm:$0xff] %v6513_v40  ;;  %v6515_v21 = vpop.permute.xlu0 %2027 }
 0x2ce   :  { %9063 = vst [vmem:[#allocation209_spill] sm:$0xff] %v6515_v21  ;;  %2727 = vrot.lane.b32.xlu1 %v2718_v8, %s5020_s30  ;;  %v2757_v8 = vsel %vm383_vm8, %v2755_v15, %v2756_v9  ;;  %v2786_v21 = vstv %s4842_s27  ;;  %s4780_s27 = sld [smem:[#allocation9 + $0xe]] }
 0x2cf   :  { %2725 = vrot.lane.b32.xlu0 %v2714_v37, %s5020_s30  ;;  %v2750_v37 = vmul.f32 %v2746_v39, %v6361_v16  ;;  %v2789_v40 = vmul.f32 %v2786_v21, %v6381_v10  ;;  %v2787_v39 = vmul.f32 %v2786_v21, %v6345_v13 }
 0x2d0   :  { %v6522_v53 = vpop.permute.xlu1 %2065 }
 0x2d1   :  { %9064 = vst [vmem:[#allocation210_spill] sm:$0xff] %v6522_v53  ;;  %v6524_v18 = vpop.permute.xlu0 %2063  ;;  %v2759_v50 = vrot.slane %v2750_v37, 5  ;;  %v2802_v53 = vrot.slane %v2789_v40, 1  ;;  %v2791_v37 = vmul.f32 %v2786_v21, %v6361_v16 }
 0x2d2   :  { %9065 = vst [vmem:[#allocation211_spill] sm:$0xff] %v6524_v18  ;;  %2731 = vrot.lane.b32.xlu1 %v2719_v1, %s5020_s30 }
 0x2d3   :  { %2729 = vrot.lane.b32.xlu0 %v2720_v17, %s5020_s30  ;;  %v2788_v17 = vmul.f32 %v2786_v21, %v6347_v7  ;;  %s4844_s30 = sld [smem:[#allocation9 + $0x48]] }
 0x2d4   :  { %v6530_v62 = vpop.permute.xlu1 %2069 }
 0x2d5   :  { %9066 = vst [vmem:[#allocation212_spill] sm:$0xff] %v6530_v62  ;;  %v6532_v56 = vpop.permute.xlu0 %2067  ;;  %v2800_v57 = vrot.slane %v2788_v17, 1  ;;  %v2826_v62 = vstv %s4843_s28  ;;  %s4782_s28 = sld [smem:[#allocation9 + $0x1c]] }
 0x2d6   :  { %9067 = vst [vmem:[#allocation213_spill] sm:$0xff] %v6532_v56  ;;  %2763 = vrot.lane.b32.xlu1 %v2757_v8, %s5021_s8  ;;  %v2790_v56 = vmul.f32 %v2786_v21, %v6359_v2  ;;  %v2828_v40 = vmul.f32 %v2826_v62, %v6347_v7  ;;  %v2829_v17 = vmul.f32 %v2826_v62, %v6381_v10 }
 0x2d7   :  { %2761 = vrot.lane.b32.xlu0 %v2755_v15, %s5021_s8  ;;  %v2760_v15 = vsel %vm383_vm8, %v2758_v38, %v2759_v50 }
 0x2d8   :  { %v6538_v34 = vpop.permute.xlu1 %2073  ;;  %v2804_v3 = vrot.slane %v2790_v56, 1  ;;  %v2831_v56 = vmul.f32 %v2826_v62, %v6361_v16 }
 0x2d9   :  { %9068 = vst [vmem:[#allocation214_spill] sm:$0xff] %v6538_v34  ;;  %v6540_v1 = vpop.permute.xlu0 %2071  ;;  %v2792_v34 = vmul.f32 %v2786_v21, %v6391_v41  ;;  %v2805_v21 = vrot.slane %v2791_v37, 1 }
 0x2da   :  { %9069 = vst [vmem:[#allocation215_spill] sm:$0xff] %v6540_v1  ;;  %2767 = vrot.lane.b32.xlu1 %v2758_v38, %s5021_s8  ;;  %v2799_v1 = vrot.slane %v2787_v39, 1  ;;  %v2803_v38 = vsel %vm428_vm10, %v2800_v57, %v2802_v53  ;;  %v2827_v39 = vmul.f32 %v2826_v62, %v6345_v13  ;;  %v2840_v53 = vrot.slane %v2828_v40, 1 }
 0x2db   :  { %2765 = vrot.lane.b32.xlu0 %v2756_v9, %s5021_s8  ;;  %v2807_v60 = vrot.slane %v2792_v34, 1  ;;  %v2806_v26 = vsel %vm428_vm10, %v2804_v3, %v2805_v21  ;;  %v2832_v3 = vmul.f32 %v2826_v62, %v6391_v41  ;;  %v2874_v40 = vstv %s4844_s30  ;;  %s216_s30 = sld [smem:[#allocation9]] }
 0x2dc   :  { %v6547_v18 = vpop.permute.xlu1 %2113 }
 0x2dd   :  { %9070 = vst [vmem:[#allocation216_spill] sm:$0xff] %v6547_v18  ;;  %v6549_v8 = vpop.permute.xlu0 %2111  ;;  %v2808_v31 = vsel %vm428_vm10, %v2805_v21, %v2807_v60  ;;  %v2845_v60 = vrot.slane %v2831_v56, 1 }
 0x2de   :  { %9071 = vst [vmem:[#allocation217_spill] sm:$0xff] %v6549_v8  ;;  %2771 = vrot.lane.b32.xlu1 %v2759_v50, %s5021_s8  ;;  %v2801_v8 = vsel %vm428_vm10, %v2799_v1, %v2800_v57  ;;  %v2830_v1 = vmul.f32 %v2826_v62, %v6359_v2 }
 0x2df   :  { %2769 = vrot.lane.b32.xlu0 %v2760_v15, %s5021_s8 }
 0x2e0   :  { %v6557_v9 = vpop.permute.xlu1 %2117 }
 0x2e1   :  { %9072 = vst [vmem:[#allocation218_spill] sm:$0xff] %v6557_v9  ;;  %v6559_v18 = vpop.permute.xlu0 %2115  ;;  %v2839_v9 = vrot.slane %v2827_v39, 1  ;;  %v2877_v39 = vmul.f32 %v2874_v40, %v6381_v10 }
 0x2e2   :  { %9073 = vst [vmem:[#allocation219_spill] sm:$0xff] %v6559_v18  ;;  %2811 = vrot.lane.b32.xlu1 %v2803_v38, %s5021_s8  ;;  %v2842_v18 = vrot.slane %v2829_v17, 1  ;;  %v2844_v38 = vrot.slane %v2830_v1, 1  ;;  %v2876_v17 = vmul.f32 %v2874_v40, %v6347_v7 }
 0x2e3   :  { %2809 = vrot.lane.b32.xlu0 %v2801_v8, %s5021_s8  ;;  %v2841_v37 = vsel %vm428_vm10, %v2839_v9, %v2840_v53  ;;  %v2847_v9 = vrot.slane %v2832_v3, 1 }
 0x2e4   :  { %v6568_v50 = vpop.permute.xlu1 %2121  ;;  %v2843_v57 = vsel %vm428_vm10, %v2840_v53, %v2842_v18  ;;  %v2846_v21 = vsel %vm428_vm10, %v2844_v38, %v2845_v60  ;;  %v2875_v53 = vmul.f32 %v2874_v40, %v6345_v13  ;;  %v2888_v56 = vrot.slane %v2876_v17, 1 }
 0x2e5   :  { %9074 = vst [vmem:[#allocation220_spill] sm:$0xff] %v6568_v50  ;;  %v6570_v15 = vpop.permute.xlu0 %2119  ;;  %v2879_v38 = vmul.f32 %v2874_v40, %v6361_v16 }
 0x2e6   :  { %9075 = vst [vmem:[#allocation221_spill] sm:$0xff] %v6570_v15  ;;  %2815 = vrot.lane.b32.xlu1 %v2808_v31, %s5021_s8  ;;  %v2848_v15 = vsel %vm428_vm10, %v2845_v60, %v2847_v9  ;;  %v2887_v50 = vrot.slane %v2875_v53, 1  ;;  %v2922_v60 = vstv %s4845_s29  ;;  %s7155_s29 = sld [smem:[#allocation9 + $0x37]] }
 0x2e7   :  { %2813 = vrot.lane.b32.xlu0 %v2806_v26, %s5021_s8  ;;  %v2924_v53 = vmul.f32 %v2922_v60, %v6347_v7 }
 0x2e8   :  { %v6578_v34 = vpop.permute.xlu1 %2161  ;;  %v2889_v17 = vsel %vm428_vm10, %v2887_v50, %v2888_v56  ;;  %v2923_v50 = vmul.f32 %v2922_v60, %v6345_v13 }
 0x2e9   :  { %9076 = vst [vmem:[#allocation222_spill] sm:$0xff] %v6578_v34  ;;  %v6580_v8 = vpop.permute.xlu0 %2159 }
 0x2ea   :  { %9077 = vst [vmem:[#allocation223_spill] sm:$0xff] %v6580_v8  ;;  %2851 = vrot.lane.b32.xlu1 %v2843_v57, %s5021_s8  ;;  %v2890_v57 = vrot.slane %v2877_v39, 1  ;;  %v2893_v39 = vrot.slane %v2879_v38, 1  ;;  %v2936_v38 = vrot.slane %v2924_v53, 1  ;;  %v2928_v53 = vmul.f32 %v2922_v60, %v6391_v41 }
 0x2eb   :  { %2849 = vrot.lane.b32.xlu0 %v2841_v37, %s5021_s8  ;;  %v2878_v37 = vmul.f32 %v2874_v40, %v6359_v2 }
 0x2ec   :  { %v6587_v31 = vpop.permute.xlu1 %2165 }
 0x2ed   :  { %9078 = vst [vmem:[#allocation224_spill] sm:$0xff] %v6587_v31  ;;  %v6589_v26 = vpop.permute.xlu0 %2163  ;;  %v3010_v31 = vstv %s4847_s5  ;;  %s7358_s5 = sld [smem:[#allocation9 + $0x53]] }
 0x2ee   :  { %9079 = vst [vmem:[#allocation225_spill] sm:$0xff] %v6589_v26  ;;  %2855 = vrot.lane.b32.xlu1 %v2846_v21, %s5021_s8  ;;  %v2891_v21 = vsel %vm428_vm10, %v2888_v56, %v2890_v57  ;;  %v3011_v26 = vmul.f32 %v3010_v31, %v6345_v13 }
 0x2ef   :  { %2853 = vrot.lane.b32.xlu0 %v2842_v18, %s5021_s8 }
 0x2f0   :  { %v6597_v62 = vpop.permute.xlu1 %2169 }
 0x2f1   :  { %9080 = vst [vmem:[#allocation226_spill] sm:$0xff] %v6597_v62  ;;  %v6599_v1 = vpop.permute.xlu0 %2167  ;;  %v2892_v62 = vrot.slane %v2878_v37, 1 }
 0x2f2   :  { %9081 = vst [vmem:[#allocation227_spill] sm:$0xff] %v6599_v1  ;;  %2859 = vrot.lane.b32.xlu1 %v2847_v9, %s5021_s8  ;;  %v2880_v1 = vmul.f32 %v2874_v40, %v6391_v41 }
 0x2f3   :  { %2857 = vrot.lane.b32.xlu0 %v2848_v15, %s5021_s8  ;;  %v2894_v37 = vsel %vm428_vm10, %v2892_v62, %v2893_v39  ;;  %v2927_v62 = vmul.f32 %v2922_v60, %v6361_v16 }
 0x2f4   :  { %v6606_v3 = vpop.permute.xlu1 %2209 }
 0x2f5   :  { %9082 = vst [vmem:[#allocation228_spill] sm:$0xff] %v6606_v3  ;;  %v6608_v18 = vpop.permute.xlu0 %2207  ;;  %v2895_v3 = vrot.slane %v2880_v1, 1 }
 0x2f6   :  { %9083 = vst [vmem:[#allocation229_spill] sm:$0xff] %v6608_v18  ;;  %2899 = vrot.lane.b32.xlu1 %v2891_v21, %s5021_s8  ;;  %v2925_v18 = vmul.f32 %v2922_v60, %v6381_v10 }
 0x2f7   :  { %2897 = vrot.lane.b32.xlu0 %v2889_v17, %s5021_s8  ;;  %v2896_v17 = vsel %vm428_vm10, %v2893_v39, %v2895_v3 }
 0x2f8   :  { %v6615_v9 = vpop.permute.xlu1 %2213  ;;  %v2938_v21 = vrot.slane %v2925_v18, 1 }
 0x2f9   :  { %9084 = vst [vmem:[#allocation230_spill] sm:$0xff] %v6615_v9  ;;  %v6617_v15 = vpop.permute.xlu0 %2211  ;;  %v2926_v9 = vmul.f32 %v2922_v60, %v6359_v2 }
 0x2fa   :  { %9085 = vst [vmem:[#allocation231_spill] sm:$0xff] %v6617_v15  ;;  %2903 = vrot.lane.b32.xlu1 %v2894_v37, %s5021_s8  ;;  %v2935_v15 = vrot.slane %v2923_v50, 1  ;;  %v2939_v37 = vsel %vm428_vm10, %v2936_v38, %v2938_v21  ;;  %v2941_v50 = vrot.slane %v2927_v62, 1 }
 0x2fb   :  { %2901 = vrot.lane.b32.xlu0 %v2890_v57, %s5021_s8  ;;  %v2940_v39 = vrot.slane %v2926_v9, 1 }
 0x2fc   :  { %v6625_v40 = vpop.permute.xlu1 %2481  ;;  %v2937_v18 = vsel %vm428_vm10, %v2935_v15, %v2936_v38 }
 0x2fd   :  { %9086 = vst [vmem:[#allocation232_spill] sm:$0xff] %v6625_v40  ;;  %v6627_v56 = vpop.permute.xlu0 %2479  ;;  %v2942_v40 = vsel %vm428_vm10, %v2940_v39, %v2941_v50 }
 0x2fe   :  { %9087 = vst [vmem:[#allocation233_spill] sm:$0xff] %v6627_v56  ;;  %2907 = vrot.lane.b32.xlu1 %v2895_v3, %s5021_s8  ;;  %v2970_v56 = vstv %s4846_s3  ;;  %s7277_s3 = sld [smem:[#allocation9 + $0x59]] }
 0x2ff   :  { %2905 = vrot.lane.b32.xlu0 %v2896_v17, %s5021_s8  ;;  %v2973_v60 = vmul.f32 %v2970_v56, %v6381_v10  ;;  %v2971_v9 = vmul.f32 %v2970_v56, %v6345_v13 }
 0x300   :  { %v6634_v1 = vpop.permute.xlu1 %2485 }
 0x301   :  { %9088 = vst [vmem:[#allocation234_spill] sm:$0xff] %v6634_v1  ;;  %v6636_v57 = vpop.permute.xlu0 %2483  ;;  %v2943_v1 = vrot.slane %v2928_v53, 1  ;;  %v2975_v53 = vmul.f32 %v2970_v56, %v6361_v16  ;;  %v2986_v39 = vrot.slane %v2973_v60, 5 }
 0x302   :  { %9089 = vst [vmem:[#allocation235_spill] sm:$0xff] %v6636_v57  ;;  %2947 = vrot.lane.b32.xlu1 %v2939_v37, %s5021_s8  ;;  %v2972_v57 = vmul.f32 %v2970_v56, %v6347_v7 }
 0x303   :  { %2945 = vrot.lane.b32.xlu0 %v2937_v18, %s5021_s8  ;;  %v2944_v62 = vsel %vm428_vm10, %v2941_v50, %v2943_v1  ;;  %v2976_v18 = vmul.f32 %v2970_v56, %v6391_v41 }
 0x304   :  { %v6643_v3 = vpop.permute.xlu1 %2511  ;;  %v2984_v37 = vrot.slane %v2972_v57, 5  ;;  %v3012_v57 = vmul.f32 %v3010_v31, %v6347_v7 }
 0x305   :  { %9090 = vst [vmem:[#allocation236_spill] sm:$0xff] %v6643_v3  ;;  %v6645_v17 = vpop.permute.xlu0 %2509  ;;  %v2974_v3 = vmul.f32 %v2970_v56, %v6359_v2  ;;  %v2991_v50 = vrot.slane %v2976_v18, 5 }
 0x306   :  { %9091 = vst [vmem:[#allocation237_spill] sm:$0xff] %v6645_v17  ;;  %2951 = vrot.lane.b32.xlu1 %v2942_v40, %s5021_s8  ;;  %v2983_v17 = vrot.slane %v2971_v9, 5  ;;  %v2987_v60 = vsel %vm383_vm8, %v2984_v37, %v2986_v39  ;;  %v3024_v18 = vrot.slane %v3012_v57, 5 }
 0x307   :  { %2949 = vrot.lane.b32.xlu0 %v2938_v21, %s5021_s8  ;;  %v2988_v56 = vrot.slane %v2974_v3, 5  ;;  %v3014_v3 = vmul.f32 %v3010_v31, %v6359_v2 }
 0x308   :  { %v6653_v15 = vpop.permute.xlu1 %2515  ;;  %v2985_v9 = vsel %vm383_vm8, %v2983_v17, %v2984_v37  ;;  %v3015_v17 = vmul.f32 %v3010_v31, %v6361_v16 }
 0x309   :  { %9092 = vst [vmem:[#allocation238_spill] sm:$0xff] %v6653_v15  ;;  %v6655_v38 = vpop.permute.xlu0 %2513  ;;  %v3013_v15 = vmul.f32 %v3010_v31, %v6381_v10 }
 0x30a   :  { %9093 = vst [vmem:[#allocation239_spill] sm:$0xff] %v6655_v38  ;;  %2955 = vrot.lane.b32.xlu1 %v2943_v1, %s5021_s8  ;;  %v2989_v38 = vrot.slane %v2975_v53, 5  ;;  %v3029_v57 = vrot.slane %v3015_v17, 5 }
 0x30b   :  { %2953 = vrot.lane.b32.xlu0 %v2944_v62, %s5021_s8 }
 0x30c   :  { %v6663_v40 = vpop.permute.xlu1 %2519  ;;  %v2992_v53 = vsel %vm383_vm8, %v2989_v38, %v2991_v50  ;;  %v2990_v39 = vsel %vm383_vm8, %v2988_v56, %v2989_v38  ;;  %v3058_v38 = vstv %s4848_s6  ;;  %s7442_s6 = sld [smem:[#allocation9 + $0x60]] }
 0x30d   :  { %9094 = vst [vmem:[#allocation240_spill] sm:$0xff] %v6663_v40  ;;  %v6665_v21 = vpop.permute.xlu0 %2517  ;;  %v3023_v40 = vrot.slane %v3011_v26, 5  ;;  %v3016_v26 = vmul.f32 %v3010_v31, %v6391_v41 }
 0x30e   :  { %9095 = vst [vmem:[#allocation241_spill] sm:$0xff] %v6665_v21  ;;  %2995 = vrot.lane.b32.xlu1 %v2987_v60, %s5021_s8  ;;  %v3026_v21 = vrot.slane %v3013_v15, 5  ;;  %v3028_v15 = vrot.slane %v3014_v3, 5 }
 0x30f   :  { %2993 = vrot.lane.b32.xlu0 %v2985_v9, %s5021_s8  ;;  %v3025_v50 = vsel %vm383_vm8, %v3023_v40, %v3024_v18  ;;  %v3060_v40 = vmul.f32 %v3058_v38, %v6347_v7 }
 0x310   :  { %v6674_v1 = vpop.permute.xlu1 %2549  ;;  %v3027_v9 = vsel %vm383_vm8, %v3024_v18, %v3026_v21 }
 0x311   :  { %9096 = vst [vmem:[#allocation242_spill] sm:$0xff] %v6674_v1  ;;  %v6676_v62 = vpop.permute.xlu0 %2547 }
 0x312   :  { %9097 = vst [vmem:[#allocation243_spill] sm:$0xff] %v6676_v62  ;;  %2999 = vrot.lane.b32.xlu1 %v2992_v53, %s5021_s8 }
 0x313   :  { %2997 = vrot.lane.b32.xlu0 %v2990_v39, %s5021_s8  ;;  %v3030_v39 = vsel %vm383_vm8, %v3028_v15, %v3029_v57 }
 0x314   :  { %v6684_v37 = vpop.permute.xlu1 %2553 }
 0x315   :  { %9098 = vst [vmem:[#allocation244_spill] sm:$0xff] %v6684_v37  ;;  %v6686_v60 = vpop.permute.xlu0 %2551  ;;  %v3059_v37 = vmul.f32 %v3058_v38, %v6345_v13 }
 0x316   :  { %9099 = vst [vmem:[#allocation245_spill] sm:$0xff] %v6686_v60  ;;  %3035 = vrot.lane.b32.xlu1 %v3027_v9, %s5021_s8  ;;  %v3031_v60 = vrot.slane %v3016_v26, 5  ;;  %v3068_v9 = vrot.slane %v3060_v40, 6  ;;  %v3061_v26 = vmul.f32 %v3058_v38, %v6359_v2 }
 0x317   :  { %3033 = vrot.lane.b32.xlu0 %v3025_v50, %s5021_s8  ;;  %v3067_v17 = vrot.slane %v3059_v37, 6  ;;  %v3098_v37 = vstv %s4849_s7  ;;  %s7464_s7 = sld [smem:[#allocation9 + $0x31]] }
 0x318   :  { %v6693_v56 = vpop.permute.xlu1 %2557  ;;  %v3032_v3 = vsel %vm383_vm8, %v3029_v57, %v3031_v60  ;;  %v3070_v40 = vrot.slane %v3061_v26, 6  ;;  %v3101_v26 = vmul.f32 %v3098_v37, %v6381_v10 }
 0x319   :  { %9100 = vst [vmem:[#allocation246_spill] sm:$0xff] %v6693_v56  ;;  %v6695_v53 = vpop.permute.xlu0 %2555  ;;  %v3100_v56 = vmul.f32 %v3098_v37, %v6347_v7 }
 0x31a   :  { %9101 = vst [vmem:[#allocation247_spill] sm:$0xff] %v6695_v53  ;;  %3039 = vrot.lane.b32.xlu1 %v3030_v39, %s5021_s8  ;;  %v3062_v39 = vmul.f32 %v3058_v38, %v6361_v16  ;;  %v3099_v53 = vmul.f32 %v3098_v37, %v6345_v13 }
 0x31b   :  { %3037 = vrot.lane.b32.xlu0 %v3026_v21, %s5021_s8  ;;  %v3069_v21 = vsel %vm697_vm7, %v3067_v17, %v3068_v9  ;;  %v3112_v1 = vrot.slane %v3100_v56, 6  ;;  %v3104_v56 = vmul.f32 %v3098_v37, %v6391_v41 }
 0x31c   :  { %v6702_v31 = vpop.permute.xlu1 %2587  ;;  %v3111_v62 = vrot.slane %v3099_v53, 6  ;;  %v3103_v53 = vmul.f32 %v3098_v37, %v6361_v16 }
 0x31d   :  { %9102 = vst [vmem:[#allocation248_spill] sm:$0xff] %v6702_v31  ;;  %v6704_v18 = vpop.permute.xlu0 %2585 }
 0x31e   :  { %9103 = vst [vmem:[#allocation249_spill] sm:$0xff] %v6704_v18  ;;  %3043 = vrot.lane.b32.xlu1 %v3031_v60, %s5021_s8 }
 0x31f   :  { %3041 = vrot.lane.b32.xlu0 %v3032_v3, %s5021_s8  ;;  %s4850_s8 = sld [smem:[#allocation9 + $0x42]]  ;;  %v3071_v3 = vrot.slane %v3062_v39, 6 }
 0x320   :  { %v6709_v50 = vpop.permute.xlu1 %2591 }
 0x321   :  { %9104 = vst [vmem:[#allocation250_spill] sm:$0xff] %v6709_v50  ;;  %v6711_v15 = vpop.permute.xlu0 %2589 }
 0x322   :  { %9105 = vst [vmem:[#allocation251_spill] sm:$0xff] %v6711_v15  ;;  %3075 = vrot.lane.b32.xlu1 %v3069_v21, %s5022_s17  ;;  %v3119_v15 = vrot.slane %v3104_v56, 6 }
 0x323   :  { %3073 = vrot.lane.b32.xlu0 %v3067_v17, %s5022_s17  ;;  %v3072_v17 = vsel %vm697_vm7, %v3070_v40, %v3071_v3 }
 0x324   :  { %v6718_v57 = vpop.permute.xlu1 %2595 }
 0x325   :  { %9106 = vst [vmem:[#allocation252_spill] sm:$0xff] %v6718_v57  ;;  %v6720_v60 = vpop.permute.xlu0 %2593 }
 0x326   :  { %9107 = vst [vmem:[#allocation253_spill] sm:$0xff] %v6720_v60  ;;  %3079 = vrot.lane.b32.xlu1 %v3070_v40, %s5022_s17  ;;  %v3114_v60 = vrot.slane %v3101_v26, 6  ;;  %v3117_v26 = vrot.slane %v3103_v53, 6 }
 0x327   :  { %3077 = vrot.lane.b32.xlu0 %v3068_v9, %s5022_s17  ;;  %v3102_v9 = vmul.f32 %v3098_v37, %v6359_v2 }
 0x328   :  { %v6726_v38 = vpop.permute.xlu1 %2635  ;;  %v3115_v50 = vsel %vm697_vm7, %v3112_v1, %v3114_v60 }
 0x329   :  { %9108 = vst [vmem:[#allocation254_spill] sm:$0xff] %v6726_v38  ;;  %v6728_v21 = vpop.permute.xlu0 %2633  ;;  %v3146_v38 = vstv %s4850_s8  ;;  %s7469_s8 = sld [smem:[#allocation9 + $0x38]] }
 0x32a   :  { %9109 = vst [vmem:[#allocation255_spill] sm:$0xff] %v6728_v21  ;;  %3083 = vrot.lane.b32.xlu1 %v3071_v3, %s5022_s17  ;;  %v3113_v21 = vsel %vm697_vm7, %v3111_v62, %v3112_v1  ;;  %v3147_v31 = vmul.f32 %v3146_v38, %v6345_v13  ;;  %v3152_v18 = vmul.f32 %v3146_v38, %v6391_v41 }
 0x32b   :  { %3081 = vrot.lane.b32.xlu0 %v3072_v17, %s5022_s17  ;;  %v3116_v17 = vrot.slane %v3102_v9, 6  ;;  %v3120_v1 = vsel %vm697_vm7, %v3117_v26, %v3119_v15  ;;  %v3150_v56 = vmul.f32 %v3146_v38, %v6359_v2 }
 0x32c   :  { %v6734_v39 = vpop.permute.xlu1 %2639  ;;  %v3159_v53 = vrot.slane %v3147_v31, 2 }
 0x32d   :  { %9110 = vst [vmem:[#allocation256_spill] sm:$0xff] %v6734_v39  ;;  %v6736_v57 = vpop.permute.xlu0 %2637  ;;  %v3149_v39 = vmul.f32 %v3146_v38, %v6381_v10  ;;  %v3118_v60 = vsel %vm697_vm7, %v3116_v17, %v3117_v26 }
 0x32e   :  { %9111 = vst [vmem:[#allocation257_spill] sm:$0xff] %v6736_v57  ;;  %3123 = vrot.lane.b32.xlu1 %v3113_v21, %s5022_s17  ;;  %v3148_v57 = vmul.f32 %v3146_v38, %v6347_v7 }
 0x32f   :  { %3121 = vrot.lane.b32.xlu0 %v3111_v62, %s5022_s17  ;;  %v3186_v62 = vstv %s4851_s9  ;;  %s7570_s9 = sld [smem:[#allocation9 + $0x45]] }
 0x330   :  { %v6744_v40 = vpop.permute.xlu1 %2675  ;;  %v3160_v9 = vrot.slane %v3148_v57, 2  ;;  %v3188_v34 = vmul.f32 %v3186_v62, %v6347_v7  ;;  %v3189_v31 = vmul.f32 %v3186_v62, %v6381_v10 }
 0x331   :  { %9112 = vst [vmem:[#allocation258_spill] sm:$0xff] %v6744_v40  ;;  %v6746_v3 = vpop.permute.xlu0 %2673  ;;  %v3151_v40 = vmul.f32 %v3146_v38, %v6361_v16  ;;  %v3187_v38 = vmul.f32 %v3186_v62, %v6345_v13 }
 0x332   :  { %9113 = vst [vmem:[#allocation259_spill] sm:$0xff] %v6746_v3  ;;  %3127 = vrot.lane.b32.xlu1 %v3116_v17, %s5022_s17  ;;  %v3162_v3 = vrot.slane %v3149_v39, 2  ;;  %v3161_v15 = vsel %vm790_vm9, %v3159_v53, %v3160_v9  ;;  %v3164_v17 = vrot.slane %v3150_v56, 2  ;;  %v3191_v56 = vmul.f32 %v3186_v62, %v6361_v16 }
 0x333   :  { %3125 = vrot.lane.b32.xlu0 %v3115_v50, %s5022_s17  ;;  %v3165_v39 = vrot.slane %v3151_v40, 2  ;;  %v3200_v40 = vrot.slane %v3188_v34, 2  ;;  %v3199_v53 = vrot.slane %v3187_v38, 2 }
 0x334   :  { %v6754_v37 = vpop.permute.xlu1 %2679  ;;  %v3163_v57 = vsel %vm790_vm9, %v3160_v9, %v3162_v3  ;;  %v3190_v3 = vmul.f32 %v3186_v62, %v6359_v2 }
 0x335   :  { %9114 = vst [vmem:[#allocation260_spill] sm:$0xff] %v6754_v37  ;;  %v6756_v21 = vpop.permute.xlu0 %2677  ;;  %v3167_v37 = vrot.slane %v3152_v18, 2  ;;  %v3166_v9 = vsel %vm790_vm9, %v3164_v17, %v3165_v39  ;;  %v3234_v17 = vstv %s4852_s10  ;;  %s7600_s10 = sld [smem:[#allocation9 + $0x3f]] }
 0x336   :  { %9115 = vst [vmem:[#allocation261_spill] sm:$0xff] %v6756_v21  ;;  %3131 = vrot.lane.b32.xlu1 %v3120_v1, %s5022_s17 }
 0x337   :  { %3129 = vrot.lane.b32.xlu0 %v3118_v60, %s5022_s17  ;;  %v3168_v18 = vsel %vm790_vm9, %v3165_v39, %v3167_v37  ;;  %v3202_v60 = vrot.slane %v3189_v31, 2  ;;  %v3201_v37 = vsel %vm790_vm9, %v3199_v53, %v3200_v40  ;;  %v3205_v39 = vrot.slane %v3191_v56, 2 }
 0x338   :  { %v6765_v50 = vpop.permute.xlu1 %2683 }
 0x339   :  { %9116 = vst [vmem:[#allocation262_spill] sm:$0xff] %v6765_v50  ;;  %v6767_v21 = vpop.permute.xlu0 %2681  ;;  %v3203_v34 = vsel %vm790_vm9, %v3200_v40, %v3202_v60  ;;  %v3235_v40 = vmul.f32 %v3234_v17, %v6345_v13 }
 0x33a   :  { %9117 = vst [vmem:[#allocation263_spill] sm:$0xff] %v6767_v21  ;;  %3171 = vrot.lane.b32.xlu1 %v3163_v57, %s5022_s17 }
 0x33b   :  { %3169 = vrot.lane.b32.xlu0 %v3161_v15, %s5022_s17 }
 0x33c   :  { %v6776_v26 = vpop.permute.xlu1 %2723 }
 0x33d   :  { %9118 = vst [vmem:[#allocation264_spill] sm:$0xff] %v6776_v26  ;;  %v6778_v1 = vpop.permute.xlu0 %2721  ;;  %v3204_v26 = vrot.slane %v3190_v3, 2 }
 0x33e   :  { %9119 = vst [vmem:[#allocation265_spill] sm:$0xff] %v6778_v1  ;;  %3175 = vrot.lane.b32.xlu1 %v3168_v18, %s5022_s17  ;;  %v3192_v1 = vmul.f32 %v3186_v62, %v6391_v41  ;;  %v3236_v62 = vmul.f32 %v3234_v17, %v6347_v7 }
 0x33f   :  { %3173 = vrot.lane.b32.xlu0 %v3166_v9, %s5022_s17  ;;  %v3206_v9 = vsel %vm790_vm9, %v3204_v26, %v3205_v39 }
 0x340   :  { %v6786_v57 = vpop.permute.xlu1 %2727  ;;  %v3207_v18 = vrot.slane %v3192_v1, 2  ;;  %v3238_v1 = vmul.f32 %v3234_v17, %v6359_v2 }
 0x341   :  { %9120 = vst [vmem:[#allocation266_spill] sm:$0xff] %v6786_v57  ;;  %v6788_v15 = vpop.permute.xlu0 %2725  ;;  %v3282_v57 = vstv %s4853_s11  ;;  %s7692_s11 = sld [smem:[#allocation9 + $0x4d]] }
 0x342   :  { %9121 = vst [vmem:[#allocation267_spill] sm:$0xff] %v6788_v15  ;;  %3211 = vrot.lane.b32.xlu1 %v3203_v34, %s5022_s17  ;;  %v3237_v15 = vmul.f32 %v3234_v17, %v6381_v10  ;;  %v3208_v56 = vsel %vm790_vm9, %v3205_v39, %v3207_v18  ;;  %v3248_v34 = vrot.slane %v3236_v62, 2 }
 0x343   :  { %3209 = vrot.lane.b32.xlu0 %v3201_v37, %s5022_s17  ;;  %v3247_v37 = vrot.slane %v3235_v40, 2  ;;  %v3284_v40 = vmul.f32 %v3282_v57, %v6347_v7 }
 0x344   :  { %v6795_v31 = vpop.permute.xlu1 %2731  ;;  %v3250_v26 = vrot.slane %v3237_v15, 2  ;;  %v3240_v15 = vmul.f32 %v3234_v17, %v6391_v41 }
 0x345   :  { %9122 = vst [vmem:[#allocation268_spill] sm:$0xff] %v6795_v31  ;;  %v6797_v38 = vpop.permute.xlu0 %2729  ;;  %v3252_v31 = vrot.slane %v3238_v1, 2  ;;  %v3249_v39 = vsel %vm790_vm9, %v3247_v37, %v3248_v34 }
 0x346   :  { %9123 = vst [vmem:[#allocation269_spill] sm:$0xff] %v6797_v38  ;;  %3215 = vrot.lane.b32.xlu1 %v3206_v9, %s5022_s17  ;;  %v3239_v38 = vmul.f32 %v3234_v17, %v6361_v16  ;;  %v3251_v21 = vsel %vm790_vm9, %v3248_v34, %v3250_v26  ;;  %v3283_v34 = vmul.f32 %v3282_v57, %v6345_v13 }
 0x347   :  { %3213 = vrot.lane.b32.xlu0 %v3202_v60, %s5022_s17 }
 0x348   :  { %v6805_v3 = vpop.permute.xlu1 %2763  ;;  %v3253_v50 = vrot.slane %v3239_v38, 2  ;;  %v3296_v38 = vrot.slane %v3284_v40, 2  ;;  %v3288_v40 = vmul.f32 %v3282_v57, %v6391_v41 }
 0x349   :  { %9124 = vst [vmem:[#allocation270_spill] sm:$0xff] %v6805_v3  ;;  %v6807_v53 = vpop.permute.xlu0 %2761 }
 0x34a   :  { %9125 = vst [vmem:[#allocation271_spill] sm:$0xff] %v6807_v53  ;;  %3219 = vrot.lane.b32.xlu1 %v3207_v18, %s5022_s17  ;;  %v3254_v1 = vsel %vm790_vm9, %v3252_v31, %v3253_v50  ;;  %v3287_v31 = vmul.f32 %v3282_v57, %v6361_v16  ;;  %v7177_v53 = vld [vmem:[#allocation4 + $0x18] sm:$0xff] }
 0x34b   :  { %3217 = vrot.lane.b32.xlu0 %v3208_v56, %s5022_s17  ;;  %v3285_v56 = vmul.f32 %v3282_v57, %v6381_v10 }
 0x34c   :  { %v6814_v9 = vpop.permute.xlu1 %2767 }
 0x34d   :  { %9126 = vst [vmem:[#allocation272_spill] sm:$0xff] %v6814_v9  ;;  %v6816_v60 = vpop.permute.xlu0 %2765  ;;  %v3255_v9 = vrot.slane %v3240_v15, 2  ;;  %v3298_v37 = vrot.slane %v3285_v56, 2 }
 0x34e   :  { %9127 = vst [vmem:[#allocation273_spill] sm:$0xff] %v6816_v60  ;;  %3259 = vrot.lane.b32.xlu1 %v3251_v21, %s5022_s17 }
 0x34f   :  { %3257 = vrot.lane.b32.xlu0 %v3249_v39, %s5022_s17  ;;  %v3256_v7 = vsel %vm790_vm9, %v3253_v50, %v3255_v9  ;;  %v3295_v39 = vrot.slane %v3283_v34, 2  ;;  %v3299_v15 = vsel %vm790_vm9, %v3296_v38, %v3298_v37  ;;  %v3330_v34 = vstv %s4854_s12  ;;  %s7704_s12 = sld [smem:[#allocation9 + $0x52]] }
 0x350   :  { %v6823_v18 = vpop.permute.xlu1 %2771 }
 0x351   :  { %9128 = vst [vmem:[#allocation274_spill] sm:$0xff] %v6823_v18  ;;  %v6825_v62 = vpop.permute.xlu0 %2769  ;;  %v3286_v18 = vmul.f32 %v3282_v57, %v6359_v2  ;;  %v3297_v56 = vsel %vm790_vm9, %v3295_v39, %v3296_v38  ;;  %v3333_v57 = vmul.f32 %v3330_v34, %v6381_v10  ;;  %v6860_v39 = vld [vmem:[#allocation4 + $0x30] sm:$0xff] }
 0x352   :  { %9129 = vst [vmem:[#allocation275_spill] sm:$0xff] %v6825_v62  ;;  %3263 = vrot.lane.b32.xlu1 %v3254_v1, %s5022_s17  ;;  %v3301_v1 = vrot.slane %v3287_v31, 2  ;;  %v3331_v31 = vmul.f32 %v6860_v39, %v3330_v34 }
 0x353   :  { %3261 = vrot.lane.b32.xlu0 %v3250_v26, %s5022_s17  ;;  %v3300_v50 = vrot.slane %v3286_v18, 2  ;;  %v3303_v18 = vrot.slane %v3288_v40, 2  ;;  %v3336_v40 = vmul.f32 %v3330_v34, %v6391_v41 }
 0x354   :  { %v6833_v21 = vpop.permute.xlu1 %2811 }
 0x355   :  { %9130 = vst [vmem:[#allocation276_spill] sm:$0xff] %v6833_v21  ;;  %v6835_v17 = vpop.permute.xlu0 %2809  ;;  %v3302_v38 = vsel %vm790_vm9, %v3300_v50, %v3301_v1  ;;  %v3304_v50 = vsel %vm790_vm9, %v3301_v1, %v3303_v18  ;;  %v3343_v21 = vrot.slane %v3331_v31, 6  ;;  %v3351_v41 = vrot.slane %v3336_v40, 6 }
 0x356   :  { %9131 = vst [vmem:[#allocation277_spill] sm:$0xff] %v6835_v17  ;;  %3267 = vrot.lane.b32.xlu1 %v3255_v9, %s5022_s17  ;;  %v6855_v9 = vld [vmem:[#allocation4 + $0x38] sm:$0xff]  ;;  %v6869_v17 = vld [vmem:[#allocation4 + $0x50] sm:$0xff] }
 0x357   :  { %3265 = vrot.lane.b32.xlu0 %v3256_v7, %s5022_s17  ;;  %v3332_v7 = vmul.f32 %v6855_v9, %v3330_v34  ;;  %v3335_v10 = vmul.f32 %v6869_v17, %v3330_v34 }
 0x358   :  { %v6842_v13 = vpop.permute.xlu1 %2815 }
 0x359   :  { %9132 = vst [vmem:[#allocation278_spill] sm:$0xff] %v6842_v13  ;;  %v6844_v26 = vpop.permute.xlu0 %2813  ;;  %v3346_v13 = vrot.slane %v3333_v57, 6 }
 0x35a   :  { %9133 = vst [vmem:[#allocation279_spill] sm:$0xff] %v6844_v26  ;;  %3307 = vrot.lane.b32.xlu1 %v3299_v15, %s5022_s17  ;;  %v3344_v26 = vrot.slane %v3332_v7, 6 }
 0x35b   :  { %3305 = vrot.lane.b32.xlu0 %v3297_v56, %s5022_s17 }
 0x35c   :  { %v6851_v2 = vpop.permute.xlu1 %2851  ;;  %v3345_v1 = vsel %vm697_vm7, %v3343_v21, %v3344_v26 }
 0x35d   :  { %9134 = vst [vmem:[#allocation280_spill] sm:$0xff] %v6851_v2  ;;  %v6853_v16 = vpop.permute.xlu0 %2849  ;;  %v3347_v2 = vsel %vm697_vm7, %v3344_v26, %v3346_v13 }
 0x35e   :  { %9135 = vst [vmem:[#allocation281_spill] sm:$0xff] %v6853_v16  ;;  %3311 = vrot.lane.b32.xlu1 %v3302_v38, %s5022_s17  ;;  %v6874_v16 = vld [vmem:[#allocation4 + $0x48] sm:$0xff] }
 0x35f   :  { %3309 = vrot.lane.b32.xlu0 %v3298_v37, %s5022_s17  ;;  %v3334_v38 = vmul.f32 %v6874_v16, %v3330_v34  ;;  %v3370_v37 = vstv %s4855_s14  ;;  %s7738_s14 = sld [smem:[#allocation9 + $0x5b]] }
 0x360   :  { %v6865_v15 = vpop.permute.xlu1 %2855  ;;  %v3372_v34 = vmul.f32 %v6855_v9, %v3370_v37 }
 0x361   :  { %9136 = vst [vmem:[#allocation282_spill] sm:$0xff] %v6865_v15  ;;  %v6867_v56 = vpop.permute.xlu0 %2853  ;;  %v3348_v31 = vrot.slane %v3334_v38, 6  ;;  %v3371_v15 = vmul.f32 %v6860_v39, %v3370_v37  ;;  %v3373_v38 = vmul.f32 %v6874_v16, %v3370_v37 }
 0x362   :  { %9137 = vst [vmem:[#allocation283_spill] sm:$0xff] %v6867_v56  ;;  %3315 = vrot.lane.b32.xlu1 %v3303_v18, %s5022_s17  ;;  %v3349_v56 = vrot.slane %v3335_v10, 6  ;;  %v3380_v21 = vrot.slane %v3372_v34, 7 }
 0x363   :  { %3313 = vrot.lane.b32.xlu0 %v3304_v50, %s5022_s17  ;;  %v3379_v40 = vrot.slane %v3371_v15, 7  ;;  %v3410_v15 = vstv %s4856_s15  ;;  %s7786_s15 = sld [smem:[#allocation9 + $0x4c]] }
 0x364   :  { %v6879_v7 = vpop.permute.xlu1 %2859  ;;  %v3352_v13 = vsel %vm697_vm7, %v3349_v56, %v3351_v41  ;;  %v3350_v10 = vsel %vm697_vm7, %v3348_v31, %v3349_v56  ;;  %v3382_v31 = vrot.slane %v3373_v38, 7 }
 0x365   :  { %9138 = vst [vmem:[#allocation284_spill] sm:$0xff] %v6879_v7  ;;  %v6881_v57 = vpop.permute.xlu0 %2857 }
 0x366   :  { %9139 = vst [vmem:[#allocation285_spill] sm:$0xff] %v6881_v57  ;;  %3355 = vrot.lane.b32.xlu1 %v3347_v2, %s5022_s17 }
 0x367   :  { %3353 = vrot.lane.b32.xlu0 %v3345_v1, %s5022_s17  ;;  %v3381_v1 = vsel %vm1011_vm11, %v3379_v40, %v3380_v21 }
 0x368   :  { %v6889_v18 = vpop.permute.xlu1 %2899 }
 0x369   :  { %9140 = vst [vmem:[#allocation286_spill] sm:$0xff] %v6889_v18  ;;  %v6891_v50 = vpop.permute.xlu0 %2897  ;;  %v3415_v18 = vmul.f32 %v6869_v17, %v3410_v15 }
 0x36a   :  { %9141 = vst [vmem:[#allocation287_spill] sm:$0xff] %v6891_v50  ;;  %3359 = vrot.lane.b32.xlu1 %v3352_v13, %s5022_s17  ;;  %v3374_v50 = vmul.f32 %v6869_v17, %v3370_v37  ;;  %v3411_v13 = vmul.f32 %v6860_v39, %v3410_v15 }
 0x36b   :  { %3357 = vrot.lane.b32.xlu0 %v3350_v10, %s5022_s17  ;;  %v3412_v10 = vmul.f32 %v6855_v9, %v3410_v15  ;;  %s4857_s17 = sld [smem:[#allocation9 + $0x43]]  ;;  %v3429_v62 = vrot.slane %v3415_v18, 7 }
 0x36c   :  { %v6897_v26 = vpop.permute.xlu1 %2903  ;;  %v3383_v34 = vrot.slane %v3374_v50, 7 }
 0x36d   :  { %9142 = vst [vmem:[#allocation288_spill] sm:$0xff] %v6897_v26  ;;  %v6899_v2 = vpop.permute.xlu0 %2901  ;;  %v3414_v26 = vmul.f32 %v6874_v16, %v3410_v15 }
 0x36e   :  { %9143 = vst [vmem:[#allocation289_spill] sm:$0xff] %v6899_v2  ;;  %3387 = vrot.lane.b32.xlu1 %v3381_v1, %s5023_s24  ;;  %v3424_v2 = vrot.slane %v3412_v10, 7  ;;  %v6931_v10 = vld [vmem:[#allocation4 + $0x58] sm:$0x3f] }
 0x36f   :  { %3385 = vrot.lane.b32.xlu0 %v3379_v40, %s5023_s24  ;;  %v3384_v40 = vsel %vm1011_vm11, %v3382_v31, %v3383_v34  ;;  %v3416_v57 = vmul.f32 %v6931_v10, %v3410_v15 }
 0x370   :  { %v6906_v56 = vpop.permute.xlu1 %2907 }
 0x371   :  { %9144 = vst [vmem:[#allocation290_spill] sm:$0xff] %v6906_v56  ;;  %v6908_v41 = vpop.permute.xlu0 %2905  ;;  %v3423_v56 = vrot.slane %v3411_v13, 7 }
 0x372   :  { %9145 = vst [vmem:[#allocation291_spill] sm:$0xff] %v6908_v41  ;;  %3391 = vrot.lane.b32.xlu1 %v3382_v31, %s5023_s24  ;;  %v6919_v41 = vld [vmem:[#allocation4 + $0x40] sm:$0x3f] }
 0x373   :  { %3389 = vrot.lane.b32.xlu0 %v3380_v21, %s5023_s24  ;;  %v3413_v50 = vmul.f32 %v6919_v41, %v3410_v15  ;;  %v3425_v31 = vsel %vm1011_vm11, %v3423_v56, %v3424_v2 }
 0x374   :  { %v6914_v37 = vpop.permute.xlu1 %2947 }
 0x375   :  { %9146 = vst [vmem:[#allocation292_spill] sm:$0xff] %v6914_v37  ;;  %v6916_v1 = vpop.permute.xlu0 %2945  ;;  %v3426_v13 = vrot.slane %v3413_v50, 7  ;;  %v3431_v37 = vrot.slane %v3416_v57, 7 }
 0x376   :  { %9147 = vst [vmem:[#allocation293_spill] sm:$0xff] %v6916_v1  ;;  %3395 = vrot.lane.b32.xlu1 %v3383_v34, %s5023_s24  ;;  %v3458_v34 = vstv %s4857_s17  ;;  %v3546_v1 = vstv %s4859_s18  ;;  %s7870_s17 = sld [smem:[#allocation9 + $0x61]]  ;;  %s8202_s18 = sld [smem:[#allocation9 + $0x54]] }
 0x377   :  { %3393 = vrot.lane.b32.xlu0 %v3384_v40, %s5023_s24  ;;  %v3459_v50 = vmul.f32 %v6860_v39, %v3458_v34  ;;  %v3460_v60 = vmul.f32 %v6855_v9, %v3458_v34  ;;  %v3432_v18 = vsel %vm1011_vm11, %v3429_v62, %v3431_v37  ;;  %v3464_v37 = vmul.f32 %v6931_v10, %v3458_v34 }
 0x378   :  { %v6924_v38 = vpop.permute.xlu1 %2951 }
 0x379   :  { %9148 = vst [vmem:[#allocation294_spill] sm:$0xff] %v6924_v38  ;;  %v6926_v21 = vpop.permute.xlu0 %2949  ;;  %v3428_v38 = vrot.slane %v3414_v26, 7  ;;  %v3471_v57 = vrot.slane %v3459_v50, 7 }
 0x37a   :  { %9149 = vst [vmem:[#allocation295_spill] sm:$0xff] %v6926_v21  ;;  %3435 = vrot.lane.b32.xlu1 %v3425_v31, %s5023_s24  ;;  %v3427_v21 = vsel %vm1011_vm11, %v3424_v2, %v3426_v13  ;;  %v3461_v31 = vmul.f32 %v6919_v41, %v3458_v34  ;;  %v3472_v2 = vrot.slane %v3460_v60, 7  ;;  %v3462_v13 = vmul.f32 %v6874_v16, %v3458_v34 }
 0x37b   :  { %3433 = vrot.lane.b32.xlu0 %v3423_v56, %s5023_s24  ;;  %v3430_v26 = vsel %vm1011_vm11, %v3428_v38, %v3429_v62  ;;  %v3506_v62 = vstv %s4858_s16  ;;  %s7902_s16 = sld [smem:[#allocation9 + $0x3e]] }
 0x37c   :  { %v6936_v40 = vpop.permute.xlu1 %2955  ;;  %v3476_v60 = vrot.slane %v3462_v13, 7  ;;  %v3512_v3 = vmul.f32 %v6931_v10, %v3506_v62 }
 0x37d   :  { %9150 = vst [vmem:[#allocation296_spill] sm:$0xff] %v6936_v40  ;;  %v6938_v7 = vpop.permute.xlu0 %2953 }
 0x37e   :  { %9151 = vst [vmem:[#allocation297_spill] sm:$0xff] %v6938_v7  ;;  %3439 = vrot.lane.b32.xlu1 %v3428_v38, %s5023_s24  ;;  %v3474_v7 = vrot.slane %v3461_v31, 7 }
 0x37f   :  { %3437 = vrot.lane.b32.xlu0 %v3427_v21, %s5023_s24  ;;  %v3463_v21 = vmul.f32 %v6869_v17, %v3458_v34  ;;  %v3507_v34 = vmul.f32 %v6860_v39, %v3506_v62 }
 0x380   :  { %v6945_v15 = vpop.permute.xlu1 %2995  ;;  %v3475_v31 = vsel %vm1011_vm11, %v3472_v2, %v3474_v7 }
 0x381   :  { %9152 = vst [vmem:[#allocation298_spill] sm:$0xff] %v6945_v15  ;;  %v6947_v56 = vpop.permute.xlu0 %2993  ;;  %v3477_v38 = vrot.slane %v3463_v21, 7 }
 0x382   :  { %9153 = vst [vmem:[#allocation299_spill] sm:$0xff] %v6947_v56  ;;  %3443 = vrot.lane.b32.xlu1 %v3432_v18, %s5023_s24  ;;  %v3473_v56 = vsel %vm1011_vm11, %v3471_v57, %v3472_v2  ;;  %v3519_v2 = vrot.slane %v3507_v34, 3  ;;  %v3547_v34 = vmul.f32 %v6860_v39, %v3546_v1 }
 0x383   :  { %3441 = vrot.lane.b32.xlu0 %v3430_v26, %s5023_s24  ;;  %v3508_v26 = vmul.f32 %v6855_v9, %v3506_v62 }
 0x384   :  { %v6956_v40 = vpop.permute.xlu1 %2999 }
 0x385   :  { %9154 = vst [vmem:[#allocation300_spill] sm:$0xff] %v6956_v40  ;;  %v6958_v15 = vpop.permute.xlu0 %2997  ;;  %v3479_v40 = vrot.slane %v3464_v37, 7  ;;  %v3520_v21 = vrot.slane %v3508_v26, 3  ;;  %v3510_v37 = vmul.f32 %v6874_v16, %v3506_v62 }
 0x386   :  { %9155 = vst [vmem:[#allocation301_spill] sm:$0xff] %v6958_v15  ;;  %3483 = vrot.lane.b32.xlu1 %v3473_v56, %s5023_s24  ;;  %v3509_v15 = vmul.f32 %v6919_v41, %v3506_v62  ;;  %v3478_v56 = vsel %vm1011_vm11, %v3476_v60, %v3477_v38 }
 0x387   :  { %3481 = vrot.lane.b32.xlu0 %v3471_v57, %s5023_s24  ;;  %v3480_v7 = vsel %vm1011_vm11, %v3477_v38, %v3479_v40  ;;  %v3524_v38 = vrot.slane %v3510_v37, 3 }
 0x388   :  { %v6964_v50 = vpop.permute.xlu1 %3035 }
 0x389   :  { %9156 = vst [vmem:[#allocation302_spill] sm:$0xff] %v6964_v50  ;;  %v6966_v18 = vpop.permute.xlu0 %3033  ;;  %v3511_v50 = vmul.f32 %v6869_v17, %v3506_v62  ;;  %v3521_v62 = vsel %vm1152_vm12, %v3519_v2, %v3520_v21  ;;  %v3551_v2 = vmul.f32 %v6869_v17, %v3546_v1 }
 0x38a   :  { %9157 = vst [vmem:[#allocation303_spill] sm:$0xff] %v6966_v18  ;;  %3487 = vrot.lane.b32.xlu1 %v3476_v60, %s5023_s24  ;;  %v3522_v18 = vrot.slane %v3509_v15, 3  ;;  %v3527_v15 = vrot.slane %v3512_v3, 3 }
 0x38b   :  { %3485 = vrot.lane.b32.xlu0 %v3475_v31, %s5023_s24  ;;  %v3525_v26 = vrot.slane %v3511_v50, 3 }
 0x38c   :  { %v6975_v57 = vpop.permute.xlu1 %3039  ;;  %v3523_v40 = vsel %vm1152_vm12, %v3520_v21, %v3522_v18  ;;  %v3559_v18 = vrot.slane %v3547_v34, 3  ;;  %v3550_v21 = vmul.f32 %v6874_v16, %v3546_v1 }
 0x38d   :  { %9158 = vst [vmem:[#allocation304_spill] sm:$0xff] %v6975_v57  ;;  %v6977_v13 = vpop.permute.xlu0 %3037  ;;  %v3549_v57 = vmul.f32 %v6919_v41, %v3546_v1  ;;  %v3528_v3 = vsel %vm1152_vm12, %v3525_v26, %v3527_v15  ;;  %v3594_v15 = vstv %s4860_s19  ;;  %s5028_s19 = smov 16  }
 0x38e   :  { %9159 = vst [vmem:[#allocation305_spill] sm:$0xff] %v6977_v13  ;;  %3491 = vrot.lane.b32.xlu1 %v3480_v7, %s5023_s24  ;;  %v3548_v13 = vmul.f32 %v6855_v9, %v3546_v1 }
 0x38f   :  { %3489 = vrot.lane.b32.xlu0 %v3478_v56, %s5023_s24 }
 0x390   :  { %v6985_v60 = vpop.permute.xlu1 %3043  ;;  %v3560_v7 = vrot.slane %v3548_v13, 3 }
 0x391   :  { %9160 = vst [vmem:[#allocation306_spill] sm:$0xff] %v6985_v60  ;;  %v6987_v31 = vpop.permute.xlu0 %3041  ;;  %v3526_v60 = vsel %vm1152_vm12, %v3524_v38, %v3525_v26  ;;  %v3564_v26 = vrot.slane %v3550_v21, 3  ;;  %v3565_v38 = vrot.slane %v3551_v2, 3 }
 0x392   :  { %9161 = vst [vmem:[#allocation307_spill] sm:$0xff] %v6987_v31  ;;  %3531 = vrot.lane.b32.xlu1 %v3523_v40, %s5023_s24  ;;  %v3562_v31 = vrot.slane %v3549_v57, 3  ;;  %v3561_v13 = vsel %vm1152_vm12, %v3559_v18, %v3560_v7 }
 0x393   :  { %3529 = vrot.lane.b32.xlu0 %v3521_v62, %s5023_s24  ;;  %v3552_v62 = vmul.f32 %v6931_v10, %v3546_v1  ;;  %v3566_v1 = vsel %vm1152_vm12, %v3564_v26, %v3565_v38 }
 0x394   :  { %v6996_v56 = vpop.permute.xlu1 %3075  ;;  %v3563_v57 = vsel %vm1152_vm12, %v3560_v7, %v3562_v31 }
 0x395   :  { %9162 = vst [vmem:[#allocation308_spill] sm:$0xff] %v6996_v56  ;;  %v6998_v50 = vpop.permute.xlu0 %3073 }
 0x396   :  { %9163 = vst [vmem:[#allocation309_spill] sm:$0xff] %v6998_v50  ;;  %3535 = vrot.lane.b32.xlu1 %v3528_v3, %s5023_s24  ;;  %v3596_v3 = vmul.f32 %v6855_v9, %v3594_v15  ;;  %v3595_v50 = vmul.f32 %v6860_v39, %v3594_v15 }
 0x397   :  { %3533 = vrot.lane.b32.xlu0 %v3526_v60, %s5023_s24 }
 0x398   :  { %v7006_v37 = vpop.permute.xlu1 %3079  ;;  %v3608_v21 = vrot.slane %v3596_v3, 3 }
 0x399   :  { %9164 = vst [vmem:[#allocation310_spill] sm:$0xff] %v7006_v37  ;;  %v7008_v40 = vpop.permute.xlu0 %3077  ;;  %v3567_v37 = vrot.slane %v3552_v62, 3  ;;  %v3599_v62 = vmul.f32 %v6869_v17, %v3594_v15 }
 0x39a   :  { %9165 = vst [vmem:[#allocation311_spill] sm:$0xff] %v7008_v40  ;;  %3571 = vrot.lane.b32.xlu1 %v3563_v57, %s5023_s24  ;;  %v3597_v40 = vmul.f32 %v6919_v41, %v3594_v15 }
 0x39b   :  { %3569 = vrot.lane.b32.xlu0 %v3561_v13, %s5023_s24  ;;  %v3568_v57 = vsel %vm1152_vm12, %v3565_v38, %v3567_v37  ;;  %v3607_v13 = vrot.slane %v3595_v50, 3  ;;  %v3613_v50 = vrot.slane %v3599_v62, 3 }
 0x39c   :  { %v7015_v34 = vpop.permute.xlu1 %3083  ;;  %v3610_v2 = vrot.slane %v3597_v40, 3 }
 0x39d   :  { %9166 = vst [vmem:[#allocation312_spill] sm:$0xff] %v7015_v34  ;;  %v7017_v60 = vpop.permute.xlu0 %3081  ;;  %v3609_v40 = vsel %vm1152_vm12, %v3607_v13, %v3608_v21  ;;  %v3642_v34 = vstv %s4861_s20  ;;  %s5029_s20 = smov 32  }
 0x39e   :  { %9167 = vst [vmem:[#allocation313_spill] sm:$0xff] %v7017_v60  ;;  %3575 = vrot.lane.b32.xlu1 %v3566_v1, %s5023_s24  ;;  %v3598_v60 = vmul.f32 %v6874_v16, %v3594_v15  ;;  %v3600_v1 = vmul.f32 %v6931_v10, %v3594_v15  ;;  %v3611_v3 = vsel %vm1152_vm12, %v3608_v21, %v3610_v2 }
 0x39f   :  { %3573 = vrot.lane.b32.xlu0 %v3562_v31, %s5023_s24  ;;  %v3644_v15 = vmul.f32 %v6855_v9, %v3642_v34  ;;  %v3643_v21 = vmul.f32 %v6860_v39, %v3642_v34  ;;  %v3646_v62 = vmul.f32 %v6874_v16, %v3642_v34 }
 0x3a0   :  { %v7025_v7 = vpop.permute.xlu1 %3123  ;;  %v3612_v38 = vrot.slane %v3598_v60, 3  ;;  %v3615_v56 = vrot.slane %v3600_v1, 3  ;;  %v3647_v1 = vmul.f32 %v6869_v17, %v3642_v34 }
 0x3a1   :  { %9168 = vst [vmem:[#allocation314_spill] sm:$0xff] %v7025_v7  ;;  %v7027_v18 = vpop.permute.xlu0 %3121  ;;  %v3660_v7 = vrot.slane %v3646_v62, 3 }
 0x3a2   :  { %9169 = vst [vmem:[#allocation315_spill] sm:$0xff] %v7027_v18  ;;  %3579 = vrot.lane.b32.xlu1 %v3567_v37, %s5023_s24  ;;  %v3661_v18 = vrot.slane %v3647_v1, 3 }
 0x3a3   :  { %3577 = vrot.lane.b32.xlu0 %v3568_v57, %s5023_s24 }
 0x3a4   :  { %v7034_v26 = vpop.permute.xlu1 %3127 }
 0x3a5   :  { %9170 = vst [vmem:[#allocation316_spill] sm:$0xff] %v7034_v26  ;;  %v7036_v31 = vpop.permute.xlu0 %3125  ;;  %v3614_v26 = vsel %vm1152_vm12, %v3612_v38, %v3613_v50 }
 0x3a6   :  { %9171 = vst [vmem:[#allocation317_spill] sm:$0xff] %v7036_v31  ;;  %3619 = vrot.lane.b32.xlu1 %v3611_v3, %s5023_s24  ;;  %v3645_v31 = vmul.f32 %v6919_v41, %v3642_v34  ;;  %v3616_v3 = vsel %vm1152_vm12, %v3613_v50, %v3615_v56  ;;  %v3662_v50 = vsel %vm1152_vm12, %v3660_v7, %v3661_v18 }
 0x3a7   :  { %3617 = vrot.lane.b32.xlu0 %v3609_v40, %s5023_s24  ;;  %v3656_v40 = vrot.slane %v3644_v15, 3 }
 0x3a8   :  { %v7043_v37 = vpop.permute.xlu1 %3131  ;;  %v3658_v38 = vrot.slane %v3645_v31, 3 }
 0x3a9   :  { %9172 = vst [vmem:[#allocation318_spill] sm:$0xff] %v7043_v37  ;;  %v7045_v57 = vpop.permute.xlu0 %3129  ;;  %v3655_v37 = vrot.slane %v3643_v21, 3 }
 0x3aa   :  { %9173 = vst [vmem:[#allocation319_spill] sm:$0xff] %v7045_v57  ;;  %3623 = vrot.lane.b32.xlu1 %v3614_v26, %s5023_s24 }
 0x3ab   :  { %3621 = vrot.lane.b32.xlu0 %v3610_v2, %s5023_s24  ;;  %v3657_v57 = vsel %vm1152_vm12, %v3655_v37, %v3656_v40 }
 0x3ac   :  { %v7053_v60 = vpop.permute.xlu1 %3171 }
 0x3ad   :  { %9174 = vst [vmem:[#allocation320_spill] sm:$0xff] %v7053_v60  ;;  %v7055_v13 = vpop.permute.xlu0 %3169  ;;  %v3648_v60 = vmul.f32 %v6931_v10, %v3642_v34 }
 0x3ae   :  { %9175 = vst [vmem:[#allocation321_spill] sm:$0xff] %v7055_v13  ;;  %3627 = vrot.lane.b32.xlu1 %v3615_v56, %s5023_s24  ;;  %v3659_v13 = vsel %vm1152_vm12, %v3656_v40, %v3658_v38 }
 0x3af   :  { %3625 = vrot.lane.b32.xlu0 %v3616_v3, %s5023_s24  ;;  %v3663_v15 = vrot.slane %v3648_v60, 3 }
 0x3b0   :  { %v7062_v26 = vpop.permute.xlu1 %3175 }
 0x3b1   :  { %9176 = vst [vmem:[#allocation322_spill] sm:$0xff] %v7062_v26  ;;  %v7064_v2 = vpop.permute.xlu0 %3173  ;;  %v3664_v21 = vsel %vm1152_vm12, %v3661_v18, %v3663_v15 }
 0x3b2   :  { %9177 = vst [vmem:[#allocation323_spill] sm:$0xff] %v7064_v2  ;;  %3667 = vrot.lane.b32.xlu1 %v3659_v13, %s5023_s24  ;;  %v3690_v13 = vstv %s4862_s21  ;;  %s5030_s21 = smov 48  }
 0x3b3   :  { %3665 = vrot.lane.b32.xlu0 %v3657_v57, %s5023_s24  ;;  %v3692_v60 = vmul.f32 %v6855_v9, %v3690_v13  ;;  %v3691_v62 = vmul.f32 %v6860_v39, %v3690_v13  ;;  %v3694_v3 = vmul.f32 %v6869_v17, %v3690_v13  ;;  %v3693_v40 = vmul.f32 %v6874_v16, %v3690_v13 }
 0x3b4   :  { %v7071_v56 = vpop.permute.xlu1 %3211 }
 0x3b5   :  { %9178 = vst [vmem:[#allocation324_spill] sm:$0xff] %v7071_v56  ;;  %v7073_v31 = vpop.permute.xlu0 %3209 }
 0x3b6   :  { %9179 = vst [vmem:[#allocation325_spill] sm:$0xff] %v7073_v31  ;;  %3671 = vrot.lane.b32.xlu1 %v3662_v50, %s5023_s24 }
 0x3b7   :  { %3669 = vrot.lane.b32.xlu0 %v3658_v38, %s5023_s24  ;;  %v3716_v38 = vstv %s4863_s1  ;;  %s5031_s1 = smov 64  }
 0x3b8   :  { %v7078_v34 = vpop.permute.xlu1 %3215  ;;  %v3721_v26 = vmul.f32 %v6869_v17, %v3716_v38 }
 0x3b9   :  { %9180 = vst [vmem:[#allocation326_spill] sm:$0xff] %v7078_v34  ;;  %v7080_v37 = vpop.permute.xlu0 %3213  ;;  %v269_v34 = vstv %s4782_s28 }
 0x3ba   :  { %9181 = vst [vmem:[#allocation327_spill] sm:$0xff] %v7080_v37  ;;  %3675 = vrot.lane.b32.xlu1 %v3663_v15, %s5023_s24  ;;  %v7211_v49 = vmul.f32 %v7208_v28, %v269_v34 }
 0x3bb   :  { %3673 = vrot.lane.b32.xlu0 %v3664_v21, %s5023_s24  ;;  %v3718_v21 = vmul.f32 %v6855_v9, %v3716_v38  ;;  %s4864_s24 = sld [smem:[#allocation9 + $0x44]] }
 0x3bc   :  { %v7085_v57 = vpop.permute.xlu1 %3219 }
 0x3bd   :  { %9182 = vst [vmem:[#allocation328_spill] sm:$0xff] %v7085_v57  ;;  %v7087_v7 = vpop.permute.xlu0 %3217  ;;  %v7160_v57 = vstv %s4780_s27 }
 0x3be   :  { %9183 = vst [vmem:[#allocation329_spill] sm:$0xff] %v7087_v7  ;;  %3701 = vrot.lane.b32.xlu1 %v3692_v60, %s5024_s4  ;;  %v3717_v60 = vmul.f32 %v6860_v39, %v3716_v38 }
 0x3bf   :  { %3699 = vrot.lane.b32.xlu0 %v3691_v62, %s5024_s4 }
 0x3c0   :  { %v7093_v1 = vpop.permute.xlu1 %3259 }
 0x3c1   :  { %9184 = vst [vmem:[#allocation330_spill] sm:$0xff] %v7093_v1  ;;  %v7095_v18 = vpop.permute.xlu0 %3257  ;;  %v7123_v31 = vstv %s4864_s24  ;;  %v7151_v1 = vstv %s4784_s26  ;;  %s5032_s24 = smov 80  }
 0x3c2   :  { %9185 = vst [vmem:[#allocation331_spill] sm:$0xff] %v7095_v18  ;;  %3705 = vrot.lane.b32.xlu1 %v3694_v3, %s5024_s4  ;;  %v3720_v3 = vmul.f32 %v6874_v16, %v3716_v38  ;;  %v3756_v56 = vmul.f32 %v6855_v9, %v7123_v31  ;;  %v7149_v18 = vstv %s4783_s25  ;;  %v3759_v52 = vmul.f32 %v6869_v17, %v7123_v31  ;;  %s5036_s25 = smov [#allocation10]  }
 0x3c3   :  { %3703 = vrot.lane.b32.xlu0 %v3693_v40, %s5024_s4  ;;  %v3719_v40 = vmul.f32 %v6919_v41, %v3716_v38  ;;  %s4766_s26 = sshll.u32 %s5036_s25, 4  ;;  %s4767_s26 = int_to_ptr.vmem [resolvable:$true] %s4766_s26 }
 0x3c4   :  { %v7101_v50 = vpop.permute.xlu1 %3263  ;;  %p4990_p0 = scmp.lt.s32.totalorder %s4767_s26, %s4767_s26 }
 0x3c5   :  { %9186 = vst [vmem:[#allocation332_spill] sm:$0xff] %v7101_v50  ;;  %v7103_v15 = vpop.permute.xlu0 %3261  ;;  %v7147_v50 = vstv %s4779_s23  ;;  %s5034_s23 = smov 112  }
 0x3c6   :  { %9187 = vst [vmem:[#allocation333_spill] sm:$0xff] %v7103_v15  ;;  %3731 = vrot.lane.b32.xlu1 %v3718_v21, %s5024_s4  ;;  %v3757_v15 = vmul.f32 %v6919_v41, %v7123_v31 }
 0x3c7   :  { %3729 = vrot.lane.b32.xlu0 %v3717_v60, %s5024_s4  ;;  %v3722_v60 = vmul.f32 %v6931_v10, %v3716_v38  ;;  %v3755_v38 = vmul.f32 %v6860_v39, %v7123_v31 }
 0x3c8   :  { %v7109_v62 = vpop.permute.xlu1 %3267 }
 0x3c9   :  { %9188 = vst [vmem:[#allocation334_spill] sm:$0xff] %v7109_v62  ;;  %v7111_v13 = vpop.permute.xlu0 %3265  ;;  %v3758_v62 = vmul.f32 %v6874_v16, %v7123_v31 }
 0x3ca   :  { %9189 = vst [vmem:[#allocation335_spill] sm:$0xff] %v7111_v13  ;;  %3735 = vrot.lane.b32.xlu1 %v3720_v3, %s5024_s4  ;;  %v7137_v13 = vstv %s4781_s22  ;;  %s5033_s22 = smov 96  }
 0x3cb   :  { %3733 = vrot.lane.b32.xlu0 %v3719_v40, %s5024_s4  ;;  %v7181_v8 = vmul.f32 %v7177_v53, %v7137_v13  ;;  %v7198_v6 = vmul.f32 %v7194_v24, %v7137_v13 }
 0x3cc   :  { %v7117_v2 = vpop.permute.xlu1 %3307 }
 0x3cd   :  { %9190 = vst [vmem:[#allocation336_spill] sm:$0xff] %v7117_v2  ;;  %v7119_v21 = vpop.permute.xlu0 %3305  ;;  %v7172_v2 = vld [vmem:[#allocation4 + $0x8] sm:$0xff] }
 0x3ce   :  { %9191 = vst [vmem:[#allocation337_spill] sm:$0xff] %v7119_v21  ;;  %3739 = vrot.lane.b32.xlu1 %v3722_v60, %s5024_s4  ;;  %v7175_v21 = vmul.f32 %v7172_v2, %v269_v34 }
 0x3cf   :  { %3737 = vrot.lane.b32.xlu0 %v3721_v26, %s5024_s4 }
 0x3d0   :  { %v7127_v3 = vpop.permute.xlu1 %3311  ;;  %v284_v25 = vrot.slane %v7175_v21, 4 }
 0x3d1   :  { %9192 = vst [vmem:[#allocation338_spill] sm:$0xff] %v7127_v3  ;;  %v7129_v40 = vpop.permute.xlu0 %3309  ;;  %v7170_v3 = vstv %s216_s30 }
 0x3d2   :  { %9193 = vst [vmem:[#allocation339_spill] sm:$0xff] %v7129_v40  ;;  %3769 = vrot.lane.b32.xlu1 %v3756_v56, %s5024_s4  ;;  %v7153_v56 = vstv %s4865_s0  ;;  %v218_v27 = vmul.f32 %v7194_v24, %v7170_v3  ;;  %s4985_s0 = scalar_lea.vmem %s4767_s26, 64 }
 0x3d3   :  { %3767 = vrot.lane.b32.xlu0 %v3755_v38, %s5024_s4  ;;  %v4938_v38 = vld [vmem:[#allocation4 + $0x10] sm:$0x3f]  ;;  %v3793_v61 = vmul.f32 %v6860_v39, %v7153_v56  ;;  %v3795_v19 = vmul.f32 %v6919_v41, %v7153_v56  ;;  %p4986_p13 = scmp.ne.s32.totalorder %s4767_s26, %s4985_s0  ;;  %p4991_p1 = scmp.lt.s32.totalorder %s4985_s0, %s4985_s0 }
 0x3d4   :  { %v7139_v60 = vpop.permute.xlu1 %3315  ;;  %v7158_v7 = vmul.f32 %v4938_v38, %v7149_v18  ;;  %v7163_v37 = vmul.f32 %v4938_v38, %v7151_v1  ;;  %v272_v40 = vmul.f32 %v4938_v38, %v269_v34  ;;  %v244_v58 = vmul.f32 %v4938_v38, %v7160_v57 }
 0x3d5   :  { %9194 = vst [vmem:[#allocation340_spill] sm:$0xff] %v7139_v60  ;;  %v7141_v26 = vpop.permute.xlu0 %3313  ;;  %v4939_v60 = vld [vmem:[#allocation4 + $0x28] sm:$0x3f]  ;;  %p4992_p2 = por %p4991_p1, %p4990_p0 }
 0x3d6   :  { %9195 = vst [vmem:[#allocation341_spill] sm:$0xff] %v7141_v26  ;;  %3773 = vrot.lane.b32.xlu1 %v3758_v62, %s5024_s4  ;;  %v7168_v26 = vmul.f32 %v4939_v60, %v7149_v18  ;;  %v7201_v14 = vmul.f32 %v4939_v60, %v7137_v13  ;;  %v233_v54 = vmul.f32 %v4939_v60, %v7147_v50  ;;  %v286_v51 = vrot.slane %v272_v40, 4 }
 0x3d7   :  { %3771 = vrot.lane.b32.xlu0 %v3757_v15, %s5024_s4  ;;  %v7184_v15 = vmul.f32 %v4939_v60, %v7151_v1  ;;  %v247_v22 = vmul.f32 %v4939_v60, %v7160_v57  ;;  %v270_v40 = vmul.f32 %v7194_v24, %v269_v34  ;;  %v9200_v35 = vrot.slane %v7158_v7, 4  ;;  %p4993_p3 = pnand %p4992_p2, %p4986_p13 }
 0x3d8   :  { %v7186_v62 = vpop.permute.xlu1 %3355  ;;  %v8840_v63 = vrot.slane %v7168_v26, 4  ;;  %v9202_v48 = vrot.slane %v7163_v37, 4 }
 0x3d9   :  { %9196 = vst [vmem:[#allocation342_spill] sm:$0xff] %v7186_v62  ;;  %v7188_v23 = vpop.permute.xlu0 %3353  ;;  %v230_v62 = vmul.f32 %v4938_v38, %v7147_v50 }
 0x3da   :  { %9197 = vst [vmem:[#allocation343_spill] sm:$0xff] %v7188_v23  ;;  %3805 = vrot.lane.b32.xlu1 %v3793_v61, %s5024_s4  ;;  %v275_v23 = vmul.f32 %v4939_v60, %v269_v34  ;;  %v3794_v61 = vmul.f32 %v6855_v9, %v7153_v56  ;;  %v7232_v21 = vadd.f32 %v8840_v63, %v233_v54  ;;  %v3966_v60 = vstv %s7155_s29 }
 0x3db   :  { %3775 = vrot.lane.b32.xlu0 %v3759_v52, %s5024_s4  ;;  %v7228_v52 = vmul.f32 %v4938_v38, %v7137_v13  ;;  %v7246_v43 = vadd.f32 %v9202_v48, %v244_v58  ;;  %v289_v38 = vrot.slane %v7211_v49, 4  ;;  %v287_v54 = vsel %vm282_vm13, %v284_v25, %v286_v51 }
 0x3dc   :  { %v7219_v32 = vpop.permute.xlu1 %3359  ;;  %v291_v63 = vrot.slane %v275_v23, 4  ;;  %v3796_v51 = vmul.f32 %v6874_v16, %v7153_v56  ;;  %v3967_v49 = vmul.f32 %v6860_v39, %v3966_v60  ;;  %v7270_v23 = vmul.f32 %v7172_v2, %v7137_v13 }
 0x3dd   :  { %9198 = vst [vmem:[#allocation344_spill] sm:$0xff] %v7219_v32  ;;  %v7221_v12 = vpop.permute.xlu0 %3357  ;;  %v7238_v32 = vadd.f32 %v9200_v35, %v230_v62  ;;  %v7254_v35 = vmul.f32 %v7172_v2, %v7149_v18  ;;  %v283_v62 = vrot.slane %v270_v40, 4 }
 0x3de   :  { %9199 = vst [vmem:[#allocation345_spill] sm:$0xff] %v7221_v12  ;;  %v9201_v12 = vrot.slane %v7184_v15, 4  ;;  %3809 = vrot.lane.b32.xlu1 %v3795_v19, %s5024_s4  ;;  %v3797_v19 = vmul.f32 %v6869_v17, %v7153_v56  ;;  %9205 = vst [vmem:[#allocation348_spill] sm:$0xff] %v7270_v23 }
 0x3df   :  { %3807 = vrot.lane.b32.xlu0 %v3794_v61, %s5024_s4  ;;  %v3968_v61 = vmul.f32 %v6855_v9, %v3966_v60  ;;  %v285_v40 = vsel %vm282_vm13, %v283_v62, %v284_v25  ;;  %v229_v25 = vmul.f32 %v7172_v2, %v7147_v50 }
 0x3e0   :  { %v7242_v45 = vadd.f32 %v9201_v12, %v247_v22  ;;  %v273_v12 = vmul.f32 %v7177_v53, %v269_v34  ;;  %v219_v22 = vmul.f32 %v7172_v2, %v7170_v3  ;;  %v7259_v48 = vpop.permute.xlu1 %3387  ;;  %v7274_v34 = vmul.f32 %v7208_v28, %v7137_v13 }
 0x3e1   :  { %9203 = vst [vmem:[#allocation346_spill] sm:$0xff] %v7259_v48  ;;  %v7261_v58 = vpop.permute.xlu0 %3385  ;;  %v221_v48 = vmul.f32 %v7208_v28, %v7170_v3  ;;  %v292_v13 = vsel %vm282_vm13, %v289_v38, %v291_v63  ;;  %v3976_v63 = vrot.slane %v3968_v61, 5  ;;  %v7308_v59 = vadd.f32 %v285_v40, %v218_v27 }
 0x3e2   :  { %9204 = vst [vmem:[#allocation347_spill] sm:$0xff] %v7261_v58  ;;  %9206 = vst [vmem:[#allocation349_spill] sm:$0xff] %v7274_v34  ;;  %v7279_v58 = vadd.f32 %v287_v54, %v219_v22  ;;  %3813 = vrot.lane.b32.xlu1 %v3797_v19, %s5024_s4  ;;  %v316_v34 = vrot.slane %v7254_v35, 4  ;;  %v288_v23 = vrot.slane %v273_v12, 4  ;;  %v306_v54 = vmul.f32 %v7177_v53, %v7149_v18 }
 0x3e3   :  { %3811 = vrot.lane.b32.xlu0 %v3796_v51, %s5024_s4  ;;  %v307_v22 = vmul.f32 %v7208_v28, %v7149_v18  ;;  %v3975_v19 = vrot.slane %v3967_v49, 5  ;;  %v3798_v51 = vmul.f32 %v6931_v10, %v7153_v56  ;;  %v3969_v35 = vmul.f32 %v6874_v16, %v3966_v60  ;;  %9211 = vst [vmem:[#allocation354_spill] sm:$0xff] %v7308_v59 }
 0x3e4   :  { %9207 = vst [vmem:[#allocation350_spill] sm:$0xff] %v7279_v58  ;;  %v7294_v58 = vpop.permute.xlu1 %3391  ;;  %v7304_v12 = vmul.f32 %v6869_v17, %v3966_v60  ;;  %v7306_v62 = vadd.f32 %v292_v13, %v221_v48  ;;  %v9212_v56 = vrot.slane %v7158_v7, 4  ;;  %v340_v60 = vmul.f32 %v7172_v2, %v7151_v1 }
 0x3e5   :  { %9208 = vst [vmem:[#allocation351_spill] sm:$0xff] %v7294_v58  ;;  %v7296_v4 = vpop.permute.xlu0 %3389  ;;  %v342_v48 = vmul.f32 %v7177_v53, %v7151_v1  ;;  %v343_v27 = vmul.f32 %v7208_v28, %v7151_v1  ;;  %v320_v61 = vrot.slane %v306_v54, 4  ;;  %v321_v13 = vrot.slane %v307_v22, 4 }
 0x3e6   :  { %9209 = vst [vmem:[#allocation352_spill] sm:$0xff] %v7296_v4  ;;  %9210 = vst [vmem:[#allocation353_spill] sm:$0xff] %v7306_v62  ;;  %v220_v4 = vmul.f32 %v7177_v53, %v7170_v3  ;;  %3981 = vrot.lane.b32.xlu1 %v3975_v19, %s5025_s13  ;;  %v319_v49 = vsel %vm282_vm13, %v316_v34, %v9212_v56  ;;  %v290_v3 = vsel %vm282_vm13, %v288_v23, %v289_v38 }
 0x3e7   :  { %3815 = vrot.lane.b32.xlu0 %v3798_v51, %s5024_s4  ;;  %v303_v40 = vmul.f32 %v7194_v24, %v7149_v18  ;;  %v3977_v56 = vsel %vm383_vm8, %v3975_v19, %v3976_v63  ;;  %v3978_v58 = vrot.slane %v3969_v35, 5  ;;  %v3979_v59 = vrot.slane %v7304_v12, 5 }
 0x3e8   :  { %v7326_v51 = vpop.permute.xlu1 %3395  ;;  %v3870_v62 = vstv %s7277_s3  ;;  %v7333_v5 = vadd.f32 %v319_v49, %v229_v25  ;;  %v231_v38 = vmul.f32 %v7177_v53, %v7147_v50  ;;  %v228_v23 = vmul.f32 %v7194_v24, %v7147_v50 }
 0x3e9   :  { %9213 = vst [vmem:[#allocation355_spill] sm:$0xff] %v7326_v51  ;;  %v7328_v7 = vpop.permute.xlu0 %3393  ;;  %v352_v18 = vrot.slane %v340_v60, 4  ;;  %v356_v54 = vrot.slane %v342_v48, 4  ;;  %v357_v22 = vrot.slane %v343_v27, 4  ;;  %v339_v19 = vmul.f32 %v7194_v24, %v7151_v1 }
 0x3ea   :  { %9214 = vst [vmem:[#allocation356_spill] sm:$0xff] %v7328_v7  ;;  %3985 = vrot.lane.b32.xlu1 %v3976_v63, %s5025_s13  ;;  %v7343_v35 = vadd.f32 %v290_v3, %v220_v4  ;;  %v315_v25 = vrot.slane %v303_v40, 4  ;;  %v3872_v7 = vmul.f32 %v6855_v9, %v3870_v62  ;;  %v7351_v51 = vmul.f32 %v6919_v41, %v3870_v62 }
 0x3eb   :  { %3983 = vrot.lane.b32.xlu0 %v3977_v56, %s5025_s13  ;;  %v322_v63 = vsel %vm282_vm13, %v320_v61, %v321_v13  ;;  %v243_v60 = vmul.f32 %v7172_v2, %v7160_v57  ;;  %v3980_v48 = vsel %vm383_vm8, %v3978_v58, %v3979_v59  ;;  %v3871_v4 = vmul.f32 %v6860_v39, %v3870_v62 }
 0x3ec   :  { %v7345_v12 = vpop.permute.xlu1 %3435  ;;  %v317_v1 = vsel %vm282_vm13, %v315_v25, %v316_v34  ;;  %v232_v27 = vmul.f32 %v7208_v28, %v7147_v50  ;;  %v9217_v3 = vrot.slane %v7168_v26, 4  ;;  %v9218_v2 = vrot.slane %v7163_v37, 4 }
 0x3ed   :  { %9215 = vst [vmem:[#allocation357_spill] sm:$0xff] %v7345_v12  ;;  %v7347_v49 = vpop.permute.xlu0 %3433  ;;  %v245_v56 = vmul.f32 %v7177_v53, %v7160_v57  ;;  %v358_v34 = vsel %vm282_vm13, %v356_v54, %v357_v22  ;;  %v351_v25 = vrot.slane %v339_v19, 4  ;;  %v9219_v50 = vrot.slane %v7184_v15, 4 }
 0x3ee   :  { %9216 = vst [vmem:[#allocation358_spill] sm:$0xff] %v7347_v49  ;;  %v324_v40 = vsel %vm282_vm13, %v321_v13, %v9217_v3  ;;  %3989 = vrot.lane.b32.xlu1 %v3980_v48, %s5025_s13  ;;  %v355_v61 = vsel %vm282_vm13, %v352_v18, %v9218_v2  ;;  %v3884_v37 = vrot.slane %v3872_v7, 4  ;;  %v3886_v48 = vrot.slane %v7351_v51, 4 }
 0x3ef   :  { %3987 = vrot.lane.b32.xlu0 %v3978_v58, %s5025_s13  ;;  %v360_v26 = vsel %vm282_vm13, %v357_v22, %v9219_v50  ;;  %v3760_v58 = vmul.f32 %v6931_v10, %v7123_v31  ;;  %v353_v3 = vsel %vm282_vm13, %v351_v25, %v352_v18  ;;  %v3883_v53 = vrot.slane %v3871_v4, 4 }
 0x3f0   :  { %v7377_v49 = vpop.permute.xlu1 %3439  ;;  %v3874_v54 = vmul.f32 %v6874_v16, %v3870_v62  ;;  %v3875_v19 = vmul.f32 %v6869_v17, %v3870_v62  ;;  %v7387_v15 = vadd.f32 %v322_v63, %v231_v38  ;;  %v242_v22 = vmul.f32 %v7194_v24, %v7160_v57 }
 0x3f1   :  { %9220 = vst [vmem:[#allocation359_spill] sm:$0xff] %v7377_v49  ;;  %v7379_v13 = vpop.permute.xlu0 %3437  ;;  %v246_v2 = vmul.f32 %v7208_v28, %v7160_v57  ;;  %v7395_v31 = vadd.f32 %v317_v1, %v228_v23  ;;  %v7397_v51 = vadd.f32 %v355_v61, %v243_v60  ;;  %v7399_v7 = vadd.f32 %v324_v40, %v232_v27  ;;  %v7722_v49 = vld [vmem:[#allocation4 + $0x58] sm:$0x3f] }
 0x3f2   :  { %9221 = vst [vmem:[#allocation360_spill] sm:$0xff] %v7379_v13  ;;  %3777 = vrot.lane.b32.xlu1 %v3760_v58, %s5024_s4  ;;  %v370_v18 = vadd.f32 %v358_v34, %v245_v56  ;;  %v367_v38 = vadd.f32 %v353_v3, %v242_v22  ;;  %v3887_v28 = vsel %vm282_vm13, %v3884_v37, %v3886_v48  ;;  %v3888_v23 = vrot.slane %v3874_v54, 4  ;;  %v9233_v54 = vld [vmem:[#allocation348_spill] sm:$0xff] }
 0x3f3   :  { %3991 = vrot.lane.b32.xlu0 %v3979_v59, %s5025_s13  ;;  %v7401_v63 = vadd.f32 %v360_v26, %v246_v2  ;;  %v3876_v57 = vmul.f32 %v6931_v10, %v3870_v62  ;;  %v3885_v59 = vsel %vm282_vm13, %v3883_v53, %v3884_v37  ;;  %v3889_v1 = vrot.slane %v3875_v19, 4  ;;  %v9228_v26 = vld [vmem:[#allocation22_spill] sm:$0xff]  ;;  %v9234_v19 = vld [vmem:[#allocation24_spill] sm:$0xff] }
 0x3f4   :  { %v7403_v4 = vpop.permute.xlu1 %3443  ;;  %v4142_v60 = vstv %s7358_s5  ;;  %v7413_v27 = vadd.f32 %v5535_v46, %v7181_v8  ;;  %v502_v40 = vadd.f32 %v5559_v30, %v7232_v21  ;;  %v499_v61 = vadd.f32 %v5561_v33, %v7238_v32 }
 0x3f5   :  { %9222 = vst [vmem:[#allocation361_spill] sm:$0xff] %v7403_v4  ;;  %v7405_v24 = vpop.permute.xlu0 %3441  ;;  %v413_v62 = vadd.f32 %v5543_v29, %v7201_v14  ;;  %v410_v56 = vadd.f32 %v5545_v0, %v7228_v52  ;;  %v550_v46 = vadd.f32 %v5567_v36, %v7242_v45  ;;  %v547_v8 = vadd.f32 %v5569_v42, %v7246_v43  ;;  %v9224_v43 = vld [vmem:[#allocation17_spill] sm:$0xff]  ;;  %v9226_v52 = vld [vmem:[#allocation20_spill] sm:$0xff] }
 0x3f6   :  { %9223 = vst [vmem:[#allocation362_spill] sm:$0xff] %v7405_v24  ;;  %3895 = vrot.lane.b32.xlu1 %v3887_v28, %s5024_s4  ;;  %v686_v30 = vadd.f32 %v5595_v11, %v502_v40  ;;  %v683_v33 = vadd.f32 %v5597_v55, %v499_v61  ;;  %v4144_v34 = vmul.f32 %v6855_v9, %v4142_v60  ;;  %v3891_v45 = vrot.slane %v3876_v57, 4  ;;  %v9237_v61 = vld [vmem:[#allocation349_spill] sm:$0xff] }
 0x3f7   :  { %3893 = vrot.lane.b32.xlu0 %v3885_v59, %s5024_s4  ;;  %v7437_v29 = vmul.f32 %v6919_v41, %v4142_v60  ;;  %v727_v0 = vadd.f32 %v5618_v20, %v550_v46  ;;  %v3890_v36 = vsel %vm282_vm13, %v3888_v23, %v3889_v1  ;;  %v4143_v42 = vmul.f32 %v6860_v39, %v4142_v60  ;;  %v9225_v20 = vld [vmem:[#allocation14_spill] sm:$0xff]  ;;  %v9227_v39 = vld [vmem:[#allocation21_spill] sm:$0xff] }
 0x3f8   :  { %v7431_v32 = vpop.permute.xlu1 %3483  ;;  %v408_v11 = vadd.f32 %v5537_v44, %v7198_v6  ;;  %v7447_v55 = vadd.f32 %v5585_v47, %v413_v62  ;;  %v724_v14 = vadd.f32 %v9224_v43, %v547_v8  ;;  %v7453_v9 = vadd.f32 %v9225_v20, %v410_v56  ;;  %v9230_v47 = vld [vmem:[#allocation23_spill] sm:$0xff]  ;;  %v9235_v59 = vld [vmem:[#allocation350_spill] sm:$0xff]  ;;  %v9239_v46 = vld [vmem:[#allocation353_spill] sm:$0xff] }
 0x3f9   :  { %v7433_v21 = vpop.permute.xlu0 %3481  ;;  %v7456_v25 = vadd.f32 %v9226_v52, %v686_v30  ;;  %v7459_v50 = vadd.f32 %v9227_v39, %v683_v33  ;;  %v7462_v44 = vadd.f32 %v9228_v26, %v727_v0  ;;  %v4158_v3 = vrot.slane %v7437_v29, 1  ;;  %v9236_v23 = vld [vmem:[#allocation26_spill] sm:$0xff]  ;;  %v9238_v62 = vld [vmem:[#allocation27_spill] sm:$0xff]  ;;  %v9240_v8 = vld [vmem:[#allocation28_spill] sm:$0xff] }
 0x3fa   :  { %3899 = vrot.lane.b32.xlu1 %v3890_v36, %s5024_s4  ;;  %v7467_v6 = vadd.f32 %v9230_v47, %v724_v14  ;;  %v4146_v53 = vmul.f32 %v6874_v16, %v4142_v60  ;;  %v409_v22 = vadd.f32 %v9234_v19, %v9233_v54  ;;  %v3892_v2 = vsel %vm282_vm13, %v3889_v1, %v3891_v45  ;;  %v9241_v16 = vld [vmem:[#allocation354_spill] sm:$0xff]  ;;  %v9242_v1 = vld [vmem:[#allocation29_spill] sm:$0xff]  ;;  %v9244_v29 = vld [vmem:[#allocation31_spill] sm:$0xff] }
 0x3fb   :  { %3897 = vrot.lane.b32.xlu0 %v3886_v48, %s5024_s4  ;;  %9229 = vst [vmem:[#allocation17_spill] sm:$0xff] %v7462_v44  ;;  %v4156_v48 = vrot.slane %v4144_v34, 1  ;;  %v4155_v28 = vrot.slane %v4143_v42, 1  ;;  %v4147_v57 = vmul.f32 %v6869_v17, %v4142_v60  ;;  %v7483_v40 = vadd.f32 %v9236_v23, %v9235_v59  ;;  %v9243_v33 = vld [vmem:[#allocation30_spill] sm:$0xff]  ;;  %v9245_v36 = vld [vmem:[#allocation36_spill] sm:$0xff]  ;;  %v9253_v59 = vld [vmem:[#allocation35_spill] sm:$0xff] }
 0x3fc   :  { %9231 = vst [vmem:[#allocation14_spill] sm:$0xff] %v7467_v6  ;;  %v7471_v58 = vpop.permute.xlu1 %3487  ;;  %v7487_v56 = vadd.f32 %v9238_v62, %v9237_v61  ;;  %v7491_v30 = vadd.f32 %v9240_v8, %v9239_v46  ;;  %v7497_v17 = vadd.f32 %v9242_v1, %v9241_v16  ;;  %v7501_v34 = vadd.f32 %v9243_v33, %v7333_v5  ;;  %v9246_v43 = vld [vmem:[#allocation32_spill] sm:$0xff]  ;;  %v9258_v62 = vld [vmem:[#allocation38_spill] sm:$0xff]  ;;  %v9305_v44 = vld [vmem:[#allocation51_spill] sm:$0xff] }
 0x3fd   :  { %9232 = vst [vmem:[#allocation20_spill] sm:$0xff] %v7471_v58  ;;  %v7473_v37 = vpop.permute.xlu0 %3485  ;;  %v7505_v0 = vadd.f32 %v9244_v29, %v7343_v35  ;;  %v548_v42 = vadd.f32 %v9245_v36, %v370_v18  ;;  %v7510_v14 = vadd.f32 %v9246_v43, %v7387_v15  ;;  %v4159_v5 = vsel %vm428_vm10, %v4156_v48, %v4158_v3  ;;  %v9250_v15 = vld [vmem:[#allocation33_spill] sm:$0xff]  ;;  %v9259_v46 = vld [vmem:[#allocation16_spill] sm:$0xff]  ;;  %v9264_v43 = vld [vmem:[#allocation39_spill] sm:$0xff] }
 0x3fe   :  { %3903 = vrot.lane.b32.xlu1 %v3891_v45, %s5024_s4  ;;  %v9247_v45 = vld [vmem:[#allocation37_spill] sm:$0xff]  ;;  %v4160_v26 = vrot.slane %v4146_v53, 1  ;;  %v4157_v35 = vsel %vm428_vm10, %v4155_v28, %v4156_v48  ;;  %v4161_v47 = vrot.slane %v4147_v57, 1  ;;  %v4148_v18 = vmul.f32 %v6931_v10, %v4142_v60  ;;  %v9254_v60 = vld [vmem:[#allocation40_spill] sm:$0xff]  ;;  %v9256_v57 = vld [vmem:[#allocation15_spill] sm:$0xff] }
 0x3ff   :  { %3901 = vrot.lane.b32.xlu0 %v3892_v2, %s5024_s4  ;;  %v545_v20 = vadd.f32 %v9247_v45, %v367_v38  ;;  %v7521_v54 = vstv %s7442_s6  ;;  %v7525_v19 = vadd.f32 %v9250_v15, %v7395_v31  ;;  %v9251_v38 = vld [vmem:[#allocation34_spill] sm:$0xff]  ;;  %v7533_v23 = vadd.f32 %v9253_v59, %v7399_v7  ;;  %v9255_v53 = vld [vmem:[#allocation41_spill] sm:$0xff]  ;;  %v7566_v36 = vld [vmem:[#allocation4 + $0x30] sm:$0xff] }
 0x400   :  { %v7513_v52 = vpop.permute.xlu1 %3491  ;;  %v7529_v2 = vadd.f32 %v9251_v38, %v7397_v51  ;;  %v596_v48 = vadd.f32 %v9254_v60, %v7413_v27  ;;  %v593_v28 = vadd.f32 %v9255_v53, %v408_v11  ;;  %v7541_v31 = vadd.f32 %v9256_v57, %v548_v42  ;;  %v7557_v33 = vld [vmem:[#allocation4 + $0x38] sm:$0xff]  ;;  %v7590_v38 = vld [vmem:[#allocation4 + $0x48] sm:$0xff]  ;;  %v7595_v59 = vld [vmem:[#allocation4 + $0x50] sm:$0xff] }
 0x401   :  { %9248 = vst [vmem:[#allocation21_spill] sm:$0xff] %v7513_v52  ;;  %v7515_v39 = vpop.permute.xlu0 %3489  ;;  %v2230_v61 = vstv %s7464_s7  ;;  %v7545_v51 = vadd.f32 %v9258_v62, %v409_v22  ;;  %v7548_v8 = vadd.f32 %v9259_v46, %v545_v20  ;;  %v7551_v7 = vstv %s7469_s8  ;;  %9263 = vst [vmem:[#allocation349_spill] sm:$0xff] %v7557_v33  ;;  %v9306_v6 = vld [vmem:[#allocation52_spill] sm:$0xff] }
 0x402   :  { %9249 = vst [vmem:[#allocation22_spill] sm:$0xff] %v7515_v39  ;;  %9252 = vst [vmem:[#allocation23_spill] sm:$0xff] %v7529_v2  ;;  %4167 = vrot.lane.b32.xlu1 %v4159_v5, %s5025_s13  ;;  %v3920_v27 = vmul.f32 %v7557_v33, %v7521_v54  ;;  %v4162_v11 = vsel %vm428_vm10, %v4160_v26, %v4161_v47  ;;  %v4163_v29 = vrot.slane %v4148_v18, 1  ;;  %v9267_v26 = vld [vmem:[#allocation18_spill] sm:$0xff]  ;;  %v9268_v18 = vld [vmem:[#allocation19_spill] sm:$0xff] }
 0x403   :  { %4165 = vrot.lane.b32.xlu0 %v4157_v35, %s5025_s13  ;;  %9257 = vst [vmem:[#allocation348_spill] sm:$0xff] %v7541_v31  ;;  %9260 = vst [vmem:[#allocation24_spill] sm:$0xff] %v7548_v8  ;;  %v7564_v22 = vmul.f32 %v6919_v41, %v7521_v54  ;;  %v3919_v42 = vmul.f32 %v7566_v36, %v7521_v54  ;;  %v7574_v45 = vadd.f32 %v9264_v43, %v7401_v63 }
 0x404   :  { %v7553_v16 = vpop.permute.xlu1 %3531  ;;  %v7577_v20 = vmul.f32 %v7566_v36, %v2230_v61  ;;  %v7580_v5 = vmul.f32 %v7557_v33, %v2230_v61  ;;  %v7585_v35 = vadd.f32 %v9267_v26, %v596_v48  ;;  %v7588_v15 = vadd.f32 %v9268_v18, %v593_v28  ;;  %9269 = vst [vmem:[#allocation28_spill] sm:$0xff] %v7590_v38  ;;  %v9274_v26 = vld [vmem:[#allocation42_spill] sm:$0xff] }
 0x405   :  { %9261 = vst [vmem:[#allocation350_spill] sm:$0xff] %v7553_v16  ;;  %v7555_v1 = vpop.permute.xlu0 %3529  ;;  %9265 = vst [vmem:[#allocation27_spill] sm:$0xff] %v7574_v45  ;;  %v7593_v63 = vmul.f32 %v7590_v38, %v2230_v61  ;;  %v7598_v60 = vmul.f32 %v7595_v59, %v2230_v61  ;;  %v2260_v48 = vmul.f32 %v7557_v33, %v7551_v7  ;;  %v3932_v46 = vrot.slane %v3920_v27, 4 }
 0x406   :  { %9262 = vst [vmem:[#allocation26_spill] sm:$0xff] %v7555_v1  ;;  %9266 = vst [vmem:[#allocation353_spill] sm:$0xff] %v7577_v20  ;;  %4171 = vrot.lane.b32.xlu1 %v4162_v11, %s5025_s13  ;;  %v3922_v57 = vmul.f32 %v7590_v38, %v7521_v54  ;;  %v7616_v61 = vmul.f32 %v7595_v59, %v7521_v54  ;;  %v4164_v62 = vsel %vm428_vm10, %v4161_v47, %v4163_v29  ;;  %v9276_v47 = vld [vmem:[#allocation43_spill] sm:$0xff] }
 0x407   :  { %4169 = vrot.lane.b32.xlu0 %v4158_v3, %s5025_s13  ;;  %9270 = vst [vmem:[#allocation354_spill] sm:$0xff] %v7598_v60  ;;  %v7604_v3 = vmul.f32 %v7566_v36, %v7551_v7  ;;  %v3934_v11 = vrot.slane %v7564_v22, 4  ;;  %v3931_v43 = vrot.slane %v3919_v42, 4  ;;  %v7622_v18 = vadd.f32 %v9274_v26, %v7483_v40  ;;  %v9277_v22 = vld [vmem:[#allocation44_spill] sm:$0xff]  ;;  %v9281_v26 = vld [vmem:[#allocation45_spill] sm:$0xff] }
 0x408   :  { %v7608_v53 = vpop.permute.xlu1 %3535  ;;  %v2261_v1 = vmul.f32 %v6919_v41, %v7551_v7  ;;  %v7632_v27 = vadd.f32 %v9276_v47, %v7487_v56  ;;  %v7636_v40 = vadd.f32 %v9277_v22, %v7491_v30  ;;  %v2272_v41 = vrot.slane %v2260_v48, 7  ;;  %v9283_v48 = vld [vmem:[#allocation46_spill] sm:$0xff] }
 0x409   :  { %9271 = vst [vmem:[#allocation29_spill] sm:$0xff] %v7604_v3  ;;  %9272 = vst [vmem:[#allocation30_spill] sm:$0xff] %v7608_v53  ;;  %v7610_v28 = vpop.permute.xlu0 %3533  ;;  %v3937_v56 = vrot.slane %v7616_v61, 4  ;;  %v3935_v47 = vsel %vm282_vm13, %v3932_v46, %v3934_v11  ;;  %v3933_v30 = vsel %vm282_vm13, %v3931_v43, %v3932_v46  ;;  %v3924_v22 = vmul.f32 %v6931_v10, %v7521_v54  ;;  %v9288_v10 = vld [vmem:[#allocation47_spill] sm:$0xff] }
 0x40a   :  { %9273 = vst [vmem:[#allocation31_spill] sm:$0xff] %v7610_v28  ;;  %9275 = vst [vmem:[#allocation36_spill] sm:$0xff] %v7622_v18  ;;  %4175 = vrot.lane.b32.xlu1 %v4163_v29, %s5025_s13  ;;  %v4046_v42 = vstv %s7570_s9  ;;  %v7653_v53 = vadd.f32 %v9281_v26, %v7497_v17  ;;  %v7657_v16 = vadd.f32 %v9283_v48, %v7501_v34  ;;  %v9286_v61 = vrot.slane %v7577_v20, 7 }
 0x40b   :  { %4173 = vrot.lane.b32.xlu0 %v4164_v62, %s5025_s13  ;;  %9278 = vst [vmem:[#allocation32_spill] sm:$0xff] %v7636_v40  ;;  %v3936_v62 = vrot.slane %v3922_v57, 4  ;;  %v9285_v57 = vrot.slane %v7580_v5, 7  ;;  %v2274_v46 = vrot.slane %v2261_v1, 7  ;;  %v7670_v17 = vadd.f32 %v9288_v10, %v7505_v0 }
 0x40c   :  { %v7641_v28 = vpop.permute.xlu1 %3571  ;;  %9282 = vst [vmem:[#allocation34_spill] sm:$0xff] %v7653_v53  ;;  %9284 = vst [vmem:[#allocation35_spill] sm:$0xff] %v7657_v16  ;;  %v9290_v54 = vrot.slane %v7598_v60, 7  ;;  %v9291_v34 = vrot.slane %v7593_v63, 7  ;;  %v7681_v26 = vmul.f32 %v7590_v38, %v7551_v7  ;;  %v2294_v1 = vstv %s7600_s10 }
 0x40d   :  { %9279 = vst [vmem:[#allocation37_spill] sm:$0xff] %v7641_v28  ;;  %v7643_v29 = vpop.permute.xlu0 %3569  ;;  %9289 = vst [vmem:[#allocation41_spill] sm:$0xff] %v7670_v17  ;;  %v4048_v10 = vmul.f32 %v7557_v33, %v4046_v42  ;;  %v4047_v28 = vmul.f32 %v7566_v36, %v4046_v42  ;;  %v7714_v24 = vsel %vm1011_vm11, %v2272_v41, %v2274_v46 }
 0x40e   :  { %9280 = vst [vmem:[#allocation33_spill] sm:$0xff] %v7643_v29  ;;  %v7664_v29 = vsel %vm1011_vm11, %v9286_v61, %v9285_v57  ;;  %3943 = vrot.lane.b32.xlu1 %v3935_v47, %s5024_s4  ;;  %v7677_v43 = vsel %vm1011_vm11, %v9291_v34, %v9290_v54  ;;  %v9293_v47 = vld [vmem:[#allocation48_spill] sm:$0xff]  ;;  %v7699_v54 = vld [vmem:[#allocation4 + $0x40] sm:$0x3f]  ;;  %9301 = vst [vmem:[#allocation42_spill] sm:$0xff] %v7714_v24  ;;  %v7717_v4 = vmul.f32 %v7566_v36, %v2294_v1 }
 0x40f   :  { %9287 = vst [vmem:[#allocation40_spill] sm:$0xff] %v7664_v29  ;;  %3941 = vrot.lane.b32.xlu0 %v3933_v30, %s5024_s4  ;;  %9292 = vst [vmem:[#allocation15_spill] sm:$0xff] %v7677_v43  ;;  %v7686_v48 = vadd.f32 %v9293_v47, %v7510_v14  ;;  %v9294_v30 = vld [vmem:[#allocation49_spill] sm:$0xff]  ;;  %v7702_v34 = vmul.f32 %v7699_v54, %v4046_v42  ;;  %v9299_v14 = vrot.slane %v7604_v3, 7  ;;  %v4060_v20 = vrot.slane %v4048_v10, 1 }
 0x410   :  { %v7690_v0 = vadd.f32 %v9294_v30, %v7525_v19  ;;  %v7694_v57 = vpop.permute.xlu1 %3575  ;;  %9298 = vst [vmem:[#allocation18_spill] sm:$0xff] %v7699_v54  ;;  %v3938_v47 = vsel %vm282_vm13, %v3936_v62, %v3937_v56  ;;  %v3939_v30 = vrot.slane %v3924_v22, 4  ;;  %v2296_v13 = vmul.f32 %v7557_v33, %v2294_v1 }
 0x411   :  { %9296 = vst [vmem:[#allocation16_spill] sm:$0xff] %v7694_v57  ;;  %v7696_v61 = vpop.permute.xlu0 %3573  ;;  %v7709_v19 = vsel %vm1011_vm11, %v9299_v14, %v2272_v41  ;;  %v7726_v62 = vmul.f32 %v7722_v49, %v7551_v7  ;;  %v7729_v22 = vmul.f32 %v7590_v38, %v2294_v1  ;;  %v2297_v41 = vmul.f32 %v7699_v54, %v2294_v1 }
 0x412   :  { %9295 = vst [vmem:[#allocation38_spill] sm:$0xff] %v7690_v0  ;;  %9297 = vst [vmem:[#allocation39_spill] sm:$0xff] %v7696_v61  ;;  %3947 = vrot.lane.b32.xlu1 %v3938_v47, %s5024_s4  ;;  %v2300_v46 = vmul.f32 %v7722_v49, %v2294_v1  ;;  %v7735_v14 = vmul.f32 %v7595_v59, %v7551_v7  ;;  %v2299_v47 = vmul.f32 %v7595_v59, %v2294_v1 }
 0x413   :  { %9300 = vst [vmem:[#allocation19_spill] sm:$0xff] %v7709_v19  ;;  %3945 = vrot.lane.b32.xlu0 %v3934_v11, %s5024_s4  ;;  %v4062_v29 = vrot.slane %v7702_v34, 1  ;;  %v3940_v24 = vsel %vm282_vm13, %v3937_v56, %v3939_v30  ;;  %v4059_v3 = vrot.slane %v4047_v28, 1  ;;  %v4050_v19 = vmul.f32 %v7590_v38, %v4046_v42  ;;  %v9307_v28 = vld [vmem:[#allocation55_spill] sm:$0xff] }
 0x414   :  { %9302 = vst [vmem:[#allocation43_spill] sm:$0xff] %v7735_v14  ;;  %v7740_v11 = vpop.permute.xlu1 %3579  ;;  %v4051_v7 = vmul.f32 %v7595_v59, %v4046_v42  ;;  %v685_v1 = vadd.f32 %v9305_v44, %v7533_v23  ;;  %v7752_v8 = vadd.f32 %v9306_v6, %v7545_v51  ;;  %v8843_v10 = vrot.slane %v7717_v4, 7 }
 0x415   :  { %9303 = vst [vmem:[#allocation44_spill] sm:$0xff] %v7740_v11  ;;  %v7742_v12 = vpop.permute.xlu0 %3577  ;;  %v2308_v31 = vrot.slane %v2296_v13, 7  ;;  %v772_v56 = vadd.f32 %v9307_v28, %v7453_v9  ;;  %v2310_v0 = vrot.slane %v2297_v41, 7  ;;  %v2313_v11 = vrot.slane %v2299_v47, 7  ;;  %v9311_v41 = vld [vmem:[#allocation54_spill] sm:$0xff] }
 0x416   :  { %9304 = vst [vmem:[#allocation45_spill] sm:$0xff] %v7742_v12  ;;  %3951 = vrot.lane.b32.xlu1 %v3939_v30, %s5024_s4  ;;  %v2315_v12 = vrot.slane %v2300_v46, 7  ;;  %v7761_v44 = vstv %s7692_s11  ;;  %v4052_v13 = vmul.f32 %v7722_v49, %v4046_v42  ;;  %v3830_v51 = vstv %s7704_s12 }
 0x417   :  { %3949 = vrot.lane.b32.xlu0 %v3940_v24, %s5024_s4  ;;  %9308 = vst [vmem:[#allocation46_spill] sm:$0xff] %v7761_v44  ;;  %v4063_v24 = vsel %vm428_vm10, %v4060_v20, %v4062_v29  ;;  %v4061_v30 = vsel %vm428_vm10, %v4059_v3, %v4060_v20  ;;  %v4064_v9 = vrot.slane %v4050_v19, 1  ;;  %v4065_v28 = vrot.slane %v4051_v7, 1  ;;  %v9313_v20 = vld [vmem:[#allocation57_spill] sm:$0xff] }
 0x418   :  { %v7763_v23 = vpop.permute.xlu1 %3619  ;;  %v7773_v46 = vadd.f32 %v9311_v41, %v7447_v55  ;;  %v7778_v47 = vsel %vm1011_vm11, %v8843_v10, %v2308_v31  ;;  %v7782_v42 = vmul.f32 %v7595_v59, %v7761_v44  ;;  %v7790_v3 = vadd.f32 %v9313_v20, %v7632_v27  ;;  %v9314_v55 = vld [vmem:[#allocation25_spill] sm:$0xff] }
 0x419   :  { %9309 = vst [vmem:[#allocation47_spill] sm:$0xff] %v7763_v23  ;;  %v7765_v6 = vpop.permute.xlu0 %3617  ;;  %v7793_v19 = vadd.f32 %v9314_v55, %v772_v56  ;;  %v2366_v7 = vmul.f32 %v7590_v38, %v7761_v44  ;;  %v3832_v41 = vmul.f32 %v7557_v33, %v3830_v51  ;;  %v7799_v10 = vsel %vm1011_vm11, %v2308_v31, %v2310_v0  ;;  %v9318_v23 = vld [vmem:[#allocation62_spill] sm:$0xff] }
 0x41a   :  { %9310 = vst [vmem:[#allocation48_spill] sm:$0xff] %v7765_v6  ;;  %9312 = vst [vmem:[#allocation49_spill] sm:$0xff] %v7782_v42  ;;  %4071 = vrot.lane.b32.xlu1 %v4063_v24, %s5025_s13  ;;  %v2434_v24 = vstv %s7738_s14  ;;  %v3833_v6 = vmul.f32 %v7699_v54, %v3830_v51  ;;  %v3831_v27 = vmul.f32 %v7566_v36, %v3830_v51  ;;  %v9317_v20 = vrot.slane %v7729_v22, 7 }
 0x41b   :  { %4069 = vrot.lane.b32.xlu0 %v4061_v30, %s5025_s13  ;;  %v7809_v56 = vsel %vm1011_vm11, %v2313_v11, %v2315_v12  ;;  %v4066_v31 = vsel %vm428_vm10, %v4064_v9, %v4065_v28  ;;  %v4067_v0 = vrot.slane %v4052_v13, 1  ;;  %v7826_v57 = vmul.f32 %v7699_v54, %v7761_v44 }
 0x41c   :  { %v7802_v34 = vpop.permute.xlu1 %3623  ;;  %v7814_v55 = vsel %vm1011_vm11, %v9317_v20, %v2313_v11  ;;  %v2380_v11 = vrot.slane %v2366_v7, 3  ;;  %v2436_v13 = vmul.f32 %v7557_v33, %v2434_v24  ;;  %v7833_v9 = vmul.f32 %v7699_v54, %v2434_v24 }
 0x41d   :  { %9315 = vst [vmem:[#allocation51_spill] sm:$0xff] %v7802_v34  ;;  %v7804_v30 = vpop.permute.xlu0 %3621  ;;  %v7819_v34 = vadd.f32 %v9318_v23, %v7686_v48  ;;  %v3844_v48 = vrot.slane %v3832_v41, 4  ;;  %v3843_v20 = vrot.slane %v3831_v27, 4  ;;  %v3835_v12 = vmul.f32 %v7595_v59, %v3830_v51 }
 0x41e   :  { %9316 = vst [vmem:[#allocation52_spill] sm:$0xff] %v7804_v30  ;;  %v9319_v30 = vld [vmem:[#allocation65_spill] sm:$0xff]  ;;  %4075 = vrot.lane.b32.xlu1 %v4066_v31, %s5025_s13  ;;  %v3836_v31 = vmul.f32 %v7722_v49, %v3830_v51  ;;  %v2435_v7 = vmul.f32 %v7566_v36, %v2434_v24  ;;  %v4068_v17 = vsel %vm428_vm10, %v4065_v28, %v4067_v0  ;;  %v4094_v27 = vstv %s7786_s15 }
 0x41f   :  { %v7822_v61 = vadd.f32 %v9319_v30, %v685_v1  ;;  %4073 = vrot.lane.b32.xlu0 %v4062_v29, %s5025_s13  ;;  %v3846_v30 = vrot.slane %v3833_v6, 4  ;;  %v7843_v29 = vmul.f32 %v7722_v49, %v7761_v44  ;;  %v3834_v41 = vmul.f32 %v7590_v38, %v3830_v51  ;;  %v9323_v44 = vld [vmem:[#allocation68_spill] sm:$0xff] }
 0x420   :  { %v7835_v1 = vpop.permute.xlu1 %3627  ;;  %v7851_v6 = vmul.f32 %v7722_v49, %v2434_v24  ;;  %v956_v16 = vadd.f32 %v9323_v44, %v7752_v8  ;;  %v9324_v53 = vrot.slane %v7782_v42, 3  ;;  %v2448_v51 = vrot.slane %v2436_v13, 3  ;;  %v9329_v42 = vld [vmem:[#allocation73_spill] sm:$0xff] }
 0x421   :  { %9320 = vst [vmem:[#allocation55_spill] sm:$0xff] %v7835_v1  ;;  %v7837_v23 = vpop.permute.xlu0 %3625  ;;  %9322 = vst [vmem:[#allocation57_spill] sm:$0xff] %v7843_v29  ;;  %v2439_v1 = vmul.f32 %v7595_v59, %v2434_v24  ;;  %v3849_v45 = vrot.slane %v3835_v12, 4  ;;  %v3851_v2 = vrot.slane %v3836_v31, 4  ;;  %v3848_v8 = vrot.slane %v3834_v41, 4  ;;  %v9326_v12 = vld [vmem:[#allocation70_spill] sm:$0xff] }
 0x422   :  { %9321 = vst [vmem:[#allocation54_spill] sm:$0xff] %v7837_v23  ;;  %v2438_v23 = vmul.f32 %v7590_v38, %v2434_v24  ;;  %4079 = vrot.lane.b32.xlu1 %v4067_v0, %s5025_s13  ;;  %v7861_v28 = vsel %vm1152_vm12, %v2380_v11, %v9324_v53  ;;  %v3847_v0 = vsel %vm282_vm13, %v3844_v48, %v3846_v30  ;;  %v2447_v13 = vrot.slane %v2435_v7, 3  ;;  %v9327_v30 = vld [vmem:[#allocation71_spill] sm:$0xff]  ;;  %v9328_v31 = vld [vmem:[#allocation72_spill] sm:$0xff] }
 0x423   :  { %4077 = vrot.lane.b32.xlu0 %v4068_v17, %s5025_s13  ;;  %v3845_v17 = vsel %vm282_vm13, %v3843_v20, %v3844_v48  ;;  %v4096_v44 = vmul.f32 %v7557_v33, %v4094_v27  ;;  %v7874_v53 = vmul.f32 %v7699_v54, %v4094_v27  ;;  %v4095_v11 = vmul.f32 %v7566_v36, %v4094_v27 }
 0x424   :  { %v7864_v18 = vpop.permute.xlu1 %3667  ;;  %v2453_v40 = vrot.slane %v2439_v1, 3  ;;  %v2452_v52 = vrot.slane %v2438_v23, 3  ;;  %v8847_v14 = vrot.slane %v7851_v6, 3  ;;  %v958_v48 = vadd.f32 %v9326_v12, %v7585_v35 }
 0x425   :  { %9325 = vst [vmem:[#allocation25_spill] sm:$0xff] %v7864_v18  ;;  %v7866_v24 = vpop.permute.xlu0 %3665  ;;  %v955_v20 = vadd.f32 %v9327_v30, %v7588_v15  ;;  %v960_v41 = vadd.f32 %v9328_v31, %v7773_v46  ;;  %v959_v7 = vadd.f32 %v9329_v42, %v7790_v3  ;;  %v9330_v1 = vrot.slane %v7833_v9, 3  ;;  %v9372_v18 = vld [vmem:[#allocation156_spill] sm:$0xff] }
 0x426   :  { %3855 = vrot.lane.b32.xlu1 %v3847_v0, %s5024_s4  ;;  %v3852_v35 = vsel %vm282_vm13, %v3849_v45, %v3851_v2  ;;  %v4098_v12 = vmul.f32 %v7590_v38, %v4094_v27  ;;  %v4099_v15 = vmul.f32 %v7595_v59, %v4094_v27  ;;  %v3850_v46 = vsel %vm282_vm13, %v3848_v8, %v3849_v45  ;;  %v9333_v45 = vld [vmem:[#allocation80_spill] sm:$0xff] }
 0x427   :  { %3853 = vrot.lane.b32.xlu0 %v3845_v17, %s5024_s4  ;;  %v7891_v23 = vsel %vm1152_vm12, %v2448_v51, %v9330_v1  ;;  %v4108_v30 = vrot.slane %v4096_v44, 1  ;;  %v4110_v42 = vrot.slane %v7874_v53, 1  ;;  %v4107_v3 = vrot.slane %v4095_v11, 1  ;;  %v9334_v44 = vld [vmem:[#allocation81_spill] sm:$0xff] }
 0x428   :  { %v7893_v0 = vpop.permute.xlu1 %3671  ;;  %v7905_v31 = vsel %vm1152_vm12, %v2447_v13, %v2448_v51  ;;  %v7908_v1 = vsel %vm1152_vm12, %v2452_v52, %v2453_v40  ;;  %v7913_v2 = vsel %vm1152_vm12, %v2453_v40, %v8847_v14  ;;  %v1039_v8 = vadd.f32 %v9333_v45, %v7819_v34  ;;  %v9335_v51 = vld [vmem:[#allocation82_spill] sm:$0xff]  ;;  %v9336_v52 = vld [vmem:[#allocation83_spill] sm:$0xff] }
 0x429   :  { %9331 = vst [vmem:[#allocation62_spill] sm:$0xff] %v7893_v0  ;;  %v7895_v17 = vpop.permute.xlu0 %3669  ;;  %v1038_v53 = vadd.f32 %v9334_v44, %v7459_v50  ;;  %v1041_v11 = vadd.f32 %v9335_v51, %v7456_v25  ;;  %v1040_v13 = vadd.f32 %v9336_v52, %v7822_v61  ;;  %v9337_v0 = vld [vmem:[#allocation90_spill] sm:$0xff]  ;;  %v9338_v40 = vld [vmem:[#allocation91_spill] sm:$0xff]  ;;  %v4230_v34 = vstv %s7870_s17  ;;  %v9341_v51 = vld [vmem:[#allocation92_spill] sm:$0xff] }
 0x42a   :  { %9332 = vst [vmem:[#allocation65_spill] sm:$0xff] %v7895_v17  ;;  %3859 = vrot.lane.b32.xlu1 %v3852_v35, %s5024_s4  ;;  %v1133_v39 = vadd.f32 %v9337_v0, %v956_v16  ;;  %v1132_v14 = vadd.f32 %v9338_v40, %v955_v20  ;;  %v4111_v45 = vsel %vm428_vm10, %v4108_v30, %v4110_v42  ;;  %v4112_v44 = vrot.slane %v4098_v12, 1  ;;  %v9342_v61 = vld [vmem:[#allocation93_spill] sm:$0xff]  ;;  %v9343_v0 = vld [vmem:[#allocation94_spill] sm:$0xff]  ;;  %v9347_v12 = vld [vmem:[#allocation104_spill] sm:$0xff] }
 0x42b   :  { %3857 = vrot.lane.b32.xlu0 %v3850_v46, %s5024_s4  ;;  %v4100_v46 = vmul.f32 %v7722_v49, %v4094_v27  ;;  %v4109_v50 = vsel %vm428_vm10, %v4107_v3, %v4108_v30  ;;  %v4113_v25 = vrot.slane %v4099_v15, 1  ;;  %v1135_v43 = vadd.f32 %v9341_v51, %v958_v48  ;;  %v9344_v27 = vld [vmem:[#allocation95_spill] sm:$0xff]  ;;  %v9345_v40 = vld [vmem:[#allocation102_spill] sm:$0xff]  ;;  %v9348_v3 = vld [vmem:[#allocation105_spill] sm:$0xff]  ;;  %s7958_s4 = sld [smem:[#allocation9 + $0x5a]] }
 0x42c   :  { %v7927_v58 = vpop.permute.xlu1 %3675  ;;  %v1134_v16 = vadd.f32 %v9342_v61, %v7793_v19  ;;  %v1137_v20 = vadd.f32 %v9343_v0, %v960_v41  ;;  %v1136_v52 = vadd.f32 %v9344_v27, %v959_v7  ;;  %v1226_v15 = vadd.f32 %v9347_v12, %v1041_v11  ;;  %v9349_v51 = vld [vmem:[#allocation112_spill] sm:$0xff]  ;;  %v9352_v11 = vld [vmem:[#allocation113_spill] sm:$0xff]  ;;  %v9354_v0 = vld [vmem:[#allocation115_spill] sm:$0xff] }
 0x42d   :  { %9339 = vst [vmem:[#allocation68_spill] sm:$0xff] %v7927_v58  ;;  %v7929_v35 = vpop.permute.xlu0 %3673  ;;  %v1224_v58 = vadd.f32 %v9345_v40, %v1039_v8  ;;  %v1225_v48 = vadd.f32 %v9348_v3, %v1040_v13  ;;  %v1318_v60 = vadd.f32 %v9349_v51, %v1133_v39  ;;  %v4115_v61 = vrot.slane %v4100_v46, 1  ;;  %v9353_v46 = vld [vmem:[#allocation114_spill] sm:$0xff]  ;;  %v9355_v40 = vld [vmem:[#allocation116_spill] sm:$0xff]  ;;  %v9356_v51 = vld [vmem:[#allocation117_spill] sm:$0xff] }
 0x42e   :  { %9340 = vst [vmem:[#allocation70_spill] sm:$0xff] %v7929_v35  ;;  %4119 = vrot.lane.b32.xlu1 %v4111_v45, %s5025_s13  ;;  %v9346_v35 = vld [vmem:[#allocation103_spill] sm:$0xff]  ;;  %v4232_v45 = vmul.f32 %v7557_v33, %v4230_v34  ;;  %v7954_v7 = vmul.f32 %v7699_v54, %v4230_v34  ;;  %v4231_v8 = vmul.f32 %v7566_v36, %v4230_v34 }
 0x42f   :  { %4117 = vrot.lane.b32.xlu0 %v4109_v50, %s5025_s13  ;;  %v1223_v30 = vadd.f32 %v9346_v35, %v1038_v53  ;;  %v4114_v50 = vsel %vm428_vm10, %v4112_v44, %v4113_v25  ;;  %v4006_v53 = vstv %s7902_s16  ;;  %v1317_v13 = vadd.f32 %v9352_v11, %v1132_v14 }
 0x430   :  { %v7947_v19 = vpop.permute.xlu1 %3701  ;;  %v4234_v39 = vmul.f32 %v7590_v38, %v4230_v34  ;;  %v4235_v35 = vmul.f32 %v7595_v59, %v4230_v34  ;;  %v1320_v44 = vadd.f32 %v9353_v46, %v1135_v43  ;;  %v1319_v27 = vadd.f32 %v9354_v0, %v1134_v16 }
 0x431   :  { %9350 = vst [vmem:[#allocation71_spill] sm:$0xff] %v7947_v19  ;;  %v7949_v41 = vpop.permute.xlu0 %3699  ;;  %v7968_v12 = vadd.f32 %v9355_v40, %v1137_v20  ;;  %v7971_v3 = vmul.f32 %v7722_v49, %v4230_v34  ;;  %v1321_v14 = vadd.f32 %v9356_v51, %v1136_v52  ;;  %v4007_v43 = vmul.f32 %v7566_v36, %v4006_v53  ;;  %v9359_v34 = vld [vmem:[#allocation124_spill] sm:$0xff]  ;;  %v9360_v52 = vld [vmem:[#allocation125_spill] sm:$0xff]  ;;  %v9361_v19 = vld [vmem:[#allocation126_spill] sm:$0xff] }
 0x432   :  { %9351 = vst [vmem:[#allocation72_spill] sm:$0xff] %v7949_v41  ;;  %4123 = vrot.lane.b32.xlu1 %v4114_v50, %s5025_s13  ;;  %v4009_v41 = vmul.f32 %v7699_v54, %v4006_v53  ;;  %v4116_v16 = vsel %vm428_vm10, %v4113_v25, %v4115_v61  ;;  %v4244_v46 = vrot.slane %v4232_v45, 5  ;;  %v4246_v20 = vrot.slane %v7954_v7, 5  ;;  %v9362_v25 = vld [vmem:[#allocation127_spill] sm:$0xff] }
 0x433   :  { %4121 = vrot.lane.b32.xlu0 %v4110_v42, %s5025_s13  ;;  %v4008_v42 = vmul.f32 %v7557_v33, %v4006_v53  ;;  %v4243_v0 = vrot.slane %v4231_v8, 5  ;;  %v7984_v40 = vadd.f32 %v9359_v34, %v1224_v58  ;;  %v7987_v51 = vadd.f32 %v9360_v52, %v1223_v30  ;;  %v9363_v7 = vld [vmem:[#allocation135_spill] sm:$0xff] }
 0x434   :  { %v7974_v11 = vpop.permute.xlu1 %3705  ;;  %v7992_v17 = vadd.f32 %v9361_v19, %v1226_v15  ;;  %v7995_v45 = vadd.f32 %v9362_v25, %v1225_v48  ;;  %v1457_v8 = vadd.f32 %v9363_v7, %v1317_v13  ;;  %v4251_v58 = vrot.slane %v7971_v3, 5  ;;  %v9368_v7 = vld [vmem:[#allocation137_spill] sm:$0xff] }
 0x435   :  { %9357 = vst [vmem:[#allocation73_spill] sm:$0xff] %v7974_v11  ;;  %v7976_v50 = vpop.permute.xlu0 %3703  ;;  %v4249_v11 = vrot.slane %v4235_v35, 5  ;;  %v4022_v52 = vrot.slane %v4009_v41, 1  ;;  %v9366_v35 = vld [vmem:[#allocation157_spill] sm:$0xff]  ;;  %v4247_v19 = vsel %vm383_vm8, %v4244_v46, %v4246_v20  ;;  %v4245_v48 = vsel %vm383_vm8, %v4243_v0, %v4244_v46 }
 0x436   :  { %9358 = vst [vmem:[#allocation80_spill] sm:$0xff] %v7976_v50  ;;  %4127 = vrot.lane.b32.xlu1 %v4115_v61, %s5025_s13  ;;  %v4248_v50 = vrot.slane %v4234_v39, 5  ;;  %v4020_v61 = vrot.slane %v4008_v42, 1  ;;  %v8004_v39 = vmul.f32 %v7595_v59, %v4006_v53  ;;  %v1633_v15 = vadd.f32 %v9366_v35, %v1457_v8  ;;  %v9367_v42 = vld [vmem:[#allocation134_spill] sm:$0xff]  ;;  %v9369_v8 = vld [vmem:[#allocation179_spill] sm:$0xff] }
 0x437   :  { %4125 = vrot.lane.b32.xlu0 %v4116_v16, %s5025_s13  ;;  %v4019_v16 = vrot.slane %v4007_v43, 1  ;;  %v4190_v25 = vstv %s7958_s4  ;;  %v4012_v3 = vmul.f32 %v7722_v49, %v4006_v53  ;;  %v4010_v41 = vmul.f32 %v7590_v38, %v4006_v53 }
 0x438   :  { %v7999_v34 = vpop.permute.xlu1 %3731  ;;  %v4250_v13 = vsel %vm383_vm8, %v4248_v50, %v4249_v11  ;;  %v1458_v43 = vadd.f32 %v9367_v42, %v1318_v60  ;;  %v1817_v35 = vadd.f32 %v9369_v8, %v1633_v15  ;;  %v4192_v53 = vmul.f32 %v7557_v33, %v4190_v25  ;;  %v9373_v42 = vld [vmem:[#allocation159_spill] sm:$0xff]  ;;  %v9375_v8 = vld [vmem:[#allocation136_spill] sm:$0xff]  ;;  %v9377_v33 = vld [vmem:[#allocation178_spill] sm:$0xff] }
 0x439   :  { %9364 = vst [vmem:[#allocation81_spill] sm:$0xff] %v7999_v34  ;;  %v8001_v30 = vpop.permute.xlu0 %3729  ;;  %v4252_v34 = vsel %vm383_vm8, %v4249_v11, %v4251_v58  ;;  %v4021_v50 = vsel %vm428_vm10, %v4019_v16, %v4020_v61  ;;  %v4193_v11 = vmul.f32 %v7699_v54, %v4190_v25  ;;  %v4191_v16 = vmul.f32 %v7566_v36, %v4190_v25 }
 0x43a   :  { %9365 = vst [vmem:[#allocation82_spill] sm:$0xff] %v8001_v30  ;;  %4255 = vrot.lane.b32.xlu1 %v4247_v19, %s5025_s13  ;;  %v1459_v30 = vadd.f32 %v9368_v7, %v1319_v27  ;;  %v4023_v19 = vsel %vm428_vm10, %v4020_v61, %v4022_v52  ;;  %v1634_v60 = vadd.f32 %v9372_v18, %v1458_v43  ;;  %v9374_v7 = vld [vmem:[#allocation201_spill] sm:$0xff]  ;;  %v4027_v52 = vrot.slane %v4012_v3, 1 }
 0x43b   :  { %4253 = vrot.lane.b32.xlu0 %v4245_v48, %s5025_s13  ;;  %v4025_v48 = vrot.slane %v8004_v39, 1  ;;  %v1993_v15 = vadd.f32 %v9374_v7, %v1817_v35  ;;  %v4024_v61 = vrot.slane %v4010_v41, 1  ;;  %v9376_v39 = vld [vmem:[#allocation139_spill] sm:$0xff]  ;;  %v9378_v43 = vld [vmem:[#allocation181_spill] sm:$0xff]  ;;  %v9380_v7 = vld [vmem:[#allocation158_spill] sm:$0xff]  ;;  %v4196_v3 = vmul.f32 %v7722_v49, %v4190_v25 }
 0x43c   :  { %v8019_v46 = vpop.permute.xlu1 %3735  ;;  %v1635_v27 = vadd.f32 %v9373_v42, %v1459_v30  ;;  %v1818_v18 = vadd.f32 %v9377_v33, %v1634_v60  ;;  %v9379_v42 = vld [vmem:[#allocation223_spill] sm:$0xff]  ;;  %v9383_v41 = vld [vmem:[#allocation161_spill] sm:$0xff] }
 0x43d   :  { %9370 = vst [vmem:[#allocation83_spill] sm:$0xff] %v8019_v46  ;;  %v8021_v0 = vpop.permute.xlu0 %3733  ;;  %v1460_v46 = vadd.f32 %v9375_v8, %v1320_v44  ;;  %v2177_v35 = vadd.f32 %v9379_v42, %v1993_v15  ;;  %v9385_v33 = vld [vmem:[#allocation203_spill] sm:$0xff]  ;;  %v9386_v15 = vld [vmem:[#allocation138_spill] sm:$0xff] }
 0x43e   :  { %9371 = vst [vmem:[#allocation90_spill] sm:$0xff] %v8021_v0  ;;  %4259 = vrot.lane.b32.xlu1 %v4250_v13, %s5025_s13  ;;  %v1461_v0 = vadd.f32 %v9376_v39, %v1321_v14  ;;  %v1819_v30 = vadd.f32 %v9378_v43, %v1635_v27  ;;  %v4204_v13 = vrot.slane %v4192_v53, 5  ;;  %v9384_v14 = vld [vmem:[#allocation200_spill] sm:$0xff]  ;;  %v4206_v27 = vrot.slane %v4193_v11, 5  ;;  %v9391_v11 = vld [vmem:[#allocation225_spill] sm:$0xff] }
 0x43f   :  { %4257 = vrot.lane.b32.xlu0 %v4246_v20, %s5025_s13  ;;  %v1636_v54 = vadd.f32 %v9380_v7, %v1460_v46  ;;  %v4195_v20 = vmul.f32 %v7595_v59, %v4190_v25  ;;  %v1994_v39 = vadd.f32 %v9384_v14, %v1818_v18  ;;  %v1462_v43 = vadd.f32 %v9386_v15, %v7968_v12  ;;  %v9387_v46 = vld [vmem:[#allocation180_spill] sm:$0xff]  ;;  %v9393_v15 = vld [vmem:[#allocation202_spill] sm:$0xff] }
 0x440   :  { %v8040_v29 = vpop.permute.xlu1 %3739  ;;  %v1637_v8 = vadd.f32 %v9383_v41, %v1461_v0  ;;  %v1995_v60 = vadd.f32 %v9385_v33, %v1819_v30  ;;  %v4203_v53 = vrot.slane %v4191_v16, 5  ;;  %v4194_v7 = vmul.f32 %v7590_v38, %v4190_v25  ;;  %v9389_v0 = vld [vmem:[#allocation222_spill] sm:$0xff]  ;;  %v9392_v33 = vld [vmem:[#allocation160_spill] sm:$0xff]  ;;  %v9394_v25 = vld [vmem:[#allocation205_spill] sm:$0xff] }
 0x441   :  { %9381 = vst [vmem:[#allocation91_spill] sm:$0xff] %v8040_v29  ;;  %v8042_v44 = vpop.permute.xlu0 %3737  ;;  %v1820_v42 = vadd.f32 %v9387_v46, %v1636_v54  ;;  %v2178_v41 = vadd.f32 %v9389_v0, %v1994_v39  ;;  %v9390_v18 = vrot.slane %v7717_v4, 7  ;;  %v1638_v12 = vadd.f32 %v9392_v33, %v1462_v43  ;;  %v9399_v0 = vld [vmem:[#allocation204_spill] sm:$0xff] }
 0x442   :  { %9382 = vst [vmem:[#allocation92_spill] sm:$0xff] %v8042_v44  ;;  %4263 = vrot.lane.b32.xlu1 %v4251_v58, %s5025_s13  ;;  %v9388_v44 = vld [vmem:[#allocation183_spill] sm:$0xff]  ;;  %v2179_v14 = vadd.f32 %v9391_v11, %v1995_v60  ;;  %v4211_v16 = vrot.slane %v4196_v3, 5  ;;  %v4207_v4 = vsel %vm383_vm8, %v4204_v13, %v4206_v27  ;;  %v9396_v60 = vld [vmem:[#allocation224_spill] sm:$0xff] }
 0x443   :  { %4261 = vrot.lane.b32.xlu0 %v4252_v34, %s5025_s13  ;;  %v1821_v29 = vadd.f32 %v9388_v44, %v1637_v8  ;;  %v2323_v30 = vadd.f32 %v9390_v18, %v2177_v35  ;;  %v1996_v54 = vadd.f32 %v9393_v15, %v1820_v42  ;;  %v4209_v34 = vrot.slane %v4195_v20, 5  ;;  %v9395_v35 = vld [vmem:[#allocation182_spill] sm:$0xff]  ;;  %v9397_v3 = vld [vmem:[#allocation227_spill] sm:$0xff] }
 0x444   :  { %v8062_v46 = vpop.permute.xlu1 %3769  ;;  %v4028_v44 = vsel %vm428_vm10, %v4025_v48, %v4027_v52  ;;  %v4026_v8 = vsel %vm428_vm10, %v4024_v61, %v4025_v48  ;;  %v1822_v39 = vadd.f32 %v9395_v35, %v1638_v12  ;;  %v4205_v42 = vsel %vm383_vm8, %v4203_v53, %v4204_v13  ;;  %v9398_v61 = vld [vmem:[#allocation146_spill] sm:$0xff]  ;;  %v9408_v35 = vld [vmem:[#allocation271_spill] sm:$0xff] }
 0x445   :  { %v8064_v58 = vpop.permute.xlu0 %3767  ;;  %v1997_v38 = vadd.f32 %v9394_v25, %v1821_v29  ;;  %v2180_v43 = vadd.f32 %v9396_v60, %v1996_v54  ;;  %v2324_v20 = vadd.f32 %v7778_v47, %v2178_v41  ;;  %v2325_v29 = vadd.f32 %v7799_v10, %v2179_v14  ;;  %v9400_v47 = vld [vmem:[#allocation147_spill] sm:$0xff]  ;;  %v9401_v10 = vld [vmem:[#allocation148_spill] sm:$0xff]  ;;  %v9409_v60 = vld [vmem:[#allocation169_spill] sm:$0xff] }
 0x446   :  { %4031 = vrot.lane.b32.xlu1 %v4023_v19, %s5025_s13  ;;  %v2463_v48 = vadd.f32 %v7905_v31, %v2323_v30  ;;  %v1548_v27 = vadd.f32 %v9398_v61, %v7984_v40  ;;  %v1998_v18 = vadd.f32 %v9399_v0, %v1822_v39  ;;  %v4208_v13 = vrot.slane %v4194_v7, 5  ;;  %v9402_v31 = vld [vmem:[#allocation149_spill] sm:$0xff]  ;;  %v9404_v14 = vld [vmem:[#allocation168_spill] sm:$0xff] }
 0x447   :  { %4029 = vrot.lane.b32.xlu0 %v4021_v50, %s5025_s13  ;;  %v2181_v52 = vadd.f32 %v9397_v3, %v1997_v38  ;;  %v4212_v50 = vsel %vm383_vm8, %v4209_v34, %v4211_v16  ;;  %v1547_v53 = vadd.f32 %v9400_v47, %v7987_v51  ;;  %v1550_v38 = vadd.f32 %v9401_v10, %v7992_v17  ;;  %v9403_v30 = vld [vmem:[#allocation249_spill] sm:$0xff]  ;;  %v9406_v16 = vld [vmem:[#allocation226_spill] sm:$0xff]  ;;  %v9416_v47 = vld [vmem:[#allocation191_spill] sm:$0xff] }
 0x448   :  { %v8082_v11 = vpop.permute.xlu1 %3773  ;;  %v1549_v41 = vadd.f32 %v9402_v31, %v7995_v45  ;;  %v2603_v40 = vadd.f32 %v9403_v30, %v2463_v48  ;;  %v1724_v33 = vadd.f32 %v9404_v14, %v1548_v27  ;;  %v8858_v12 = vrot.slane %v7681_v26, 7  ;;  %v9410_v48 = vld [vmem:[#allocation170_spill] sm:$0xff]  ;;  %v9418_v30 = vld [vmem:[#allocation273_spill] sm:$0xff]  ;;  %v9419_v14 = vld [vmem:[#allocation315_spill] sm:$0xff] }
 0x449   :  { %v8084_v19 = vpop.permute.xlu0 %3771  ;;  %v9405_v15 = vrot.slane %v7729_v22, 7  ;;  %v2182_v7 = vadd.f32 %v9406_v16, %v1998_v18  ;;  %v2327_v17 = vadd.f32 %v7814_v55, %v2181_v52  ;;  %v2464_v51 = vadd.f32 %v7891_v23, %v2324_v20  ;;  %v9413_v52 = vld [vmem:[#allocation248_spill] sm:$0xff]  ;;  %v9414_v20 = vld [vmem:[#allocation251_spill] sm:$0xff] }
 0x44a   :  { %4035 = vrot.lane.b32.xlu1 %v4028_v44, %s5025_s13  ;;  %v9407_v45 = vrot.slane %v7833_v9, 3  ;;  %v2779_v39 = vadd.f32 %v9408_v35, %v2603_v40  ;;  %v1723_v3 = vadd.f32 %v9409_v60, %v1547_v53  ;;  %v1726_v22 = vadd.f32 %v9410_v48, %v1550_v38  ;;  %v9424_v35 = vld [vmem:[#allocation253_spill] sm:$0xff] }
 0x44b   :  { %v2326_v54 = vadd.f32 %v9405_v15, %v2180_v43  ;;  %4033 = vrot.lane.b32.xlu0 %v4026_v8, %s5025_s13  ;;  %v9411_v43 = vld [vmem:[#allocation171_spill] sm:$0xff]  ;;  %v4210_v44 = vsel %vm383_vm8, %v4208_v13, %v4209_v34  ;;  %v9412_v8 = vld [vmem:[#allocation190_spill] sm:$0xff]  ;;  %v2604_v23 = vadd.f32 %v9413_v52, %v2464_v51  ;;  %v2279_v53 = vrot.slane %v7726_v62, 7  ;;  %v9420_v15 = vld [vmem:[#allocation192_spill] sm:$0xff] }
 0x44c   :  { %v2465_v25 = vadd.f32 %v9407_v45, %v2325_v29  ;;  %v1725_v61 = vadd.f32 %v9411_v43, %v1549_v41  ;;  %v3806_v27 = vpop.permute.xlu1 %3805  ;;  %v1908_v55 = vadd.f32 %v9412_v8, %v1724_v33  ;;  %v9415_v29 = vld [vmem:[#allocation293_spill] sm:$0xff]  ;;  %v1907_v10 = vadd.f32 %v9416_v47, %v1723_v3  ;;  %v9417_v13 = vld [vmem:[#allocation270_spill] sm:$0xff]  ;;  %v9421_v51 = vld [vmem:[#allocation212_spill] sm:$0xff] }
 0x44d   :  { %v8109_v0 = vpop.permute.xlu0 %3775  ;;  %v2963_v18 = vadd.f32 %v9415_v29, %v2779_v39  ;;  %v2328_v38 = vadd.f32 %v7809_v56, %v2182_v7  ;;  %v2466_v31 = vadd.f32 %v7908_v1, %v2326_v54  ;;  %v2467_v34 = vadd.f32 %v7913_v2, %v2327_v17  ;;  %v9423_v7 = vld [vmem:[#allocation250_spill] sm:$0xff]  ;;  %v9425_v39 = vld [vmem:[#allocation292_spill] sm:$0xff]  ;;  %v9426_v17 = vld [vmem:[#allocation295_spill] sm:$0xff] }
 0x44e   :  { %v2605_v9 = vadd.f32 %v9414_v20, %v2465_v25  ;;  %4215 = vrot.lane.b32.xlu1 %v4207_v4, %s5025_s13  ;;  %v2780_v41 = vadd.f32 %v9417_v13, %v2604_v23  ;;  %v1910_v16 = vadd.f32 %v9420_v15, %v1726_v22  ;;  %v2084_v45 = vadd.f32 %v9421_v51, %v1908_v55  ;;  %v9422_v25 = vld [vmem:[#allocation213_spill] sm:$0xff]  ;;  %v9430_v23 = vld [vmem:[#allocation272_spill] sm:$0xff] }
 0x44f   :  { %4213 = vrot.lane.b32.xlu0 %v4205_v42, %s5025_s13  ;;  %v3139_v33 = vadd.f32 %v9419_v14, %v2963_v18  ;;  %v2083_v56 = vadd.f32 %v9422_v25, %v1907_v10  ;;  %v2606_v1 = vadd.f32 %v9423_v7, %v2466_v31  ;;  %v2607_v42 = vadd.f32 %v9424_v35, %v2467_v34  ;;  %v9427_v3 = vld [vmem:[#allocation337_spill] sm:$0xff]  ;;  %v9432_v18 = vld [vmem:[#allocation314_spill] sm:$0xff]  ;;  %v9439_v51 = vld [vmem:[#allocation336_spill] sm:$0xff] }
 0x450   :  { %v2781_v40 = vadd.f32 %v9418_v30, %v2605_v9  ;;  %v3810_v54 = vpop.permute.xlu1 %3809  ;;  %v2964_v2 = vadd.f32 %v9425_v39, %v2780_v41  ;;  %v9428_v43 = vld [vmem:[#allocation193_spill] sm:$0xff]  ;;  %v2378_v22 = vrot.slane %v7826_v57, 3  ;;  %v9429_v55 = vrot.slane %v7851_v6, 3  ;;  %v9431_v9 = vld [vmem:[#allocation275_spill] sm:$0xff]  ;;  %v9436_v41 = vld [vmem:[#allocation252_spill] sm:$0xff] }
 0x451   :  { %v3808_v4 = vpop.permute.xlu0 %3807  ;;  %v3323_v48 = vadd.f32 %v9427_v3, %v3139_v33  ;;  %v1909_v8 = vadd.f32 %v9428_v43, %v1725_v61  ;;  %v2782_v20 = vadd.f32 %v9430_v23, %v2606_v1  ;;  %v2783_v29 = vadd.f32 %v9431_v9, %v2607_v42  ;;  %v9433_v10 = vld [vmem:[#allocation317_spill] sm:$0xff]  ;;  %v9440_v7 = vld [vmem:[#allocation339_spill] sm:$0xff]  ;;  %v9441_v35 = vld [vmem:[#allocation214_spill] sm:$0xff] }
 0x452   :  { %v2965_v60 = vadd.f32 %v9426_v17, %v2781_v40  ;;  %v2468_v52 = vadd.f32 %v9429_v55, %v2328_v38  ;;  %4219 = vrot.lane.b32.xlu1 %v4212_v50, %s5025_s13  ;;  %v3140_v47 = vadd.f32 %v9432_v18, %v2964_v2  ;;  %v9434_v61 = vrot.slane %v7593_v63, 7  ;;  %v9437_v40 = vld [vmem:[#allocation294_spill] sm:$0xff]  ;;  %v9438_v33 = vld [vmem:[#allocation297_spill] sm:$0xff]  ;;  %v9444_v39 = vld [vmem:[#allocation316_spill] sm:$0xff] }
 0x453   :  { %4217 = vrot.lane.b32.xlu0 %v4210_v44, %s5025_s13  ;;  %v3499_v34 = vadd.f32 %v7433_v21, %v3323_v48  ;;  %v9435_v6 = vrot.slane %v7580_v5, 7  ;;  %v2966_v50 = vadd.f32 %v9437_v40, %v2782_v20  ;;  %v2967_v15 = vadd.f32 %v9438_v33, %v2783_v29  ;;  %v9443_v5 = vld [vmem:[#allocation274_spill] sm:$0xff]  ;;  %v9445_v17 = vld [vmem:[#allocation319_spill] sm:$0xff]  ;;  %s8162_s13 = sld [smem:[#allocation9 + $0x46]]  ;;  %v9449_v18 = vld [vmem:[#allocation341_spill] sm:$0xff] }
 0x454   :  { %v3141_v31 = vadd.f32 %v9433_v10, %v2965_v60  ;;  %v2254_v13 = vadd.f32 %v9434_v61, %v2084_v45  ;;  %v2608_v30 = vadd.f32 %v9436_v41, %v2468_v52  ;;  %v3814_v14 = vpop.permute.xlu1 %3813  ;;  %v3324_v25 = vadd.f32 %v9439_v51, %v3140_v47  ;;  %v9442_v45 = vld [vmem:[#allocation215_spill] sm:$0xff]  ;;  %v9450_v10 = vld [vmem:[#allocation25_spill] sm:$0xff] }
 0x455   :  { %v2253_v38 = vadd.f32 %v9435_v6, %v2083_v56  ;;  %v3812_v44 = vpop.permute.xlu0 %3811  ;;  %v3683_v21 = vadd.f32 %v7866_v24, %v3499_v34  ;;  %v2086_v63 = vadd.f32 %v9441_v35, %v1910_v16  ;;  %v2085_v42 = vadd.f32 %v9442_v45, %v1909_v8  ;;  %v9446_v24 = vld [vmem:[#allocation57_spill] sm:$0xff]  ;;  %v9447_v16 = vld [vmem:[#allocation296_spill] sm:$0xff]  ;;  %v9448_v8 = vld [vmem:[#allocation338_spill] sm:$0xff] }
 0x456   :  { %v3325_v1 = vadd.f32 %v9440_v7, %v3141_v31  ;;  %v2784_v56 = vadd.f32 %v9443_v5, %v2608_v30  ;;  %v3142_v2 = vadd.f32 %v9444_v39, %v2966_v50  ;;  %v3143_v60 = vadd.f32 %v9445_v17, %v2967_v15  ;;  %v9455_v30 = vld [vmem:[#allocation318_spill] sm:$0xff]  ;;  %v9456_v50 = vld [vmem:[#allocation20_spill] sm:$0xff]  ;;  %v9459_v35 = vld [vmem:[#allocation239_spill] sm:$0xff] }
 0x457   :  { %v3500_v3 = vadd.f32 %v7431_v32, %v3324_v25  ;;  %v3823_v43 = vadd.f32 %v3806_v27, %v3683_v21  ;;  %v2394_v55 = vadd.f32 %v7861_v28, %v2254_v13  ;;  %v2383_v52 = vrot.slane %v9446_v24, 3  ;;  %v9451_v32 = vld [vmem:[#allocation65_spill] sm:$0xff]  ;;  %v9452_v27 = vld [vmem:[#allocation354_spill] sm:$0xff]  ;;  %v9454_v28 = vld [vmem:[#allocation15_spill] sm:$0xff] }
 0x458   :  { %v3501_v48 = vadd.f32 %v7473_v37, %v3325_v1  ;;  %v2968_v23 = vadd.f32 %v9447_v16, %v2784_v56  ;;  %v3326_v20 = vadd.f32 %v9448_v8, %v3142_v2  ;;  %v3982_v9 = vpop.permute.xlu1 %3981  ;;  %v3327_v47 = vadd.f32 %v9449_v18, %v3143_v60  ;;  %v9457_v15 = vld [vmem:[#allocation22_spill] sm:$0xff]  ;;  %v9460_v5 = vld [vmem:[#allocation49_spill] sm:$0xff] }
 0x459   :  { %v3816_v29 = vpop.permute.xlu0 %3815  ;;  %v3684_v31 = vadd.f32 %v9450_v10, %v3500_v3  ;;  %v8171_v37 = vadd.f32 %v3982_v9, %v3823_v43  ;;  %v9453_v61 = vrot.slane %v9452_v27, 7  ;;  %v2255_v13 = vadd.f32 %v9454_v28, %v2085_v42  ;;  %v9458_v1 = vld [vmem:[#allocation238_spill] sm:$0xff]  ;;  %v9462_v42 = vld [vmem:[#allocation340_spill] sm:$0xff]  ;;  %v9468_v18 = vld [vmem:[#allocation21_spill] sm:$0xff] }
 0x45a   :  { %v3685_v34 = vadd.f32 %v9451_v32, %v3501_v48  ;;  %v2393_v41 = vadd.f32 %v2378_v22, %v2253_v38  ;;  %v3144_v40 = vadd.f32 %v9455_v30, %v2968_v23  ;;  %v3502_v33 = vadd.f32 %v9456_v50, %v3326_v20  ;;  %v9463_v17 = vld [vmem:[#allocation62_spill] sm:$0xff]  ;;  %v9466_v23 = vld [vmem:[#allocation260_spill] sm:$0xff]  ;;  %v9467_v20 = vld [vmem:[#allocation261_spill] sm:$0xff] }
 0x45b   :  { %v2256_v6 = vadd.f32 %v9453_v61, %v2086_v63  ;;  %v3503_v51 = vadd.f32 %v9457_v15, %v3327_v47  ;;  %v3824_v7 = vadd.f32 %v3808_v4, %v3684_v31  ;;  %v2530_v21 = vadd.f32 %v9458_v1, %v2394_v55  ;;  %v9464_v3 = vld [vmem:[#allocation70_spill] sm:$0xff]  ;;  %v9465_v4 = vld [vmem:[#allocation43_spill] sm:$0xff]  ;;  %v9470_v61 = vld [vmem:[#allocation241_spill] sm:$0xff] }
 0x45c   :  { %v3825_v25 = vadd.f32 %v3810_v54, %v3685_v34  ;;  %v2529_v45 = vadd.f32 %v9459_v35, %v2393_v41  ;;  %v9461_v56 = vrot.slane %v9460_v5, 3  ;;  %v3328_v39 = vadd.f32 %v9462_v42, %v3144_v40  ;;  %v3986_v38 = vpop.permute.xlu1 %3985  ;;  %v9469_v34 = vld [vmem:[#allocation240_spill] sm:$0xff]  ;;  %v9471_v41 = vld [vmem:[#allocation282_spill] sm:$0xff]  ;;  %v9479_v42 = vld [vmem:[#allocation305_spill] sm:$0xff] }
 0x45d   :  { %v3984_v2 = vpop.permute.xlu0 %3983  ;;  %v3686_v60 = vadd.f32 %v9463_v17, %v3502_v33  ;;  %v3687_v48 = vadd.f32 %v9464_v3, %v3503_v51  ;;  %v2277_v55 = vrot.slane %v9465_v4, 7  ;;  %v2396_v24 = vadd.f32 %v2383_v52, %v2256_v6  ;;  %v9473_v50 = vld [vmem:[#allocation68_spill] sm:$0xff]  ;;  %v9475_v51 = vld [vmem:[#allocation50_spill] sm:$0xff]  ;;  %v9481_v17 = vld [vmem:[#allocation53_spill] sm:$0xff] }
 0x45e   :  { %v2384_v63 = vsel %vm1152_vm12, %v9461_v56, %v2383_v52  ;;  %v8189_v43 = vadd.f32 %v3986_v38, %v3825_v25  ;;  %v8191_v54 = vadd.f32 %v3984_v2, %v3824_v7  ;;  %v2694_v8 = vadd.f32 %v9466_v23, %v2530_v21  ;;  %v9476_v21 = vld [vmem:[#allocation262_spill] sm:$0xff]  ;;  %v9478_v56 = vld [vmem:[#allocation304_spill] sm:$0xff]  ;;  %v9480_v2 = vld [vmem:[#allocation27_spill] sm:$0xff] }
 0x45f   :  { %v2395_v16 = vadd.f32 %v2384_v63, %v2255_v13  ;;  %v2693_v9 = vadd.f32 %v9467_v20, %v2529_v45  ;;  %v3504_v47 = vadd.f32 %v9468_v18, %v3328_v39  ;;  %v3827_v10 = vadd.f32 %v3814_v14, %v3687_v48  ;;  %v9472_v13 = vld [vmem:[#allocation283_spill] sm:$0xff]  ;;  %v9484_v48 = vld [vmem:[#allocation18_spill] sm:$0xff] }
 0x460   :  { %v3826_v31 = vadd.f32 %v3812_v44, %v3686_v60  ;;  %v8198_v32 = vstv %s8162_s13  ;;  %v2532_v27 = vadd.f32 %v9469_v34, %v2396_v24  ;;  %v2870_v30 = vadd.f32 %v9471_v41, %v2694_v8  ;;  %v3990_v52 = vpop.permute.xlu1 %3989  ;;  %v9474_v44 = vld [vmem:[#allocation23_spill] sm:$0xff]  ;;  %v9483_v60 = vld [vmem:[#allocation56_spill] sm:$0xff]  ;;  %v9486_v8 = vld [vmem:[#allocation285_spill] sm:$0xff] }
 0x461   :  { %v2531_v28 = vadd.f32 %v9470_v61, %v2395_v16  ;;  %v3988_v6 = vpop.permute.xlu0 %3987  ;;  %v2869_v40 = vadd.f32 %v9472_v13, %v2693_v9  ;;  %v3688_v33 = vadd.f32 %v9473_v50, %v3504_v47  ;;  %v8207_v15 = vadd.f32 %v3990_v52, %v3827_v10  ;;  %v9477_v45 = vld [vmem:[#allocation263_spill] sm:$0xff]  ;;  %v9490_v34 = vld [vmem:[#allocation58_spill] sm:$0xff] }
 0x462   :  { %v8209_v14 = vadd.f32 %v3988_v6, %v3826_v31  ;;  %v8213_v25 = vadd.f32 %v9475_v51, %v9474_v44  ;;  %v8218_v7 = vsel %vm1011_vm11, %v2277_v55, %v2279_v53  ;;  %v8223_v1 = vsel %vm1011_vm11, %v8858_v12, %v2277_v55  ;;  %v9482_v53 = vld [vmem:[#allocation36_spill] sm:$0xff]  ;;  %v9488_v18 = vld [vmem:[#allocation327_spill] sm:$0xff]  ;;  %v9491_v61 = vld [vmem:[#allocation34_spill] sm:$0xff] }
 0x463   :  { %v2696_v35 = vadd.f32 %v9476_v21, %v2532_v27  ;;  %v2695_v5 = vadd.f32 %v9477_v45, %v2531_v28  ;;  %v3054_v63 = vadd.f32 %v9478_v56, %v2870_v30  ;;  %v3053_v39 = vadd.f32 %v9479_v42, %v2869_v40  ;;  %v9485_v55 = vld [vmem:[#allocation284_spill] sm:$0xff]  ;;  %v9492_v28 = vld [vmem:[#allocation59_spill] sm:$0xff]  ;;  %v9493_v30 = vld [vmem:[#allocation349_spill] sm:$0xff] }
 0x464   :  { %v3828_v38 = vadd.f32 %v3816_v29, %v3688_v33  ;;  %v8231_v62 = vadd.f32 %v9481_v17, %v9480_v2  ;;  %v8235_v3 = vadd.f32 %v9483_v60, %v9482_v53  ;;  %v2333_v4 = vmul.f32 %v9484_v48, %v8198_v32  ;;  %v8240_v16 = vpop.permute.xlu1 %3777  ;;  %v9487_v29 = vld [vmem:[#allocation326_spill] sm:$0xff]  ;;  %v9489_v31 = vld [vmem:[#allocation32_spill] sm:$0xff]  ;;  %v9495_v50 = vld [vmem:[#allocation307_spill] sm:$0xff] }
 0x465   :  { %v2872_v24 = vadd.f32 %v9485_v55, %v2696_v35  ;;  %v3992_v23 = vpop.permute.xlu0 %3991  ;;  %v2871_v20 = vadd.f32 %v9486_v8, %v2695_v5  ;;  %v3230_v9 = vadd.f32 %v9487_v29, %v3054_v63  ;;  %v3229_v47 = vadd.f32 %v9488_v18, %v3053_v39  ;;  %v9494_v13 = vld [vmem:[#allocation306_spill] sm:$0xff]  ;;  %v9496_v44 = vld [vmem:[#allocation351_spill] sm:$0xff]  ;;  %v9497_v21 = vld [vmem:[#allocation352_spill] sm:$0xff] }
 0x466   :  { %v8245_v10 = vadd.f32 %v3992_v23, %v3828_v38  ;;  %v8249_v27 = vadd.f32 %v9490_v34, %v9489_v31  ;;  %v8253_v41 = vadd.f32 %v9492_v28, %v9491_v61  ;;  %v2332_v52 = vmul.f32 %v9493_v30, %v8198_v32  ;;  %v9498_v45 = vld [vmem:[#allocation35_spill] sm:$0xff]  ;;  %v9499_v5 = vld [vmem:[#allocation60_spill] sm:$0xff]  ;;  %v9500_v63 = vld [vmem:[#allocation41_spill] sm:$0xff] }
 0x467   :  { %v2331_v6 = vmul.f32 %v7566_v36, %v8198_v32  ;;  %v3056_v40 = vadd.f32 %v9494_v13, %v2872_v24  ;;  %v3055_v33 = vadd.f32 %v9495_v50, %v2871_v20  ;;  %v3406_v51 = vadd.f32 %v9496_v44, %v3230_v9  ;;  %v9501_v42 = vld [vmem:[#allocation61_spill] sm:$0xff]  ;;  %v9502_v60 = vld [vmem:[#allocation328_spill] sm:$0xff]  ;;  %v9505_v29 = vld [vmem:[#allocation39_spill] sm:$0xff] }
 0x468   :  { %v3405_v35 = vadd.f32 %v9497_v21, %v3229_v47  ;;  %v8265_v56 = vadd.f32 %v9499_v5, %v9498_v45  ;;  %v8269_v39 = vadd.f32 %v9501_v42, %v9500_v63  ;;  %v2346_v38 = vrot.slane %v2333_v4, 3  ;;  %v8272_v17 = vpop.permute.xlu1 %3895  ;;  %v9503_v24 = vld [vmem:[#allocation329_spill] sm:$0xff]  ;;  %v9504_v8 = vld [vmem:[#allocation16_spill] sm:$0xff]  ;;  %v9506_v34 = vld [vmem:[#allocation355_spill] sm:$0xff] }
 0x469   :  { %v2398_v2 = vstv %s8202_s18  ;;  %v8274_v53 = vpop.permute.xlu0 %3893  ;;  %v3232_v55 = vadd.f32 %v9502_v60, %v3056_v40  ;;  %v3231_v23 = vadd.f32 %v9503_v24, %v3055_v33  ;;  %v3590_v20 = vadd.f32 %v9504_v8, %v3406_v51  ;;  %v9507_v28 = vld [vmem:[#allocation356_spill] sm:$0xff]  ;;  %v9508_v40 = vld [vmem:[#allocation83_spill] sm:$0xff]  ;;  %v9509_v33 = vld [vmem:[#allocation90_spill] sm:$0xff] }
 0x46a   :  { %v3589_v9 = vadd.f32 %v9505_v29, %v3405_v35  ;;  %v2344_v18 = vrot.slane %v2332_v52, 3  ;;  %v2343_v47 = vrot.slane %v2331_v6, 3  ;;  %v2336_v31 = vmul.f32 %v7722_v49, %v8198_v32  ;;  %v9510_v51 = vld [vmem:[#allocation46_spill] sm:$0xff]  ;;  %v9511_v63 = vld [vmem:[#allocation44_spill] sm:$0xff]  ;;  %v9512_v60 = vld [vmem:[#allocation45_spill] sm:$0xff] }
 0x46b   :  { %v8284_v4 = vmul.f32 %v7595_v59, %v8198_v32  ;;  %v3408_v61 = vadd.f32 %v9506_v34, %v3232_v55  ;;  %v3407_v13 = vadd.f32 %v9507_v28, %v3231_v23  ;;  %v3750_v50 = vadd.f32 %v9508_v40, %v3590_v20  ;;  %v9515_v8 = vld [vmem:[#allocation28_spill] sm:$0xff]  ;;  %v9549_v12 = vld [vmem:[#allocation98_spill] sm:$0xff] }
 0x46c   :  { %v3749_v44 = vadd.f32 %v9509_v33, %v3589_v9  ;;  %v2364_v21 = vmul.f32 %v9493_v30, %v9510_v51  ;;  %v2363_v52 = vmul.f32 %v7566_v36, %v9510_v51  ;;  %v2400_v6 = vmul.f32 %v9493_v30, %v2398_v2  ;;  %v3900_v45 = vpop.permute.xlu1 %3899  ;;  %v4950_v36 = vld [vmem:[#allocation4 + $0x30] sm:$0xff] }
 0x46d   :  { %v8296_v35 = vmul.f32 %v9484_v48, %v2398_v2  ;;  %v3898_v5 = vpop.permute.xlu0 %3897  ;;  %v3592_v42 = vadd.f32 %v9511_v63, %v3408_v61  ;;  %v3591_v55 = vadd.f32 %v9512_v60, %v3407_v13  ;;  %v8300_v24 = vadd.f32 %v3900_v45, %v3750_v50  ;;  %v9516_v61 = vld [vmem:[#allocation91_spill] sm:$0xff]  ;;  %v9517_v13 = vld [vmem:[#allocation92_spill] sm:$0xff]  ;;  %v9518_v50 = vld [vmem:[#allocation38_spill] sm:$0xff] }
 0x46e   :  { %v8302_v23 = vadd.f32 %v3898_v5, %v3749_v44  ;;  %v8306_v20 = vmul.f32 %v9515_v8, %v8198_v32  ;;  %v2399_v29 = vmul.f32 %v4950_v36, %v2398_v2  ;;  %v8309_v30 = vmul.f32 %v7595_v59, %v2398_v2  ;;  %v9519_v33 = vld [vmem:[#allocation63_spill] sm:$0xff] }
 0x46f   :  { %9513 = vst [vmem:[#allocation93_spill] sm:$0xff] %v8300_v24  ;;  %v2402_v48 = vmul.f32 %v9515_v8, %v2398_v2  ;;  %v2351_v9 = vrot.slane %v2336_v31, 3  ;;  %v8855_v34 = vrot.slane %v8284_v4, 3  ;;  %v3752_v28 = vadd.f32 %v9516_v61, %v3592_v42  ;;  %v9574_v24 = vld [vmem:[#allocation121_spill] sm:$0xff] }
 0x470   :  { %9514 = vst [vmem:[#allocation94_spill] sm:$0xff] %v8302_v23  ;;  %v3751_v40 = vadd.f32 %v9517_v13, %v3591_v55  ;;  %v859_v44 = vadd.f32 %v9519_v33, %v9518_v50  ;;  %v8318_v32 = vsel %vm1152_vm12, %v2344_v18, %v2346_v38  ;;  %v2376_v51 = vrot.slane %v2364_v21, 3  ;;  %v3904_v5 = vpop.permute.xlu1 %3903  ;;  %v9523_v38 = vld [vmem:[#allocation64_spill] sm:$0xff]  ;;  %v9527_v13 = vld [vmem:[#allocation66_spill] sm:$0xff]  ;;  %v9529_v50 = vld [vmem:[#allocation67_spill] sm:$0xff] }
 0x471   :  { %9520 = vst [vmem:[#allocation95_spill] sm:$0xff] %v8318_v32  ;;  %v2375_v45 = vrot.slane %v2363_v52, 3  ;;  %v3902_v59 = vpop.permute.xlu0 %3901  ;;  %v2412_v63 = vrot.slane %v2400_v6, 3  ;;  %v8856_v60 = vrot.slane %v8296_v35, 3  ;;  %v8321_v31 = vadd.f32 %v3904_v5, %v3752_v28 }
 0x472   :  { %v8323_v8 = vadd.f32 %v3902_v59, %v3751_v40  ;;  %v2411_v42 = vrot.slane %v2399_v29, 3  ;;  %v8857_v55 = vrot.slane %v8309_v30, 3  ;;  %v2416_v36 = vrot.slane %v2402_v48, 3  ;;  %v9526_v29 = vld [vmem:[#allocation348_spill] sm:$0xff] }
 0x473   :  { %9521 = vst [vmem:[#allocation102_spill] sm:$0xff] %v8321_v31  ;;  %v8327_v61 = vmul.f32 %v7722_v49, %v2398_v2  ;;  %v908_v21 = vadd.f32 %v9523_v38, %v8213_v25  ;;  %v8332_v52 = vsel %vm1152_vm12, %v2343_v47, %v2344_v18  ;;  %v8337_v6 = vsel %vm1152_vm12, %v8855_v34, %v2351_v9  ;;  %v9528_v48 = vld [vmem:[#allocation24_spill] sm:$0xff]  ;;  %v9530_v9 = vld [vmem:[#allocation69_spill] sm:$0xff] }
 0x474   :  { %9522 = vst [vmem:[#allocation103_spill] sm:$0xff] %v8323_v8  ;;  %9524 = vst [vmem:[#allocation104_spill] sm:$0xff] %v8332_v52  ;;  %v910_v40 = vadd.f32 %v9527_v13, %v9526_v29  ;;  %v907_v49 = vadd.f32 %v9529_v50, %v9528_v48  ;;  %v8347_v25 = vsel %vm1152_vm12, %v2376_v51, %v2378_v22  ;;  %v4168_v18 = vpop.permute.xlu1 %4167  ;;  %v9531_v22 = vld [vmem:[#allocation74_spill] sm:$0xff]  ;;  %v9532_v29 = vld [vmem:[#allocation75_spill] sm:$0xff] }
 0x475   :  { %9525 = vst [vmem:[#allocation105_spill] sm:$0xff] %v8337_v6  ;;  %v8350_v2 = vsel %vm1152_vm12, %v2375_v45, %v2376_v51  ;;  %v4166_v47 = vpop.permute.xlu0 %4165  ;;  %v911_v33 = vadd.f32 %v9530_v9, %v8231_v62  ;;  %v8357_v5 = vsel %vm1152_vm12, %v2412_v63, %v8856_v60  ;;  %v4184_v59 = vadd.f32 %v4168_v18, %v8191_v54  ;;  %v9533_v54 = vld [vmem:[#allocation76_spill] sm:$0xff]  ;;  %v9538_v60 = vld [vmem:[#allocation85_spill] sm:$0xff]  ;;  %v9604_v52 = vld [vmem:[#allocation143_spill] sm:$0xff] }
 0x476   :  { %v4183_v57 = vadd.f32 %v4166_v47, %v8171_v37  ;;  %v998_v38 = vadd.f32 %v9531_v22, %v8235_v3  ;;  %v8364_v51 = vsel %vm1152_vm12, %v2411_v42, %v2412_v63  ;;  %v8369_v45 = vsel %vm1152_vm12, %v2416_v36, %v8857_v55  ;;  %v9534_v3 = vld [vmem:[#allocation77_spill] sm:$0xff]  ;;  %v9535_v63 = vld [vmem:[#allocation78_spill] sm:$0xff]  ;;  %v9536_v47 = vld [vmem:[#allocation79_spill] sm:$0xff] }
 0x477   :  { %v997_v13 = vadd.f32 %v9532_v29, %v8253_v41  ;;  %v1000_v48 = vadd.f32 %v9533_v54, %v8249_v27  ;;  %v4308_v37 = vrot.slane %v4184_v59, 1  ;;  %v999_v18 = vadd.f32 %v9534_v3, %v8269_v39  ;;  %v9537_v36 = vld [vmem:[#allocation84_spill] sm:$0xff]  ;;  %v9539_v39 = vld [vmem:[#allocation86_spill] sm:$0xff] }
 0x478   :  { %v4307_v50 = vrot.slane %v4183_v57, 1  ;;  %v1037_v42 = vadd.f32 %v9535_v63, %v8265_v56  ;;  %v1036_v9 = vadd.f32 %v9536_v47, %v859_v44  ;;  %v1085_v22 = vadd.f32 %v9537_v36, %v908_v21  ;;  %v4172_v28 = vpop.permute.xlu1 %4171  ;;  %v9540_v29 = vld [vmem:[#allocation14_spill] sm:$0xff]  ;;  %v9541_v56 = vld [vmem:[#allocation87_spill] sm:$0xff]  ;;  %v9542_v44 = vld [vmem:[#allocation17_spill] sm:$0xff] }
 0x479   :  { %v4170_v34 = vpop.permute.xlu0 %4169  ;;  %v1084_v55 = vadd.f32 %v9538_v60, %v907_v49  ;;  %v4186_v41 = vadd.f32 %v4172_v28, %v8209_v14  ;;  %v1087_v57 = vadd.f32 %v9539_v39, %v910_v40  ;;  %v1086_v54 = vadd.f32 %v9541_v56, %v9540_v29  ;;  %v9543_v3 = vld [vmem:[#allocation88_spill] sm:$0xff]  ;;  %v9544_v63 = vld [vmem:[#allocation106_spill] sm:$0xff]  ;;  %v9545_v36 = vld [vmem:[#allocation89_spill] sm:$0xff] }
 0x47a   :  { %v8385_v27 = vadd.f32 %v4170_v34, %v8189_v43  ;;  %v8388_v59 = vsel %vm428_vm10, %v4307_v50, %v4308_v37  ;;  %v1089_v21 = vadd.f32 %v9543_v3, %v9542_v44  ;;  %v1270_v47 = vadd.f32 %v9544_v63, %v1085_v22  ;;  %v9546_v49 = vld [vmem:[#allocation96_spill] sm:$0xff]  ;;  %v9547_v28 = vld [vmem:[#allocation107_spill] sm:$0xff]  ;;  %v9548_v50 = vld [vmem:[#allocation97_spill] sm:$0xff] }
 0x47b   :  { %v1088_v60 = vadd.f32 %v9545_v36, %v911_v33  ;;  %v1176_v14 = vadd.f32 %v9546_v49, %v998_v38  ;;  %v1269_v43 = vadd.f32 %v9547_v28, %v1084_v55  ;;  %v1175_v62 = vadd.f32 %v9548_v50, %v997_v13  ;;  %v9550_v39 = vld [vmem:[#allocation99_spill] sm:$0xff]  ;;  %v9551_v29 = vld [vmem:[#allocation128_spill] sm:$0xff]  ;;  %v9552_v3 = vld [vmem:[#allocation129_spill] sm:$0xff] }
 0x47c   :  { %v8859_v34 = vrot.slane %v8385_v27, 1  ;;  %v1178_v40 = vadd.f32 %v9549_v12, %v1000_v48  ;;  %v1177_v8 = vadd.f32 %v9550_v39, %v999_v18  ;;  %v1420_v56 = vadd.f32 %v9551_v29, %v1270_v47  ;;  %v4176_v31 = vpop.permute.xlu1 %4175  ;;  %v9554_v13 = vld [vmem:[#allocation100_spill] sm:$0xff]  ;;  %v9556_v63 = vld [vmem:[#allocation109_spill] sm:$0xff]  ;;  %v9557_v36 = vld [vmem:[#allocation150_spill] sm:$0xff] }
 0x47d   :  { %v4174_v44 = vpop.permute.xlu0 %4173  ;;  %v1419_v22 = vadd.f32 %v9552_v3, %v1269_v43  ;;  %v8406_v33 = vadd.f32 %v4176_v31, %v8245_v10  ;;  %v1222_v12 = vadd.f32 %v9554_v13, %v1037_v42  ;;  %v9555_v48 = vld [vmem:[#allocation108_spill] sm:$0xff]  ;;  %v1271_v47 = vadd.f32 %v9556_v63, %v1086_v54  ;;  %v9558_v28 = vld [vmem:[#allocation151_spill] sm:$0xff]  ;;  %v9560_v29 = vld [vmem:[#allocation110_spill] sm:$0xff] }
 0x47e   :  { %v4187_v38 = vadd.f32 %v4174_v44, %v8207_v15  ;;  %v8412_v55 = vsel %vm428_vm10, %v4308_v37, %v8859_v34  ;;  %v1272_v18 = vadd.f32 %v9555_v48, %v1087_v57  ;;  %v1594_v49 = vadd.f32 %v9557_v36, %v1420_v56  ;;  %v9559_v15 = vld [vmem:[#allocation101_spill] sm:$0xff]  ;;  %v9561_v37 = vld [vmem:[#allocation130_spill] sm:$0xff]  ;;  %v9562_v34 = vld [vmem:[#allocation131_spill] sm:$0xff] }
 0x47f   :  { %9553 = vst [vmem:[#allocation112_spill] sm:$0xff] %v8406_v33  ;;  %v1593_v43 = vadd.f32 %v9558_v28, %v1419_v22  ;;  %v4312_v50 = vrot.slane %v4186_v41, 1  ;;  %v8860_v10 = vrot.slane %v8406_v33, 1  ;;  %v1221_v39 = vadd.f32 %v9559_v15, %v1036_v9  ;;  %v9563_v54 = vld [vmem:[#allocation172_spill] sm:$0xff]  ;;  %v9564_v48 = vld [vmem:[#allocation173_spill] sm:$0xff]  ;;  %v9568_v63 = vld [vmem:[#allocation119_spill] sm:$0xff] }
 0x480   :  { %v4313_v31 = vrot.slane %v4187_v38, 1  ;;  %v1274_v44 = vadd.f32 %v9560_v29, %v1089_v21  ;;  %v1422_v3 = vadd.f32 %v9561_v37, %v1272_v18  ;;  %v1421_v42 = vadd.f32 %v9562_v34, %v1271_v47  ;;  %v8424_v13 = vpop.permute.xlu1 %3943  ;;  %v9566_v21 = vld [vmem:[#allocation111_spill] sm:$0xff]  ;;  %v9567_v18 = vld [vmem:[#allocation118_spill] sm:$0xff]  ;;  %v9569_v36 = vld [vmem:[#allocation120_spill] sm:$0xff] }
 0x481   :  { %v8426_v57 = vpop.permute.xlu0 %3941  ;;  %v1770_v56 = vadd.f32 %v9563_v54, %v1594_v49  ;;  %v1769_v22 = vadd.f32 %v9564_v48, %v1593_v43  ;;  %v1273_v38 = vadd.f32 %v9566_v21, %v1088_v60  ;;  %v1346_v34 = vadd.f32 %v9567_v18, %v1176_v14  ;;  %v9570_v15 = vld [vmem:[#allocation152_spill] sm:$0xff]  ;;  %v9571_v29 = vld [vmem:[#allocation153_spill] sm:$0xff]  ;;  %v9572_v37 = vld [vmem:[#allocation194_spill] sm:$0xff] }
 0x482   :  { %v8431_v41 = vsel %vm428_vm10, %v4312_v50, %v4313_v31  ;;  %v8436_v9 = vsel %vm428_vm10, %v4313_v31, %v8860_v10  ;;  %v1345_v47 = vadd.f32 %v9568_v63, %v1175_v62  ;;  %v1348_v28 = vadd.f32 %v9569_v36, %v1178_v40  ;;  %v9573_v54 = vld [vmem:[#allocation195_spill] sm:$0xff]  ;;  %v9575_v31 = vld [vmem:[#allocation122_spill] sm:$0xff]  ;;  %v9576_v6 = vld [vmem:[#allocation132_spill] sm:$0xff] }
 0x483   :  { %9565 = vst [vmem:[#allocation113_spill] sm:$0xff] %v8436_v9  ;;  %v1596_v49 = vadd.f32 %v9570_v15, %v1422_v3  ;;  %v1595_v43 = vadd.f32 %v9571_v29, %v1421_v42  ;;  %v1946_v50 = vadd.f32 %v9572_v37, %v1770_v56  ;;  %v1945_v48 = vadd.f32 %v9573_v54, %v1769_v22  ;;  %v9577_v21 = vld [vmem:[#allocation133_spill] sm:$0xff]  ;;  %v9578_v40 = vld [vmem:[#allocation174_spill] sm:$0xff]  ;;  %v9579_v63 = vld [vmem:[#allocation175_spill] sm:$0xff] }
 0x484   :  { %v1347_v23 = vadd.f32 %v9574_v24, %v1177_v8  ;;  %v1382_v10 = vadd.f32 %v9575_v31, %v1222_v12  ;;  %v1424_v60 = vadd.f32 %v9576_v6, %v1274_v44  ;;  %v1423_v14 = vadd.f32 %v9577_v21, %v1273_v38  ;;  %v8450_v18 = vpop.permute.xlu1 %3947  ;;  %v9580_v36 = vld [vmem:[#allocation216_spill] sm:$0xff]  ;;  %v9581_v15 = vld [vmem:[#allocation217_spill] sm:$0xff]  ;;  %v9582_v29 = vld [vmem:[#allocation123_spill] sm:$0xff] }
 0x485   :  { %v8452_v62 = vpop.permute.xlu0 %3945  ;;  %v1772_v3 = vadd.f32 %v9578_v40, %v1596_v49  ;;  %v1771_v42 = vadd.f32 %v9579_v63, %v1595_v43  ;;  %v2130_v56 = vadd.f32 %v9580_v36, %v1946_v50  ;;  %v2129_v22 = vadd.f32 %v9581_v15, %v1945_v48  ;;  %v9583_v8 = vld [vmem:[#allocation144_spill] sm:$0xff]  ;;  %v9584_v37 = vld [vmem:[#allocation154_spill] sm:$0xff]  ;;  %v9585_v44 = vld [vmem:[#allocation155_spill] sm:$0xff] }
 0x486   :  { %v1381_v24 = vadd.f32 %v9582_v29, %v1221_v39  ;;  %v1546_v12 = vadd.f32 %v9583_v8, %v1382_v10  ;;  %v1598_v6 = vadd.f32 %v9584_v37, %v1424_v60  ;;  %v1597_v38 = vadd.f32 %v9585_v44, %v1423_v14  ;;  %v9586_v54 = vld [vmem:[#allocation140_spill] sm:$0xff]  ;;  %v9587_v21 = vld [vmem:[#allocation141_spill] sm:$0xff]  ;;  %v9591_v36 = vld [vmem:[#allocation166_spill] sm:$0xff] }
 0x487   :  { %v1500_v31 = vadd.f32 %v9586_v54, %v1346_v34  ;;  %v1499_v9 = vadd.f32 %v9587_v21, %v1345_v47  ;;  %v9588_v33 = vld [vmem:[#allocation196_spill] sm:$0xff]  ;;  %v9589_v40 = vld [vmem:[#allocation197_spill] sm:$0xff]  ;;  %v9594_v14 = vld [vmem:[#allocation19_spill] sm:$0xff]  ;;  %v1501_v32 = vadd.f32 %v9604_v52, %v1347_v23 }
 0x488   :  { %v1948_v49 = vadd.f32 %v9588_v33, %v1772_v3  ;;  %v1947_v43 = vadd.f32 %v9589_v40, %v1771_v42  ;;  %v9590_v63 = vld [vmem:[#allocation145_spill] sm:$0xff]  ;;  %v1722_v48 = vadd.f32 %v9591_v36, %v1546_v12  ;;  %v9592_v15 = vld [vmem:[#allocation176_spill] sm:$0xff]  ;;  %v8470_v8 = vpop.permute.xlu1 %3951  ;;  %v2288_v34 = vadd.f32 %v9594_v14, %v2130_v56  ;;  %v9597_v33 = vld [vmem:[#allocation218_spill] sm:$0xff] }
 0x489   :  { %v1545_v50 = vadd.f32 %v9590_v63, %v1381_v24  ;;  %v1774_v39 = vadd.f32 %v9592_v15, %v1598_v6  ;;  %v9593_v29 = vld [vmem:[#allocation177_spill] sm:$0xff]  ;;  %v8472_v60 = vpop.permute.xlu0 %3949  ;;  %v9598_v42 = vld [vmem:[#allocation219_spill] sm:$0xff]  ;;  %v9600_v12 = vld [vmem:[#allocation188_spill] sm:$0xff] }
 0x48a   :  { %v1773_v10 = vadd.f32 %v9593_v29, %v1597_v38  ;;  %v9595_v37 = vld [vmem:[#allocation29_spill] sm:$0xff]  ;;  %v2132_v3 = vadd.f32 %v9597_v33, %v1948_v49  ;;  %v2131_v54 = vadd.f32 %v9598_v42, %v1947_v43  ;;  %v9599_v24 = vld [vmem:[#allocation167_spill] sm:$0xff]  ;;  %v1906_v40 = vadd.f32 %v9600_v12, %v1722_v48  ;;  %v9601_v6 = vld [vmem:[#allocation198_spill] sm:$0xff] }
 0x48b   :  { %v9596_v47 = vrot.slane %v9595_v37, 7  ;;  %v1721_v21 = vadd.f32 %v9599_v24, %v1545_v50  ;;  %v1950_v63 = vadd.f32 %v9601_v6, %v1774_v39  ;;  %v9602_v38 = vld [vmem:[#allocation199_spill] sm:$0xff]  ;;  %v9603_v15 = vld [vmem:[#allocation142_spill] sm:$0xff]  ;;  %v9609_v42 = vld [vmem:[#allocation220_spill] sm:$0xff] }
 0x48c   :  { %v1949_v36 = vadd.f32 %v9602_v38, %v1773_v10  ;;  %v1502_v29 = vadd.f32 %v9603_v15, %v1348_v28  ;;  %v9605_v56 = vld [vmem:[#allocation162_spill] sm:$0xff]  ;;  %v9606_v37 = vld [vmem:[#allocation163_spill] sm:$0xff]  ;;  %v9610_v24 = vld [vmem:[#allocation221_spill] sm:$0xff]  ;;  %v8491_v12 = vpop.permute.xlu1 %4071  ;;  %v9611_v28 = vrot.slane %v7681_v26, 7 }
 0x48d   :  { %v2287_v44 = vadd.f32 %v9596_v47, %v2129_v22  ;;  %v1676_v14 = vadd.f32 %v9605_v56, %v1500_v31  ;;  %v1675_v22 = vadd.f32 %v9606_v37, %v1499_v9  ;;  %v9607_v47 = vld [vmem:[#allocation189_spill] sm:$0xff]  ;;  %v9608_v33 = vld [vmem:[#allocation210_spill] sm:$0xff]  ;;  %v2134_v50 = vadd.f32 %v9609_v42, %v1950_v63  ;;  %v8493_v39 = vpop.permute.xlu0 %4069  ;;  %v9615_v63 = vld [vmem:[#allocation211_spill] sm:$0xff] }
 0x48e   :  { %v1905_v49 = vadd.f32 %v9607_v47, %v1721_v21  ;;  %v2082_v43 = vadd.f32 %v9608_v33, %v1906_v40  ;;  %v2133_v48 = vadd.f32 %v9610_v24, %v1949_v36  ;;  %v2290_v10 = vadd.f32 %v9611_v28, %v2132_v3  ;;  %v9612_v23 = vld [vmem:[#allocation42_spill] sm:$0xff]  ;;  %v9613_v21 = vld [vmem:[#allocation164_spill] sm:$0xff]  ;;  %v9614_v40 = vld [vmem:[#allocation165_spill] sm:$0xff] }
 0x48f   :  { %v2289_v52 = vadd.f32 %v9612_v23, %v2131_v54  ;;  %v2428_v31 = vadd.f32 %v8357_v5, %v2288_v34  ;;  %v2427_v9 = vadd.f32 %v8364_v51, %v2287_v44  ;;  %v1678_v6 = vadd.f32 %v9613_v21, %v1502_v29  ;;  %v9618_v26 = vld [vmem:[#allocation184_spill] sm:$0xff]  ;;  %v9619_v47 = vld [vmem:[#allocation185_spill] sm:$0xff]  ;;  %v9620_v33 = vld [vmem:[#allocation242_spill] sm:$0xff] }
 0x490   :  { %v1677_v38 = vadd.f32 %v9614_v40, %v1501_v32  ;;  %v2081_v15 = vadd.f32 %v9615_v63, %v1905_v49  ;;  %v9616_v36 = vrot.slane %v8327_v61, 3  ;;  %v9617_v56 = vrot.slane %v8309_v30, 3  ;;  %v9621_v34 = vld [vmem:[#allocation243_spill] sm:$0xff]  ;;  %v9622_v44 = vld [vmem:[#allocation186_spill] sm:$0xff]  ;;  %v9623_v42 = vld [vmem:[#allocation40_spill] sm:$0xff]  ;;  %v8516_v28 = vpop.permute.xlu1 %4075 }
 0x491   :  { %v1860_v3 = vadd.f32 %v9618_v26, %v1676_v14  ;;  %v1859_v54 = vadd.f32 %v9619_v47, %v1675_v22  ;;  %v2566_v5 = vadd.f32 %v9620_v33, %v2428_v31  ;;  %v2565_v51 = vadd.f32 %v9621_v34, %v2427_v9  ;;  %v8518_v30 = vpop.permute.xlu0 %4073  ;;  %v9625_v31 = vld [vmem:[#allocation264_spill] sm:$0xff]  ;;  %v9626_v9 = vld [vmem:[#allocation265_spill] sm:$0xff]  ;;  %v9635_v33 = vld [vmem:[#allocation287_spill] sm:$0xff] }
 0x492   :  { %v2420_v37 = vsel %vm1152_vm12, %v9617_v56, %v9616_v36  ;;  %v1862_v29 = vadd.f32 %v9622_v44, %v1678_v6  ;;  %v2252_v32 = vadd.f32 %v9623_v42, %v2082_v43  ;;  %v2292_v49 = vadd.f32 %v8218_v7, %v2134_v50  ;;  %v9627_v6 = vld [vmem:[#allocation187_spill] sm:$0xff]  ;;  %v9628_v43 = vld [vmem:[#allocation206_spill] sm:$0xff]  ;;  %v9632_v26 = vld [vmem:[#allocation244_spill] sm:$0xff] }
 0x493   :  { %v2291_v24 = vadd.f32 %v8223_v1, %v2133_v48  ;;  %v2430_v14 = vadd.f32 %v8369_v45, %v2290_v10  ;;  %v9624_v22 = vrot.slane %v8296_v35, 3  ;;  %v2740_v21 = vadd.f32 %v9625_v31, %v2566_v5  ;;  %v9629_v50 = vld [vmem:[#allocation207_spill] sm:$0xff]  ;;  %v9630_v48 = vld [vmem:[#allocation353_spill] sm:$0xff]  ;;  %v9636_v34 = vld [vmem:[#allocation208_spill] sm:$0xff] }
 0x494   :  { %v2739_v40 = vadd.f32 %v9626_v9, %v2565_v51  ;;  %v8526_v63 = vadd.f32 %v9627_v6, %v1677_v38  ;;  %v2036_v7 = vadd.f32 %v9628_v43, %v1860_v3  ;;  %v8530_v1 = vadd.f32 %v9629_v50, %v1859_v54  ;;  %v9633_v10 = vld [vmem:[#allocation245_spill] sm:$0xff]  ;;  %v8544_v42 = vpop.permute.xlu1 %4079 }
 0x495   :  { %v2429_v23 = vadd.f32 %v9624_v22, %v2289_v52  ;;  %v9631_v36 = vrot.slane %v9630_v48, 7  ;;  %v2568_v45 = vadd.f32 %v9632_v26, %v2430_v14  ;;  %v9634_v52 = vld [vmem:[#allocation286_spill] sm:$0xff]  ;;  %v8539_v51 = vadd.f32 %v9636_v34, %v1862_v29  ;;  %v9642_v29 = vld [vmem:[#allocation228_spill] sm:$0xff]  ;;  %v9646_v48 = vld [vmem:[#allocation289_spill] sm:$0xff] }
 0x496   :  { %v2916_v47 = vadd.f32 %v9634_v52, %v2740_v21  ;;  %v2915_v5 = vadd.f32 %v9635_v33, %v2739_v40  ;;  %v2392_v38 = vadd.f32 %v8347_v25, %v2252_v32  ;;  %v9637_v3 = vrot.slane %v8327_v61, 3  ;;  %v9638_v14 = vld [vmem:[#allocation266_spill] sm:$0xff]  ;;  %v9640_v21 = vld [vmem:[#allocation308_spill] sm:$0xff]  ;;  %v9641_v40 = vld [vmem:[#allocation309_spill] sm:$0xff] }
 0x497   :  { %v2251_v56 = vadd.f32 %v9631_v36, %v2081_v15  ;;  %v2567_v35 = vadd.f32 %v9633_v10, %v2429_v23  ;;  %v2431_v44 = vadd.f32 %v2420_v37, %v2291_v24  ;;  %v8546_v15 = vpop.permute.xlu0 %4077  ;;  %v2742_v22 = vadd.f32 %v9638_v14, %v2568_v45  ;;  %v9639_v23 = vld [vmem:[#allocation267_spill] sm:$0xff]  ;;  %v9643_v61 = vld [vmem:[#allocation246_spill] sm:$0xff]  ;;  %v9645_v24 = vld [vmem:[#allocation288_spill] sm:$0xff] }
 0x498   :  { %v2432_v54 = vadd.f32 %v9637_v3, %v2292_v49  ;;  %v3092_v9 = vadd.f32 %v9640_v21, %v2916_v47  ;;  %v3091_v6 = vadd.f32 %v9641_v40, %v2915_v5  ;;  %v8553_v43 = vadd.f32 %v9642_v29, %v2036_v7  ;;  %v9644_v37 = vld [vmem:[#allocation247_spill] sm:$0xff]  ;;  %v9647_v26 = vld [vmem:[#allocation330_spill] sm:$0xff]  ;;  %v9649_v52 = vld [vmem:[#allocation236_spill] sm:$0xff] }
 0x499   :  { %v2741_v31 = vadd.f32 %v9639_v23, %v2567_v35  ;;  %v2391_v25 = vadd.f32 %v8350_v2, %v2251_v56  ;;  %v2569_v49 = vadd.f32 %v9644_v37, %v2431_v44  ;;  %v2918_v50 = vadd.f32 %v9645_v24, %v2742_v22  ;;  %v9648_v10 = vld [vmem:[#allocation331_spill] sm:$0xff]  ;;  %v9650_v33 = vld [vmem:[#allocation237_spill] sm:$0xff]  ;;  %v9651_v7 = vld [vmem:[#allocation268_spill] sm:$0xff]  ;;  %v8566_v56 = vpop.permute.xlu1 %3855 }
 0x49a   :  { %v2570_v32 = vadd.f32 %v9643_v61, %v2432_v54  ;;  %v3276_v45 = vadd.f32 %v9647_v26, %v3092_v9  ;;  %v3275_v35 = vadd.f32 %v9648_v10, %v3091_v6  ;;  %v2528_v47 = vadd.f32 %v9649_v52, %v2392_v38  ;;  %v9652_v3 = vld [vmem:[#allocation269_spill] sm:$0xff]  ;;  %v9653_v44 = vld [vmem:[#allocation310_spill] sm:$0xff]  ;;  %v9654_v22 = vld [vmem:[#allocation311_spill] sm:$0xff] }
 0x49b   :  { %v2917_v36 = vadd.f32 %v9646_v48, %v2741_v31  ;;  %v2527_v5 = vadd.f32 %v9650_v33, %v2391_v25  ;;  %v2743_v2 = vadd.f32 %v9652_v3, %v2569_v49  ;;  %v8568_v54 = vpop.permute.xlu0 %3853  ;;  %v3094_v14 = vadd.f32 %v9653_v44, %v2918_v50  ;;  %v9655_v31 = vld [vmem:[#allocation357_spill] sm:$0xff]  ;;  %v9656_v9 = vld [vmem:[#allocation358_spill] sm:$0xff]  ;;  %v9658_v29 = vld [vmem:[#allocation259_spill] sm:$0xff] }
 0x49c   :  { %v2744_v34 = vadd.f32 %v9651_v7, %v2570_v32  ;;  %v3452_v21 = vadd.f32 %v9655_v31, %v3276_v45  ;;  %v3451_v40 = vadd.f32 %v9656_v9, %v3275_v35  ;;  %v9657_v6 = vld [vmem:[#allocation258_spill] sm:$0xff]  ;;  %v9660_v37 = vld [vmem:[#allocation291_spill] sm:$0xff]  ;;  %v9661_v24 = vld [vmem:[#allocation332_spill] sm:$0xff] }
 0x49d   :  { %v3093_v23 = vadd.f32 %v9654_v22, %v2917_v36  ;;  %v2692_v38 = vadd.f32 %v9657_v6, %v2528_v47  ;;  %v2691_v25 = vadd.f32 %v9658_v29, %v2527_v5  ;;  %v9659_v61 = vld [vmem:[#allocation290_spill] sm:$0xff]  ;;  %v2919_v49 = vadd.f32 %v9660_v37, %v2743_v2  ;;  %v9662_v26 = vld [vmem:[#allocation333_spill] sm:$0xff]  ;;  %v9663_v52 = vld [vmem:[#allocation47_spill] sm:$0xff]  ;;  %v8586_v31 = vpop.permute.xlu1 %3859 }
 0x49e   :  { %v2920_v32 = vadd.f32 %v9659_v61, %v2744_v34  ;;  %v3278_v48 = vadd.f32 %v9661_v24, %v3094_v14  ;;  %v3636_v50 = vadd.f32 %v9663_v52, %v3452_v21  ;;  %v9664_v33 = vld [vmem:[#allocation48_spill] sm:$0xff]  ;;  %v9666_v3 = vld [vmem:[#allocation281_spill] sm:$0xff]  ;;  %v9669_v2 = vld [vmem:[#allocation359_spill] sm:$0xff] }
 0x49f   :  { %v3277_v10 = vadd.f32 %v9662_v26, %v3093_v23  ;;  %v3635_v36 = vadd.f32 %v9664_v33, %v3451_v40  ;;  %v9665_v7 = vld [vmem:[#allocation280_spill] sm:$0xff]  ;;  %v2867_v35 = vadd.f32 %v9666_v3, %v2691_v25  ;;  %v9668_v22 = vld [vmem:[#allocation313_spill] sm:$0xff]  ;;  %v8588_v34 = vpop.permute.xlu0 %3857  ;;  %v9671_v6 = vld [vmem:[#allocation302_spill] sm:$0xff] }
 0x4a0   :  { %v2868_v45 = vadd.f32 %v9665_v7, %v2692_v38  ;;  %v9667_v44 = vld [vmem:[#allocation312_spill] sm:$0xff]  ;;  %v3095_v5 = vadd.f32 %v9668_v22, %v2919_v49  ;;  %v3454_v14 = vadd.f32 %v9669_v2, %v3278_v48  ;;  %v3786_v21 = vadd.f32 %v8062_v46, %v3636_v50  ;;  %v9672_v29 = vld [vmem:[#allocation303_spill] sm:$0xff]  ;;  %v9673_v61 = vld [vmem:[#allocation334_spill] sm:$0xff] }
 0x4a1   :  { %v3096_v47 = vadd.f32 %v9667_v44, %v2920_v32  ;;  %v9670_v9 = vld [vmem:[#allocation360_spill] sm:$0xff]  ;;  %v3785_v40 = vadd.f32 %v8064_v58, %v3635_v36  ;;  %v3051_v25 = vadd.f32 %v9672_v29, %v2867_v35  ;;  %v9674_v37 = vld [vmem:[#allocation335_spill] sm:$0xff]  ;;  %v9678_v50 = vld [vmem:[#allocation325_spill] sm:$0xff]  ;;  %v4120_v44 = vpop.permute.xlu1 %4119 }
 0x4a2   :  { %v3453_v23 = vadd.f32 %v9670_v9, %v3277_v10  ;;  %v3052_v38 = vadd.f32 %v9671_v6, %v2868_v45  ;;  %v3279_v49 = vadd.f32 %v9674_v37, %v3095_v5  ;;  %v9675_v24 = vld [vmem:[#allocation51_spill] sm:$0xff]  ;;  %v9676_v52 = vld [vmem:[#allocation52_spill] sm:$0xff]  ;;  %v3960_v48 = vadd.f32 %v8424_v13, %v3786_v21  ;;  %v9679_v36 = vld [vmem:[#allocation361_spill] sm:$0xff] }
 0x4a3   :  { %v3280_v32 = vadd.f32 %v9673_v61, %v3096_v47  ;;  %v3638_v26 = vadd.f32 %v9675_v24, %v3454_v14  ;;  %v3959_v10 = vadd.f32 %v8426_v57, %v3785_v40  ;;  %v9677_v7 = vld [vmem:[#allocation324_spill] sm:$0xff]  ;;  %v3227_v58 = vadd.f32 %v9678_v50, %v3051_v25  ;;  %v9680_v3 = vld [vmem:[#allocation362_spill] sm:$0xff]  ;;  %v4118_v47 = vpop.permute.xlu0 %4117  ;;  %v9683_v21 = vld [vmem:[#allocation55_spill] sm:$0xff] }
 0x4a4   :  { %v3637_v33 = vadd.f32 %v9676_v52, %v3453_v23  ;;  %v3228_v46 = vadd.f32 %v9677_v7, %v3052_v38  ;;  %v3455_v35 = vadd.f32 %v9680_v3, %v3279_v49  ;;  %v4136_v2 = vadd.f32 %v4120_v44, %v3960_v48  ;;  %v9681_v9 = vld [vmem:[#allocation346_spill] sm:$0xff]  ;;  %v9682_v23 = vld [vmem:[#allocation347_spill] sm:$0xff]  ;;  %v9686_v37 = vld [vmem:[#allocation33_spill] sm:$0xff] }
 0x4a5   :  { %v3456_v45 = vadd.f32 %v9679_v36, %v3280_v32  ;;  %v3788_v22 = vadd.f32 %v8082_v11, %v3638_v26  ;;  %v4135_v14 = vadd.f32 %v4118_v47, %v3959_v10  ;;  %v3403_v57 = vadd.f32 %v9682_v23, %v3227_v58  ;;  %v9684_v6 = vld [vmem:[#allocation54_spill] sm:$0xff]  ;;  %v9685_v32 = vld [vmem:[#allocation37_spill] sm:$0xff]  ;;  %v4124_v52 = vpop.permute.xlu1 %4123 }
 0x4a6   :  { %v3787_v5 = vadd.f32 %v8084_v19, %v3637_v33  ;;  %v3404_v13 = vadd.f32 %v9681_v9, %v3228_v46  ;;  %v3639_v38 = vadd.f32 %v9684_v6, %v3455_v35  ;;  %v4324_v61 = vadd.f32 %v8412_v55, %v4136_v2  ;;  %v9688_v55 = vld [vmem:[#allocation81_spill] sm:$0xff] }
 0x4a7   :  { %v3640_v40 = vadd.f32 %v9683_v21, %v3456_v45  ;;  %v3962_v29 = vadd.f32 %v8450_v18, %v3788_v22  ;;  %v4323_v11 = vadd.f32 %v8388_v59, %v4135_v14  ;;  %v3587_v49 = vadd.f32 %v9686_v37, %v3403_v57  ;;  %v4122_v33 = vpop.permute.xlu0 %4121  ;;  %v9689_v59 = vld [vmem:[#allocation82_spill] sm:$0xff]  ;;  %v9691_v44 = vld [vmem:[#allocation209_spill] sm:$0xff]  ;;  %v9695_v57 = vld [vmem:[#allocation231_spill] sm:$0xff] }
 0x4a8   :  { %v3961_v25 = vadd.f32 %v8452_v62, %v3787_v5  ;;  %v3588_v19 = vadd.f32 %v9685_v32, %v3404_v13  ;;  %v3789_v24 = vadd.f32 %v8109_v0, %v3639_v38  ;;  %v4336_v48 = vrot.slane %v4324_v61, 2  ;;  %v9687_v62 = vld [vmem:[#allocation229_spill] sm:$0xff]  ;;  %v9696_v21 = vld [vmem:[#allocation95_spill] sm:$0xff]  ;;  %v9698_v38 = vld [vmem:[#allocation112_spill] sm:$0xff] }
 0x4a9   :  { %v3790_v26 = vadd.f32 %v8240_v16, %v3640_v40  ;;  %v4335_v10 = vrot.slane %v4323_v11, 2  ;;  %v4138_v7 = vadd.f32 %v4124_v52, %v3962_v29  ;;  %v2219_v46 = vadd.f32 %v9687_v62, %v8530_v1  ;;  %v9692_v1 = vld [vmem:[#allocation230_spill] sm:$0xff]  ;;  %v4128_v2 = vpop.permute.xlu1 %4127  ;;  %v9697_v40 = vld [vmem:[#allocation104_spill] sm:$0xff] }
 0x4aa   :  { %v4137_v18 = vadd.f32 %v4122_v33, %v3961_v25  ;;  %v3748_v50 = vadd.f32 %v9688_v55, %v3588_v19  ;;  %v3747_v58 = vadd.f32 %v9689_v59, %v3587_v49  ;;  %v3963_v45 = vadd.f32 %v8472_v60, %v3789_v24  ;;  %v9700_v25 = vld [vmem:[#allocation113_spill] sm:$0xff]  ;;  %v9701_v11 = vld [vmem:[#allocation232_spill] sm:$0xff] }
 0x4ab   :  { %v3964_v36 = vadd.f32 %v8470_v8, %v3790_v26  ;;  %v4326_v0 = vadd.f32 %v8431_v41, %v4138_v7  ;;  %v9690_v16 = vrot.slane %v8385_v27, 1  ;;  %v8630_v35 = vsel %vm790_vm9, %v4335_v10, %v4336_v48  ;;  %v4126_v27 = vpop.permute.xlu0 %4125  ;;  %v9702_v19 = vld [vmem:[#allocation233_spill] sm:$0xff] }
 0x4ac   :  { %v2037_v47 = vadd.f32 %v9691_v44, %v8526_v63  ;;  %v2222_v22 = vadd.f32 %v9692_v1, %v8539_v51  ;;  %v9693_v5 = vrot.slane %v8284_v4, 3  ;;  %v9694_v8 = vrot.slane %v8306_v20, 3  ;;  %v9703_v49 = vld [vmem:[#allocation105_spill] sm:$0xff] }
 0x4ad   :  { %v4325_v3 = vadd.f32 %v9690_v16, %v4137_v18  ;;  %v3912_v41 = vadd.f32 %v8272_v17, %v3748_v50  ;;  %v3911_v14 = vadd.f32 %v8274_v53, %v3747_v58  ;;  %v4140_v13 = vadd.f32 %v4128_v2, %v3964_v36  ;;  %v4256_v26 = vpop.permute.xlu1 %4255  ;;  %v9704_v18 = vld [vmem:[#allocation254_spill] sm:$0xff] }
 0x4ae   :  { %v2350_v60 = vsel %vm1152_vm12, %v9694_v8, %v9693_v5  ;;  %v4139_v23 = vadd.f32 %v4126_v27, %v3963_v45  ;;  %v2221_v63 = vadd.f32 %v9695_v57, %v2037_v47  ;;  %v2358_v51 = vadd.f32 %v9696_v21, %v8553_v43  ;;  %v9709_v47 = vld [vmem:[#allocation276_spill] sm:$0xff]  ;;  %v9714_v57 = vld [vmem:[#allocation298_spill] sm:$0xff]  ;;  %v9715_v21 = vld [vmem:[#allocation299_spill] sm:$0xff] }
 0x4af   :  { %v4338_v9 = vrot.slane %v4325_v3, 2  ;;  %v2357_v4 = vadd.f32 %v9697_v40, %v2219_v46  ;;  %v4088_v20 = vadd.f32 %v8491_v12, %v3912_v41  ;;  %v4087_v6 = vadd.f32 %v8493_v39, %v3911_v14  ;;  %v4254_v52 = vpop.permute.xlu0 %4253  ;;  %v9705_v46 = vld [vmem:[#allocation255_spill] sm:$0xff]  ;;  %v9711_v41 = vld [vmem:[#allocation93_spill] sm:$0xff]  ;;  %v9712_v14 = vld [vmem:[#allocation256_spill] sm:$0xff] }
 0x4b0   :  { %v9699_v17 = vrot.slane %v9698_v38, 1  ;;  %v4327_v61 = vadd.f32 %v9700_v25, %v4139_v23  ;;  %v2492_v32 = vadd.f32 %v9701_v11, %v2358_v51  ;;  %v2360_v43 = vadd.f32 %v9703_v49, %v2222_v22  ;;  %v9708_v3 = vld [vmem:[#allocation235_spill] sm:$0xff]  ;;  %v9710_v22 = vld [vmem:[#allocation277_spill] sm:$0xff]  ;;  %v9716_v40 = vld [vmem:[#allocation102_spill] sm:$0xff] }
 0x4b1   :  { %v8653_v53 = vsel %vm790_vm9, %v4336_v48, %v4338_v9  ;;  %v2491_v37 = vadd.f32 %v9702_v19, %v2357_v4  ;;  %v4340_v24 = vrot.slane %v4326_v0, 2  ;;  %v4272_v39 = vadd.f32 %v4256_v26, %v4088_v20  ;;  %v9706_v48 = vld [vmem:[#allocation94_spill] sm:$0xff]  ;;  %v4260_v8 = vpop.permute.xlu1 %4259  ;;  %v9717_v20 = vld [vmem:[#allocation103_spill] sm:$0xff]  ;;  %v9720_v11 = vld [vmem:[#allocation320_spill] sm:$0xff] }
 0x4b2   :  { %v4328_v29 = vadd.f32 %v9699_v17, %v4140_v13  ;;  %v4341_v33 = vrot.slane %v4327_v61, 2  ;;  %v4271_v10 = vadd.f32 %v4254_v52, %v4087_v6  ;;  %v2359_v7 = vadd.f32 %v2350_v60, %v2221_v63  ;;  %v9707_v0 = vld [vmem:[#allocation234_spill] sm:$0xff]  ;;  %v9713_v13 = vld [vmem:[#allocation257_spill] sm:$0xff]  ;;  %v9719_v25 = vld [vmem:[#allocation279_spill] sm:$0xff] }
 0x4b3   :  { %v2646_v62 = vadd.f32 %v9704_v18, %v2492_v32  ;;  %v2645_v55 = vadd.f32 %v9705_v46, %v2491_v37  ;;  %v4089_v50 = vadd.f32 %v8518_v30, %v9706_v48  ;;  %v4284_v59 = vrot.slane %v4272_v39, 1  ;;  %v4258_v60 = vpop.permute.xlu0 %4257  ;;  %v9721_v49 = vld [vmem:[#allocation321_spill] sm:$0xff]  ;;  %v9724_v39 = vld [vmem:[#allocation342_spill] sm:$0xff] }
 0x4b4   :  { %v4343_v12 = vrot.slane %v4328_v29, 2  ;;  %v4283_v58 = vrot.slane %v4271_v10, 1  ;;  %v8666_v45 = vsel %vm790_vm9, %v4340_v24, %v4341_v33  ;;  %v2494_v16 = vadd.f32 %v9707_v0, %v2360_v43  ;;  %v9726_v48 = vld [vmem:[#allocation322_spill] sm:$0xff] }
 0x4b5   :  { %v2493_v44 = vadd.f32 %v9708_v3, %v2359_v7  ;;  %v2822_v1 = vadd.f32 %v9709_v47, %v2646_v62  ;;  %v2821_v5 = vadd.f32 %v9710_v22, %v2645_v55  ;;  %v4090_v30 = vadd.f32 %v8516_v28, %v9711_v41  ;;  %v9718_v28 = vld [vmem:[#allocation278_spill] sm:$0xff]  ;;  %v4264_v19 = vpop.permute.xlu1 %4263  ;;  %v9725_v7 = vld [vmem:[#allocation343_spill] sm:$0xff]  ;;  %v9731_v41 = vld [vmem:[#allocation345_spill] sm:$0xff] }
 0x4b6   :  { %v8663_v36 = vsel %vm790_vm9, %v4341_v33, %v4343_v12  ;;  %v4273_v2 = vadd.f32 %v4258_v60, %v4089_v50  ;;  %v4285_v27 = vsel %vm428_vm10, %v4283_v58, %v4284_v59  ;;  %v2648_v9 = vadd.f32 %v9712_v14, %v2494_v16  ;;  %v9723_v33 = vld [vmem:[#allocation301_spill] sm:$0xff]  ;;  %v9727_v58 = vld [vmem:[#allocation323_spill] sm:$0xff] }
 0x4b7   :  { %v2647_v23 = vadd.f32 %v9713_v13, %v2493_v44  ;;  %v3006_v63 = vadd.f32 %v9714_v57, %v2822_v1  ;;  %v3005_v51 = vadd.f32 %v9715_v21, %v2821_v5  ;;  %v4092_v4 = vadd.f32 %v8544_v42, %v9716_v40  ;;  %v4262_v37 = vpop.permute.xlu0 %4261  ;;  %v9722_v42 = vld [vmem:[#allocation300_spill] sm:$0xff]  ;;  %v9728_v44 = vld [vmem:[#allocation350_spill] sm:$0xff] }
 0x4b8   :  { %v4091_v6 = vadd.f32 %v8546_v15, %v9717_v20  ;;  %v4274_v38 = vadd.f32 %v4260_v8, %v4090_v30  ;;  %v4286_v17 = vrot.slane %v4273_v2, 1  ;;  %v2824_v29 = vadd.f32 %v9718_v28, %v2648_v9  ;;  %v9730_v8 = vld [vmem:[#allocation344_spill] sm:$0xff]  ;;  %v9732_v2 = vld [vmem:[#allocation71_spill] sm:$0xff] }
 0x4b9   :  { %v2823_v61 = vadd.f32 %v9719_v25, %v2647_v23  ;;  %v3182_v32 = vadd.f32 %v9720_v11, %v3006_v63  ;;  %v3181_v43 = vadd.f32 %v9721_v49, %v3005_v51  ;;  %v4276_v24 = vadd.f32 %v4264_v19, %v4092_v4  ;;  %v4032_v16 = vpop.permute.xlu1 %4031  ;;  %v9733_v9 = vld [vmem:[#allocation72_spill] sm:$0xff]  ;;  %v9734_v63 = vld [vmem:[#allocation30_spill] sm:$0xff]  ;;  %v9735_v51 = vld [vmem:[#allocation31_spill] sm:$0xff] }
 0x4ba   :  { %v4275_v26 = vadd.f32 %v4262_v37, %v4091_v6  ;;  %v4287_v52 = vsel %vm428_vm10, %v4284_v59, %v4286_v17  ;;  %v3008_v12 = vadd.f32 %v9722_v42, %v2824_v29  ;;  %v4288_v62 = vrot.slane %v4274_v38, 1  ;;  %v9729_v59 = vld [vmem:[#allocation26_spill] sm:$0xff]  ;;  %v9736_v6 = vld [vmem:[#allocation73_spill] sm:$0xff]  ;;  %v9737_v17 = vld [vmem:[#allocation80_spill] sm:$0xff] }
 0x4bb   :  { %v3007_v15 = vadd.f32 %v9723_v33, %v2823_v61  ;;  %v3366_v10 = vadd.f32 %v9724_v39, %v3182_v32  ;;  %v3365_v18 = vadd.f32 %v9725_v7, %v3181_v43  ;;  %v4291_v46 = vrot.slane %v4276_v24, 1  ;;  %v4030_v3 = vpop.permute.xlu0 %4029 }
 0x4bc   :  { %v4289_v55 = vrot.slane %v4275_v26, 1  ;;  %v3184_v50 = vadd.f32 %v9726_v48, %v3008_v12  ;;  %v5026_v48 = vmov 1983009808  }
 0x4bd   :  { %v3183_v0 = vadd.f32 %v9727_v58, %v3007_v15  ;;  %v3542_v47 = vadd.f32 %v9728_v44, %v3366_v10  ;;  %v3541_v1 = vadd.f32 %v9729_v59, %v3365_v18  ;;  %v4036_v23 = vpop.permute.xlu1 %4035  ;;  %v4381_v58 = vlaneseq }
 0x4be   :  { %v4292_v22 = vsel %vm428_vm10, %v4289_v55, %v4291_v46  ;;  %v4290_v5 = vsel %vm428_vm10, %v4288_v62, %v4289_v55  ;;  %v3368_v60 = vadd.f32 %v9730_v8, %v3184_v50  ;;  %v4379_v50 = vunpack.c.l.s4 %v5026_v48 }
 0x4bf   :  { %v3367_v30 = vadd.f32 %v9731_v41, %v3183_v0  ;;  %v3712_v14 = vadd.f32 %v9732_v2, %v3542_v47  ;;  %v3711_v13 = vadd.f32 %v9733_v9, %v3541_v1  ;;  %v4034_v57 = vpop.permute.xlu0 %4033  ;;  %v8715_v59 = vshrl.u32 %v4381_v58, 7 }
 0x4c0   :  { %v3544_v21 = vadd.f32 %v9734_v63, %v3368_v60  ;;  %v4380_v47 = vunpack.c.0.s8 %v4379_v50 }
 0x4c1   :  { %v3543_v40 = vadd.f32 %v9735_v51, %v3367_v30  ;;  %v3866_v4 = vadd.f32 %v8566_v56, %v3712_v14  ;;  %v3865_v20 = vadd.f32 %v8568_v54, %v3711_v13  ;;  %v4216_v61 = vpop.permute.xlu1 %4215  ;;  %v9738_v13 = vmov 0.0  }
 0x4c2   :  { %v3714_v38 = vadd.f32 %v9736_v6, %v3544_v21 }
 0x4c3   :  { %v3713_v28 = vadd.f32 %v9737_v17, %v3543_v40  ;;  %v4042_v29 = vadd.f32 %v4032_v16, %v3866_v4  ;;  %v4041_v25 = vadd.f32 %v4030_v3, %v3865_v20  ;;  %v4214_v11 = vpop.permute.xlu0 %4213 }
 0x4c4   :  { %v3868_v32 = vadd.f32 %v8586_v31, %v3714_v38 }
 0x4c5   :  { %v3867_v19 = vadd.f32 %v8588_v34, %v3713_v28  ;;  %v4226_v37 = vadd.f32 %v4216_v61, %v4042_v29  ;;  %v4225_v49 = vadd.f32 %v4214_v11, %v4041_v25  ;;  %v4220_v42 = vpop.permute.xlu1 %4219 }
 0x4c6   :  { %v4044_v43 = vadd.f32 %v4036_v23, %v3868_v32 }
 0x4c7   :  { %v4043_v24 = vadd.f32 %v4034_v57, %v3867_v19  ;;  %v4298_v26 = vadd.f32 %v4287_v52, %v4226_v37  ;;  %v4297_v56 = vadd.f32 %v4285_v27, %v4225_v49  ;;  %v4218_v54 = vpop.permute.xlu0 %4217 }
 0x4c8   :  { %v4228_v15 = vadd.f32 %v4220_v42, %v4044_v43 }
 0x4c9   :  { %v4350_v12 = vadd.f32 %v8653_v53, %v4298_v26  ;;  %v4349_v33 = vadd.f32 %v8630_v35, %v4297_v56  ;;  %v4227_v39 = vadd.f32 %v4218_v54, %v4043_v24 }
 0x4ca   :  { %v4300_v18 = vadd.f32 %v4292_v22, %v4228_v15  ;;  %v4383_v22 = vsub.s32 %v4380_v47, %v8715_v59 }
 0x4cb   :  { %v4877_v10 = vmul.f32 -1.442695, %v4350_v12  ;;  %v4876_v7 = vmul.f32 -1.442695, %v4349_v33  ;;  %v4299_v31 = vadd.f32 %v4290_v5, %v4227_v39 }
 0x4cc   :  { %v4352_v34 = vadd.f32 %v8663_v36, %v4300_v18  ;;  %v5027_v36 = vmov 1934713408  }
 0x4cd   :  { %4905 = vpow2.f32 %v4877_v10  ;;  %v4351_v62 = vadd.f32 %v8666_v45, %v4299_v31  ;;  %v4394_v44 = vunpack.c.l.s4 %v5027_v36 }
 0x4ce   :  { %4907 = vpow2.f32 %v4876_v7  ;;  %v4879_v52 = vmul.f32 -1.442695, %v4352_v34 }
 0x4cf   :  { %v4878_v27 = vmul.f32 -1.442695, %v4351_v62  ;;  %v4395_v1 = vunpack.c.0.s8 %v4394_v44 }
 0x4d0   :  { %4909 = vpow2.f32 %v4879_v52 }
 0x4d1   :  { %4911 = vpow2.f32 %v4878_v27  ;;  %v8719_v8 = vsub.s32 %v4395_v1, %v8715_v59 }
 0x4d7   :  { %v4906_v46 = vpop.eup %4905 }
 0x4d8   :  { %v4908_v53 = vpop.eup %4907  ;;  %v4366_v55 = vadd.f32 1.0, %v4906_v46 }
 0x4d9   :  { %v4365_v35 = vadd.f32 1.0, %v4908_v53 }
 0x4da   :  { %4913 = vrcp.f32 %v4366_v55  ;;  %v4910_v0 = vpop.eup %4909 }
 0x4db   :  { %4915 = vrcp.f32 %v4365_v35  ;;  %v4912_v16 = vpop.eup %4911  ;;  %v4368_v3 = vadd.f32 1.0, %v4910_v0 }
 0x4dc   :  { %v4367_v45 = vadd.f32 1.0, %v4912_v16 }
 0x4dd   :  { %4917 = vrcp.f32 %v4368_v3 }
 0x4de   :  { %4919 = vrcp.f32 %v4367_v45 }
 0x4e4   :  { %v4914_v5 = vpop.eup %4913 }
 0x4e5   :  { %v4916_v60 = vpop.eup %4915  ;;  %v4433_v30 = vrot.slane %v4914_v5, %v4383_v22  ;;  %v4426_v49 = vcombine.high %v4914_v5, %v9738_v13 }
 0x4e6   :  { %v4384_v41 = vrot.slane %v4916_v60, %v4383_v22  ;;  %v4377_v37 = vcombine.high %v4916_v60, %v9738_v13 }
 0x4e7   :  { %v4918_v2 = vpop.eup %4917  ;;  %v8727_v57 = vrot.slane %v4433_v30, %v8719_v8  ;;  %v4441_v28 = vcombine.high %v4433_v30, %v9738_v13  ;;  %v4440_v42 = vrot.slane %v4426_v49, %v4383_v22 }
 0x4e8   :  { %v8722_v14 = vrot.slane %v4384_v41, %v8719_v8  ;;  %v4920_v9 = vpop.eup %4919  ;;  %v4531_v21 = vrot.slane %v4918_v2, %v4383_v22  ;;  %v4392_v20 = vcombine.high %v4384_v41, %v9738_v13  ;;  %v4391_v26 = vrot.slane %v4377_v37, %v4383_v22 }
 0x4e9   :  { %v4482_v63 = vrot.slane %v4920_v9, %v4383_v22  ;;  %v4471_v40 = vcombine.high %v8727_v57, %v9738_v13  ;;  %v4455_v25 = vrot.slane %v4441_v28, %v8719_v8  ;;  %v4475_v56 = vcombine.high %v4920_v9, %v9738_v13 }
 0x4ea   :  { %v4422_v23 = vcombine.high %v8722_v14, %v9738_v13  ;;  %v8738_v6 = vrot.slane %v4531_v21, %v8719_v8  ;;  %v4406_v38 = vrot.slane %v4392_v20, %v8719_v8  ;;  %v4539_v11 = vcombine.high %v4531_v21, %v9738_v13 }
 0x4eb   :  { %v8730_v51 = vrot.slane %v4482_v63, %v8719_v8  ;;  %v4490_v29 = vcombine.high %v4482_v63, %v9738_v13  ;;  %v4472_v43 = vcombine.high %v4455_v25, %v9738_v13  ;;  %v4414_v54 = vrot.slane %v4391_v26, %v8719_v8 }
 0x4ec   :  { %4575 = vrot.lane.b32.xlu0 %v4422_v23, %s5028_s19  ;;  %v4569_v17 = vcombine.high %v8738_v6, %v9738_v13  ;;  %v4423_v32 = vcombine.high %v4406_v38, %v9738_v13  ;;  %v4553_v19 = vrot.slane %v4539_v11, %v8719_v8  ;;  %v4489_v33 = vrot.slane %v4475_v56, %v4383_v22 }
 0x4ed   :  { %v4520_v4 = vcombine.high %v8730_v51, %v9738_v13  ;;  %v4504_v61 = vrot.slane %v4490_v29, %v8719_v8  ;;  %v4524_v15 = vcombine.high %v4918_v2, %v9738_v13  ;;  %v4463_v39 = vrot.slane %v4440_v42, %v8719_v8 }
 0x4ee   :  { %v4570_v12 = vcombine.high %v4553_v19, %v9738_v13  ;;  %v4512_v10 = vrot.slane %v4489_v33, %v8719_v8  ;;  %v4424_v18 = vcombine.high %v4414_v54, %v9738_v13  ;;  %v4407_v52 = vcombine.high %v4391_v26, %v9738_v13 }
 0x4ef   :  { %4577 = vrot.lane.b32.xlu1 %v4520_v4, %s5028_s19  ;;  %v4521_v24 = vcombine.high %v4504_v61, %v9738_v13  ;;  %v4538_v7 = vrot.slane %v4524_v15, %v4383_v22  ;;  %v4473_v34 = vcombine.high %v4463_v39, %v9738_v13  ;;  %v4456_v53 = vcombine.high %v4440_v42, %v9738_v13 }
 0x4f0   :  { %4631 = vrot.lane.b32.xlu0 %v4471_v40, %s5028_s19  ;;  %v4522_v62 = vcombine.high %v4512_v10, %v9738_v13  ;;  %v4421_v27 = vrot.slane %v4407_v52, %v8719_v8  ;;  %v4505_v55 = vcombine.high %v4489_v33, %v9738_v13  ;;  %v5035_v29 = vmov 1966171168  }
 0x4f1   :  { %v4561_v31 = vrot.slane %v4538_v7, %v8719_v8  ;;  %v4470_v35 = vrot.slane %v4456_v53, %v8719_v8  ;;  %v4554_v50 = vcombine.high %v4538_v7, %v9738_v13 }
 0x4f2   :  { %v4519_v48 = vrot.slane %v4505_v55, %v8719_v8  ;;  %v4425_v0 = vcombine.high %v4421_v27, %v9738_v13 }
 0x4f3   :  { %4633 = vrot.lane.b32.xlu1 %v4569_v17, %s5028_s19  ;;  %v4571_v46 = vcombine.high %v4561_v31, %v9738_v13  ;;  %v4568_v16 = vrot.slane %v4554_v50, %v8719_v8  ;;  %v4474_v3 = vcombine.high %v4470_v35, %v9738_v13 }
 0x4f4   :  { %4583 = vrot.lane.b32.xlu0 %v4406_v38, %s5029_s20  ;;  %v4523_v36 = vcombine.high %v4519_v48, %v9738_v13 }
 0x4f5   :  { %v4572_v44 = vcombine.high %v4568_v16, %v9738_v13 }
 0x4f7   :  { %4585 = vrot.lane.b32.xlu1 %v4504_v61, %s5029_s20 }
 0x4f8   :  { %4639 = vrot.lane.b32.xlu0 %v4455_v25, %s5029_s20  ;;  %v4725_v25 = vunpack.c.l.s4 %v5035_v29 }
 0x4fb   :  { %4641 = vrot.lane.b32.xlu1 %v4553_v19, %s5029_s20 }
 0x4fc   :  { %4591 = vrot.lane.b32.xlu0 %v4423_v32, %s5030_s21  ;;  %v4726_v32 = vunpack.c.0.s8 %v4725_v25 }
 0x4ff   :  { %4593 = vrot.lane.b32.xlu1 %v4521_v24, %s5030_s21 }
 0x500   :  { %4647 = vrot.lane.b32.xlu0 %v4472_v43, %s5030_s21 }
 0x503   :  { %4649 = vrot.lane.b32.xlu1 %v4570_v12, %s5030_s21 }
 0x504   :  { %4599 = vrot.lane.b32.xlu0 %v4414_v54, %s5031_s1 }
 0x507   :  { %4601 = vrot.lane.b32.xlu1 %v4512_v10, %s5031_s1 }
 0x508   :  { %4655 = vrot.lane.b32.xlu0 %v4463_v39, %s5031_s1 }
 0x50b   :  { %4657 = vrot.lane.b32.xlu1 %v4561_v31, %s5031_s1 }
 0x50c   :  { %4607 = vrot.lane.b32.xlu0 %v4424_v18, %s5032_s24 }
 0x50f   :  { %4609 = vrot.lane.b32.xlu1 %v4522_v62, %s5032_s24 }
 0x510   :  { %4663 = vrot.lane.b32.xlu0 %v4473_v34, %s5032_s24 }
 0x513   :  { %4665 = vrot.lane.b32.xlu1 %v4571_v46, %s5032_s24 }
 0x514   :  { %4615 = vrot.lane.b32.xlu0 %v4421_v27, %s5033_s22 }
 0x517   :  { %4617 = vrot.lane.b32.xlu1 %v4519_v48, %s5033_s22 }
 0x518   :  { %4671 = vrot.lane.b32.xlu0 %v4470_v35, %s5033_s22 }
 0x51b   :  { %4673 = vrot.lane.b32.xlu1 %v4568_v16, %s5033_s22 }
 0x51c   :  { %4623 = vrot.lane.b32.xlu0 %v4425_v0, %s5034_s23 }
 0x51f   :  { %4625 = vrot.lane.b32.xlu1 %v4523_v36, %s5034_s23 }
 0x520   :  { %4679 = vrot.lane.b32.xlu0 %v4474_v3, %s5034_s23 }
 0x523   :  { %4681 = vrot.lane.b32.xlu1 %v4572_v44, %s5034_s23 }
 0x55e   :  { %v4576_v45 = vpop.permute.xlu0 %4575 }
 0x55f   :  { %v4685_v19 = vsel %vm43_vm0, %v8722_v14, %v4576_v45 }
 0x561   :  { %v4578_v47 = vpop.permute.xlu1 %4577 }
 0x562   :  { %v4632_v1 = vpop.permute.xlu0 %4631  ;;  %v4686_v12 = vsel %vm43_vm0, %v8730_v51, %v4578_v47 }
 0x563   :  { %v4705_v37 = vsel %vm43_vm0, %v8727_v57, %v4632_v1  ;;  %v4729_v57 = vsub.s32 %v4726_v32, %v8715_v59 }
 0x565   :  { %v4634_v22 = vpop.permute.xlu1 %4633 }
 0x566   :  { %v4584_v5 = vpop.permute.xlu0 %4583  ;;  %v4706_v33 = vsel %vm43_vm0, %v8738_v6, %v4634_v22  ;;  %vm4757_vm0 = vcmp.lt.s32.totalorder %v4381_v58, 256 }
 0x567   :  { %v4688_v49 = vsel %vm4687_vm14, %v4685_v19, %v4584_v5 }
 0x569   :  { %v4586_v60 = vpop.permute.xlu1 %4585 }
 0x56a   :  { %v4640_v41 = vpop.permute.xlu0 %4639  ;;  %v4689_v10 = vsel %vm4687_vm14, %v4686_v12, %v4586_v60 }
 0x56b   :  { %v4707_v43 = vsel %vm4687_vm14, %v4705_v37, %v4640_v41 }
 0x56d   :  { %v4642_v8 = vpop.permute.xlu1 %4641 }
 0x56e   :  { %v4592_v30 = vpop.permute.xlu0 %4591  ;;  %v4708_v7 = vsel %vm4687_vm14, %v4706_v33, %v4642_v8 }
 0x56f   :  { %v4691_v56 = vsel %vm4690_vm15, %v4688_v49, %v4592_v30 }
 0x571   :  { %v4594_v2 = vpop.permute.xlu1 %4593 }
 0x572   :  { %v4648_v9 = vpop.permute.xlu0 %4647  ;;  %v4692_v62 = vsel %vm4690_vm15, %v4689_v10, %v4594_v2 }
 0x573   :  { %v4709_v42 = vsel %vm4690_vm15, %v4707_v43, %v4648_v9 }
 0x575   :  { %v4650_v23 = vpop.permute.xlu1 %4649 }
 0x576   :  { %v4600_v63 = vpop.permute.xlu0 %4599  ;;  %v4710_v51 = vsel %vm4690_vm15, %v4708_v7, %v4650_v23 }
 0x577   :  { %v4694_v54 = vsel %vm4693_vm1, %v4691_v56, %v4600_v63 }
 0x579   :  { %v4602_v21 = vpop.permute.xlu1 %4601 }
 0x57a   :  { %v4656_v40 = vpop.permute.xlu0 %4655  ;;  %v4695_v27 = vsel %vm4693_vm1, %v4692_v62, %v4602_v21 }
 0x57b   :  { %v4711_v14 = vsel %vm4693_vm1, %v4709_v42, %v4656_v40 }
 0x57d   :  { %v4658_v4 = vpop.permute.xlu1 %4657 }
 0x57e   :  { %v4608_v20 = vpop.permute.xlu0 %4607  ;;  %v4712_v46 = vsel %vm4693_vm1, %v4710_v51, %v4658_v4 }
 0x57f   :  { %v4697_v15 = vsel %vm4696_vm2, %v4694_v54, %v4608_v20 }
 0x581   :  { %v4610_v38 = vpop.permute.xlu1 %4609 }
 0x582   :  { %v4664_v13 = vpop.permute.xlu0 %4663  ;;  %v4698_v55 = vsel %vm4696_vm2, %v4695_v27, %v4610_v38 }
 0x583   :  { %v4713_v39 = vsel %vm4696_vm2, %v4711_v14, %v4664_v13 }
 0x585   :  { %v4666_v17 = vpop.permute.xlu1 %4665 }
 0x586   :  { %v4616_v28 = vpop.permute.xlu0 %4615  ;;  %v4714_v35 = vsel %vm4696_vm2, %v4712_v46, %v4666_v17 }
 0x587   :  { %v4700_v18 = vsel %vm4699_vm3, %v4697_v15, %v4616_v28 }
 0x589   :  { %v4618_v61 = vpop.permute.xlu1 %4617 }
 0x58a   :  { %v4672_v11 = vpop.permute.xlu0 %4671  ;;  %v4701_v48 = vsel %vm4699_vm3, %v4698_v55, %v4618_v61 }
 0x58b   :  { %v4715_v31 = vsel %vm4699_vm3, %v4713_v39, %v4672_v11 }
 0x58d   :  { %v4674_v24 = vpop.permute.xlu1 %4673 }
 0x58e   :  { %v4624_v26 = vpop.permute.xlu0 %4623  ;;  %v4716_v50 = vsel %vm4699_vm3, %v4714_v35, %v4674_v24 }
 0x58f   :  { %v4703_v6 = vsel %vm4702_vm4, %v4700_v18, %v4624_v26 }
 0x591   :  { %v4626_v34 = vpop.permute.xlu1 %4625 }
 0x592   :  { %v4680_v59 = vpop.permute.xlu0 %4679  ;;  %v4704_v3 = vsel %vm4702_vm4, %v4701_v48, %v4626_v34 }
 0x593   :  { %v4717_v52 = vsel %vm4702_vm4, %v4715_v31, %v4680_v59 }
 0x594   :  { %v4723_v53 = vcombine.low %v4703_v6, %v4717_v52 }
 0x595   :  { %v4682_v16 = vpop.permute.xlu1 %4681 }
 0x596   :  { %v4730_v0 = vrot.slane %v4723_v53, %v4729_v57  ;;  %v4718_v36 = vsel %vm4702_vm4, %v4716_v50, %v4682_v16 }
 0x597   :  { %v4738_v45 = vcombine.low %v4704_v3, %v4718_v36 }
 0x598   :  { %v4737_v44 = vrot.slane %v4730_v0, %v4729_v57 }
 0x599   :  { %v4745_v47 = vrot.slane %v4738_v45, %v4729_v57 }
 0x59a   :  { %4759 = vst.msk [vmem:[#allocation10] sm:$0x3] %vm4757_vm0, %v4737_v44 }
 0x59b   :  { %v4752_v1 = vrot.slane %v4745_v47, %v4729_v57 }
 0x59d   :  { %4760 = vst.msk [vmem:[#allocation10 + $0x2] sm:$0x3] %vm4757_vm0, %v4752_v1 }
 0x59e   :  { %4996 = shalt.err (!%p4993_p3)
}
 0x59f   :  { %s4997_s30 = scalar_lea.hbm %s8831_s2, 64 }
 0x5a0   :  { %p4998_p4 = scmp.ne.s32.totalorder %s8831_s2, %s4997_s30  ;;  %p5001_p5 = scmp.lt.u32.totalorder %s4997_s30, %s8831_s2 }
 0x5a2   :  { %p5003_p6 = pnand %p5001_p5, %p4998_p4 }
 0x5a4   :  { %5006 = shalt.err (!%p5003_p6)
}
 0x5a5   :  { %s5037_s7 = smov 2  }
 0x5a6   :  { %4772 = dma.vmem_to_hbm [thread:$0]  %s4767_s26, 64, %s8831_s2, [#allocation7], %s5029_s20, %s5029_s20, %s5037_s7  }
 0x5a7   :  { %5011 = dma.done.wait [#allocation7], 64  }
 0x5a8   :  { %5012 = vsyncadd [#allocation7], 4294967232 }
 0x5a9   :  { %4776 = vsyncpa [#allocation6], 1 }
 0x5aa   :  { %4777 = vsyncpa [#allocation7], 1 }
 0x5ab   :  { %4778 = vsyncpa [#allocation8], 1 }

</bundles_post_ra>
